<compile_context>
chip_gen: v6e
topology: v6e:2x2x1
jax: 0.10.0
libtpu: 0.0.40
codegen_flags: <defaults>
</compile_context>

<pallas_src>
import functools

import numpy as np
import jax
import jax.numpy as jnp
from jax.experimental import pallas as pl
from jax.experimental.pallas import tpu as pltpu

Z_DIM = 10
NC = 3
LANE = 128


def _round_up(n, m):
    return ((n + m - 1) // m) * m


# ----------------------------------------------------------------------------
# Pallas kernels
# ----------------------------------------------------------------------------
def _linear_kernel(x_ref, w_ref, b_ref, o_ref, *, relu):
    acc = jnp.dot(x_ref[...], w_ref[...], preferred_element_type=jnp.float32)
    acc = acc + b_ref[...]
    if relu:
        acc = jnp.maximum(acc, 0.0)
    o_ref[...] = acc.astype(o_ref.dtype)


def pallas_linear(x, w, b, relu=False, out_dtype=jnp.bfloat16,
                  compute_dtype=jnp.bfloat16):
    """y = relu?(x @ w + b); x:(M,K), w:(K,N), b:(N,).

    N is zero-padded to a multiple of 128 (lane-dense output stores); pad
    columns are sliced off before returning.  Matmul operands run in bf16 with
    f32 accumulation; bias/ReLU epilogue stays in f32."""
    M, K = x.shape
    K2, N = w.shape
    assert K == K2

    N_pad = _round_up(N, LANE)
    if N_pad != N:
        w = jnp.pad(w, ((0, 0), (0, N_pad - N)))
        b = jnp.pad(b, (0, N_pad - N))
    x = x.astype(compute_dtype)
    w = w.astype(compute_dtype)
    b = b.astype(jnp.float32).reshape(1, N_pad)

    # Whole-M block whenever possible (per-grid-step overhead dominates at
    # these sizes); for large M keep >=2 blocks so both v7x TensorCores work.
    tm = M
    if M > 1024:
        for cand in (1024, 512, 256, 128):
            if M % cand == 0:
                tm = cand
                break
    grid = (M // tm,)

    kernel = functools.partial(_linear_kernel, relu=relu)
    out = pl.pallas_call(
        kernel,
        out_shape=jax.ShapeDtypeStruct((M, N_pad), out_dtype),
        grid=grid,
        in_specs=[
            pl.BlockSpec((tm, K), lambda i: (i, 0)),
            pl.BlockSpec((K, N_pad), lambda i: (0, 0)),
            pl.BlockSpec((1, N_pad), lambda i: (0, 0)),
        ],
        out_specs=pl.BlockSpec((tm, N_pad), lambda i: (i, 0)),
        compiler_params=pltpu.CompilerParams(
            dimension_semantics=("parallel",)),
    )(x, w, b)
    if N_pad != N:
        out = out[:, :N]
    return out


def _head_kernel(h_ref, wc5_ref, bc5_ref, we_ref, be_ref, eps_ref,
                 wd_ref, bd_ref, wt1_ref, bt1_ref,
                 mu_ref, logvar_ref, feat_ref, *, z_dim):
    f32 = jnp.float32
    h = h_ref[...].astype(f32)
    # encoder Conv2d(64, 256, 4, 1) on the 4x4 map == linear, + ReLU
    h = jnp.maximum(
        jnp.dot(h, wc5_ref[...], preferred_element_type=f32) + bc5_ref[...], 0.0)
    # encoder Linear(256 -> 2*z)
    dist = jnp.dot(h, we_ref[...], preferred_element_type=f32) + be_ref[...]
    mu = dist[:, :z_dim]
    logvar = dist[:, z_dim:]
    mu_ref[...] = mu
    logvar_ref[...] = logvar
    # reparametrize: z = mu + exp(logvar/2) * eps
    z = mu + jnp.exp(logvar * 0.5) * eps_ref[...]
    # decoder Linear(z -> 256) + ReLU
    d = jnp.maximum(
        jnp.dot(z, wd_ref[...], preferred_element_type=f32) + bd_ref[...], 0.0)
    # decoder ConvTranspose2d(256, 64, 4) on 1x1 input == linear, + ReLU
    feat = jnp.maximum(
        jnp.dot(d, wt1_ref[...], preferred_element_type=f32) + bt1_ref[...], 0.0)
    feat_ref[...] = feat.astype(feat_ref.dtype)


def pallas_head(h, params, eps, z_dim=Z_DIM):
    """Fused: conv5+ReLU, enc Linear, reparametrize, dec Linear+ReLU, deconv1+ReLU."""
    B = h.shape[0]
    wc5, bc5 = params["enc_conv"][4]                        # (256, 64, 4, 4)
    wc5m = wc5.transpose(2, 3, 1, 0).reshape(4 * 4 * 64, 256)
    we, be = params["enc_fc"]                               # (256, 2z), (2z,)
    wd, bd = params["dec_fc"]                               # (z, 256), (256,)
    wt1, bt1 = params["dec_deconv1"]                        # (256, 64, 4, 4)
    wt1m = wt1.transpose(0, 2, 3, 1).reshape(256, 4 * 4 * 64)
    bt1m = jnp.tile(bt1, 4 * 4)

    inputs = [h, wc5m, bc5.reshape(1, -1), we, be.reshape(1, -1), eps,
              wd, bd.reshape(1, -1), wt1m, bt1m.reshape(1, -1)]
    in_specs = [pl.BlockSpec(a.shape, lambda i: (0, 0)) for a in inputs]
    out_shape = (jax.ShapeDtypeStruct((B, z_dim), jnp.float32),
                 jax.ShapeDtypeStruct((B, z_dim), jnp.float32),
                 jax.ShapeDtypeStruct((B, 4 * 4 * 64), jnp.bfloat16))
    out_specs = (pl.BlockSpec((B, z_dim), lambda i: (0, 0)),
                 pl.BlockSpec((B, z_dim), lambda i: (0, 0)),
                 pl.BlockSpec((B, 4 * 4 * 64), lambda i: (0, 0)))
    kernel = functools.partial(_head_kernel, z_dim=z_dim)
    return pl.pallas_call(
        kernel,
        out_shape=out_shape,
        grid=(1,),
        in_specs=in_specs,
        out_specs=out_specs,
    )(*inputs)


# ----------------------------------------------------------------------------
# Conv / ConvTranspose glue (NHWC; im2col & interleave in plain JAX)
# ----------------------------------------------------------------------------
def _im2col_nhwc(x, k, stride, pad):
    B, H, W, C = x.shape
    xp = jnp.pad(x, ((0, 0), (pad, pad), (pad, pad), (0, 0)))
    Ho = (H + 2 * pad - k) // stride + 1
    Wo = (W + 2 * pad - k) // stride + 1
    cols = []
    for di in range(k):
        for dj in range(k):
            cols.append(xp[:, di:di + stride * (Ho - 1) + 1:stride,
                           dj:dj + stride * (Wo - 1) + 1:stride, :])
    patches = jnp.stack(cols, axis=3)            # (B, Ho, Wo, k*k, C)
    return patches.reshape(B * Ho * Wo, k * k * C), Ho, Wo


def conv2d(x, weight, bias, stride, pad, relu, out_dtype=jnp.bfloat16):
    """PyTorch-semantics Conv2d; x NHWC, weight (Cout, Cin, k, k)."""
    Cout, Cin, k, _ = weight.shape
    B = x.shape[0]
    cols, Ho, Wo = _im2col_nhwc(x, k, stride, pad)
    w_mat = weight.transpose(2, 3, 1, 0).reshape(k * k * Cin, Cout)
    y = pallas_linear(cols, w_mat, bias, relu=relu, out_dtype=out_dtype)
    return y.reshape(B, Ho, Wo, Cout)


# kernel-row/col index for (output phase r, patch tap d):  k = 3-2d+r... -> table
_KMAP = np.array([[3, 1], [2, 0]], dtype=np.int32)


def conv_transpose2d_s2(x, weight, bias, relu, out_dtype=jnp.bfloat16):
    """ConvTranspose2d(k=4, stride=2, pad=1); x NHWC, weight (Cin, Cout, 4, 4).

    Sub-pixel decomposition: one matmul over 2x2 patches of the 1-padded input
    produces all 4 output phases (no zero-insertion), then interleave."""
    B, H, W, Cin = x.shape
    Cin2, Cout, k, _ = weight.shape
    assert Cin == Cin2 and k == 4

    xp = jnp.pad(x, ((0, 0), (1, 1), (1, 1), (0, 0)))
    P = H + 1
    cols = []
    for dy in range(2):
        for dx in range(2):
            cols.append(xp[:, dy:dy + P, dx:dx + P, :])
    patches = jnp.stack(cols, axis=3).reshape(B * P * P, 4 * Cin)

    # W_mat[(dy,dx,ci), (ry,rx,co)] = w[ci, co, KMAP[ry,dy], KMAP[rx,dx]]
    w_perm = weight.transpose(2, 3, 0, 1)            # (kh, kw, Cin, Cout)
    w_sel = w_perm[_KMAP]                            # (ry, dy, kw, Cin, Cout)
    w_sel = w_sel[:, :, _KMAP]                       # (ry, dy, rx, dx, Cin, Cout)
    w_mat = w_sel.transpose(1, 3, 4, 0, 2, 5).reshape(4 * Cin, 4 * Cout)
    b_all = jnp.tile(bias, 4)                        # (ry, rx, co) ordering

    y = pallas_linear(patches, w_mat, b_all, relu=relu, out_dtype=out_dtype)
    y = y.reshape(B, P, P, 2, 2, Cout)

    # out[b, 2m+ry, 2n+rx, :] = y[b, m+ry, n+rx, ry, rx, :]
    rows = []
    for ry in range(2):
        cols_ = []
        for rx in range(2):
            cols_.append(y[:, ry:ry + H, rx:rx + W, ry, rx, :])
        rows.append(jnp.stack(cols_, axis=3))        # (B, H, W, 2, Cout)
    out = jnp.stack(rows, axis=2)                    # (B, H, 2, W, 2, Cout)
    return out.reshape(B, 2 * H, 2 * W, Cout)


# ----------------------------------------------------------------------------
# Parameter initialization (deterministic kaiming-style normal, zero biases)
# ----------------------------------------------------------------------------
def init_params(key, z_dim=Z_DIM, nc=NC):
    keys = iter(jax.random.split(key, 16))

    def conv_w(cout, cin, k):
        fan_in = cin * k * k
        w = jax.random.normal(next(keys), (cout, cin, k, k), jnp.float32) \
            * jnp.sqrt(2.0 / fan_in)
        return w, jnp.zeros((cout,), jnp.float32)

    def convT_w(cin, cout, k):
        fan_in = cout * k * k
        w = jax.random.normal(next(keys), (cin, cout, k, k), jnp.float32) \
            * jnp.sqrt(2.0 / fan_in)
        return w, jnp.zeros((cout,), jnp.float32)

    def lin_w(din, dout):
        w = jax.random.normal(next(keys), (din, dout), jnp.float32) \
            * jnp.sqrt(2.0 / din)
        return w, jnp.zeros((dout,), jnp.float32)

    return {
        "enc_conv": [conv_w(32, nc, 4), conv_w(32, 32, 4), conv_w(64, 32, 4),
                     conv_w(64, 64, 4), conv_w(256, 64, 4)],
        "enc_fc": lin_w(256, z_dim * 2),
        "dec_fc": lin_w(z_dim, 256),
        "dec_deconv1": convT_w(256, 64, 4),
        "dec_deconv": [convT_w(64, 64, 4), convT_w(64, 32, 4),
                       convT_w(32, 32, 4), convT_w(32, nc, 4)],
    }


# ----------------------------------------------------------------------------
# BetaVAE_H forward
# ----------------------------------------------------------------------------
def beta_vae_h_forward(params, x, eps, z_dim=Z_DIM):
    B = x.shape[0]
    # NCHW -> NHWC once at entry; activations stay NHWC / bf16 in between.
    h = jnp.transpose(x, (0, 2, 3, 1)).astype(jnp.bfloat16)
    for (w, b) in params["enc_conv"][:4]:
        h = conv2d(h, w, b, stride=2, pad=1, relu=True)    # 64->32->16->8->4
    # conv5 (k=4, s=1, p=0) consumes the whole 4x4 map -> im2col == flatten.
    h = h.reshape(B, 4 * 4 * 64)

    # Fused head (single pallas_call).
    mu, logvar, feat = pallas_head(h, params, eps, z_dim=z_dim)

    d = feat.reshape(B, 4, 4, 64)                          # 4x4 decoder seed
    n_dec = len(params["dec_deconv"])
    for i, (w, b) in enumerate(params["dec_deconv"]):
        last = i == n_dec - 1
        d = conv_transpose2d_s2(d, w, b, relu=not last,
                                out_dtype=jnp.float32 if last else jnp.bfloat16)
    x_recon = jnp.transpose(d, (0, 3, 1, 2))               # NHWC -> NCHW
    return x_recon, mu, logvar


# ----------------------------------------------------------------------------
if __name__ == "__main__":
    key = jax.random.PRNGKey(0)
    k_param, k_x, k_eps = jax.random.split(key, 3)

    B = 2
    # BetaVAE_H expects 64x64 inputs with nc=3 channels (View((-1, 256*1*1))).
    x = jax.random.uniform(k_x, (B, NC, 64, 64), jnp.float32)
    # TODO(synk): PyTorch reparametrize samples eps internally; here it is drawn
    # outside and passed in (same distribution, deterministic seed).
    eps = jax.random.normal(k_eps, (B, Z_DIM), jnp.float32)

    params = init_params(k_param)

    fwd = jax.jit(beta_vae_h_forward)
    x_recon, mu, logvar = fwd(params, x, eps)
    jax.block_until_ready((x_recon, mu, logvar))

    assert x_recon.shape == x.shape
    assert mu.shape == (B, Z_DIM)
    assert logvar.shape == (B, Z_DIM)
    assert bool(jnp.all(jnp.isfinite(x_recon)))
    assert bool(jnp.all(jnp.isfinite(mu)))
    assert bool(jnp.all(jnp.isfinite(logvar)))
    print("KERNEL_OK")
</pallas_src>

<mosaic_0001>
module attributes {stable_mosaic.version = 11 : i64} {
  func.func @_linear_kernel(%arg0: i32, %arg1: memref<1024x48xbf16, #tpu.memory_space<vmem>>, %arg2: memref<48x128xbf16, #tpu.memory_space<vmem>>, %arg3: memref<1x128xf32, #tpu.memory_space<vmem>>, %arg4: memref<1024x128xbf16, #tpu.memory_space<vmem>>) attributes {dimension_semantics = [#tpu.dimension_semantics<parallel>], iteration_bounds = array<i64: 2>, scalar_prefetch = 0 : i64, scratch_operands = 0 : i64, tpu.core_type = #tpu.core_type<tc>, window_params = [{transform_indices = @transform_0, window_bounds = array<i64: 1024, 48>}, {pipeline_mode = #tpu.pipeline_mode<synchronous>, transform_indices = @transform_1, window_bounds = array<i64: 48, 128>}, {pipeline_mode = #tpu.pipeline_mode<synchronous>, transform_indices = @transform_2, window_bounds = array<i64: 1, 128>}, {transform_indices = @transform_3, window_bounds = array<i64: 1024, 128>}]} {
    %c0 = arith.constant 0 : index
    %c0_0 = arith.constant 0 : index
    %0 = vector.load %arg1[%c0, %c0_0] : memref<1024x48xbf16, #tpu.memory_space<vmem>>, vector<1024x48xbf16>
    %c0_1 = arith.constant 0 : index
    %c0_2 = arith.constant 0 : index
    %1 = vector.load %arg2[%c0_1, %c0_2] : memref<48x128xbf16, #tpu.memory_space<vmem>>, vector<48x128xbf16>
    %cst = arith.constant dense<0.000000e+00> : vector<1024x128xf32>
    %2 = tpu.matmul %0, %1, %cst {dimension_numbers = #tpu.dot_dimension_numbers<[1], [0], [0], [1], [0, 0, 1, 1], [], []>} : vector<1024x48xbf16>, vector<48x128xbf16>, vector<1024x128xf32> -> vector<1024x128xf32>
    %c0_3 = arith.constant 0 : index
    %c0_4 = arith.constant 0 : index
    %3 = vector.load %arg3[%c0_3, %c0_4] : memref<1x128xf32, #tpu.memory_space<vmem>>, vector<1x128xf32>
    %4 = vector.broadcast %3 : vector<1x128xf32> to vector<1024x128xf32>
    %5 = arith.addf %2, %4 : vector<1024x128xf32>
    %cst_5 = arith.constant 0.000000e+00 : f32
    %6 = vector.broadcast %cst_5 : f32 to vector<1024x128xf32>
    %7 = arith.maximumf %5, %6 : vector<1024x128xf32>
    %8 = arith.truncf %7 : vector<1024x128xf32> to vector<1024x128xbf16>
    %c0_6 = arith.constant 0 : index
    %c0_7 = arith.constant 0 : index
    %9 = vector.load %arg4[%c0_6, %c0_7] : memref<1024x128xbf16, #tpu.memory_space<vmem>>, vector<1024x128xbf16>
    tpu.vector_store %arg4[%c0_6, %c0_7], %8 {strides = array<i32>} : memref<1024x128xbf16, #tpu.memory_space<vmem>>, vector<1024x128xbf16>,
    return
  }
  func.func @transform_0(%arg0: i32) -> (i32, i32) {
    %c0_i32 = arith.constant 0 : i32
    %c0_i32_0 = arith.constant 0 : i32
    return %arg0, %c0_i32 : i32, i32
  }
  func.func @transform_1(%arg0: i32) -> (i32, i32) {
    %c0_i32 = arith.constant 0 : i32
    %c0_i32_0 = arith.constant 0 : i32
    %c0_i32_1 = arith.constant 0 : i32
    return %c0_i32, %c0_i32_0 : i32, i32
  }
  func.func @transform_2(%arg0: i32) -> (i32, i32) {
    %c0_i32 = arith.constant 0 : i32
    %c0_i32_0 = arith.constant 0 : i32
    %c0_i32_1 = arith.constant 0 : i32
    return %c0_i32, %c0_i32_0 : i32, i32
  }
  func.func @transform_3(%arg0: i32) -> (i32, i32) {
    %c0_i32 = arith.constant 0 : i32
    %c0_i32_0 = arith.constant 0 : i32
    return %arg0, %c0_i32 : i32, i32
  }
}

module attributes {stable_mosaic.version = 11 : i64} {
  func.func @_linear_kernel(%arg0: i32, %arg1: memref<512x512xbf16, #tpu.memory_space<vmem>>, %arg2: memref<512x128xbf16, #tpu.memory_space<vmem>>, %arg3: memref<1x128xf32, #tpu.memory_space<vmem>>, %arg4: memref<512x128xbf16, #tpu.memory_space<vmem>>) attributes {dimension_semantics = [#tpu.dimension_semantics<parallel>], iteration_bounds = array<i64: 1>, scalar_prefetch = 0 : i64, scratch_operands = 0 : i64, tpu.core_type = #tpu.core_type<tc>, window_params = [{transform_indices = @transform_0, window_bounds = array<i64: 512, 512>}, {pipeline_mode = #tpu.pipeline_mode<synchronous>, transform_indices = @transform_1, window_bounds = array<i64: 512, 128>}, {pipeline_mode = #tpu.pipeline_mode<synchronous>, transform_indices = @transform_2, window_bounds = array<i64: 1, 128>}, {transform_indices = @transform_3, window_bounds = array<i64: 512, 128>}]} {
    %c0 = arith.constant 0 : index
    %c0_0 = arith.constant 0 : index
    %0 = vector.load %arg1[%c0, %c0_0] : memref<512x512xbf16, #tpu.memory_space<vmem>>, vector<512x512xbf16>
    %c0_1 = arith.constant 0 : index
    %c0_2 = arith.constant 0 : index
    %1 = vector.load %arg2[%c0_1, %c0_2] : memref<512x128xbf16, #tpu.memory_space<vmem>>, vector<512x128xbf16>
    %cst = arith.constant dense<0.000000e+00> : vector<512x128xf32>
    %2 = tpu.matmul %0, %1, %cst {dimension_numbers = #tpu.dot_dimension_numbers<[1], [0], [0], [1], [0, 0, 1, 1], [], []>} : vector<512x512xbf16>, vector<512x128xbf16>, vector<512x128xf32> -> vector<512x128xf32>
    %c0_3 = arith.constant 0 : index
    %c0_4 = arith.constant 0 : index
    %3 = vector.load %arg3[%c0_3, %c0_4] : memref<1x128xf32, #tpu.memory_space<vmem>>, vector<1x128xf32>
    %4 = vector.broadcast %3 : vector<1x128xf32> to vector<512x128xf32>
    %5 = arith.addf %2, %4 : vector<512x128xf32>
    %cst_5 = arith.constant 0.000000e+00 : f32
    %6 = vector.broadcast %cst_5 : f32 to vector<512x128xf32>
    %7 = arith.maximumf %5, %6 : vector<512x128xf32>
    %8 = arith.truncf %7 : vector<512x128xf32> to vector<512x128xbf16>
    %c0_6 = arith.constant 0 : index
    %c0_7 = arith.constant 0 : index
    %9 = vector.load %arg4[%c0_6, %c0_7] : memref<512x128xbf16, #tpu.memory_space<vmem>>, vector<512x128xbf16>
    tpu.vector_store %arg4[%c0_6, %c0_7], %8 {strides = array<i32>} : memref<512x128xbf16, #tpu.memory_space<vmem>>, vector<512x128xbf16>,
    return
  }
  func.func @transform_0(%arg0: i32) -> (i32, i32) {
    %c0_i32 = arith.constant 0 : i32
    %c0_i32_0 = arith.constant 0 : i32
    return %arg0, %c0_i32 : i32, i32
  }
  func.func @transform_1(%arg0: i32) -> (i32, i32) {
    %c0_i32 = arith.constant 0 : i32
    %c0_i32_0 = arith.constant 0 : i32
    %c0_i32_1 = arith.constant 0 : i32
    return %c0_i32, %c0_i32_0 : i32, i32
  }
  func.func @transform_2(%arg0: i32) -> (i32, i32) {
    %c0_i32 = arith.constant 0 : i32
    %c0_i32_0 = arith.constant 0 : i32
    %c0_i32_1 = arith.constant 0 : i32
    return %c0_i32, %c0_i32_0 : i32, i32
  }
  func.func @transform_3(%arg0: i32) -> (i32, i32) {
    %c0_i32 = arith.constant 0 : i32
    %c0_i32_0 = arith.constant 0 : i32
    return %arg0, %c0_i32 : i32, i32
  }
}

module attributes {stable_mosaic.version = 11 : i64} {
  func.func @_linear_kernel(%arg0: i32, %arg1: memref<128x512xbf16, #tpu.memory_space<vmem>>, %arg2: memref<512x128xbf16, #tpu.memory_space<vmem>>, %arg3: memref<1x128xf32, #tpu.memory_space<vmem>>, %arg4: memref<128x128xbf16, #tpu.memory_space<vmem>>) attributes {dimension_semantics = [#tpu.dimension_semantics<parallel>], iteration_bounds = array<i64: 1>, scalar_prefetch = 0 : i64, scratch_operands = 0 : i64, tpu.core_type = #tpu.core_type<tc>, window_params = [{transform_indices = @transform_0, window_bounds = array<i64: 128, 512>}, {pipeline_mode = #tpu.pipeline_mode<synchronous>, transform_indices = @transform_1, window_bounds = array<i64: 512, 128>}, {pipeline_mode = #tpu.pipeline_mode<synchronous>, transform_indices = @transform_2, window_bounds = array<i64: 1, 128>}, {transform_indices = @transform_3, window_bounds = array<i64: 128, 128>}]} {
    %c0 = arith.constant 0 : index
    %c0_0 = arith.constant 0 : index
    %0 = vector.load %arg1[%c0, %c0_0] : memref<128x512xbf16, #tpu.memory_space<vmem>>, vector<128x512xbf16>
    %c0_1 = arith.constant 0 : index
    %c0_2 = arith.constant 0 : index
    %1 = vector.load %arg2[%c0_1, %c0_2] : memref<512x128xbf16, #tpu.memory_space<vmem>>, vector<512x128xbf16>
    %cst = arith.constant dense<0.000000e+00> : vector<128x128xf32>
    %2 = tpu.matmul %0, %1, %cst {dimension_numbers = #tpu.dot_dimension_numbers<[1], [0], [0], [1], [0, 0, 1, 1], [], []>} : vector<128x512xbf16>, vector<512x128xbf16>, vector<128x128xf32> -> vector<128x128xf32>
    %c0_3 = arith.constant 0 : index
    %c0_4 = arith.constant 0 : index
    %3 = vector.load %arg3[%c0_3, %c0_4] : memref<1x128xf32, #tpu.memory_space<vmem>>, vector<1x128xf32>
    %4 = vector.broadcast %3 : vector<1x128xf32> to vector<128x128xf32>
    %5 = arith.addf %2, %4 : vector<128x128xf32>
    %cst_5 = arith.constant 0.000000e+00 : f32
    %6 = vector.broadcast %cst_5 : f32 to vector<128x128xf32>
    %7 = arith.maximumf %5, %6 : vector<128x128xf32>
    %8 = arith.truncf %7 : vector<128x128xf32> to vector<128x128xbf16>
    %c0_6 = arith.constant 0 : index
    %c0_7 = arith.constant 0 : index
    %9 = vector.load %arg4[%c0_6, %c0_7] : memref<128x128xbf16, #tpu.memory_space<vmem>>, vector<128x128xbf16>
    tpu.vector_store %arg4[%c0_6, %c0_7], %8 {strides = array<i32>} : memref<128x128xbf16, #tpu.memory_space<vmem>>, vector<128x128xbf16>,
    return
  }
  func.func @transform_0(%arg0: i32) -> (i32, i32) {
    %c0_i32 = arith.constant 0 : i32
    %c0_i32_0 = arith.constant 0 : i32
    return %arg0, %c0_i32 : i32, i32
  }
  func.func @transform_1(%arg0: i32) -> (i32, i32) {
    %c0_i32 = arith.constant 0 : i32
    %c0_i32_0 = arith.constant 0 : i32
    %c0_i32_1 = arith.constant 0 : i32
    return %c0_i32, %c0_i32_0 : i32, i32
  }
  func.func @transform_2(%arg0: i32) -> (i32, i32) {
    %c0_i32 = arith.constant 0 : i32
    %c0_i32_0 = arith.constant 0 : i32
    %c0_i32_1 = arith.constant 0 : i32
    return %c0_i32, %c0_i32_0 : i32, i32
  }
  func.func @transform_3(%arg0: i32) -> (i32, i32) {
    %c0_i32 = arith.constant 0 : i32
    %c0_i32_0 = arith.constant 0 : i32
    return %arg0, %c0_i32 : i32, i32
  }
}

module attributes {stable_mosaic.version = 11 : i64} {
  func.func @_linear_kernel(%arg0: i32, %arg1: memref<32x1024xbf16, #tpu.memory_space<vmem>>, %arg2: memref<1024x128xbf16, #tpu.memory_space<vmem>>, %arg3: memref<1x128xf32, #tpu.memory_space<vmem>>, %arg4: memref<32x128xbf16, #tpu.memory_space<vmem>>) attributes {dimension_semantics = [#tpu.dimension_semantics<parallel>], iteration_bounds = array<i64: 1>, scalar_prefetch = 0 : i64, scratch_operands = 0 : i64, tpu.core_type = #tpu.core_type<tc>, window_params = [{transform_indices = @transform_0, window_bounds = array<i64: 32, 1024>}, {pipeline_mode = #tpu.pipeline_mode<synchronous>, transform_indices = @transform_1, window_bounds = array<i64: 1024, 128>}, {pipeline_mode = #tpu.pipeline_mode<synchronous>, transform_indices = @transform_2, window_bounds = array<i64: 1, 128>}, {transform_indices = @transform_3, window_bounds = array<i64: 32, 128>}]} {
    %c0 = arith.constant 0 : index
    %c0_0 = arith.constant 0 : index
    %0 = vector.load %arg1[%c0, %c0_0] : memref<32x1024xbf16, #tpu.memory_space<vmem>>, vector<32x1024xbf16>
    %c0_1 = arith.constant 0 : index
    %c0_2 = arith.constant 0 : index
    %1 = vector.load %arg2[%c0_1, %c0_2] : memref<1024x128xbf16, #tpu.memory_space<vmem>>, vector<1024x128xbf16>
    %cst = arith.constant dense<0.000000e+00> : vector<32x128xf32>
    %2 = tpu.matmul %0, %1, %cst {dimension_numbers = #tpu.dot_dimension_numbers<[1], [0], [0], [1], [0, 0, 1, 1], [], []>} : vector<32x1024xbf16>, vector<1024x128xbf16>, vector<32x128xf32> -> vector<32x128xf32>
    %c0_3 = arith.constant 0 : index
    %c0_4 = arith.constant 0 : index
    %3 = vector.load %arg3[%c0_3, %c0_4] : memref<1x128xf32, #tpu.memory_space<vmem>>, vector<1x128xf32>
    %4 = vector.broadcast %3 : vector<1x128xf32> to vector<32x128xf32>
    %5 = arith.addf %2, %4 : vector<32x128xf32>
    %cst_5 = arith.constant 0.000000e+00 : f32
    %6 = vector.broadcast %cst_5 : f32 to vector<32x128xf32>
    %7 = arith.maximumf %5, %6 : vector<32x128xf32>
    %8 = arith.truncf %7 : vector<32x128xf32> to vector<32x128xbf16>
    %c0_6 = arith.constant 0 : index
    %c0_7 = arith.constant 0 : index
    %9 = vector.load %arg4[%c0_6, %c0_7] : memref<32x128xbf16, #tpu.memory_space<vmem>>, vector<32x128xbf16>
    tpu.vector_store %arg4[%c0_6, %c0_7], %8 {strides = array<i32>} : memref<32x128xbf16, #tpu.memory_space<vmem>>, vector<32x128xbf16>,
    return
  }
  func.func @transform_0(%arg0: i32) -> (i32, i32) {
    %c0_i32 = arith.constant 0 : i32
    %c0_i32_0 = arith.constant 0 : i32
    return %arg0, %c0_i32 : i32, i32
  }
  func.func @transform_1(%arg0: i32) -> (i32, i32) {
    %c0_i32 = arith.constant 0 : i32
    %c0_i32_0 = arith.constant 0 : i32
    %c0_i32_1 = arith.constant 0 : i32
    return %c0_i32, %c0_i32_0 : i32, i32
  }
  func.func @transform_2(%arg0: i32) -> (i32, i32) {
    %c0_i32 = arith.constant 0 : i32
    %c0_i32_0 = arith.constant 0 : i32
    %c0_i32_1 = arith.constant 0 : i32
    return %c0_i32, %c0_i32_0 : i32, i32
  }
  func.func @transform_3(%arg0: i32) -> (i32, i32) {
    %c0_i32 = arith.constant 0 : i32
    %c0_i32_0 = arith.constant 0 : i32
    return %arg0, %c0_i32 : i32, i32
  }
}

module attributes {stable_mosaic.version = 11 : i64} {
  func.func @_head_kernel(%arg0: i32, %arg1: memref<2x1024xbf16, #tpu.memory_space<vmem>>, %arg2: memref<1024x256xf32, #tpu.memory_space<vmem>>, %arg3: memref<1x256xf32, #tpu.memory_space<vmem>>, %arg4: memref<256x20xf32, #tpu.memory_space<vmem>>, %arg5: memref<1x20xf32, #tpu.memory_space<vmem>>, %arg6: memref<2x10xf32, #tpu.memory_space<vmem>>, %arg7: memref<10x256xf32, #tpu.memory_space<vmem>>, %arg8: memref<1x256xf32, #tpu.memory_space<vmem>>, %arg9: memref<256x1024xf32, #tpu.memory_space<vmem>>, %arg10: memref<1x1024xf32, #tpu.memory_space<vmem>>, %arg11: memref<2x10xf32, #tpu.memory_space<vmem>>, %arg12: memref<2x10xf32, #tpu.memory_space<vmem>>, %arg13: memref<2x1024xbf16, #tpu.memory_space<vmem>>) attributes {dimension_semantics = [#tpu.dimension_semantics<arbitrary>], iteration_bounds = array<i64: 1>, scalar_prefetch = 0 : i64, scratch_operands = 0 : i64, tpu.core_type = #tpu.core_type<tc>, window_params = [{pipeline_mode = #tpu.pipeline_mode<synchronous>, transform_indices = @transform_0, window_bounds = array<i64: 2, 1024>}, {pipeline_mode = #tpu.pipeline_mode<synchronous>, transform_indices = @transform_1, window_bounds = array<i64: 1024, 256>}, {pipeline_mode = #tpu.pipeline_mode<synchronous>, transform_indices = @transform_2, window_bounds = array<i64: 1, 256>}, {pipeline_mode = #tpu.pipeline_mode<synchronous>, transform_indices = @transform_3, window_bounds = array<i64: 256, 20>}, {pipeline_mode = #tpu.pipeline_mode<synchronous>, transform_indices = @transform_4, window_bounds = array<i64: 1, 20>}, {pipeline_mode = #tpu.pipeline_mode<synchronous>, transform_indices = @transform_5, window_bounds = array<i64: 2, 10>}, {pipeline_mode = #tpu.pipeline_mode<synchronous>, transform_indices = @transform_6, window_bounds = array<i64: 10, 256>}, {pipeline_mode = #tpu.pipeline_mode<synchronous>, transform_indices = @transform_7, window_bounds = array<i64: 1, 256>}, {pipeline_mode = #tpu.pipeline_mode<synchronous>, transform_indices = @transform_8, window_bounds = array<i64: 256, 1024>}, {pipeline_mode = #tpu.pipeline_mode<synchronous>, transform_indices = @transform_9, window_bounds = array<i64: 1, 1024>}, {pipeline_mode = #tpu.pipeline_mode<synchronous>, transform_indices = @transform_10, window_bounds = array<i64: 2, 10>}, {pipeline_mode = #tpu.pipeline_mode<synchronous>, transform_indices = @transform_11, window_bounds = array<i64: 2, 10>}, {pipeline_mode = #tpu.pipeline_mode<synchronous>, transform_indices = @transform_12, window_bounds = array<i64: 2, 1024>}]} {
    %c0 = arith.constant 0 : index
    %c0_0 = arith.constant 0 : index
    %0 = vector.load %arg1[%c0, %c0_0] : memref<2x1024xbf16, #tpu.memory_space<vmem>>, vector<2x1024xbf16>
    %1 = arith.extf %0 : vector<2x1024xbf16> to vector<2x1024xf32>
    %c0_1 = arith.constant 0 : index
    %c0_2 = arith.constant 0 : index
    %2 = vector.load %arg2[%c0_1, %c0_2] : memref<1024x256xf32, #tpu.memory_space<vmem>>, vector<1024x256xf32>
    %cst = arith.constant dense<0.000000e+00> : vector<2x256xf32>
    %3 = tpu.matmul %1, %2, %cst {dimension_numbers = #tpu.dot_dimension_numbers<[1], [0], [0], [1], [0, 0, 1, 1], [], []>} : vector<2x1024xf32>, vector<1024x256xf32>, vector<2x256xf32> -> vector<2x256xf32>
    %c0_3 = arith.constant 0 : index
    %c0_4 = arith.constant 0 : index
    %4 = vector.load %arg3[%c0_3, %c0_4] : memref<1x256xf32, #tpu.memory_space<vmem>>, vector<1x256xf32>
    %5 = vector.broadcast %4 : vector<1x256xf32> to vector<2x256xf32>
    %6 = arith.addf %3, %5 : vector<2x256xf32>
    %cst_5 = arith.constant 0.000000e+00 : f32
    %7 = vector.broadcast %cst_5 : f32 to vector<2x256xf32>
    %8 = arith.maximumf %6, %7 : vector<2x256xf32>
    %c0_6 = arith.constant 0 : index
    %c0_7 = arith.constant 0 : index
    %9 = vector.load %arg4[%c0_6, %c0_7] : memref<256x20xf32, #tpu.memory_space<vmem>>, vector<256x20xf32>
    %cst_8 = arith.constant dense<0.000000e+00> : vector<2x20xf32>
    %10 = tpu.matmul %8, %9, %cst_8 {dimension_numbers = #tpu.dot_dimension_numbers<[1], [0], [0], [1], [0, 0, 1, 1], [], []>} : vector<2x256xf32>, vector<256x20xf32>, vector<2x20xf32> -> vector<2x20xf32>
    %c0_9 = arith.constant 0 : index
    %c0_10 = arith.constant 0 : index
    %11 = vector.load %arg5[%c0_9, %c0_10] : memref<1x20xf32, #tpu.memory_space<vmem>>, vector<1x20xf32>
    %12 = vector.broadcast %11 : vector<1x20xf32> to vector<2x20xf32>
    %13 = arith.addf %10, %12 : vector<2x20xf32>
    %14 = vector.extract_strided_slice %13 {offsets = [0, 0], sizes = [2, 10], strides = [1, 1]} : vector<2x20xf32> to vector<2x10xf32>
    %15 = vector.extract_strided_slice %13 {offsets = [0, 10], sizes = [2, 10], strides = [1, 1]} : vector<2x20xf32> to vector<2x10xf32>
    %c0_11 = arith.constant 0 : index
    %c0_12 = arith.constant 0 : index
    %16 = vector.load %arg11[%c0_11, %c0_12] : memref<2x10xf32, #tpu.memory_space<vmem>>, vector<2x10xf32>
    tpu.vector_store %arg11[%c0_11, %c0_12], %14 {strides = array<i32>} : memref<2x10xf32, #tpu.memory_space<vmem>>, vector<2x10xf32>,
    %c0_13 = arith.constant 0 : index
    %c0_14 = arith.constant 0 : index
    %17 = vector.load %arg12[%c0_13, %c0_14] : memref<2x10xf32, #tpu.memory_space<vmem>>, vector<2x10xf32>
    tpu.vector_store %arg12[%c0_13, %c0_14], %15 {strides = array<i32>} : memref<2x10xf32, #tpu.memory_space<vmem>>, vector<2x10xf32>,
    %cst_15 = arith.constant 5.000000e-01 : f32
    %18 = vector.broadcast %cst_15 : f32 to vector<2x10xf32>
    %19 = arith.mulf %15, %18 : vector<2x10xf32>
    %20 = math.exp %19 : vector<2x10xf32>
    %c0_16 = arith.constant 0 : index
    %c0_17 = arith.constant 0 : index
    %21 = vector.load %arg6[%c0_16, %c0_17] : memref<2x10xf32, #tpu.memory_space<vmem>>, vector<2x10xf32>
    %22 = arith.mulf %20, %21 : vector<2x10xf32>
    %23 = arith.addf %14, %22 : vector<2x10xf32>
    %c0_18 = arith.constant 0 : index
    %c0_19 = arith.constant 0 : index
    %24 = vector.load %arg7[%c0_18, %c0_19] : memref<10x256xf32, #tpu.memory_space<vmem>>, vector<10x256xf32>
    %cst_20 = arith.constant dense<0.000000e+00> : vector<2x256xf32>
    %25 = tpu.matmul %23, %24, %cst_20 {dimension_numbers = #tpu.dot_dimension_numbers<[1], [0], [0], [1], [0, 0, 1, 1], [], []>} : vector<2x10xf32>, vector<10x256xf32>, vector<2x256xf32> -> vector<2x256xf32>
    %c0_21 = arith.constant 0 : index
    %c0_22 = arith.constant 0 : index
    %26 = vector.load %arg8[%c0_21, %c0_22] : memref<1x256xf32, #tpu.memory_space<vmem>>, vector<1x256xf32>
    %27 = vector.broadcast %26 : vector<1x256xf32> to vector<2x256xf32>
    %28 = arith.addf %25, %27 : vector<2x256xf32>
    %cst_23 = arith.constant 0.000000e+00 : f32
    %29 = vector.broadcast %cst_23 : f32 to vector<2x256xf32>
    %30 = arith.maximumf %28, %29 : vector<2x256xf32>
    %c0_24 = arith.constant 0 : index
    %c0_25 = arith.constant 0 : index
    %31 = vector.load %arg9[%c0_24, %c0_25] : memref<256x1024xf32, #tpu.memory_space<vmem>>, vector<256x1024xf32>
    %cst_26 = arith.constant dense<0.000000e+00> : vector<2x1024xf32>
    %32 = tpu.matmul %30, %31, %cst_26 {dimension_numbers = #tpu.dot_dimension_numbers<[1], [0], [0], [1], [0, 0, 1, 1], [], []>} : vector<2x256xf32>, vector<256x1024xf32>, vector<2x1024xf32> -> vector<2x1024xf32>
    %c0_27 = arith.constant 0 : index
    %c0_28 = arith.constant 0 : index
    %33 = vector.load %arg10[%c0_27, %c0_28] : memref<1x1024xf32, #tpu.memory_space<vmem>>, vector<1x1024xf32>
    %34 = vector.broadcast %33 : vector<1x1024xf32> to vector<2x1024xf32>
    %35 = arith.addf %32, %34 : vector<2x1024xf32>
    %cst_29 = arith.constant 0.000000e+00 : f32
    %36 = vector.broadcast %cst_29 : f32 to vector<2x1024xf32>
    %37 = arith.maximumf %35, %36 : vector<2x1024xf32>
    %38 = arith.truncf %37 : vector<2x1024xf32> to vector<2x1024xbf16>
    %c0_30 = arith.constant 0 : index
    %c0_31 = arith.constant 0 : index
    %39 = vector.load %arg13[%c0_30, %c0_31] : memref<2x1024xbf16, #tpu.memory_space<vmem>>, vector<2x1024xbf16>
    tpu.vector_store %arg13[%c0_30, %c0_31], %38 {strides = array<i32>} : memref<2x1024xbf16, #tpu.memory_space<vmem>>, vector<2x1024xbf16>,
    return
  }
  func.func @transform_0(%arg0: i32) -> (i32, i32) {
    %c0_i32 = arith.constant 0 : i32
    %c0_i32_0 = arith.constant 0 : i32
    %c0_i32_1 = arith.constant 0 : i32
    return %c0_i32, %c0_i32_0 : i32, i32
  }
  func.func @transform_1(%arg0: i32) -> (i32, i32) {
    %c0_i32 = arith.constant 0 : i32
    %c0_i32_0 = arith.constant 0 : i32
    %c0_i32_1 = arith.constant 0 : i32
    return %c0_i32, %c0_i32_0 : i32, i32
  }
  func.func @transform_2(%arg0: i32) -> (i32, i32) {
    %c0_i32 = arith.constant 0 : i32
    %c0_i32_0 = arith.constant 0 : i32
    %c0_i32_1 = arith.constant 0 : i32
    return %c0_i32, %c0_i32_0 : i32, i32
  }
  func.func @transform_3(%arg0: i32) -> (i32, i32) {
    %c0_i32 = arith.constant 0 : i32
    %c0_i32_0 = arith.constant 0 : i32
    %c0_i32_1 = arith.constant 0 : i32
    return %c0_i32, %c0_i32_0 : i32, i32
  }
  func.func @transform_4(%arg0: i32) -> (i32, i32) {
    %c0_i32 = arith.constant 0 : i32
    %c0_i32_0 = arith.constant 0 : i32
    %c0_i32_1 = arith.constant 0 : i32
    return %c0_i32, %c0_i32_0 : i32, i32
  }
  func.func @transform_5(%arg0: i32) -> (i32, i32) {
    %c0_i32 = arith.constant 0 : i32
    %c0_i32_0 = arith.constant 0 : i32
    %c0_i32_1 = arith.constant 0 : i32
    return %c0_i32, %c0_i32_0 : i32, i32
  }
  func.func @transform_6(%arg0: i32) -> (i32, i32) {
    %c0_i32 = arith.constant 0 : i32
    %c0_i32_0 = arith.constant 0 : i32
    %c0_i32_1 = arith.constant 0 : i32
    return %c0_i32, %c0_i32_0 : i32, i32
  }
  func.func @transform_7(%arg0: i32) -> (i32, i32) {
    %c0_i32 = arith.constant 0 : i32
    %c0_i32_0 = arith.constant 0 : i32
    %c0_i32_1 = arith.constant 0 : i32
    return %c0_i32, %c0_i32_0 : i32, i32
  }
  func.func @transform_8(%arg0: i32) -> (i32, i32) {
    %c0_i32 = arith.constant 0 : i32
    %c0_i32_0 = arith.constant 0 : i32
    %c0_i32_1 = arith.constant 0 : i32
    return %c0_i32, %c0_i32_0 : i32, i32
  }
  func.func @transform_9(%arg0: i32) -> (i32, i32) {
    %c0_i32 = arith.constant 0 : i32
    %c0_i32_0 = arith.constant 0 : i32
    %c0_i32_1 = arith.constant 0 : i32
    return %c0_i32, %c0_i32_0 : i32, i32
  }
  func.func @transform_10(%arg0: i32) -> (i32, i32) {
    %c0_i32 = arith.constant 0 : i32
    %c0_i32_0 = arith.constant 0 : i32
    %c0_i32_1 = arith.constant 0 : i32
    return %c0_i32, %c0_i32_0 : i32, i32
  }
  func.func @transform_11(%arg0: i32) -> (i32, i32) {
    %c0_i32 = arith.constant 0 : i32
    %c0_i32_0 = arith.constant 0 : i32
    %c0_i32_1 = arith.constant 0 : i32
    return %c0_i32, %c0_i32_0 : i32, i32
  }
  func.func @transform_12(%arg0: i32) -> (i32, i32) {
    %c0_i32 = arith.constant 0 : i32
    %c0_i32_0 = arith.constant 0 : i32
    %c0_i32_1 = arith.constant 0 : i32
    return %c0_i32, %c0_i32_0 : i32, i32
  }
}

module attributes {stable_mosaic.version = 11 : i64} {
  func.func @_linear_kernel(%arg0: i32, %arg1: memref<50x256xbf16, #tpu.memory_space<vmem>>, %arg2: memref<256x256xbf16, #tpu.memory_space<vmem>>, %arg3: memref<1x256xf32, #tpu.memory_space<vmem>>, %arg4: memref<50x256xbf16, #tpu.memory_space<vmem>>) attributes {dimension_semantics = [#tpu.dimension_semantics<parallel>], iteration_bounds = array<i64: 1>, scalar_prefetch = 0 : i64, scratch_operands = 0 : i64, tpu.core_type = #tpu.core_type<tc>, window_params = [{transform_indices = @transform_0, window_bounds = array<i64: 50, 256>}, {pipeline_mode = #tpu.pipeline_mode<synchronous>, transform_indices = @transform_1, window_bounds = array<i64: 256, 256>}, {pipeline_mode = #tpu.pipeline_mode<synchronous>, transform_indices = @transform_2, window_bounds = array<i64: 1, 256>}, {transform_indices = @transform_3, window_bounds = array<i64: 50, 256>}]} {
    %c0 = arith.constant 0 : index
    %c0_0 = arith.constant 0 : index
    %0 = vector.load %arg1[%c0, %c0_0] : memref<50x256xbf16, #tpu.memory_space<vmem>>, vector<50x256xbf16>
    %c0_1 = arith.constant 0 : index
    %c0_2 = arith.constant 0 : index
    %1 = vector.load %arg2[%c0_1, %c0_2] : memref<256x256xbf16, #tpu.memory_space<vmem>>, vector<256x256xbf16>
    %cst = arith.constant dense<0.000000e+00> : vector<50x256xf32>
    %2 = tpu.matmul %0, %1, %cst {dimension_numbers = #tpu.dot_dimension_numbers<[1], [0], [0], [1], [0, 0, 1, 1], [], []>} : vector<50x256xbf16>, vector<256x256xbf16>, vector<50x256xf32> -> vector<50x256xf32>
    %c0_3 = arith.constant 0 : index
    %c0_4 = arith.constant 0 : index
    %3 = vector.load %arg3[%c0_3, %c0_4] : memref<1x256xf32, #tpu.memory_space<vmem>>, vector<1x256xf32>
    %4 = vector.broadcast %3 : vector<1x256xf32> to vector<50x256xf32>
    %5 = arith.addf %2, %4 : vector<50x256xf32>
    %cst_5 = arith.constant 0.000000e+00 : f32
    %6 = vector.broadcast %cst_5 : f32 to vector<50x256xf32>
    %7 = arith.maximumf %5, %6 : vector<50x256xf32>
    %8 = arith.truncf %7 : vector<50x256xf32> to vector<50x256xbf16>
    %c0_6 = arith.constant 0 : index
    %c0_7 = arith.constant 0 : index
    %9 = vector.load %arg4[%c0_6, %c0_7] : memref<50x256xbf16, #tpu.memory_space<vmem>>, vector<50x256xbf16>
    tpu.vector_store %arg4[%c0_6, %c0_7], %8 {strides = array<i32>} : memref<50x256xbf16, #tpu.memory_space<vmem>>, vector<50x256xbf16>,
    return
  }
  func.func @transform_0(%arg0: i32) -> (i32, i32) {
    %c0_i32 = arith.constant 0 : i32
    %c0_i32_0 = arith.constant 0 : i32
    return %arg0, %c0_i32 : i32, i32
  }
  func.func @transform_1(%arg0: i32) -> (i32, i32) {
    %c0_i32 = arith.constant 0 : i32
    %c0_i32_0 = arith.constant 0 : i32
    %c0_i32_1 = arith.constant 0 : i32
    return %c0_i32, %c0_i32_0 : i32, i32
  }
  func.func @transform_2(%arg0: i32) -> (i32, i32) {
    %c0_i32 = arith.constant 0 : i32
    %c0_i32_0 = arith.constant 0 : i32
    %c0_i32_1 = arith.constant 0 : i32
    return %c0_i32, %c0_i32_0 : i32, i32
  }
  func.func @transform_3(%arg0: i32) -> (i32, i32) {
    %c0_i32 = arith.constant 0 : i32
    %c0_i32_0 = arith.constant 0 : i32
    return %arg0, %c0_i32 : i32, i32
  }
}

module attributes {stable_mosaic.version = 11 : i64} {
  func.func @_linear_kernel(%arg0: i32, %arg1: memref<162x256xbf16, #tpu.memory_space<vmem>>, %arg2: memref<256x128xbf16, #tpu.memory_space<vmem>>, %arg3: memref<1x128xf32, #tpu.memory_space<vmem>>, %arg4: memref<162x128xbf16, #tpu.memory_space<vmem>>) attributes {dimension_semantics = [#tpu.dimension_semantics<parallel>], iteration_bounds = array<i64: 1>, scalar_prefetch = 0 : i64, scratch_operands = 0 : i64, tpu.core_type = #tpu.core_type<tc>, window_params = [{transform_indices = @transform_0, window_bounds = array<i64: 162, 256>}, {pipeline_mode = #tpu.pipeline_mode<synchronous>, transform_indices = @transform_1, window_bounds = array<i64: 256, 128>}, {pipeline_mode = #tpu.pipeline_mode<synchronous>, transform_indices = @transform_2, window_bounds = array<i64: 1, 128>}, {transform_indices = @transform_3, window_bounds = array<i64: 162, 128>}]} {
    %c0 = arith.constant 0 : index
    %c0_0 = arith.constant 0 : index
    %0 = vector.load %arg1[%c0, %c0_0] : memref<162x256xbf16, #tpu.memory_space<vmem>>, vector<162x256xbf16>
    %c0_1 = arith.constant 0 : index
    %c0_2 = arith.constant 0 : index
    %1 = vector.load %arg2[%c0_1, %c0_2] : memref<256x128xbf16, #tpu.memory_space<vmem>>, vector<256x128xbf16>
    %cst = arith.constant dense<0.000000e+00> : vector<162x128xf32>
    %2 = tpu.matmul %0, %1, %cst {dimension_numbers = #tpu.dot_dimension_numbers<[1], [0], [0], [1], [0, 0, 1, 1], [], []>} : vector<162x256xbf16>, vector<256x128xbf16>, vector<162x128xf32> -> vector<162x128xf32>
    %c0_3 = arith.constant 0 : index
    %c0_4 = arith.constant 0 : index
    %3 = vector.load %arg3[%c0_3, %c0_4] : memref<1x128xf32, #tpu.memory_space<vmem>>, vector<1x128xf32>
    %4 = vector.broadcast %3 : vector<1x128xf32> to vector<162x128xf32>
    %5 = arith.addf %2, %4 : vector<162x128xf32>
    %cst_5 = arith.constant 0.000000e+00 : f32
    %6 = vector.broadcast %cst_5 : f32 to vector<162x128xf32>
    %7 = arith.maximumf %5, %6 : vector<162x128xf32>
    %8 = arith.truncf %7 : vector<162x128xf32> to vector<162x128xbf16>
    %c0_6 = arith.constant 0 : index
    %c0_7 = arith.constant 0 : index
    %9 = vector.load %arg4[%c0_6, %c0_7] : memref<162x128xbf16, #tpu.memory_space<vmem>>, vector<162x128xbf16>
    tpu.vector_store %arg4[%c0_6, %c0_7], %8 {strides = array<i32>} : memref<162x128xbf16, #tpu.memory_space<vmem>>, vector<162x128xbf16>,
    return
  }
  func.func @transform_0(%arg0: i32) -> (i32, i32) {
    %c0_i32 = arith.constant 0 : i32
    %c0_i32_0 = arith.constant 0 : i32
    return %arg0, %c0_i32 : i32, i32
  }
  func.func @transform_1(%arg0: i32) -> (i32, i32) {
    %c0_i32 = arith.constant 0 : i32
    %c0_i32_0 = arith.constant 0 : i32
    %c0_i32_1 = arith.constant 0 : i32
    return %c0_i32, %c0_i32_0 : i32, i32
  }
  func.func @transform_2(%arg0: i32) -> (i32, i32) {
    %c0_i32 = arith.constant 0 : i32
    %c0_i32_0 = arith.constant 0 : i32
    %c0_i32_1 = arith.constant 0 : i32
    return %c0_i32, %c0_i32_0 : i32, i32
  }
  func.func @transform_3(%arg0: i32) -> (i32, i32) {
    %c0_i32 = arith.constant 0 : i32
    %c0_i32_0 = arith.constant 0 : i32
    return %arg0, %c0_i32 : i32, i32
  }
}

module attributes {stable_mosaic.version = 11 : i64} {
  func.func @_linear_kernel(%arg0: i32, %arg1: memref<578x128xbf16, #tpu.memory_space<vmem>>, %arg2: memref<128x128xbf16, #tpu.memory_space<vmem>>, %arg3: memref<1x128xf32, #tpu.memory_space<vmem>>, %arg4: memref<578x128xbf16, #tpu.memory_space<vmem>>) attributes {dimension_semantics = [#tpu.dimension_semantics<parallel>], iteration_bounds = array<i64: 1>, scalar_prefetch = 0 : i64, scratch_operands = 0 : i64, tpu.core_type = #tpu.core_type<tc>, window_params = [{transform_indices = @transform_0, window_bounds = array<i64: 578, 128>}, {pipeline_mode = #tpu.pipeline_mode<synchronous>, transform_indices = @transform_1, window_bounds = array<i64: 128, 128>}, {pipeline_mode = #tpu.pipeline_mode<synchronous>, transform_indices = @transform_2, window_bounds = array<i64: 1, 128>}, {transform_indices = @transform_3, window_bounds = array<i64: 578, 128>}]} {
    %c0 = arith.constant 0 : index
    %c0_0 = arith.constant 0 : index
    %0 = vector.load %arg1[%c0, %c0_0] : memref<578x128xbf16, #tpu.memory_space<vmem>>, vector<578x128xbf16>
    %c0_1 = arith.constant 0 : index
    %c0_2 = arith.constant 0 : index
    %1 = vector.load %arg2[%c0_1, %c0_2] : memref<128x128xbf16, #tpu.memory_space<vmem>>, vector<128x128xbf16>
    %cst = arith.constant dense<0.000000e+00> : vector<578x128xf32>
    %2 = tpu.matmul %0, %1, %cst {dimension_numbers = #tpu.dot_dimension_numbers<[1], [0], [0], [1], [0, 0, 1, 1], [], []>} : vector<578x128xbf16>, vector<128x128xbf16>, vector<578x128xf32> -> vector<578x128xf32>
    %c0_3 = arith.constant 0 : index
    %c0_4 = arith.constant 0 : index
    %3 = vector.load %arg3[%c0_3, %c0_4] : memref<1x128xf32, #tpu.memory_space<vmem>>, vector<1x128xf32>
    %4 = vector.broadcast %3 : vector<1x128xf32> to vector<578x128xf32>
    %5 = arith.addf %2, %4 : vector<578x128xf32>
    %cst_5 = arith.constant 0.000000e+00 : f32
    %6 = vector.broadcast %cst_5 : f32 to vector<578x128xf32>
    %7 = arith.maximumf %5, %6 : vector<578x128xf32>
    %8 = arith.truncf %7 : vector<578x128xf32> to vector<578x128xbf16>
    %c0_6 = arith.constant 0 : index
    %c0_7 = arith.constant 0 : index
    %9 = vector.load %arg4[%c0_6, %c0_7] : memref<578x128xbf16, #tpu.memory_space<vmem>>, vector<578x128xbf16>
    tpu.vector_store %arg4[%c0_6, %c0_7], %8 {strides = array<i32>} : memref<578x128xbf16, #tpu.memory_space<vmem>>, vector<578x128xbf16>,
    return
  }
  func.func @transform_0(%arg0: i32) -> (i32, i32) {
    %c0_i32 = arith.constant 0 : i32
    %c0_i32_0 = arith.constant 0 : i32
    return %arg0, %c0_i32 : i32, i32
  }
  func.func @transform_1(%arg0: i32) -> (i32, i32) {
    %c0_i32 = arith.constant 0 : i32
    %c0_i32_0 = arith.constant 0 : i32
    %c0_i32_1 = arith.constant 0 : i32
    return %c0_i32, %c0_i32_0 : i32, i32
  }
  func.func @transform_2(%arg0: i32) -> (i32, i32) {
    %c0_i32 = arith.constant 0 : i32
    %c0_i32_0 = arith.constant 0 : i32
    %c0_i32_1 = arith.constant 0 : i32
    return %c0_i32, %c0_i32_0 : i32, i32
  }
  func.func @transform_3(%arg0: i32) -> (i32, i32) {
    %c0_i32 = arith.constant 0 : i32
    %c0_i32_0 = arith.constant 0 : i32
    return %arg0, %c0_i32 : i32, i32
  }
}

module attributes {stable_mosaic.version = 11 : i64} {
  func.func @_linear_kernel(%arg0: i32, %arg1: memref<2178x128xbf16, #tpu.memory_space<vmem>>, %arg2: memref<128x128xbf16, #tpu.memory_space<vmem>>, %arg3: memref<1x128xf32, #tpu.memory_space<vmem>>, %arg4: memref<2178x128xf32, #tpu.memory_space<vmem>>) attributes {dimension_semantics = [#tpu.dimension_semantics<parallel>], iteration_bounds = array<i64: 1>, scalar_prefetch = 0 : i64, scratch_operands = 0 : i64, tpu.core_type = #tpu.core_type<tc>, window_params = [{transform_indices = @transform_0, window_bounds = array<i64: 2178, 128>}, {pipeline_mode = #tpu.pipeline_mode<synchronous>, transform_indices = @transform_1, window_bounds = array<i64: 128, 128>}, {pipeline_mode = #tpu.pipeline_mode<synchronous>, transform_indices = @transform_2, window_bounds = array<i64: 1, 128>}, {transform_indices = @transform_3, window_bounds = array<i64: 2178, 128>}]} {
    %c0 = arith.constant 0 : index
    %c0_0 = arith.constant 0 : index
    %0 = vector.load %arg1[%c0, %c0_0] : memref<2178x128xbf16, #tpu.memory_space<vmem>>, vector<2178x128xbf16>
    %c0_1 = arith.constant 0 : index
    %c0_2 = arith.constant 0 : index
    %1 = vector.load %arg2[%c0_1, %c0_2] : memref<128x128xbf16, #tpu.memory_space<vmem>>, vector<128x128xbf16>
    %cst = arith.constant dense<0.000000e+00> : vector<2178x128xf32>
    %2 = tpu.matmul %0, %1, %cst {dimension_numbers = #tpu.dot_dimension_numbers<[1], [0], [0], [1], [0, 0, 1, 1], [], []>} : vector<2178x128xbf16>, vector<128x128xbf16>, vector<2178x128xf32> -> vector<2178x128xf32>
    %c0_3 = arith.constant 0 : index
    %c0_4 = arith.constant 0 : index
    %3 = vector.load %arg3[%c0_3, %c0_4] : memref<1x128xf32, #tpu.memory_space<vmem>>, vector<1x128xf32>
    %4 = vector.broadcast %3 : vector<1x128xf32> to vector<2178x128xf32>
    %5 = arith.addf %2, %4 : vector<2178x128xf32>
    %c0_5 = arith.constant 0 : index
    %c0_6 = arith.constant 0 : index
    %6 = vector.load %arg4[%c0_5, %c0_6] : memref<2178x128xf32, #tpu.memory_space<vmem>>, vector<2178x128xf32>
    tpu.vector_store %arg4[%c0_5, %c0_6], %5 {strides = array<i32>} : memref<2178x128xf32, #tpu.memory_space<vmem>>, vector<2178x128xf32>,
    return
  }
  func.func @transform_0(%arg0: i32) -> (i32, i32) {
    %c0_i32 = arith.constant 0 : i32
    %c0_i32_0 = arith.constant 0 : i32
    return %arg0, %c0_i32 : i32, i32
  }
  func.func @transform_1(%arg0: i32) -> (i32, i32) {
    %c0_i32 = arith.constant 0 : i32
    %c0_i32_0 = arith.constant 0 : i32
    %c0_i32_1 = arith.constant 0 : i32
    return %c0_i32, %c0_i32_0 : i32, i32
  }
  func.func @transform_2(%arg0: i32) -> (i32, i32) {
    %c0_i32 = arith.constant 0 : i32
    %c0_i32_0 = arith.constant 0 : i32
    %c0_i32_1 = arith.constant 0 : i32
    return %c0_i32, %c0_i32_0 : i32, i32
  }
  func.func @transform_3(%arg0: i32) -> (i32, i32) {
    %c0_i32 = arith.constant 0 : i32
    %c0_i32_0 = arith.constant 0 : i32
    return %arg0, %c0_i32 : i32, i32
  }
}

</mosaic_0001>

<bundles_post_ra>
// kernel: beta_vae_h_forward.9
= control target key start
LH: loop header
LB: loop body
LE: loop exit
PB: predicated region body
PF: predicated region fallthrough
CT: control target
= control target key end

     0   :  { %s3308_s12 = smov 0   ;;  %s3670_s0 = inlined_call_operand.vmem [shape: bf16[2048,48], index: 0, kind: input, shape index: {}]   ;;  %s3671_s1 = inlined_call_operand.vmem [shape: bf16[48,128], index: 1, kind: input, shape index: {}]   ;;  %s3672_s2 = inlined_call_operand.vmem [shape: f32[1,128], index: 2, kind: input, shape index: {}]   ;;  %s3673_s3 = inlined_call_operand.vmem [shape: bf16[2048,128], index: 3, kind: output, shape index: {}]  }
   0x1 LB: > { %s2216_s13 = sadd.s32 4294967295, %s3286_s12   ;;  %p2220_p0 = scmp.ge.s32.totalorder %s3286_s12, 1  ;;  %s3286_s12 = sphi %s3308_s12, %s13_s12  }
   0x2   : > { %p138_p1 = scmp.lt.s32.totalorder %s3286_s12, 3 }
   0x4   : > { %p139_p2 = pnand %p2220_p0, %p138_p1 }
   0x5   : > { %s2221_s16 = sshll.u32 (!%p139_p2), %s2216_s13, 7 }
   0x6   : > { %142 = sbr.rel (%p139_p2) target bundleno = 350 (0x15e), region = 32  ;;  %p163_p3 = scmp.lt.s32.totalorder (!%p139_p2), %s2221_s16, 255 }
   0xb   : > { %v3213_v0 = vld [vmem:[%s3671_s1 + $0x10] sm:$0xff]   ;;  %v3214_v1 = vld [vmem:[%s3671_s1 + $0x8] sm:$0xff]   ;;  %s3675_s16 = smov (!%p163_p3, %s2221_s16), 255  ;;  %v3215_v2 = vld [vmem:[%s3671_s1] sm:$0xff]   ;;  %vm654_vm0 = vcmask 392192  }
   0xc   : > { %3065 = vmatprep.subr.bf16.mxu0 %v3213_v0  ;;  %3199 = vmatprep.subr.bf16.mxu1 %v3213_v0  ;;  %s2222_s21 = sshll.u32 %s3675_s16, 2 }
   0xd   : > { %3066 = vmatpush3.bf16.msra.mxu0 %v3213_v0  ;;  %3202 = vmatpush3.bf16.msra.mxu1 %v3213_v0  ;;  %s3333_s24 = scalar_lea.vmem %s3670_s0, %s2222_s21  ;;  %s3481_s29 = scalar_lea.vmem %s3673_s3, %s2222_s21 }
   0xe   : > { %3067 = vmatprep.subr.bf16.mxu0 %v3214_v1  ;;  %3200 = vmatprep.subr.bf16.mxu1 %v3214_v1  ;;  %v3216_v3 = vld [vmem:[%s3333_s24] sm:$0xff]   ;;  %v3218_v5 = vld [vmem:[%s3333_s24 + $0x8] sm:$0xff]   ;;  %v3220_v7 = vld [vmem:[%s3333_s24 + $0x10] sm:$0xff]  }
   0xf   : > { %v3217_v4 = vld [vmem:[%s3333_s24 + $0x100] sm:$0xff]   ;;  %3071 = vmatprep.mubr.msk.bf16.mxu0 %vm654_vm0, %v3216_v3  ;;  %v3219_v6 = vld [vmem:[%s3333_s24 + $0x108] sm:$0xff]   ;;  %v3221_v8 = vld [vmem:[%s3333_s24 + $0x110] sm:$0xff]  }
  0x10   : > { %3135 = vmatprep.mubr.msk.bf16.mxu1 %vm654_vm0, %v3217_v4  ;;  %v3222_v9 = vld [vmem:[%s3333_s24 + $0x18] sm:$0xff]   ;;  %v3224_v11 = vld [vmem:[%s3333_s24 + $0x20] sm:$0xff]   ;;  %v3226_v13 = vld [vmem:[%s3333_s24 + $0x28] sm:$0xff]  }
  0x11   : > { %3068 = vmatpush3.bf16.msra.mxu0 %v3214_v1  ;;  %3203 = vmatpush3.bf16.msra.mxu1 %v3214_v1  ;;  %v3223_v10 = vld [vmem:[%s3333_s24 + $0x118] sm:$0xff]   ;;  %v3225_v12 = vld [vmem:[%s3333_s24 + $0x120] sm:$0xff]   ;;  %v3227_v14 = vld [vmem:[%s3333_s24 + $0x128] sm:$0xff]  }
  0x12   : > { %3069 = vmatprep.subr.bf16.mxu0 %v3215_v2  ;;  %3201 = vmatprep.subr.bf16.mxu1 %v3215_v2  ;;  %v3228_v15 = vld [vmem:[%s3333_s24 + $0x30] sm:$0xff]   ;;  %v3230_v17 = vld [vmem:[%s3333_s24 + $0x38] sm:$0xff]   ;;  %v3232_v19 = vld [vmem:[%s3333_s24 + $0x40] sm:$0xff]  }
  0x13   : > { %v3229_v16 = vld [vmem:[%s3333_s24 + $0x130] sm:$0xff]   ;;  %v3231_v18 = vld [vmem:[%s3333_s24 + $0x138] sm:$0xff]   ;;  %v3233_v20 = vld [vmem:[%s3333_s24 + $0x140] sm:$0xff]  }
  0x14   : > { %v3234_v21 = vld [vmem:[%s3333_s24 + $0x48] sm:$0xff]   ;;  %v3236_v23 = vld [vmem:[%s3333_s24 + $0x50] sm:$0xff]   ;;  %v3238_v25 = vld [vmem:[%s3333_s24 + $0x58] sm:$0xff]  }
  0x15   : > { %3070 = vmatpush3.bf16.msra.mxu0 %v3215_v2  ;;  %3204 = vmatpush3.bf16.msra.mxu1 %v3215_v2  ;;  %v3235_v22 = vld [vmem:[%s3333_s24 + $0x148] sm:$0xff]   ;;  %v3237_v24 = vld [vmem:[%s3333_s24 + $0x150] sm:$0xff]   ;;  %v3239_v26 = vld [vmem:[%s3333_s24 + $0x158] sm:$0xff]  }
  0x16   : > { %v3240_v27 = vld [vmem:[%s3333_s24 + $0x60] sm:$0xff]   ;;  %v3242_v29 = vld [vmem:[%s3333_s24 + $0x68] sm:$0xff]   ;;  %v3244_v31 = vld [vmem:[%s3333_s24 + $0x70] sm:$0xff]  }
  0x17   : > { %v3241_v28 = vld [vmem:[%s3333_s24 + $0x160] sm:$0xff]   ;;  %v3243_v30 = vld [vmem:[%s3333_s24 + $0x168] sm:$0xff]   ;;  %v3245_v32 = vld [vmem:[%s3333_s24 + $0x170] sm:$0xff]  }
  0x18   : > { %3072 = vmatmul.mubr.msk.bf16.vlgmr.msra.gmra.mxu0 %vm654_vm0, %v3218_v5  ;;  %3136 = vmatmul.mubr.msk.bf16.vlgmr.msra.gmra.mxu1 %vm654_vm0, %v3219_v6  ;;  %v3246_v33 = vld [vmem:[%s3333_s24 + $0x78] sm:$0xff]   ;;  %v3248_v35 = vld [vmem:[%s3333_s24 + $0x80] sm:$0xff]   ;;  %v3250_v37 = vld [vmem:[%s3333_s24 + $0x88] sm:$0xff]  }
  0x19   : > { %3075 = vmatprep.mubr.msk.bf16.mxu0 %vm654_vm0, %v3220_v7  ;;  %3139 = vmatprep.mubr.msk.bf16.mxu1 %vm654_vm0, %v3221_v8  ;;  %v3247_v34 = vld [vmem:[%s3333_s24 + $0x178] sm:$0xff]   ;;  %v3249_v36 = vld [vmem:[%s3333_s24 + $0x180] sm:$0xff]   ;;  %v3251_v38 = vld [vmem:[%s3333_s24 + $0x188] sm:$0xff]  }
  0x1a   : > { %v3252_v39 = vld [vmem:[%s3333_s24 + $0x90] sm:$0xff]   ;;  %v3254_v41 = vld [vmem:[%s3333_s24 + $0x98] sm:$0xff]   ;;  %v3256_v43 = vld [vmem:[%s3333_s24 + $0xa0] sm:$0xff]  }
  0x1b   : > { %v3253_v40 = vld [vmem:[%s3333_s24 + $0x190] sm:$0xff]   ;;  %v3255_v42 = vld [vmem:[%s3333_s24 + $0x198] sm:$0xff]   ;;  %v3257_v44 = vld [vmem:[%s3333_s24 + $0x1a0] sm:$0xff]  }
  0x1c   : > { %v3258_v45 = vld [vmem:[%s3333_s24 + $0xa8] sm:$0xff]   ;;  %v3260_v47 = vld [vmem:[%s3333_s24 + $0xb0] sm:$0xff]   ;;  %v3262_v49 = vld [vmem:[%s3333_s24 + $0xb8] sm:$0xff]  }
  0x1d   : > { %v3259_v46 = vld [vmem:[%s3333_s24 + $0x1a8] sm:$0xff]   ;;  %v3261_v48 = vld [vmem:[%s3333_s24 + $0x1b0] sm:$0xff]   ;;  %v3263_v50 = vld [vmem:[%s3333_s24 + $0x1b8] sm:$0xff]  }
  0x1e   : > { %v3264_v51 = vld [vmem:[%s3333_s24 + $0xc0] sm:$0xff]   ;;  %v3266_v53 = vld [vmem:[%s3333_s24 + $0xc8] sm:$0xff]   ;;  %v3268_v55 = vld [vmem:[%s3333_s24 + $0xd0] sm:$0xff]  }
  0x1f   : > { %v3265_v52 = vld [vmem:[%s3333_s24 + $0x1c0] sm:$0xff]   ;;  %v3267_v54 = vld [vmem:[%s3333_s24 + $0x1c8] sm:$0xff]   ;;  %v3269_v56 = vld [vmem:[%s3333_s24 + $0x1d0] sm:$0xff]  }
  0x20   : > { %3076 = vmatmul.mubr.msk.bf16.gmra.mxu0 %vm654_vm0, %v3222_v9  ;;  %3140 = vmatmul.mubr.msk.bf16.gmra.mxu1 %vm654_vm0, %v3223_v10  ;;  %v3270_v57 = vld [vmem:[%s3333_s24 + $0xd8] sm:$0xff]   ;;  %v3272_v59 = vld [vmem:[%s3333_s24 + $0xe0] sm:$0xff]   ;;  %v3274_v61 = vld [vmem:[%s3333_s24 + $0xe8] sm:$0xff]  }
  0x21   : > { %3079 = vmatprep.mubr.msk.bf16.mxu0 %vm654_vm0, %v3224_v11  ;;  %3143 = vmatprep.mubr.msk.bf16.mxu1 %vm654_vm0, %v3225_v12  ;;  %v3271_v58 = vld [vmem:[%s3333_s24 + $0x1d8] sm:$0xff]   ;;  %v3273_v60 = vld [vmem:[%s3333_s24 + $0x1e0] sm:$0xff]   ;;  %v3275_v62 = vld [vmem:[%s3333_s24 + $0x1e8] sm:$0xff]  }
  0x22   : > { %v3276_v63 = vld [vmem:[%s3333_s24 + $0xf0] sm:$0xff]   ;;  %v3278_v1 = vld [vmem:[%s3333_s24 + $0xf8] sm:$0xff]   ;;  %v3466_v3 = vld [vmem:[%s3672_s2] ss:$0 sm:$0xff] }
  0x23   : > { %v3277_v0 = vld [vmem:[%s3333_s24 + $0x1f0] sm:$0xff]   ;;  %v3279_v2 = vld [vmem:[%s3333_s24 + $0x1f8] sm:$0xff]  }
  0x28   : > { %3080 = vmatmul.mubr.msk.bf16.gmra.mxu0 %vm654_vm0, %v3226_v13  ;;  %3144 = vmatmul.mubr.msk.bf16.gmra.mxu1 %vm654_vm0, %v3227_v14 }
  0x29   : > { %3083 = vmatprep.mubr.msk.bf16.mxu0 %vm654_vm0, %v3228_v15  ;;  %3147 = vmatprep.mubr.msk.bf16.mxu1 %vm654_vm0, %v3229_v16 }
  0x30   : > { %3084 = vmatmul.mubr.msk.bf16.gmra.mxu0 %vm654_vm0, %v3230_v17  ;;  %3148 = vmatmul.mubr.msk.bf16.gmra.mxu1 %vm654_vm0, %v3231_v18 }
  0x31   : > { %3087 = vmatprep.mubr.msk.bf16.mxu0 %vm654_vm0, %v3232_v19  ;;  %3151 = vmatprep.mubr.msk.bf16.mxu1 %vm654_vm0, %v3233_v20 }
  0x38   : > { %3088 = vmatmul.mubr.msk.bf16.gmra.mxu0 %vm654_vm0, %v3234_v21  ;;  %3152 = vmatmul.mubr.msk.bf16.gmra.mxu1 %vm654_vm0, %v3235_v22 }
  0x39   : > { %3091 = vmatprep.mubr.msk.bf16.mxu0 %vm654_vm0, %v3236_v23  ;;  %3155 = vmatprep.mubr.msk.bf16.mxu1 %vm654_vm0, %v3237_v24 }
  0x40   : > { %3092 = vmatmul.mubr.msk.bf16.gmra.mxu0 %vm654_vm0, %v3238_v25  ;;  %3156 = vmatmul.mubr.msk.bf16.gmra.mxu1 %vm654_vm0, %v3239_v26 }
  0x41   : > { %3095 = vmatprep.mubr.msk.bf16.mxu0 %vm654_vm0, %v3240_v27  ;;  %3159 = vmatprep.mubr.msk.bf16.mxu1 %vm654_vm0, %v3241_v28 }
  0x48   : > { %3096 = vmatmul.mubr.msk.bf16.gmra.mxu0 %vm654_vm0, %v3242_v29  ;;  %3160 = vmatmul.mubr.msk.bf16.gmra.mxu1 %vm654_vm0, %v3243_v30 }
  0x49   : > { %3099 = vmatprep.mubr.msk.bf16.mxu0 %vm654_vm0, %v3244_v31  ;;  %3163 = vmatprep.mubr.msk.bf16.mxu1 %vm654_vm0, %v3245_v32 }
  0x50   : > { %3100 = vmatmul.mubr.msk.bf16.gmra.mxu0 %vm654_vm0, %v3246_v33  ;;  %3164 = vmatmul.mubr.msk.bf16.gmra.mxu1 %vm654_vm0, %v3247_v34 }
  0x51   : > { %3103 = vmatprep.mubr.msk.bf16.mxu0 %vm654_vm0, %v3248_v35  ;;  %3167 = vmatprep.mubr.msk.bf16.mxu1 %vm654_vm0, %v3249_v36 }
  0x58   : > { %3104 = vmatmul.mubr.msk.bf16.gmra.mxu0 %vm654_vm0, %v3250_v37  ;;  %3168 = vmatmul.mubr.msk.bf16.gmra.mxu1 %vm654_vm0, %v3251_v38 }
  0x59   : > { %3107 = vmatprep.mubr.msk.bf16.mxu0 %vm654_vm0, %v3252_v39  ;;  %3171 = vmatprep.mubr.msk.bf16.mxu1 %vm654_vm0, %v3253_v40 }
  0x60   : > { %3108 = vmatmul.mubr.msk.bf16.gmra.mxu0 %vm654_vm0, %v3254_v41  ;;  %3172 = vmatmul.mubr.msk.bf16.gmra.mxu1 %vm654_vm0, %v3255_v42 }
  0x61   : > { %3111 = vmatprep.mubr.msk.bf16.mxu0 %vm654_vm0, %v3256_v43  ;;  %3175 = vmatprep.mubr.msk.bf16.mxu1 %vm654_vm0, %v3257_v44 }
  0x68   : > { %3112 = vmatmul.mubr.msk.bf16.gmra.mxu0 %vm654_vm0, %v3258_v45  ;;  %3176 = vmatmul.mubr.msk.bf16.gmra.mxu1 %vm654_vm0, %v3259_v46 }
  0x69   : > { %3115 = vmatprep.mubr.msk.bf16.mxu0 %vm654_vm0, %v3260_v47  ;;  %3179 = vmatprep.mubr.msk.bf16.mxu1 %vm654_vm0, %v3261_v48 }
  0x70   : > { %3116 = vmatmul.mubr.msk.bf16.gmra.mxu0 %vm654_vm0, %v3262_v49  ;;  %3180 = vmatmul.mubr.msk.bf16.gmra.mxu1 %vm654_vm0, %v3263_v50 }
  0x71   : > { %3119 = vmatprep.mubr.msk.bf16.mxu0 %vm654_vm0, %v3264_v51  ;;  %3183 = vmatprep.mubr.msk.bf16.mxu1 %vm654_vm0, %v3265_v52 }
  0x78   : > { %3120 = vmatmul.mubr.msk.bf16.gmra.mxu0 %vm654_vm0, %v3266_v53  ;;  %3184 = vmatmul.mubr.msk.bf16.gmra.mxu1 %vm654_vm0, %v3267_v54 }
  0x79   : > { %3123 = vmatprep.mubr.msk.bf16.mxu0 %vm654_vm0, %v3268_v55  ;;  %3187 = vmatprep.mubr.msk.bf16.mxu1 %vm654_vm0, %v3269_v56 }
  0x80   : > { %3124 = vmatmul.mubr.msk.bf16.gmra.mxu0 %vm654_vm0, %v3270_v57  ;;  %3188 = vmatmul.mubr.msk.bf16.gmra.mxu1 %vm654_vm0, %v3271_v58 }
  0x81   : > { %3127 = vmatprep.mubr.msk.bf16.mxu0 %vm654_vm0, %v3272_v59  ;;  %3191 = vmatprep.mubr.msk.bf16.mxu1 %vm654_vm0, %v3273_v60 }
  0x88   : > { %3128 = vmatmul.mubr.msk.bf16.gmra.mxu0 %vm654_vm0, %v3274_v61  ;;  %3192 = vmatmul.mubr.msk.bf16.gmra.mxu1 %vm654_vm0, %v3275_v62 }
  0x89   : > { %3131 = vmatprep.mubr.msk.bf16.mxu0 %vm654_vm0, %v3276_v63  ;;  %3195 = vmatprep.mubr.msk.bf16.mxu1 %vm654_vm0, %v3277_v0 }
  0x90   : > { %3132 = vmatmul.mubr.msk.bf16.gmra.mxu0 %vm654_vm0, %v3278_v1  ;;  %3196 = vmatmul.mubr.msk.bf16.gmra.mxu1 %vm654_vm0, %v3279_v2 }
  0xd8   : > { %v3073_v4 = vpop.f32.mrf.mxu0  ;;  %v3137_v5 = vpop.f32.mrf.mxu1 }
  0xd9   : > { %v890_v6 = vadd.f32 %v3073_v4, %v3466_v3  ;;  %v1146_v7 = vadd.f32 %v3137_v5, %v3466_v3 }
  0xda   : > { %v881_v8 = vpop.f32.mrf.mxu0  ;;  %v1137_v9 = vpop.f32.mrf.mxu1 }
  0xdb   : > { %v882_v10 = vadd.f32 %v3466_v3, %v881_v8  ;;  %v1138_v11 = vadd.f32 %v3466_v3, %v1137_v9  ;;  %v1394_v16 = vmax.f32 %v890_v6, 0.0  ;;  %v1458_v17 = vmax.f32 %v1146_v7, 0.0 }
  0xdc   : > { %v3074_v12 = vpop.f32.mrf.mxu0  ;;  %v3138_v13 = vpop.f32.mrf.mxu1 }
  0xdd   : > { %v893_v14 = vadd.f32 %v3074_v12, %v3466_v3  ;;  %v1149_v15 = vadd.f32 %v3138_v13, %v3466_v3  ;;  %v1392_v24 = vmax.f32 %v882_v10, 0.0  ;;  %v1456_v25 = vmax.f32 %v1138_v11, 0.0 }
  0xde   : > { %v884_v18 = vpop.f32.mrf.mxu0  ;;  %v1140_v19 = vpop.f32.mrf.mxu1 }
  0xdf   : > { %v1395_v20 = vmax.f32 %v893_v14, 0.0  ;;  %v1459_v21 = vmax.f32 %v1149_v15, 0.0  ;;  %v885_v22 = vadd.f32 %v3466_v3, %v884_v18  ;;  %v1141_v23 = vadd.f32 %v3466_v3, %v1140_v19 }
  0xe0   : > { %v3077_v26 = vpop.f32.mrf.mxu0  ;;  %v3141_v27 = vpop.f32.mrf.mxu1 }
  0xe1   : > { %v2623_v28 = vpack.c.bf16 %v1395_v20, %v1394_v16  ;;  %v2783_v29 = vpack.c.bf16 %v1459_v21, %v1458_v17  ;;  %v1393_v30 = vmax.f32 %v885_v22, 0.0  ;;  %v1457_v31 = vmax.f32 %v1141_v23, 0.0 }
  0xe2   : > { %v906_v32 = vadd.f32 %v3077_v26, %v3466_v3  ;;  %v1162_v33 = vadd.f32 %v3141_v27, %v3466_v3  ;;  %v897_v34 = vpop.f32.mrf.mxu0  ;;  %v1153_v35 = vpop.f32.mrf.mxu1 }
  0xe3   : > { %2935 = vst [vmem:[%s3481_s29 + $0x8] sm:$0xff] %v2623_v28   ;;  %2967 = vst [vmem:[%s3481_s29 + $0x108] sm:$0xff] %v2783_v29   ;;  %v2618_v36 = vpack.c.bf16 %v1393_v30, %v1392_v24  ;;  %v2778_v37 = vpack.c.bf16 %v1457_v31, %v1456_v25  ;;  %v898_v38 = vadd.f32 %v3466_v3, %v897_v34 }
  0xe4   : > { %v1154_v39 = vadd.f32 %v3466_v3, %v1153_v35  ;;  %v3078_v40 = vpop.f32.mrf.mxu0  ;;  %v3142_v41 = vpop.f32.mrf.mxu1  ;;  %v1398_v44 = vmax.f32 %v906_v32, 0.0  ;;  %v1462_v45 = vmax.f32 %v1162_v33, 0.0 }
  0xe5   : > { %2619 = vst [vmem:[%s3481_s29] sm:$0xff] %v2618_v36   ;;  %2966 = vst [vmem:[%s3481_s29 + $0x100] sm:$0xff] %v2778_v37   ;;  %v909_v42 = vadd.f32 %v3078_v40, %v3466_v3  ;;  %v1165_v43 = vadd.f32 %v3142_v41, %v3466_v3  ;;  %v1396_v52 = vmax.f32 %v898_v38, 0.0 }
  0xe6   : > { %v900_v46 = vpop.f32.mrf.mxu0  ;;  %v1156_v47 = vpop.f32.mrf.mxu1  ;;  %v1460_v53 = vmax.f32 %v1154_v39, 0.0 }
  0xe7   : > { %v1399_v48 = vmax.f32 %v909_v42, 0.0  ;;  %v1463_v49 = vmax.f32 %v1165_v43, 0.0  ;;  %v901_v50 = vadd.f32 %v3466_v3, %v900_v46  ;;  %v1157_v51 = vadd.f32 %v3466_v3, %v1156_v47 }
  0xe8   : > { %v3081_v54 = vpop.f32.mrf.mxu0  ;;  %v3145_v55 = vpop.f32.mrf.mxu1 }
  0xe9   : > { %v2633_v56 = vpack.c.bf16 %v1399_v48, %v1398_v44  ;;  %v2793_v57 = vpack.c.bf16 %v1463_v49, %v1462_v45  ;;  %v1397_v58 = vmax.f32 %v901_v50, 0.0  ;;  %v1461_v59 = vmax.f32 %v1157_v51, 0.0 }
  0xea   : > { %v922_v60 = vadd.f32 %v3081_v54, %v3466_v3  ;;  %v1178_v61 = vadd.f32 %v3145_v55, %v3466_v3  ;;  %v913_v62 = vpop.f32.mrf.mxu0  ;;  %v1169_v63 = vpop.f32.mrf.mxu1 }
  0xeb   : > { %2937 = vst [vmem:[%s3481_s29 + $0x18] sm:$0xff] %v2633_v56   ;;  %2969 = vst [vmem:[%s3481_s29 + $0x118] sm:$0xff] %v2793_v57   ;;  %v2628_v0 = vpack.c.bf16 %v1397_v58, %v1396_v52  ;;  %v2788_v1 = vpack.c.bf16 %v1461_v59, %v1460_v53  ;;  %v914_v2 = vadd.f32 %v3466_v3, %v913_v62 }
  0xec   : > { %v1170_v4 = vadd.f32 %v3466_v3, %v1169_v63  ;;  %v3082_v5 = vpop.f32.mrf.mxu0  ;;  %v3146_v6 = vpop.f32.mrf.mxu1  ;;  %v1402_v9 = vmax.f32 %v922_v60, 0.0  ;;  %v1466_v10 = vmax.f32 %v1178_v61, 0.0 }
  0xed   : > { %2936 = vst [vmem:[%s3481_s29 + $0x10] sm:$0xff] %v2628_v0   ;;  %2968 = vst [vmem:[%s3481_s29 + $0x110] sm:$0xff] %v2788_v1   ;;  %v925_v7 = vadd.f32 %v3082_v5, %v3466_v3  ;;  %v1181_v8 = vadd.f32 %v3146_v6, %v3466_v3  ;;  %v1400_v17 = vmax.f32 %v914_v2, 0.0 }
  0xee   : > { %v916_v11 = vpop.f32.mrf.mxu0  ;;  %v1172_v12 = vpop.f32.mrf.mxu1  ;;  %v1464_v18 = vmax.f32 %v1170_v4, 0.0 }
  0xef   : > { %v1403_v13 = vmax.f32 %v925_v7, 0.0  ;;  %v1467_v14 = vmax.f32 %v1181_v8, 0.0  ;;  %v917_v15 = vadd.f32 %v3466_v3, %v916_v11  ;;  %v1173_v16 = vadd.f32 %v3466_v3, %v1172_v12 }
  0xf0   : > { %v3085_v19 = vpop.f32.mrf.mxu0  ;;  %v3149_v20 = vpop.f32.mrf.mxu1 }
  0xf1   : > { %v2643_v21 = vpack.c.bf16 %v1403_v13, %v1402_v9  ;;  %v2803_v22 = vpack.c.bf16 %v1467_v14, %v1466_v10  ;;  %v1401_v23 = vmax.f32 %v917_v15, 0.0  ;;  %v1465_v24 = vmax.f32 %v1173_v16, 0.0 }
  0xf2   : > { %v938_v25 = vadd.f32 %v3085_v19, %v3466_v3  ;;  %v1194_v26 = vadd.f32 %v3149_v20, %v3466_v3  ;;  %v929_v27 = vpop.f32.mrf.mxu0  ;;  %v1185_v28 = vpop.f32.mrf.mxu1 }
  0xf3   : > { %2939 = vst [vmem:[%s3481_s29 + $0x28] sm:$0xff] %v2643_v21   ;;  %2971 = vst [vmem:[%s3481_s29 + $0x128] sm:$0xff] %v2803_v22   ;;  %v2638_v29 = vpack.c.bf16 %v1401_v23, %v1400_v17  ;;  %v2798_v30 = vpack.c.bf16 %v1465_v24, %v1464_v18  ;;  %v930_v31 = vadd.f32 %v3466_v3, %v929_v27 }
  0xf4   : > { %v1186_v32 = vadd.f32 %v3466_v3, %v1185_v28  ;;  %v3086_v33 = vpop.f32.mrf.mxu0  ;;  %v3150_v34 = vpop.f32.mrf.mxu1  ;;  %v1406_v37 = vmax.f32 %v938_v25, 0.0  ;;  %v1470_v38 = vmax.f32 %v1194_v26, 0.0 }
  0xf5   : > { %2938 = vst [vmem:[%s3481_s29 + $0x20] sm:$0xff] %v2638_v29   ;;  %2970 = vst [vmem:[%s3481_s29 + $0x120] sm:$0xff] %v2798_v30   ;;  %v941_v35 = vadd.f32 %v3086_v33, %v3466_v3  ;;  %v1197_v36 = vadd.f32 %v3150_v34, %v3466_v3  ;;  %v1404_v45 = vmax.f32 %v930_v31, 0.0 }
  0xf6   : > { %v932_v39 = vpop.f32.mrf.mxu0  ;;  %v1188_v40 = vpop.f32.mrf.mxu1  ;;  %v1468_v46 = vmax.f32 %v1186_v32, 0.0 }
  0xf7   : > { %v1407_v41 = vmax.f32 %v941_v35, 0.0  ;;  %v1471_v42 = vmax.f32 %v1197_v36, 0.0  ;;  %v933_v43 = vadd.f32 %v3466_v3, %v932_v39  ;;  %v1189_v44 = vadd.f32 %v3466_v3, %v1188_v40 }
  0xf8   : > { %v3089_v47 = vpop.f32.mrf.mxu0  ;;  %v3153_v48 = vpop.f32.mrf.mxu1 }
  0xf9   : > { %v2653_v49 = vpack.c.bf16 %v1407_v41, %v1406_v37  ;;  %v2813_v50 = vpack.c.bf16 %v1471_v42, %v1470_v38  ;;  %v1405_v51 = vmax.f32 %v933_v43, 0.0  ;;  %v1469_v52 = vmax.f32 %v1189_v44, 0.0 }
  0xfa   : > { %v954_v53 = vadd.f32 %v3089_v47, %v3466_v3  ;;  %v1210_v54 = vadd.f32 %v3153_v48, %v3466_v3  ;;  %v945_v55 = vpop.f32.mrf.mxu0  ;;  %v1201_v56 = vpop.f32.mrf.mxu1 }
  0xfb   : > { %2941 = vst [vmem:[%s3481_s29 + $0x38] sm:$0xff] %v2653_v49   ;;  %2973 = vst [vmem:[%s3481_s29 + $0x138] sm:$0xff] %v2813_v50   ;;  %v2648_v57 = vpack.c.bf16 %v1405_v51, %v1404_v45  ;;  %v2808_v58 = vpack.c.bf16 %v1469_v52, %v1468_v46  ;;  %v946_v59 = vadd.f32 %v3466_v3, %v945_v55 }
  0xfc   : > { %v1202_v60 = vadd.f32 %v3466_v3, %v1201_v56  ;;  %v3090_v61 = vpop.f32.mrf.mxu0  ;;  %v3154_v62 = vpop.f32.mrf.mxu1  ;;  %v1410_v1 = vmax.f32 %v954_v53, 0.0  ;;  %v1474_v2 = vmax.f32 %v1210_v54, 0.0 }
  0xfd   : > { %2940 = vst [vmem:[%s3481_s29 + $0x30] sm:$0xff] %v2648_v57   ;;  %2972 = vst [vmem:[%s3481_s29 + $0x130] sm:$0xff] %v2808_v58   ;;  %v957_v63 = vadd.f32 %v3090_v61, %v3466_v3  ;;  %v1213_v0 = vadd.f32 %v3154_v62, %v3466_v3  ;;  %v1408_v10 = vmax.f32 %v946_v59, 0.0 }
  0xfe   : > { %v948_v4 = vpop.f32.mrf.mxu0  ;;  %v1204_v5 = vpop.f32.mrf.mxu1  ;;  %v1472_v11 = vmax.f32 %v1202_v60, 0.0 }
  0xff   : > { %v1411_v6 = vmax.f32 %v957_v63, 0.0  ;;  %v1475_v7 = vmax.f32 %v1213_v0, 0.0  ;;  %v949_v8 = vadd.f32 %v3466_v3, %v948_v4  ;;  %v1205_v9 = vadd.f32 %v3466_v3, %v1204_v5 }
 0x100   : > { %v3093_v12 = vpop.f32.mrf.mxu0  ;;  %v3157_v13 = vpop.f32.mrf.mxu1 }
 0x101   : > { %v2663_v14 = vpack.c.bf16 %v1411_v6, %v1410_v1  ;;  %v2823_v15 = vpack.c.bf16 %v1475_v7, %v1474_v2  ;;  %v1409_v16 = vmax.f32 %v949_v8, 0.0  ;;  %v1473_v17 = vmax.f32 %v1205_v9, 0.0 }
 0x102   : > { %v970_v18 = vadd.f32 %v3093_v12, %v3466_v3  ;;  %v1226_v19 = vadd.f32 %v3157_v13, %v3466_v3  ;;  %v961_v20 = vpop.f32.mrf.mxu0  ;;  %v1217_v21 = vpop.f32.mrf.mxu1 }
 0x103   : > { %2943 = vst [vmem:[%s3481_s29 + $0x48] sm:$0xff] %v2663_v14   ;;  %2975 = vst [vmem:[%s3481_s29 + $0x148] sm:$0xff] %v2823_v15   ;;  %v2658_v22 = vpack.c.bf16 %v1409_v16, %v1408_v10  ;;  %v2818_v23 = vpack.c.bf16 %v1473_v17, %v1472_v11  ;;  %v962_v24 = vadd.f32 %v3466_v3, %v961_v20 }
 0x104   : > { %v1218_v25 = vadd.f32 %v3466_v3, %v1217_v21  ;;  %v3094_v26 = vpop.f32.mrf.mxu0  ;;  %v3158_v27 = vpop.f32.mrf.mxu1  ;;  %v1414_v30 = vmax.f32 %v970_v18, 0.0  ;;  %v1478_v31 = vmax.f32 %v1226_v19, 0.0 }
 0x105   : > { %2942 = vst [vmem:[%s3481_s29 + $0x40] sm:$0xff] %v2658_v22   ;;  %2974 = vst [vmem:[%s3481_s29 + $0x140] sm:$0xff] %v2818_v23   ;;  %v973_v28 = vadd.f32 %v3094_v26, %v3466_v3  ;;  %v1229_v29 = vadd.f32 %v3158_v27, %v3466_v3  ;;  %v1412_v38 = vmax.f32 %v962_v24, 0.0 }
 0x106   : > { %v964_v32 = vpop.f32.mrf.mxu0  ;;  %v1220_v33 = vpop.f32.mrf.mxu1  ;;  %v1476_v39 = vmax.f32 %v1218_v25, 0.0 }
 0x107   : > { %v1415_v34 = vmax.f32 %v973_v28, 0.0  ;;  %v1479_v35 = vmax.f32 %v1229_v29, 0.0  ;;  %v965_v36 = vadd.f32 %v3466_v3, %v964_v32  ;;  %v1221_v37 = vadd.f32 %v3466_v3, %v1220_v33 }
 0x108   : > { %v3097_v40 = vpop.f32.mrf.mxu0  ;;  %v3161_v41 = vpop.f32.mrf.mxu1 }
 0x109   : > { %v2673_v42 = vpack.c.bf16 %v1415_v34, %v1414_v30  ;;  %v2833_v43 = vpack.c.bf16 %v1479_v35, %v1478_v31  ;;  %v1413_v44 = vmax.f32 %v965_v36, 0.0  ;;  %v1477_v45 = vmax.f32 %v1221_v37, 0.0 }
 0x10a   : > { %v986_v46 = vadd.f32 %v3097_v40, %v3466_v3  ;;  %v1242_v47 = vadd.f32 %v3161_v41, %v3466_v3  ;;  %v977_v48 = vpop.f32.mrf.mxu0  ;;  %v1233_v49 = vpop.f32.mrf.mxu1 }
 0x10b   : > { %2945 = vst [vmem:[%s3481_s29 + $0x58] sm:$0xff] %v2673_v42   ;;  %2977 = vst [vmem:[%s3481_s29 + $0x158] sm:$0xff] %v2833_v43   ;;  %v2668_v50 = vpack.c.bf16 %v1413_v44, %v1412_v38  ;;  %v2828_v51 = vpack.c.bf16 %v1477_v45, %v1476_v39  ;;  %v978_v52 = vadd.f32 %v3466_v3, %v977_v48 }
 0x10c   : > { %v1234_v53 = vadd.f32 %v3466_v3, %v1233_v49  ;;  %v3098_v54 = vpop.f32.mrf.mxu0  ;;  %v3162_v55 = vpop.f32.mrf.mxu1  ;;  %v1418_v58 = vmax.f32 %v986_v46, 0.0  ;;  %v1482_v59 = vmax.f32 %v1242_v47, 0.0 }
 0x10d   : > { %2944 = vst [vmem:[%s3481_s29 + $0x50] sm:$0xff] %v2668_v50   ;;  %2976 = vst [vmem:[%s3481_s29 + $0x150] sm:$0xff] %v2828_v51   ;;  %v989_v56 = vadd.f32 %v3098_v54, %v3466_v3  ;;  %v1245_v57 = vadd.f32 %v3162_v55, %v3466_v3  ;;  %v1416_v2 = vmax.f32 %v978_v52, 0.0 }
 0x10e   : > { %v980_v60 = vpop.f32.mrf.mxu0  ;;  %v1236_v61 = vpop.f32.mrf.mxu1  ;;  %v1480_v4 = vmax.f32 %v1234_v53, 0.0 }
 0x10f   : > { %v1419_v62 = vmax.f32 %v989_v56, 0.0  ;;  %v1483_v63 = vmax.f32 %v1245_v57, 0.0  ;;  %v981_v0 = vadd.f32 %v3466_v3, %v980_v60  ;;  %v1237_v1 = vadd.f32 %v3466_v3, %v1236_v61 }
 0x110   : > { %v3101_v5 = vpop.f32.mrf.mxu0  ;;  %v3165_v6 = vpop.f32.mrf.mxu1 }
 0x111   : > { %v2683_v7 = vpack.c.bf16 %v1419_v62, %v1418_v58  ;;  %v2843_v8 = vpack.c.bf16 %v1483_v63, %v1482_v59  ;;  %v1417_v9 = vmax.f32 %v981_v0, 0.0  ;;  %v1481_v10 = vmax.f32 %v1237_v1, 0.0 }
 0x112   : > { %v1002_v11 = vadd.f32 %v3101_v5, %v3466_v3  ;;  %v1258_v12 = vadd.f32 %v3165_v6, %v3466_v3  ;;  %v993_v13 = vpop.f32.mrf.mxu0  ;;  %v1249_v14 = vpop.f32.mrf.mxu1 }
 0x113   : > { %2947 = vst [vmem:[%s3481_s29 + $0x68] sm:$0xff] %v2683_v7   ;;  %2979 = vst [vmem:[%s3481_s29 + $0x168] sm:$0xff] %v2843_v8   ;;  %v2678_v15 = vpack.c.bf16 %v1417_v9, %v1416_v2  ;;  %v2838_v16 = vpack.c.bf16 %v1481_v10, %v1480_v4  ;;  %v994_v17 = vadd.f32 %v3466_v3, %v993_v13 }
 0x114   : > { %v1250_v18 = vadd.f32 %v3466_v3, %v1249_v14  ;;  %v3102_v19 = vpop.f32.mrf.mxu0  ;;  %v3166_v20 = vpop.f32.mrf.mxu1  ;;  %v1422_v23 = vmax.f32 %v1002_v11, 0.0  ;;  %v1486_v24 = vmax.f32 %v1258_v12, 0.0 }
 0x115   : > { %2946 = vst [vmem:[%s3481_s29 + $0x60] sm:$0xff] %v2678_v15   ;;  %2978 = vst [vmem:[%s3481_s29 + $0x160] sm:$0xff] %v2838_v16   ;;  %v1005_v21 = vadd.f32 %v3102_v19, %v3466_v3  ;;  %v1261_v22 = vadd.f32 %v3166_v20, %v3466_v3  ;;  %v1420_v31 = vmax.f32 %v994_v17, 0.0 }
 0x116   : > { %v996_v25 = vpop.f32.mrf.mxu0  ;;  %v1252_v26 = vpop.f32.mrf.mxu1  ;;  %v1484_v32 = vmax.f32 %v1250_v18, 0.0 }
 0x117   : > { %v1423_v27 = vmax.f32 %v1005_v21, 0.0  ;;  %v1487_v28 = vmax.f32 %v1261_v22, 0.0  ;;  %v997_v29 = vadd.f32 %v3466_v3, %v996_v25  ;;  %v1253_v30 = vadd.f32 %v3466_v3, %v1252_v26 }
 0x118   : > { %v3105_v33 = vpop.f32.mrf.mxu0  ;;  %v3169_v34 = vpop.f32.mrf.mxu1 }
 0x119   : > { %v2693_v35 = vpack.c.bf16 %v1423_v27, %v1422_v23  ;;  %v2853_v36 = vpack.c.bf16 %v1487_v28, %v1486_v24  ;;  %v1421_v37 = vmax.f32 %v997_v29, 0.0  ;;  %v1485_v38 = vmax.f32 %v1253_v30, 0.0 }
 0x11a   : > { %v1018_v39 = vadd.f32 %v3105_v33, %v3466_v3  ;;  %v1274_v40 = vadd.f32 %v3169_v34, %v3466_v3  ;;  %v1009_v41 = vpop.f32.mrf.mxu0  ;;  %v1265_v42 = vpop.f32.mrf.mxu1 }
 0x11b   : > { %2949 = vst [vmem:[%s3481_s29 + $0x78] sm:$0xff] %v2693_v35   ;;  %2981 = vst [vmem:[%s3481_s29 + $0x178] sm:$0xff] %v2853_v36   ;;  %v2688_v43 = vpack.c.bf16 %v1421_v37, %v1420_v31  ;;  %v2848_v44 = vpack.c.bf16 %v1485_v38, %v1484_v32  ;;  %v1010_v45 = vadd.f32 %v3466_v3, %v1009_v41 }
 0x11c   : > { %v1266_v46 = vadd.f32 %v3466_v3, %v1265_v42  ;;  %v3106_v47 = vpop.f32.mrf.mxu0  ;;  %v3170_v48 = vpop.f32.mrf.mxu1  ;;  %v1426_v51 = vmax.f32 %v1018_v39, 0.0  ;;  %v1490_v52 = vmax.f32 %v1274_v40, 0.0 }
 0x11d   : > { %2948 = vst [vmem:[%s3481_s29 + $0x70] sm:$0xff] %v2688_v43   ;;  %2980 = vst [vmem:[%s3481_s29 + $0x170] sm:$0xff] %v2848_v44   ;;  %v1021_v49 = vadd.f32 %v3106_v47, %v3466_v3  ;;  %v1277_v50 = vadd.f32 %v3170_v48, %v3466_v3  ;;  %v1424_v59 = vmax.f32 %v1010_v45, 0.0 }
 0x11e   : > { %v1012_v53 = vpop.f32.mrf.mxu0  ;;  %v1268_v54 = vpop.f32.mrf.mxu1  ;;  %v1488_v60 = vmax.f32 %v1266_v46, 0.0 }
 0x11f   : > { %v1427_v55 = vmax.f32 %v1021_v49, 0.0  ;;  %v1491_v56 = vmax.f32 %v1277_v50, 0.0  ;;  %v1013_v57 = vadd.f32 %v3466_v3, %v1012_v53  ;;  %v1269_v58 = vadd.f32 %v3466_v3, %v1268_v54 }
 0x120   : > { %v3109_v61 = vpop.f32.mrf.mxu0  ;;  %v3173_v62 = vpop.f32.mrf.mxu1 }
 0x121   : > { %v2703_v63 = vpack.c.bf16 %v1427_v55, %v1426_v51  ;;  %v2863_v0 = vpack.c.bf16 %v1491_v56, %v1490_v52  ;;  %v1425_v1 = vmax.f32 %v1013_v57, 0.0  ;;  %v1489_v2 = vmax.f32 %v1269_v58, 0.0 }
 0x122   : > { %v1034_v4 = vadd.f32 %v3109_v61, %v3466_v3  ;;  %v1290_v5 = vadd.f32 %v3173_v62, %v3466_v3  ;;  %v1025_v6 = vpop.f32.mrf.mxu0  ;;  %v1281_v7 = vpop.f32.mrf.mxu1 }
 0x123   : > { %2951 = vst [vmem:[%s3481_s29 + $0x88] sm:$0xff] %v2703_v63   ;;  %2983 = vst [vmem:[%s3481_s29 + $0x188] sm:$0xff] %v2863_v0   ;;  %v2698_v8 = vpack.c.bf16 %v1425_v1, %v1424_v59  ;;  %v2858_v9 = vpack.c.bf16 %v1489_v2, %v1488_v60  ;;  %v1026_v10 = vadd.f32 %v3466_v3, %v1025_v6 }
 0x124   : > { %v1282_v11 = vadd.f32 %v3466_v3, %v1281_v7  ;;  %v3110_v12 = vpop.f32.mrf.mxu0  ;;  %v3174_v13 = vpop.f32.mrf.mxu1  ;;  %v1430_v16 = vmax.f32 %v1034_v4, 0.0  ;;  %v1494_v17 = vmax.f32 %v1290_v5, 0.0 }
 0x125   : > { %2950 = vst [vmem:[%s3481_s29 + $0x80] sm:$0xff] %v2698_v8   ;;  %2982 = vst [vmem:[%s3481_s29 + $0x180] sm:$0xff] %v2858_v9   ;;  %v1037_v14 = vadd.f32 %v3110_v12, %v3466_v3  ;;  %v1293_v15 = vadd.f32 %v3174_v13, %v3466_v3  ;;  %v1428_v24 = vmax.f32 %v1026_v10, 0.0 }
 0x126   : > { %v1028_v18 = vpop.f32.mrf.mxu0  ;;  %v1284_v19 = vpop.f32.mrf.mxu1  ;;  %v1492_v25 = vmax.f32 %v1282_v11, 0.0 }
 0x127   : > { %v1431_v20 = vmax.f32 %v1037_v14, 0.0  ;;  %v1495_v21 = vmax.f32 %v1293_v15, 0.0  ;;  %v1029_v22 = vadd.f32 %v3466_v3, %v1028_v18  ;;  %v1285_v23 = vadd.f32 %v3466_v3, %v1284_v19 }
 0x128   : > { %v3113_v26 = vpop.f32.mrf.mxu0  ;;  %v3177_v27 = vpop.f32.mrf.mxu1 }
 0x129   : > { %v2713_v28 = vpack.c.bf16 %v1431_v20, %v1430_v16  ;;  %v2873_v29 = vpack.c.bf16 %v1495_v21, %v1494_v17  ;;  %v1429_v30 = vmax.f32 %v1029_v22, 0.0  ;;  %v1493_v31 = vmax.f32 %v1285_v23, 0.0 }
 0x12a   : > { %v1050_v32 = vadd.f32 %v3113_v26, %v3466_v3  ;;  %v1306_v33 = vadd.f32 %v3177_v27, %v3466_v3  ;;  %v1041_v34 = vpop.f32.mrf.mxu0  ;;  %v1297_v35 = vpop.f32.mrf.mxu1 }
 0x12b   : > { %2953 = vst [vmem:[%s3481_s29 + $0x98] sm:$0xff] %v2713_v28   ;;  %2985 = vst [vmem:[%s3481_s29 + $0x198] sm:$0xff] %v2873_v29   ;;  %v2708_v36 = vpack.c.bf16 %v1429_v30, %v1428_v24  ;;  %v2868_v37 = vpack.c.bf16 %v1493_v31, %v1492_v25  ;;  %v1042_v38 = vadd.f32 %v3466_v3, %v1041_v34 }
 0x12c   : > { %v1298_v39 = vadd.f32 %v3466_v3, %v1297_v35  ;;  %v3114_v40 = vpop.f32.mrf.mxu0  ;;  %v3178_v41 = vpop.f32.mrf.mxu1  ;;  %v1434_v44 = vmax.f32 %v1050_v32, 0.0  ;;  %v1498_v45 = vmax.f32 %v1306_v33, 0.0 }
 0x12d   : > { %2952 = vst [vmem:[%s3481_s29 + $0x90] sm:$0xff] %v2708_v36   ;;  %2984 = vst [vmem:[%s3481_s29 + $0x190] sm:$0xff] %v2868_v37   ;;  %v1053_v42 = vadd.f32 %v3114_v40, %v3466_v3  ;;  %v1309_v43 = vadd.f32 %v3178_v41, %v3466_v3  ;;  %v1432_v52 = vmax.f32 %v1042_v38, 0.0 }
 0x12e   : > { %v1044_v46 = vpop.f32.mrf.mxu0  ;;  %v1300_v47 = vpop.f32.mrf.mxu1  ;;  %v1496_v53 = vmax.f32 %v1298_v39, 0.0 }
 0x12f   : > { %v1435_v48 = vmax.f32 %v1053_v42, 0.0  ;;  %v1499_v49 = vmax.f32 %v1309_v43, 0.0  ;;  %v1045_v50 = vadd.f32 %v3466_v3, %v1044_v46  ;;  %v1301_v51 = vadd.f32 %v3466_v3, %v1300_v47 }
 0x130   : > { %v3117_v54 = vpop.f32.mrf.mxu0  ;;  %v3181_v55 = vpop.f32.mrf.mxu1 }
 0x131   : > { %v2723_v56 = vpack.c.bf16 %v1435_v48, %v1434_v44  ;;  %v2883_v57 = vpack.c.bf16 %v1499_v49, %v1498_v45  ;;  %v1433_v58 = vmax.f32 %v1045_v50, 0.0  ;;  %v1497_v59 = vmax.f32 %v1301_v51, 0.0 }
 0x132   : > { %v1066_v60 = vadd.f32 %v3117_v54, %v3466_v3  ;;  %v1322_v61 = vadd.f32 %v3181_v55, %v3466_v3  ;;  %v1057_v62 = vpop.f32.mrf.mxu0  ;;  %v1313_v63 = vpop.f32.mrf.mxu1 }
 0x133   : > { %2955 = vst [vmem:[%s3481_s29 + $0xa8] sm:$0xff] %v2723_v56   ;;  %2987 = vst [vmem:[%s3481_s29 + $0x1a8] sm:$0xff] %v2883_v57   ;;  %v2718_v0 = vpack.c.bf16 %v1433_v58, %v1432_v52  ;;  %v2878_v1 = vpack.c.bf16 %v1497_v59, %v1496_v53  ;;  %v1058_v2 = vadd.f32 %v3466_v3, %v1057_v62 }
 0x134   : > { %v1314_v4 = vadd.f32 %v3466_v3, %v1313_v63  ;;  %v3118_v5 = vpop.f32.mrf.mxu0  ;;  %v3182_v6 = vpop.f32.mrf.mxu1  ;;  %v1438_v9 = vmax.f32 %v1066_v60, 0.0  ;;  %v1502_v10 = vmax.f32 %v1322_v61, 0.0 }
 0x135   : > { %2954 = vst [vmem:[%s3481_s29 + $0xa0] sm:$0xff] %v2718_v0   ;;  %2986 = vst [vmem:[%s3481_s29 + $0x1a0] sm:$0xff] %v2878_v1   ;;  %v1069_v7 = vadd.f32 %v3118_v5, %v3466_v3  ;;  %v1325_v8 = vadd.f32 %v3182_v6, %v3466_v3  ;;  %v1436_v17 = vmax.f32 %v1058_v2, 0.0 }
 0x136   : > { %v1060_v11 = vpop.f32.mrf.mxu0  ;;  %v1316_v12 = vpop.f32.mrf.mxu1  ;;  %v1500_v18 = vmax.f32 %v1314_v4, 0.0 }
 0x137   : > { %v1439_v13 = vmax.f32 %v1069_v7, 0.0  ;;  %v1503_v14 = vmax.f32 %v1325_v8, 0.0  ;;  %v1061_v15 = vadd.f32 %v3466_v3, %v1060_v11  ;;  %v1317_v16 = vadd.f32 %v3466_v3, %v1316_v12 }
 0x138   : > { %v3121_v19 = vpop.f32.mrf.mxu0  ;;  %v3185_v20 = vpop.f32.mrf.mxu1 }
 0x139   : > { %v2733_v21 = vpack.c.bf16 %v1439_v13, %v1438_v9  ;;  %v2893_v22 = vpack.c.bf16 %v1503_v14, %v1502_v10  ;;  %v1437_v23 = vmax.f32 %v1061_v15, 0.0  ;;  %v1501_v24 = vmax.f32 %v1317_v16, 0.0 }
 0x13a   : > { %v1082_v25 = vadd.f32 %v3121_v19, %v3466_v3  ;;  %v1338_v26 = vadd.f32 %v3185_v20, %v3466_v3  ;;  %v1073_v27 = vpop.f32.mrf.mxu0  ;;  %v1329_v28 = vpop.f32.mrf.mxu1 }
 0x13b   : > { %2957 = vst [vmem:[%s3481_s29 + $0xb8] sm:$0xff] %v2733_v21   ;;  %2989 = vst [vmem:[%s3481_s29 + $0x1b8] sm:$0xff] %v2893_v22   ;;  %v2728_v29 = vpack.c.bf16 %v1437_v23, %v1436_v17  ;;  %v2888_v30 = vpack.c.bf16 %v1501_v24, %v1500_v18  ;;  %v1074_v31 = vadd.f32 %v3466_v3, %v1073_v27 }
 0x13c   : > { %v1330_v32 = vadd.f32 %v3466_v3, %v1329_v28  ;;  %v3122_v33 = vpop.f32.mrf.mxu0  ;;  %v3186_v34 = vpop.f32.mrf.mxu1  ;;  %v1442_v37 = vmax.f32 %v1082_v25, 0.0  ;;  %v1506_v38 = vmax.f32 %v1338_v26, 0.0 }
 0x13d   : > { %2956 = vst [vmem:[%s3481_s29 + $0xb0] sm:$0xff] %v2728_v29   ;;  %2988 = vst [vmem:[%s3481_s29 + $0x1b0] sm:$0xff] %v2888_v30   ;;  %v1085_v35 = vadd.f32 %v3122_v33, %v3466_v3  ;;  %v1341_v36 = vadd.f32 %v3186_v34, %v3466_v3  ;;  %v1440_v45 = vmax.f32 %v1074_v31, 0.0 }
 0x13e   : > { %v1076_v39 = vpop.f32.mrf.mxu0  ;;  %v1332_v40 = vpop.f32.mrf.mxu1  ;;  %v1504_v46 = vmax.f32 %v1330_v32, 0.0 }
 0x13f   : > { %v1443_v41 = vmax.f32 %v1085_v35, 0.0  ;;  %v1507_v42 = vmax.f32 %v1341_v36, 0.0  ;;  %v1077_v43 = vadd.f32 %v3466_v3, %v1076_v39  ;;  %v1333_v44 = vadd.f32 %v3466_v3, %v1332_v40 }
 0x140   : > { %v3125_v47 = vpop.f32.mrf.mxu0  ;;  %v3189_v48 = vpop.f32.mrf.mxu1 }
 0x141   : > { %v2743_v49 = vpack.c.bf16 %v1443_v41, %v1442_v37  ;;  %v2903_v50 = vpack.c.bf16 %v1507_v42, %v1506_v38  ;;  %v1441_v51 = vmax.f32 %v1077_v43, 0.0  ;;  %v1505_v52 = vmax.f32 %v1333_v44, 0.0 }
 0x142   : > { %v1098_v53 = vadd.f32 %v3125_v47, %v3466_v3  ;;  %v1354_v54 = vadd.f32 %v3189_v48, %v3466_v3  ;;  %v1089_v55 = vpop.f32.mrf.mxu0  ;;  %v1345_v56 = vpop.f32.mrf.mxu1 }
 0x143   : > { %2959 = vst [vmem:[%s3481_s29 + $0xc8] sm:$0xff] %v2743_v49   ;;  %2991 = vst [vmem:[%s3481_s29 + $0x1c8] sm:$0xff] %v2903_v50   ;;  %v2738_v57 = vpack.c.bf16 %v1441_v51, %v1440_v45  ;;  %v2898_v58 = vpack.c.bf16 %v1505_v52, %v1504_v46  ;;  %v1090_v59 = vadd.f32 %v3466_v3, %v1089_v55 }
 0x144   : > { %v1346_v60 = vadd.f32 %v3466_v3, %v1345_v56  ;;  %v3126_v61 = vpop.f32.mrf.mxu0  ;;  %v3190_v62 = vpop.f32.mrf.mxu1  ;;  %v1446_v1 = vmax.f32 %v1098_v53, 0.0  ;;  %v1510_v2 = vmax.f32 %v1354_v54, 0.0 }
 0x145   : > { %2958 = vst [vmem:[%s3481_s29 + $0xc0] sm:$0xff] %v2738_v57   ;;  %2990 = vst [vmem:[%s3481_s29 + $0x1c0] sm:$0xff] %v2898_v58   ;;  %v1101_v63 = vadd.f32 %v3126_v61, %v3466_v3  ;;  %v1357_v0 = vadd.f32 %v3190_v62, %v3466_v3  ;;  %v1444_v10 = vmax.f32 %v1090_v59, 0.0 }
 0x146   : > { %v1092_v4 = vpop.f32.mrf.mxu0  ;;  %v1348_v5 = vpop.f32.mrf.mxu1  ;;  %v1508_v11 = vmax.f32 %v1346_v60, 0.0 }
 0x147   : > { %v1447_v6 = vmax.f32 %v1101_v63, 0.0  ;;  %v1511_v7 = vmax.f32 %v1357_v0, 0.0  ;;  %v1093_v8 = vadd.f32 %v3466_v3, %v1092_v4  ;;  %v1349_v9 = vadd.f32 %v3466_v3, %v1348_v5 }
 0x148   : > { %v3129_v12 = vpop.f32.mrf.mxu0  ;;  %v3193_v13 = vpop.f32.mrf.mxu1 }
 0x149   : > { %v2753_v14 = vpack.c.bf16 %v1447_v6, %v1446_v1  ;;  %v2913_v15 = vpack.c.bf16 %v1511_v7, %v1510_v2  ;;  %v1445_v16 = vmax.f32 %v1093_v8, 0.0  ;;  %v1509_v17 = vmax.f32 %v1349_v9, 0.0 }
 0x14a   : > { %v1114_v18 = vadd.f32 %v3129_v12, %v3466_v3  ;;  %v1370_v19 = vadd.f32 %v3193_v13, %v3466_v3  ;;  %v1105_v20 = vpop.f32.mrf.mxu0  ;;  %v1361_v21 = vpop.f32.mrf.mxu1 }
 0x14b   : > { %2961 = vst [vmem:[%s3481_s29 + $0xd8] sm:$0xff] %v2753_v14   ;;  %2993 = vst [vmem:[%s3481_s29 + $0x1d8] sm:$0xff] %v2913_v15   ;;  %v2748_v22 = vpack.c.bf16 %v1445_v16, %v1444_v10  ;;  %v2908_v23 = vpack.c.bf16 %v1509_v17, %v1508_v11  ;;  %v1106_v24 = vadd.f32 %v3466_v3, %v1105_v20 }
 0x14c   : > { %v1362_v25 = vadd.f32 %v3466_v3, %v1361_v21  ;;  %v3130_v26 = vpop.f32.mrf.mxu0  ;;  %v3194_v27 = vpop.f32.mrf.mxu1  ;;  %v1450_v30 = vmax.f32 %v1114_v18, 0.0  ;;  %v1514_v31 = vmax.f32 %v1370_v19, 0.0 }
 0x14d   : > { %2960 = vst [vmem:[%s3481_s29 + $0xd0] sm:$0xff] %v2748_v22   ;;  %2992 = vst [vmem:[%s3481_s29 + $0x1d0] sm:$0xff] %v2908_v23   ;;  %v1117_v28 = vadd.f32 %v3130_v26, %v3466_v3  ;;  %v1373_v29 = vadd.f32 %v3194_v27, %v3466_v3  ;;  %v1448_v38 = vmax.f32 %v1106_v24, 0.0 }
 0x14e   : > { %v1108_v32 = vpop.f32.mrf.mxu0  ;;  %v1364_v33 = vpop.f32.mrf.mxu1  ;;  %v1512_v39 = vmax.f32 %v1362_v25, 0.0 }
 0x14f   : > { %v1451_v34 = vmax.f32 %v1117_v28, 0.0  ;;  %v1515_v35 = vmax.f32 %v1373_v29, 0.0  ;;  %v1109_v36 = vadd.f32 %v3466_v3, %v1108_v32  ;;  %v1365_v37 = vadd.f32 %v3466_v3, %v1364_v33 }
 0x150   : > { %v3133_v40 = vpop.f32.mrf.mxu0  ;;  %v3197_v41 = vpop.f32.mrf.mxu1 }
 0x151   : > { %v2763_v42 = vpack.c.bf16 %v1451_v34, %v1450_v30  ;;  %v2923_v43 = vpack.c.bf16 %v1515_v35, %v1514_v31  ;;  %v1449_v44 = vmax.f32 %v1109_v36, 0.0  ;;  %v1513_v45 = vmax.f32 %v1365_v37, 0.0 }
 0x152   : > { %v1130_v46 = vadd.f32 %v3133_v40, %v3466_v3  ;;  %v1386_v47 = vadd.f32 %v3197_v41, %v3466_v3  ;;  %v1121_v48 = vpop.f32.mrf.mxu0  ;;  %v1377_v49 = vpop.f32.mrf.mxu1 }
 0x153   : > { %2963 = vst [vmem:[%s3481_s29 + $0xe8] sm:$0xff] %v2763_v42   ;;  %2995 = vst [vmem:[%s3481_s29 + $0x1e8] sm:$0xff] %v2923_v43   ;;  %v2758_v50 = vpack.c.bf16 %v1449_v44, %v1448_v38  ;;  %v2918_v51 = vpack.c.bf16 %v1513_v45, %v1512_v39  ;;  %v1122_v52 = vadd.f32 %v3466_v3, %v1121_v48 }
 0x154   : > { %v1378_v53 = vadd.f32 %v3466_v3, %v1377_v49  ;;  %v3134_v54 = vpop.f32.mrf.mxu0  ;;  %v3198_v55 = vpop.f32.mrf.mxu1  ;;  %v1454_v58 = vmax.f32 %v1130_v46, 0.0  ;;  %v1518_v59 = vmax.f32 %v1386_v47, 0.0 }
 0x155   : > { %2962 = vst [vmem:[%s3481_s29 + $0xe0] sm:$0xff] %v2758_v50   ;;  %2994 = vst [vmem:[%s3481_s29 + $0x1e0] sm:$0xff] %v2918_v51   ;;  %v1133_v56 = vadd.f32 %v3134_v54, %v3466_v3  ;;  %v1389_v57 = vadd.f32 %v3198_v55, %v3466_v3  ;;  %v1452_v2 = vmax.f32 %v1122_v52, 0.0 }
 0x156   : > { %v1124_v60 = vpop.f32.mrf.mxu0  ;;  %v1380_v61 = vpop.f32.mrf.mxu1  ;;  %v1516_v4 = vmax.f32 %v1378_v53, 0.0 }
 0x157   : > { %v1455_v62 = vmax.f32 %v1133_v56, 0.0  ;;  %v1519_v63 = vmax.f32 %v1389_v57, 0.0  ;;  %v1125_v0 = vadd.f32 %v3466_v3, %v1124_v60  ;;  %v1381_v1 = vadd.f32 %v3466_v3, %v1380_v61 }
 0x159   : > { %v2773_v5 = vpack.c.bf16 %v1455_v62, %v1454_v58  ;;  %v2933_v6 = vpack.c.bf16 %v1519_v63, %v1518_v59  ;;  %v1453_v7 = vmax.f32 %v1125_v0, 0.0  ;;  %v1517_v8 = vmax.f32 %v1381_v1, 0.0 }
 0x15b   : > { %2965 = vst [vmem:[%s3481_s29 + $0xf8] sm:$0xff] %v2773_v5   ;;  %2997 = vst [vmem:[%s3481_s29 + $0x1f8] sm:$0xff] %v2933_v6   ;;  %v2768_v9 = vpack.c.bf16 %v1453_v7, %v1452_v2  ;;  %v2928_v10 = vpack.c.bf16 %v1517_v8, %v1516_v4 }
 0x15d   : > { %2964 = vst [vmem:[%s3481_s29 + $0xf0] sm:$0xff] %v2768_v9   ;;  %2996 = vst [vmem:[%s3481_s29 + $0x1f0] sm:$0xff] %v2928_v10  }
 0x15e PF: > { %s13_s12 = sadd.s32 1, %s3286_s12  }
 0x15f   : > { %p10_p4 = scmp.ge.s32.totalorder %s13_s12, 4  }
 0x161   :  { %12 = sbr.rel (!%p10_p4) target bundleno = 1 (0x1), region = 62 }

// kernel: beta_vae_h_forward.10
= control target key start
LH: loop header
LB: loop body
LE: loop exit
PB: predicated region body
PF: predicated region fallthrough
CT: control target
= control target key end

     0   :  { %v2718_v0 = vmov 0   ;;  %s3412_s1 = inlined_call_operand.vmem [shape: bf16[512,128], index: 1, kind: input, shape index: {}]   ;;  %s3413_s0 = inlined_call_operand.vmem [shape: bf16[512,512], index: 0, kind: input, shape index: {}]   ;;  %s3414_s2 = inlined_call_operand.vmem [shape: f32[1,128], index: 2, kind: input, shape index: {}]   ;;  %s3415_s3 = inlined_call_operand.vmem [shape: bf16[512,128], index: 3, kind: output, shape index: {}]  }
   0x1   :  { %1046 = vmatprep.subr.bf16.mxu0 %v2718_v0  ;;  %1335 = vmatprep.subr.bf16.mxu1 %v2718_v0  ;;  %v2493_v1 = vld [vmem:[%s3412_s1 + $0x38] sm:$0xff]   ;;  %v2495_v3 = vld [vmem:[%s3412_s1 + $0x30] sm:$0xff]   ;;  %v2497_v5 = vld [vmem:[%s3412_s1 + $0x28] sm:$0xff]  }
   0x2   :  { %v2494_v2 = vld [vmem:[%s3412_s1 + $0xb8] sm:$0xff]   ;;  %1047 = vmatpush1.bf16.msra.mxu0 %v2493_v1  ;;  %v2496_v4 = vld [vmem:[%s3412_s1 + $0xb0] sm:$0xff]   ;;  %v2498_v6 = vld [vmem:[%s3412_s1 + $0xa8] sm:$0xff]  }
   0x3   :  { %1336 = vmatpush1.bf16.msra.mxu1 %v2494_v2  ;;  %1048 = vmatprep.subr.bf16.mxu0 %v2718_v0  ;;  %v2499_v7 = vld [vmem:[%s3412_s1 + $0x20] sm:$0xff]   ;;  %v2501_v9 = vld [vmem:[%s3412_s1 + $0x18] sm:$0xff]   ;;  %v2503_v11 = vld [vmem:[%s3412_s1 + $0x10] sm:$0xff]  }
   0x4   :  { %1337 = vmatprep.subr.bf16.mxu1 %v2718_v0  ;;  %v2500_v8 = vld [vmem:[%s3412_s1 + $0xa0] sm:$0xff]   ;;  %v2502_v10 = vld [vmem:[%s3412_s1 + $0x98] sm:$0xff]   ;;  %v2504_v12 = vld [vmem:[%s3412_s1 + $0x90] sm:$0xff]  }
   0x5   :  { %v2505_v13 = vld [vmem:[%s3412_s1 + $0x8] sm:$0xff]   ;;  %v2507_v15 = vld [vmem:[%s3412_s1] sm:$0xff]   ;;  %v2509_v17 = vld [vmem:[%s3412_s1 + $0x78] sm:$0xff]  }
   0x6   :  { %1049 = vmatpush1.bf16.msra.mxu0 %v2495_v3  ;;  %v2506_v14 = vld [vmem:[%s3412_s1 + $0x88] sm:$0xff]   ;;  %v2508_v16 = vld [vmem:[%s3412_s1 + $0x80] sm:$0xff]   ;;  %v2510_v18 = vld [vmem:[%s3412_s1 + $0xf8] sm:$0xff]  }
   0x7   :  { %1338 = vmatpush1.bf16.msra.mxu1 %v2496_v4  ;;  %1050 = vmatprep.subr.bf16.mxu0 %v2718_v0  ;;  %v2527_v19 = vld [vmem:[%s3413_s0 + $0x4] ss:$16 sps:$4 sm:$0xff]   ;;  %v2530_v21 = vld [vmem:[%s3413_s0 + $0xc] ss:$16 sps:$4 sm:$0xff]   ;;  %v2525_v35 = vld [vmem:[%s3413_s0] ss:$16 sps:$4 sm:$0xff]  }
   0x8   :  { %1339 = vmatprep.subr.bf16.mxu1 %v2718_v0  ;;  %v2511_v20 = vld [vmem:[%s3412_s1 + $0x70] sm:$0xff]   ;;  %1078 = vmatprep.mubr.bf16.mxu0 %v2527_v19  ;;  %v2513_v23 = vld [vmem:[%s3412_s1 + $0x68] sm:$0xff]   ;;  %v2515_v25 = vld [vmem:[%s3412_s1 + $0x60] sm:$0xff]  }
   0x9   :  { %v2512_v22 = vld [vmem:[%s3412_s1 + $0xf0] sm:$0xff]   ;;  %1367 = vmatprep.mubr.bf16.mxu1 %v2530_v21  ;;  %v2514_v24 = vld [vmem:[%s3412_s1 + $0xe8] sm:$0xff]   ;;  %v2516_v26 = vld [vmem:[%s3412_s1 + $0xe0] sm:$0xff]  }
   0xa   :  { %1051 = vmatpush1.bf16.msra.mxu0 %v2497_v5  ;;  %v2517_v27 = vld [vmem:[%s3412_s1 + $0x58] sm:$0xff]   ;;  %v2519_v29 = vld [vmem:[%s3412_s1 + $0x50] sm:$0xff]   ;;  %v2521_v31 = vld [vmem:[%s3412_s1 + $0x48] sm:$0xff]  }
   0xb   :  { %1340 = vmatpush1.bf16.msra.mxu1 %v2498_v6  ;;  %1052 = vmatprep.subr.bf16.mxu0 %v2718_v0  ;;  %v2518_v28 = vld [vmem:[%s3412_s1 + $0xd8] sm:$0xff]   ;;  %v2520_v30 = vld [vmem:[%s3412_s1 + $0xd0] sm:$0xff]   ;;  %v2522_v32 = vld [vmem:[%s3412_s1 + $0xc8] sm:$0xff]  }
   0xc   :  { %1341 = vmatprep.subr.bf16.mxu1 %v2718_v0  ;;  %v2523_v33 = vld [vmem:[%s3412_s1 + $0x40] sm:$0xff]   ;;  %v2528_v36 = vld [vmem:[%s3413_s0 + $0x8] ss:$16 sps:$4 sm:$0xff]   ;;  %v2533_v38 = vld [vmem:[%s3413_s0 + $0x2c] ss:$16 sps:$4 sm:$0xff]  }
   0xd   :  { %v2524_v34 = vld [vmem:[%s3412_s1 + $0xc0] sm:$0xff]   ;;  %v2536_v40 = vld [vmem:[%s3413_s0 + $0x28] ss:$16 sps:$4 sm:$0xff]   ;;  %v2539_v42 = vld [vmem:[%s3413_s0 + $0x4c] ss:$16 sps:$4 sm:$0xff]  }
   0xe   :  { %1053 = vmatpush1.bf16.msra.mxu0 %v2499_v7  ;;  %v2531_v37 = vld [vmem:[%s3413_s0 + $0x24] ss:$16 sps:$4 sm:$0xff]   ;;  %v2535_v39 = vld [vmem:[%s3413_s0 + $0x20] ss:$16 sps:$4 sm:$0xff]   ;;  %v2542_v44 = vld [vmem:[%s3413_s0 + $0x48] ss:$16 sps:$4 sm:$0xff]  }
   0xf   :  { %1342 = vmatpush1.bf16.msra.mxu1 %v2500_v8  ;;  %1054 = vmatprep.subr.bf16.mxu0 %v2718_v0  ;;  %v2537_v41 = vld [vmem:[%s3413_s0 + $0x44] ss:$16 sps:$4 sm:$0xff]   ;;  %v2541_v43 = vld [vmem:[%s3413_s0 + $0x40] ss:$16 sps:$4 sm:$0xff]   ;;  %v2545_v46 = vld [vmem:[%s3413_s0 + $0x6c] ss:$16 sps:$4 sm:$0xff]  }
  0x10   :  { %1343 = vmatprep.subr.bf16.mxu1 %v2718_v0  ;;  %v2543_v45 = vld [vmem:[%s3413_s0 + $0x64] ss:$16 sps:$4 sm:$0xff]   ;;  %v2547_v47 = vld [vmem:[%s3413_s0 + $0x60] ss:$16 sps:$4 sm:$0xff]   ;;  %v2548_v48 = vld [vmem:[%s3413_s0 + $0x68] ss:$16 sps:$4 sm:$0xff]  }
  0x11   :  { %v2549_v49 = vld [vmem:[%s3413_s0 + $0x84] ss:$16 sps:$4 sm:$0xff]   ;;  %v2551_v50 = vld [vmem:[%s3413_s0 + $0x8c] ss:$16 sps:$4 sm:$0xff]   ;;  %v2553_v51 = vld [vmem:[%s3413_s0 + $0x80] ss:$16 sps:$4 sm:$0xff]  }
  0x12   :  { %1055 = vmatpush1.bf16.msra.mxu0 %v2501_v9  ;;  %v2554_v52 = vld [vmem:[%s3413_s0 + $0x88] ss:$16 sps:$4 sm:$0xff]   ;;  %v2555_v53 = vld [vmem:[%s3413_s0 + $0xa4] ss:$16 sps:$4 sm:$0xff]   ;;  %v2557_v54 = vld [vmem:[%s3413_s0 + $0xac] ss:$16 sps:$4 sm:$0xff]  }
  0x13   :  { %1344 = vmatpush1.bf16.msra.mxu1 %v2502_v10  ;;  %1056 = vmatprep.subr.bf16.mxu0 %v2718_v0  ;;  %v2559_v55 = vld [vmem:[%s3413_s0 + $0xa0] ss:$16 sps:$4 sm:$0xff]   ;;  %v2560_v56 = vld [vmem:[%s3413_s0 + $0xa8] ss:$16 sps:$4 sm:$0xff]   ;;  %v2561_v57 = vld [vmem:[%s3413_s0 + $0xc4] ss:$16 sps:$4 sm:$0xff]  }
  0x14   :  { %1345 = vmatprep.subr.bf16.mxu1 %v2718_v0  ;;  %v2563_v58 = vld [vmem:[%s3413_s0 + $0xcc] ss:$16 sps:$4 sm:$0xff]   ;;  %v2565_v59 = vld [vmem:[%s3413_s0 + $0xc0] ss:$16 sps:$4 sm:$0xff]   ;;  %v2566_v60 = vld [vmem:[%s3413_s0 + $0xc8] ss:$16 sps:$4 sm:$0xff]  }
  0x15   :  { %v2567_v61 = vld [vmem:[%s3413_s0 + $0xe4] ss:$16 sps:$4 sm:$0xff]   ;;  %v2569_v62 = vld [vmem:[%s3413_s0 + $0xec] ss:$16 sps:$4 sm:$0xff]   ;;  %v2571_v63 = vld [vmem:[%s3413_s0 + $0xe0] ss:$16 sps:$4 sm:$0xff]  }
  0x16   :  { %1057 = vmatpush1.bf16.msra.mxu0 %v2503_v11  ;;  %v2573_v1 = vld [vmem:[%s3413_s0 + $0x104] ss:$16 sps:$4 sm:$0xff]   ;;  %v2575_v2 = vld [vmem:[%s3413_s0 + $0x10c] ss:$16 sps:$4 sm:$0xff]   ;;  %v2577_v3 = vld [vmem:[%s3413_s0 + $0x100] ss:$16 sps:$4 sm:$0xff]  }
  0x17   :  { %1346 = vmatpush1.bf16.msra.mxu1 %v2504_v12  ;;  %1058 = vmatprep.subr.bf16.mxu0 %v2718_v0  ;;  %v2578_v4 = vld [vmem:[%s3413_s0 + $0x108] ss:$16 sps:$4 sm:$0xff]   ;;  %v2579_v5 = vld [vmem:[%s3413_s0 + $0x124] ss:$16 sps:$4 sm:$0xff]   ;;  %v2581_v6 = vld [vmem:[%s3413_s0 + $0x12c] ss:$16 sps:$4 sm:$0xff]  }
  0x18   :  { %1347 = vmatprep.subr.bf16.mxu1 %v2718_v0  ;;  %v2583_v7 = vld [vmem:[%s3413_s0 + $0x120] ss:$16 sps:$4 sm:$0xff]   ;;  %v2584_v8 = vld [vmem:[%s3413_s0 + $0x128] ss:$16 sps:$4 sm:$0xff]   ;;  %v2585_v9 = vld [vmem:[%s3413_s0 + $0x144] ss:$16 sps:$4 sm:$0xff]  }
  0x19   :  { %v2587_v10 = vld [vmem:[%s3413_s0 + $0x14c] ss:$16 sps:$4 sm:$0xff]   ;;  %v2589_v11 = vld [vmem:[%s3413_s0 + $0x140] ss:$16 sps:$4 sm:$0xff]   ;;  %v2590_v12 = vld [vmem:[%s3413_s0 + $0x148] ss:$16 sps:$4 sm:$0xff]  }
  0x1a   :  { %1059 = vmatpush1.bf16.msra.mxu0 %v2505_v13  ;;  %v2591_v13 = vld [vmem:[%s3413_s0 + $0x164] ss:$16 sps:$4 sm:$0xff]   ;;  %v2601_v19 = vld [vmem:[%s3413_s0 + $0x180] ss:$16 sps:$4 sm:$0xff]  }
  0x1b   :  { %1348 = vmatpush1.bf16.msra.mxu1 %v2506_v14  ;;  %1060 = vmatprep.subr.bf16.mxu0 %v2718_v0  ;;  %v2593_v14 = vld [vmem:[%s3413_s0 + $0x16c] ss:$16 sps:$4 sm:$0xff]   ;;  %v2603_v21 = vld [vmem:[%s3413_s0 + $0x1a4] ss:$16 sps:$4 sm:$0xff]  }
  0x1c   :  { %1349 = vmatprep.subr.bf16.mxu1 %v2718_v0 }
  0x1e   :  { %1061 = vmatpush1.bf16.msra.mxu0 %v2507_v15  ;;  %v2595_v15 = vld [vmem:[%s3413_s0 + $0x160] ss:$16 sps:$4 sm:$0xff]  }
  0x1f   :  { %1350 = vmatpush1.bf16.msra.mxu1 %v2508_v16  ;;  %1062 = vmatprep.subr.bf16.mxu0 %v2718_v0  ;;  %v2596_v16 = vld [vmem:[%s3413_s0 + $0x168] ss:$16 sps:$4 sm:$0xff]  }
  0x20   :  { %1351 = vmatprep.subr.bf16.mxu1 %v2718_v0 }
  0x22   :  { %1063 = vmatpush2.bf16.msra.mxu0 %v2509_v17  ;;  %v2597_v17 = vld [vmem:[%s3413_s0 + $0x184] ss:$16 sps:$4 sm:$0xff]  }
  0x23   :  { %1352 = vmatpush2.bf16.msra.mxu1 %v2510_v18  ;;  %1064 = vmatprep.subr.bf16.mxu0 %v2718_v0  ;;  %v2599_v18 = vld [vmem:[%s3413_s0 + $0x18c] ss:$16 sps:$4 sm:$0xff]  }
  0x24   :  { %1353 = vmatprep.subr.bf16.mxu1 %v2718_v0 }
  0x26   :  { %1065 = vmatpush2.bf16.msra.mxu0 %v2511_v20  ;;  %v2602_v20 = vld [vmem:[%s3413_s0 + $0x188] ss:$16 sps:$4 sm:$0xff]  }
  0x27   :  { %1354 = vmatpush2.bf16.msra.mxu1 %v2512_v22  ;;  %1066 = vmatprep.subr.bf16.mxu0 %v2718_v0  ;;  %v2605_v22 = vld [vmem:[%s3413_s0 + $0x1ac] ss:$16 sps:$4 sm:$0xff]  }
  0x28   :  { %1355 = vmatprep.subr.bf16.mxu1 %v2718_v0 }
  0x2a   :  { %1067 = vmatpush2.bf16.msra.mxu0 %v2513_v23  ;;  %v2607_v23 = vld [vmem:[%s3413_s0 + $0x1a0] ss:$16 sps:$4 sm:$0xff]  }
  0x2b   :  { %1356 = vmatpush2.bf16.msra.mxu1 %v2514_v24  ;;  %1068 = vmatprep.subr.bf16.mxu0 %v2718_v0  ;;  %v2608_v24 = vld [vmem:[%s3413_s0 + $0x1a8] ss:$16 sps:$4 sm:$0xff]  }
  0x2c   :  { %1357 = vmatprep.subr.bf16.mxu1 %v2718_v0 }
  0x2e   :  { %1069 = vmatpush2.bf16.msra.mxu0 %v2515_v25  ;;  %v2609_v25 = vld [vmem:[%s3413_s0 + $0x1c4] ss:$16 sps:$4 sm:$0xff]  }
  0x2f   :  { %1358 = vmatpush2.bf16.msra.mxu1 %v2516_v26  ;;  %1070 = vmatprep.subr.bf16.mxu0 %v2718_v0  ;;  %v2611_v26 = vld [vmem:[%s3413_s0 + $0x1cc] ss:$16 sps:$4 sm:$0xff]  }
  0x30   :  { %1359 = vmatprep.subr.bf16.mxu1 %v2718_v0 }
  0x32   :  { %1071 = vmatpush2.bf16.msra.mxu0 %v2517_v27  ;;  %v2613_v27 = vld [vmem:[%s3413_s0 + $0x1c0] ss:$16 sps:$4 sm:$0xff]  }
  0x33   :  { %1360 = vmatpush2.bf16.msra.mxu1 %v2518_v28  ;;  %1072 = vmatprep.subr.bf16.mxu0 %v2718_v0  ;;  %v2614_v28 = vld [vmem:[%s3413_s0 + $0x1c8] ss:$16 sps:$4 sm:$0xff]  }
  0x34   :  { %1361 = vmatprep.subr.bf16.mxu1 %v2718_v0 }
  0x36   :  { %1073 = vmatpush2.bf16.msra.mxu0 %v2519_v29  ;;  %v2615_v29 = vld [vmem:[%s3413_s0 + $0x1e4] ss:$16 sps:$4 sm:$0xff]  }
  0x37   :  { %1362 = vmatpush2.bf16.msra.mxu1 %v2520_v30  ;;  %1074 = vmatprep.subr.bf16.mxu0 %v2718_v0  ;;  %v2617_v30 = vld [vmem:[%s3413_s0 + $0x1ec] ss:$16 sps:$4 sm:$0xff]  }
  0x38   :  { %1363 = vmatprep.subr.bf16.mxu1 %v2718_v0 }
  0x3a   :  { %1075 = vmatpush2.bf16.msra.mxu0 %v2521_v31  ;;  %v2619_v31 = vld [vmem:[%s3413_s0 + $0x1e0] ss:$16 sps:$4 sm:$0xff]  }
  0x3b   :  { %1364 = vmatpush2.bf16.msra.mxu1 %v2522_v32  ;;  %1076 = vmatprep.subr.bf16.mxu0 %v2718_v0  ;;  %v2620_v32 = vld [vmem:[%s3413_s0 + $0x1e8] ss:$16 sps:$4 sm:$0xff]  }
  0x3c   :  { %1365 = vmatprep.subr.bf16.mxu1 %v2718_v0  ;;  %v2572_v0 = vld [vmem:[%s3413_s0 + $0xe8] ss:$16 sps:$4 sm:$0xff]  }
  0x3e   :  { %1077 = vmatpush2.bf16.msra.mxu0 %v2523_v33  ;;  %v2621_v33 = vld [vmem:[%s3413_s0 + $0x204] ss:$16 sps:$4 sm:$0xff]  }
  0x3f   :  { %1366 = vmatpush2.bf16.msra.mxu1 %v2524_v34  ;;  %v2623_v34 = vld [vmem:[%s3413_s0 + $0x20c] ss:$16 sps:$4 sm:$0xff]  }
  0x41   :  { %1079 = vmatmul.mubr.bf16.vlgmr.msra.gmra.mxu0 %v2525_v35  ;;  %v2625_v35 = vld [vmem:[%s3413_s0 + $0x200] ss:$16 sps:$4 sm:$0xff]  }
  0x42   :  { %1368 = vmatmul.mubr.bf16.vlgmr.msra.gmra.mxu1 %v2528_v36  ;;  %1086 = vmatprep.mubr.bf16.mxu0 %v2531_v37  ;;  %v2626_v36 = vld [vmem:[%s3413_s0 + $0x208] ss:$16 sps:$4 sm:$0xff]   ;;  %v2627_v37 = vld [vmem:[%s3413_s0 + $0x224] ss:$16 sps:$4 sm:$0xff]  }
  0x43   :  { %1375 = vmatprep.mubr.bf16.mxu1 %v2533_v38  ;;  %v2629_v38 = vld [vmem:[%s3413_s0 + $0x22c] ss:$16 sps:$4 sm:$0xff]  }
  0x49   :  { %1087 = vmatmul.mubr.bf16.gmra.mxu0 %v2535_v39  ;;  %v2631_v39 = vld [vmem:[%s3413_s0 + $0x220] ss:$16 sps:$4 sm:$0xff]  }
  0x4a   :  { %1376 = vmatmul.mubr.bf16.gmra.mxu1 %v2536_v40  ;;  %1094 = vmatprep.mubr.bf16.mxu0 %v2537_v41  ;;  %v2632_v40 = vld [vmem:[%s3413_s0 + $0x228] ss:$16 sps:$4 sm:$0xff]   ;;  %v2633_v41 = vld [vmem:[%s3413_s0 + $0x244] ss:$16 sps:$4 sm:$0xff]  }
  0x4b   :  { %1383 = vmatprep.mubr.bf16.mxu1 %v2539_v42  ;;  %v2635_v42 = vld [vmem:[%s3413_s0 + $0x24c] ss:$16 sps:$4 sm:$0xff]  }
  0x51   :  { %1095 = vmatmul.mubr.bf16.gmra.mxu0 %v2541_v43  ;;  %v2637_v43 = vld [vmem:[%s3413_s0 + $0x240] ss:$16 sps:$4 sm:$0xff]  }
  0x52   :  { %1384 = vmatmul.mubr.bf16.gmra.mxu1 %v2542_v44  ;;  %1102 = vmatprep.mubr.bf16.mxu0 %v2543_v45  ;;  %v2638_v44 = vld [vmem:[%s3413_s0 + $0x248] ss:$16 sps:$4 sm:$0xff]   ;;  %v2639_v45 = vld [vmem:[%s3413_s0 + $0x264] ss:$16 sps:$4 sm:$0xff]  }
  0x53   :  { %1391 = vmatprep.mubr.bf16.mxu1 %v2545_v46  ;;  %v2641_v46 = vld [vmem:[%s3413_s0 + $0x26c] ss:$16 sps:$4 sm:$0xff]  }
  0x59   :  { %1103 = vmatmul.mubr.bf16.gmra.mxu0 %v2547_v47  ;;  %v2643_v47 = vld [vmem:[%s3413_s0 + $0x260] ss:$16 sps:$4 sm:$0xff]  }
  0x5a   :  { %1392 = vmatmul.mubr.bf16.gmra.mxu1 %v2548_v48  ;;  %1110 = vmatprep.mubr.bf16.mxu0 %v2549_v49  ;;  %v2644_v48 = vld [vmem:[%s3413_s0 + $0x268] ss:$16 sps:$4 sm:$0xff]   ;;  %v2645_v49 = vld [vmem:[%s3413_s0 + $0x284] ss:$16 sps:$4 sm:$0xff]  }
  0x5b   :  { %1399 = vmatprep.mubr.bf16.mxu1 %v2551_v50  ;;  %v2647_v50 = vld [vmem:[%s3413_s0 + $0x28c] ss:$16 sps:$4 sm:$0xff]  }
  0x61   :  { %1111 = vmatmul.mubr.bf16.gmra.mxu0 %v2553_v51  ;;  %v2649_v51 = vld [vmem:[%s3413_s0 + $0x280] ss:$16 sps:$4 sm:$0xff]  }
  0x62   :  { %1400 = vmatmul.mubr.bf16.gmra.mxu1 %v2554_v52  ;;  %1118 = vmatprep.mubr.bf16.mxu0 %v2555_v53  ;;  %v2650_v52 = vld [vmem:[%s3413_s0 + $0x288] ss:$16 sps:$4 sm:$0xff]   ;;  %v2651_v53 = vld [vmem:[%s3413_s0 + $0x2a4] ss:$16 sps:$4 sm:$0xff]  }
  0x63   :  { %1407 = vmatprep.mubr.bf16.mxu1 %v2557_v54  ;;  %v2653_v54 = vld [vmem:[%s3413_s0 + $0x2ac] ss:$16 sps:$4 sm:$0xff]  }
  0x69   :  { %1119 = vmatmul.mubr.bf16.gmra.mxu0 %v2559_v55  ;;  %v2655_v55 = vld [vmem:[%s3413_s0 + $0x2a0] ss:$16 sps:$4 sm:$0xff]  }
  0x6a   :  { %1408 = vmatmul.mubr.bf16.gmra.mxu1 %v2560_v56  ;;  %1126 = vmatprep.mubr.bf16.mxu0 %v2561_v57  ;;  %v2656_v56 = vld [vmem:[%s3413_s0 + $0x2a8] ss:$16 sps:$4 sm:$0xff]   ;;  %v2657_v57 = vld [vmem:[%s3413_s0 + $0x2c4] ss:$16 sps:$4 sm:$0xff]  }
  0x6b   :  { %1415 = vmatprep.mubr.bf16.mxu1 %v2563_v58  ;;  %v2659_v58 = vld [vmem:[%s3413_s0 + $0x2cc] ss:$16 sps:$4 sm:$0xff]  }
  0x71   :  { %1127 = vmatmul.mubr.bf16.gmra.mxu0 %v2565_v59  ;;  %v2661_v59 = vld [vmem:[%s3413_s0 + $0x2c0] ss:$16 sps:$4 sm:$0xff]  }
  0x72   :  { %1416 = vmatmul.mubr.bf16.gmra.mxu1 %v2566_v60  ;;  %1134 = vmatprep.mubr.bf16.mxu0 %v2567_v61  ;;  %v2662_v60 = vld [vmem:[%s3413_s0 + $0x2c8] ss:$16 sps:$4 sm:$0xff]   ;;  %v2663_v61 = vld [vmem:[%s3413_s0 + $0x2e4] ss:$16 sps:$4 sm:$0xff]  }
  0x73   :  { %1423 = vmatprep.mubr.bf16.mxu1 %v2569_v62  ;;  %v2665_v62 = vld [vmem:[%s3413_s0 + $0x2ec] ss:$16 sps:$4 sm:$0xff]  }
  0x79   :  { %1135 = vmatmul.mubr.bf16.gmra.mxu0 %v2571_v63  ;;  %v2667_v63 = vld [vmem:[%s3413_s0 + $0x2e0] ss:$16 sps:$4 sm:$0xff]  }
  0x7a   :  { %1424 = vmatmul.mubr.bf16.gmra.mxu1 %v2572_v0  ;;  %1142 = vmatprep.mubr.bf16.mxu0 %v2573_v1  ;;  %v2668_v0 = vld [vmem:[%s3413_s0 + $0x2e8] ss:$16 sps:$4 sm:$0xff]   ;;  %v2669_v1 = vld [vmem:[%s3413_s0 + $0x304] ss:$16 sps:$4 sm:$0xff]  }
  0x7b   :  { %1431 = vmatprep.mubr.bf16.mxu1 %v2575_v2  ;;  %v2671_v2 = vld [vmem:[%s3413_s0 + $0x30c] ss:$16 sps:$4 sm:$0xff]  }
  0x81   :  { %1143 = vmatmul.mubr.bf16.gmra.mxu0 %v2577_v3  ;;  %v2673_v3 = vld [vmem:[%s3413_s0 + $0x300] ss:$16 sps:$4 sm:$0xff]  }
  0x82   :  { %1432 = vmatmul.mubr.bf16.gmra.mxu1 %v2578_v4  ;;  %1150 = vmatprep.mubr.bf16.mxu0 %v2579_v5  ;;  %v2674_v4 = vld [vmem:[%s3413_s0 + $0x308] ss:$16 sps:$4 sm:$0xff]   ;;  %v2675_v5 = vld [vmem:[%s3413_s0 + $0x324] ss:$16 sps:$4 sm:$0xff]  }
  0x83   :  { %1439 = vmatprep.mubr.bf16.mxu1 %v2581_v6  ;;  %v3173_v6 = vld [vmem:[%s3414_s2] ss:$0 sm:$0xff] }
  0x89   :  { %1151 = vmatmul.mubr.bf16.gmra.mxu0 %v2583_v7  ;;  %v2677_v7 = vld [vmem:[%s3413_s0 + $0x32c] ss:$16 sps:$4 sm:$0xff]  }
  0x8a   :  { %1440 = vmatmul.mubr.bf16.gmra.mxu1 %v2584_v8  ;;  %1158 = vmatprep.mubr.bf16.mxu0 %v2585_v9 }
  0x8b   :  { %1447 = vmatprep.mubr.bf16.mxu1 %v2587_v10 }
  0x91   :  { %1159 = vmatmul.mubr.bf16.gmra.mxu0 %v2589_v11 }
  0x92   :  { %1448 = vmatmul.mubr.bf16.gmra.mxu1 %v2590_v12  ;;  %1166 = vmatprep.mubr.bf16.mxu0 %v2591_v13 }
  0x93   :  { %1455 = vmatprep.mubr.bf16.mxu1 %v2593_v14  ;;  %v2679_v14 = vld [vmem:[%s3413_s0 + $0x320] ss:$16 sps:$4 sm:$0xff]  }
  0x99   :  { %1167 = vmatmul.mubr.bf16.gmra.mxu0 %v2595_v15 }
  0x9a   :  { %1456 = vmatmul.mubr.bf16.gmra.mxu1 %v2596_v16  ;;  %1174 = vmatprep.mubr.bf16.mxu0 %v2597_v17 }
  0x9b   :  { %1463 = vmatprep.mubr.bf16.mxu1 %v2599_v18  ;;  %v2680_v18 = vld [vmem:[%s3413_s0 + $0x328] ss:$16 sps:$4 sm:$0xff]  }
  0xa1   :  { %1175 = vmatmul.mubr.bf16.gmra.mxu0 %v2601_v19  ;;  %v2681_v19 = vld [vmem:[%s3413_s0 + $0x344] ss:$16 sps:$4 sm:$0xff]  }
  0xa2   :  { %1464 = vmatmul.mubr.bf16.gmra.mxu1 %v2602_v20  ;;  %1182 = vmatprep.mubr.bf16.mxu0 %v2603_v21  ;;  %v2683_v21 = vld [vmem:[%s3413_s0 + $0x34c] ss:$16 sps:$4 sm:$0xff]  }
  0xa3   :  { %1471 = vmatprep.mubr.bf16.mxu1 %v2605_v22 }
  0xa9   :  { %1183 = vmatmul.mubr.bf16.gmra.mxu0 %v2607_v23 }
  0xaa   :  { %1472 = vmatmul.mubr.bf16.gmra.mxu1 %v2608_v24  ;;  %1190 = vmatprep.mubr.bf16.mxu0 %v2609_v25 }
  0xab   :  { %1479 = vmatprep.mubr.bf16.mxu1 %v2611_v26 }
  0xb1   :  { %1191 = vmatmul.mubr.bf16.gmra.mxu0 %v2613_v27 }
  0xb2   :  { %1480 = vmatmul.mubr.bf16.gmra.mxu1 %v2614_v28  ;;  %1198 = vmatprep.mubr.bf16.mxu0 %v2615_v29 }
  0xb3   :  { %1487 = vmatprep.mubr.bf16.mxu1 %v2617_v30 }
  0xb9   :  { %1199 = vmatmul.mubr.bf16.gmra.mxu0 %v2619_v31 }
  0xba   :  { %1488 = vmatmul.mubr.bf16.gmra.mxu1 %v2620_v32  ;;  %1206 = vmatprep.mubr.bf16.mxu0 %v2621_v33  ;;  %v2685_v33 = vld [vmem:[%s3413_s0 + $0x340] ss:$16 sps:$4 sm:$0xff]  }
  0xbb   :  { %1495 = vmatprep.mubr.bf16.mxu1 %v2623_v34 }
  0xc1   :  { %1207 = vmatmul.mubr.bf16.gmra.mxu0 %v2625_v35 }
  0xc2   :  { %1496 = vmatmul.mubr.bf16.gmra.mxu1 %v2626_v36  ;;  %1214 = vmatprep.mubr.bf16.mxu0 %v2627_v37  ;;  %v2686_v37 = vld [vmem:[%s3413_s0 + $0x348] ss:$16 sps:$4 sm:$0xff]  }
  0xc3   :  { %1503 = vmatprep.mubr.bf16.mxu1 %v2629_v38  ;;  %v2687_v38 = vld [vmem:[%s3413_s0 + $0x364] ss:$16 sps:$4 sm:$0xff]  }
  0xc9   :  { %1215 = vmatmul.mubr.bf16.gmra.mxu0 %v2631_v39 }
  0xca   :  { %1504 = vmatmul.mubr.bf16.gmra.mxu1 %v2632_v40  ;;  %1222 = vmatprep.mubr.bf16.mxu0 %v2633_v41  ;;  %v2689_v40 = vld [vmem:[%s3413_s0 + $0x36c] ss:$16 sps:$4 sm:$0xff]  }
  0xcb   :  { %1511 = vmatprep.mubr.bf16.mxu1 %v2635_v42 }
  0xd1   :  { %1223 = vmatmul.mubr.bf16.gmra.mxu0 %v2637_v43 }
  0xd2   :  { %1512 = vmatmul.mubr.bf16.gmra.mxu1 %v2638_v44  ;;  %1230 = vmatprep.mubr.bf16.mxu0 %v2639_v45 }
  0xd3   :  { %1519 = vmatprep.mubr.bf16.mxu1 %v2641_v46 }
  0xd9   :  { %1231 = vmatmul.mubr.bf16.gmra.mxu0 %v2643_v47 }
  0xda   :  { %1520 = vmatmul.mubr.bf16.gmra.mxu1 %v2644_v48  ;;  %1238 = vmatprep.mubr.bf16.mxu0 %v2645_v49 }
  0xdb   :  { %1527 = vmatprep.mubr.bf16.mxu1 %v2647_v50 }
  0xe1   :  { %1239 = vmatmul.mubr.bf16.gmra.mxu0 %v2649_v51 }
  0xe2   :  { %1528 = vmatmul.mubr.bf16.gmra.mxu1 %v2650_v52  ;;  %1246 = vmatprep.mubr.bf16.mxu0 %v2651_v53  ;;  %v2691_v52 = vld [vmem:[%s3413_s0 + $0x360] ss:$16 sps:$4 sm:$0xff]  }
  0xe3   :  { %1535 = vmatprep.mubr.bf16.mxu1 %v2653_v54 }
  0xe9   :  { %1247 = vmatmul.mubr.bf16.gmra.mxu0 %v2655_v55 }
  0xea   :  { %1536 = vmatmul.mubr.bf16.gmra.mxu1 %v2656_v56  ;;  %1254 = vmatprep.mubr.bf16.mxu0 %v2657_v57  ;;  %v2692_v56 = vld [vmem:[%s3413_s0 + $0x368] ss:$16 sps:$4 sm:$0xff]   ;;  %v2695_v57 = vld [vmem:[%s3413_s0 + $0x384] ss:$16 sps:$4 sm:$0xff]  }
  0xeb   :  { %1543 = vmatprep.mubr.bf16.mxu1 %v2659_v58 }
  0xf1   :  { %1255 = vmatmul.mubr.bf16.gmra.mxu0 %v2661_v59  ;;  %v2698_v59 = vld [vmem:[%s3413_s0 + $0x38c] ss:$16 sps:$4 sm:$0xff]  }
  0xf2   :  { %1544 = vmatmul.mubr.bf16.gmra.mxu1 %v2662_v60  ;;  %1262 = vmatprep.mubr.bf16.mxu0 %v2663_v61 }
  0xf3   :  { %1551 = vmatprep.mubr.bf16.mxu1 %v2665_v62 }
  0xf9   :  { %1263 = vmatmul.mubr.bf16.gmra.mxu0 %v2667_v63 }
  0xfa   :  { %1552 = vmatmul.mubr.bf16.gmra.mxu1 %v2668_v0  ;;  %1270 = vmatprep.mubr.bf16.mxu0 %v2669_v1 }
  0xfb   :  { %1559 = vmatprep.mubr.bf16.mxu1 %v2671_v2 }
 0x101   :  { %v1080_v8 = vpop.f32.mrf.mxu0  ;;  %1271 = vmatmul.mubr.bf16.gmra.mxu0 %v2673_v3 }
 0x102   :  { %v1081_v9 = vadd.f32 %v3173_v6, %v1080_v8  ;;  %v1369_v10 = vpop.f32.mrf.mxu1  ;;  %1560 = vmatmul.mubr.bf16.gmra.mxu1 %v2674_v4  ;;  %1278 = vmatprep.mubr.bf16.mxu0 %v2675_v5  ;;  %v2693_v8 = vld [vmem:[%s3413_s0 + $0x380] ss:$16 sps:$4 sm:$0xff]  }
 0x103   :  { %v1082_v11 = vpop.f32.mrf.mxu0  ;;  %1567 = vmatprep.mubr.bf16.mxu1 %v2677_v7 }
 0x104   :  { %v1371_v12 = vpop.f32.mrf.mxu1  ;;  %v1370_v15 = vadd.f32 %v1369_v10, %v1081_v9 }
 0x105   :  { %v1083_v13 = vpop.f32.mrf.mxu0  ;;  %v2696_v12 = vld [vmem:[%s3413_s0 + $0x388] ss:$16 sps:$4 sm:$0xff]  }
 0x106   :  { %v1084_v16 = vadd.f32 %v3173_v6, %v1083_v13  ;;  %v1372_v17 = vpop.f32.mrf.mxu1  ;;  %v1624_v25 = vmax.f32 %v1370_v15, 0.0  ;;  %v2701_v13 = vld [vmem:[%s3413_s0 + $0x3a4] ss:$16 sps:$4 sm:$0xff]   ;;  %v2704_v15 = vld [vmem:[%s3413_s0 + $0x3ac] ss:$16 sps:$4 sm:$0xff]  }
 0x107   :  { %v1085_v20 = vpop.f32.mrf.mxu0 }
 0x108   :  { %v1373_v22 = vadd.f32 %v1372_v17, %v1084_v16  ;;  %v1374_v23 = vpop.f32.mrf.mxu1 }
 0x109   :  { %v1088_v24 = vpop.f32.mrf.mxu0  ;;  %1279 = vmatmul.mubr.bf16.gmra.mxu0 %v2679_v14 }
 0x10a   :  { %v1625_v26 = vmax.f32 %v1373_v22, 0.0  ;;  %v1089_v27 = vadd.f32 %v3173_v6, %v1088_v24  ;;  %v1377_v28 = vpop.f32.mrf.mxu1  ;;  %1568 = vmatmul.mubr.bf16.gmra.mxu1 %v2680_v18  ;;  %1286 = vmatprep.mubr.bf16.mxu0 %v2681_v19 }
 0x10b   :  { %v1090_v29 = vpop.f32.mrf.mxu0  ;;  %1575 = vmatprep.mubr.bf16.mxu1 %v2683_v21 }
 0x10c   :  { %v2304_v30 = vpack.c.bf16 %v1625_v26, %v1624_v25  ;;  %v1379_v31 = vpop.f32.mrf.mxu1  ;;  %v1378_v34 = vadd.f32 %v1377_v28, %v1089_v27  ;;  %v2699_v27 = vld [vmem:[%s3413_s0 + $0x3a0] ss:$16 sps:$4 sm:$0xff]  }
 0x10d   :  { %v1091_v32 = vpop.f32.mrf.mxu0  ;;  %v2702_v31 = vld [vmem:[%s3413_s0 + $0x3a8] ss:$16 sps:$4 sm:$0xff]  }
 0x10e   :  { %2305 = vst [vmem:[%s3415_s3] sm:$0xff] %v2304_v30   ;;  %v1092_v35 = vadd.f32 %v3173_v6, %v1091_v32  ;;  %v1380_v36 = vpop.f32.mrf.mxu1  ;;  %v1626_v44 = vmax.f32 %v1378_v34, 0.0  ;;  %v2707_v32 = vld [vmem:[%s3413_s0 + $0x3c4] ss:$16 sps:$4 sm:$0xff]   ;;  %v2710_v34 = vld [vmem:[%s3413_s0 + $0x3cc] ss:$16 sps:$4 sm:$0xff]  }
 0x10f   :  { %v1093_v39 = vpop.f32.mrf.mxu0 }
 0x110   :  { %v1381_v41 = vadd.f32 %v1380_v36, %v1092_v35  ;;  %v1382_v42 = vpop.f32.mrf.mxu1 }
 0x111   :  { %v1096_v43 = vpop.f32.mrf.mxu0  ;;  %1287 = vmatmul.mubr.bf16.gmra.mxu0 %v2685_v33 }
 0x112   :  { %v1627_v45 = vmax.f32 %v1381_v41, 0.0  ;;  %v1097_v46 = vadd.f32 %v3173_v6, %v1096_v43  ;;  %v1385_v47 = vpop.f32.mrf.mxu1  ;;  %1576 = vmatmul.mubr.bf16.gmra.mxu1 %v2686_v37  ;;  %1294 = vmatprep.mubr.bf16.mxu0 %v2687_v38 }
 0x113   :  { %v1098_v48 = vpop.f32.mrf.mxu0  ;;  %1583 = vmatprep.mubr.bf16.mxu1 %v2689_v40 }
 0x114   :  { %v2309_v49 = vpack.c.bf16 %v1627_v45, %v1626_v44  ;;  %v1387_v50 = vpop.f32.mrf.mxu1  ;;  %v1386_v53 = vadd.f32 %v1385_v47, %v1097_v46  ;;  %v2705_v46 = vld [vmem:[%s3413_s0 + $0x3c0] ss:$16 sps:$4 sm:$0xff]  }
 0x115   :  { %v1099_v51 = vpop.f32.mrf.mxu0  ;;  %v2708_v50 = vld [vmem:[%s3413_s0 + $0x3c8] ss:$16 sps:$4 sm:$0xff]  }
 0x116   :  { %2461 = vst [vmem:[%s3415_s3 + $0x8] sm:$0xff] %v2309_v49   ;;  %v1100_v54 = vadd.f32 %v3173_v6, %v1099_v51  ;;  %v1388_v55 = vpop.f32.mrf.mxu1  ;;  %v1628_v63 = vmax.f32 %v1386_v53, 0.0  ;;  %v2713_v51 = vld [vmem:[%s3413_s0 + $0x3e4] ss:$16 sps:$4 sm:$0xff]   ;;  %v2716_v53 = vld [vmem:[%s3413_s0 + $0x3ec] ss:$16 sps:$4 sm:$0xff]  }
 0x117   :  { %v1101_v58 = vpop.f32.mrf.mxu0 }
 0x118   :  { %v1389_v60 = vadd.f32 %v1388_v55, %v1100_v54  ;;  %v1390_v61 = vpop.f32.mrf.mxu1 }
 0x119   :  { %v1104_v62 = vpop.f32.mrf.mxu0  ;;  %1295 = vmatmul.mubr.bf16.gmra.mxu0 %v2691_v52 }
 0x11a   :  { %v1629_v0 = vmax.f32 %v1389_v60, 0.0  ;;  %v1105_v1 = vadd.f32 %v3173_v6, %v1104_v62  ;;  %v1393_v2 = vpop.f32.mrf.mxu1  ;;  %1584 = vmatmul.mubr.bf16.gmra.mxu1 %v2692_v56  ;;  %1302 = vmatprep.mubr.bf16.mxu0 %v2695_v57 }
 0x11b   :  { %v1106_v3 = vpop.f32.mrf.mxu0  ;;  %1591 = vmatprep.mubr.bf16.mxu1 %v2698_v59 }
 0x11c   :  { %v2314_v4 = vpack.c.bf16 %v1629_v0, %v1628_v63  ;;  %v1395_v5 = vpop.f32.mrf.mxu1  ;;  %v1394_v9 = vadd.f32 %v1393_v2, %v1105_v1  ;;  %v2711_v1 = vld [vmem:[%s3413_s0 + $0x3e0] ss:$16 sps:$4 sm:$0xff]  }
 0x11d   :  { %v1107_v7 = vpop.f32.mrf.mxu0  ;;  %v2714_v5 = vld [vmem:[%s3413_s0 + $0x3e8] ss:$16 sps:$4 sm:$0xff]  }
 0x11e   :  { %2462 = vst [vmem:[%s3415_s3 + $0x10] sm:$0xff] %v2314_v4   ;;  %v1108_v10 = vadd.f32 %v3173_v6, %v1107_v7  ;;  %v1396_v11 = vpop.f32.mrf.mxu1  ;;  %v1630_v19 = vmax.f32 %v1394_v9, 0.0 }
 0x11f   :  { %v1109_v14 = vpop.f32.mrf.mxu0 }
 0x120   :  { %v1397_v16 = vadd.f32 %v1396_v11, %v1108_v10  ;;  %v1398_v17 = vpop.f32.mrf.mxu1 }
 0x121   :  { %v1112_v18 = vpop.f32.mrf.mxu0  ;;  %1303 = vmatmul.mubr.bf16.gmra.mxu0 %v2693_v8 }
 0x122   :  { %v1631_v20 = vmax.f32 %v1397_v16, 0.0  ;;  %v1113_v21 = vadd.f32 %v3173_v6, %v1112_v18  ;;  %v1401_v22 = vpop.f32.mrf.mxu1  ;;  %1592 = vmatmul.mubr.bf16.gmra.mxu1 %v2696_v12  ;;  %1310 = vmatprep.mubr.bf16.mxu0 %v2701_v13 }
 0x123   :  { %v1114_v23 = vpop.f32.mrf.mxu0  ;;  %1599 = vmatprep.mubr.bf16.mxu1 %v2704_v15 }
 0x124   :  { %v2319_v24 = vpack.c.bf16 %v1631_v20, %v1630_v19  ;;  %v1403_v25 = vpop.f32.mrf.mxu1  ;;  %v1402_v28 = vadd.f32 %v1401_v22, %v1113_v21 }
 0x125   :  { %v1115_v26 = vpop.f32.mrf.mxu0 }
 0x126   :  { %2463 = vst [vmem:[%s3415_s3 + $0x18] sm:$0xff] %v2319_v24   ;;  %v1116_v29 = vadd.f32 %v3173_v6, %v1115_v26  ;;  %v1404_v30 = vpop.f32.mrf.mxu1  ;;  %v1632_v38 = vmax.f32 %v1402_v28, 0.0 }
 0x127   :  { %v1117_v33 = vpop.f32.mrf.mxu0 }
 0x128   :  { %v1405_v35 = vadd.f32 %v1404_v30, %v1116_v29  ;;  %v1406_v36 = vpop.f32.mrf.mxu1 }
 0x129   :  { %v1120_v37 = vpop.f32.mrf.mxu0  ;;  %1311 = vmatmul.mubr.bf16.gmra.mxu0 %v2699_v27 }
 0x12a   :  { %v1633_v39 = vmax.f32 %v1405_v35, 0.0  ;;  %v1121_v40 = vadd.f32 %v3173_v6, %v1120_v37  ;;  %v1409_v41 = vpop.f32.mrf.mxu1  ;;  %1600 = vmatmul.mubr.bf16.gmra.mxu1 %v2702_v31  ;;  %1318 = vmatprep.mubr.bf16.mxu0 %v2707_v32 }
 0x12b   :  { %v1122_v42 = vpop.f32.mrf.mxu0  ;;  %1607 = vmatprep.mubr.bf16.mxu1 %v2710_v34 }
 0x12c   :  { %v2324_v43 = vpack.c.bf16 %v1633_v39, %v1632_v38  ;;  %v1411_v44 = vpop.f32.mrf.mxu1  ;;  %v1410_v47 = vadd.f32 %v1409_v41, %v1121_v40 }
 0x12d   :  { %v1123_v45 = vpop.f32.mrf.mxu0 }
 0x12e   :  { %2464 = vst [vmem:[%s3415_s3 + $0x20] sm:$0xff] %v2324_v43   ;;  %v1124_v48 = vadd.f32 %v3173_v6, %v1123_v45  ;;  %v1412_v49 = vpop.f32.mrf.mxu1  ;;  %v1634_v57 = vmax.f32 %v1410_v47, 0.0 }
 0x12f   :  { %v1125_v52 = vpop.f32.mrf.mxu0 }
 0x130   :  { %v1413_v54 = vadd.f32 %v1412_v49, %v1124_v48  ;;  %v1414_v55 = vpop.f32.mrf.mxu1 }
 0x131   :  { %v1128_v56 = vpop.f32.mrf.mxu0  ;;  %1319 = vmatmul.mubr.bf16.gmra.mxu0 %v2705_v46 }
 0x132   :  { %v1635_v58 = vmax.f32 %v1413_v54, 0.0  ;;  %v1129_v59 = vadd.f32 %v3173_v6, %v1128_v56  ;;  %v1417_v60 = vpop.f32.mrf.mxu1  ;;  %1608 = vmatmul.mubr.bf16.gmra.mxu1 %v2708_v50  ;;  %1326 = vmatprep.mubr.bf16.mxu0 %v2713_v51 }
 0x133   :  { %v1130_v61 = vpop.f32.mrf.mxu0  ;;  %1615 = vmatprep.mubr.bf16.mxu1 %v2716_v53 }
 0x134   :  { %v2329_v62 = vpack.c.bf16 %v1635_v58, %v1634_v57  ;;  %v1419_v63 = vpop.f32.mrf.mxu1  ;;  %v1418_v2 = vadd.f32 %v1417_v60, %v1129_v59 }
 0x135   :  { %v1131_v0 = vpop.f32.mrf.mxu0 }
 0x136   :  { %2465 = vst [vmem:[%s3415_s3 + $0x28] sm:$0xff] %v2329_v62   ;;  %v1132_v3 = vadd.f32 %v3173_v6, %v1131_v0  ;;  %v1420_v4 = vpop.f32.mrf.mxu1  ;;  %v1636_v11 = vmax.f32 %v1418_v2, 0.0 }
 0x137   :  { %v1133_v7 = vpop.f32.mrf.mxu0 }
 0x138   :  { %v1421_v8 = vadd.f32 %v1420_v4, %v1132_v3  ;;  %v1422_v9 = vpop.f32.mrf.mxu1 }
 0x139   :  { %v1136_v10 = vpop.f32.mrf.mxu0  ;;  %1327 = vmatmul.mubr.bf16.gmra.mxu0 %v2711_v1 }
 0x13a   :  { %v1637_v12 = vmax.f32 %v1421_v8, 0.0  ;;  %v1137_v13 = vadd.f32 %v3173_v6, %v1136_v10  ;;  %v1425_v14 = vpop.f32.mrf.mxu1  ;;  %1616 = vmatmul.mubr.bf16.gmra.mxu1 %v2714_v5 }
 0x13b   :  { %v1138_v15 = vpop.f32.mrf.mxu0 }
 0x13c   :  { %v2334_v16 = vpack.c.bf16 %v1637_v12, %v1636_v11  ;;  %v1427_v17 = vpop.f32.mrf.mxu1  ;;  %v1426_v19 = vadd.f32 %v1425_v14, %v1137_v13 }
 0x13d   :  { %v1139_v18 = vpop.f32.mrf.mxu0 }
 0x13e   :  { %2466 = vst [vmem:[%s3415_s3 + $0x30] sm:$0xff] %v2334_v16   ;;  %v1140_v20 = vadd.f32 %v3173_v6, %v1139_v18  ;;  %v1428_v21 = vpop.f32.mrf.mxu1  ;;  %v1638_v26 = vmax.f32 %v1426_v19, 0.0 }
 0x13f   :  { %v1141_v22 = vpop.f32.mrf.mxu0 }
 0x140   :  { %v1429_v23 = vadd.f32 %v1428_v21, %v1140_v20  ;;  %v1430_v24 = vpop.f32.mrf.mxu1 }
 0x141   :  { %v1144_v25 = vpop.f32.mrf.mxu0 }
 0x142   :  { %v1639_v27 = vmax.f32 %v1429_v23, 0.0  ;;  %v1145_v28 = vadd.f32 %v3173_v6, %v1144_v25  ;;  %v1433_v29 = vpop.f32.mrf.mxu1 }
 0x143   :  { %v1146_v30 = vpop.f32.mrf.mxu0 }
 0x144   :  { %v2339_v31 = vpack.c.bf16 %v1639_v27, %v1638_v26  ;;  %v1435_v32 = vpop.f32.mrf.mxu1  ;;  %v1434_v34 = vadd.f32 %v1433_v29, %v1145_v28 }
 0x145   :  { %v1147_v33 = vpop.f32.mrf.mxu0 }
 0x146   :  { %2467 = vst [vmem:[%s3415_s3 + $0x38] sm:$0xff] %v2339_v31   ;;  %v1148_v35 = vadd.f32 %v3173_v6, %v1147_v33  ;;  %v1436_v36 = vpop.f32.mrf.mxu1  ;;  %v1640_v41 = vmax.f32 %v1434_v34, 0.0 }
 0x147   :  { %v1149_v37 = vpop.f32.mrf.mxu0 }
 0x148   :  { %v1437_v38 = vadd.f32 %v1436_v36, %v1148_v35  ;;  %v1438_v39 = vpop.f32.mrf.mxu1 }
 0x149   :  { %v1152_v40 = vpop.f32.mrf.mxu0 }
 0x14a   :  { %v1641_v42 = vmax.f32 %v1437_v38, 0.0  ;;  %v1153_v43 = vadd.f32 %v3173_v6, %v1152_v40  ;;  %v1441_v44 = vpop.f32.mrf.mxu1 }
 0x14b   :  { %v1154_v45 = vpop.f32.mrf.mxu0 }
 0x14c   :  { %v2344_v46 = vpack.c.bf16 %v1641_v42, %v1640_v41  ;;  %v1443_v47 = vpop.f32.mrf.mxu1  ;;  %v1442_v49 = vadd.f32 %v1441_v44, %v1153_v43 }
 0x14d   :  { %v1155_v48 = vpop.f32.mrf.mxu0 }
 0x14e   :  { %2468 = vst [vmem:[%s3415_s3 + $0x40] sm:$0xff] %v2344_v46   ;;  %v1156_v50 = vadd.f32 %v3173_v6, %v1155_v48  ;;  %v1444_v51 = vpop.f32.mrf.mxu1  ;;  %v1642_v56 = vmax.f32 %v1442_v49, 0.0 }
 0x14f   :  { %v1157_v52 = vpop.f32.mrf.mxu0 }
 0x150   :  { %v1445_v53 = vadd.f32 %v1444_v51, %v1156_v50  ;;  %v1446_v54 = vpop.f32.mrf.mxu1 }
 0x151   :  { %v1160_v55 = vpop.f32.mrf.mxu0 }
 0x152   :  { %v1643_v57 = vmax.f32 %v1445_v53, 0.0  ;;  %v1161_v58 = vadd.f32 %v3173_v6, %v1160_v55  ;;  %v1449_v59 = vpop.f32.mrf.mxu1 }
 0x153   :  { %v1162_v60 = vpop.f32.mrf.mxu0 }
 0x154   :  { %v2349_v61 = vpack.c.bf16 %v1643_v57, %v1642_v56  ;;  %v1451_v62 = vpop.f32.mrf.mxu1  ;;  %v1450_v0 = vadd.f32 %v1449_v59, %v1161_v58 }
 0x155   :  { %v1163_v63 = vpop.f32.mrf.mxu0 }
 0x156   :  { %2469 = vst [vmem:[%s3415_s3 + $0x48] sm:$0xff] %v2349_v61   ;;  %v1164_v1 = vadd.f32 %v3173_v6, %v1163_v63  ;;  %v1452_v2 = vpop.f32.mrf.mxu1  ;;  %v1644_v8 = vmax.f32 %v1450_v0, 0.0 }
 0x157   :  { %v1165_v3 = vpop.f32.mrf.mxu0 }
 0x158   :  { %v1453_v4 = vadd.f32 %v1452_v2, %v1164_v1  ;;  %v1454_v5 = vpop.f32.mrf.mxu1 }
 0x159   :  { %v1168_v7 = vpop.f32.mrf.mxu0 }
 0x15a   :  { %v1645_v9 = vmax.f32 %v1453_v4, 0.0  ;;  %v1169_v10 = vadd.f32 %v3173_v6, %v1168_v7  ;;  %v1457_v11 = vpop.f32.mrf.mxu1 }
 0x15b   :  { %v1170_v12 = vpop.f32.mrf.mxu0 }
 0x15c   :  { %v2354_v13 = vpack.c.bf16 %v1645_v9, %v1644_v8  ;;  %v1459_v14 = vpop.f32.mrf.mxu1  ;;  %v1458_v16 = vadd.f32 %v1457_v11, %v1169_v10 }
 0x15d   :  { %v1171_v15 = vpop.f32.mrf.mxu0 }
 0x15e   :  { %2470 = vst [vmem:[%s3415_s3 + $0x50] sm:$0xff] %v2354_v13   ;;  %v1172_v17 = vadd.f32 %v3173_v6, %v1171_v15  ;;  %v1460_v18 = vpop.f32.mrf.mxu1  ;;  %v1646_v23 = vmax.f32 %v1458_v16, 0.0 }
 0x15f   :  { %v1173_v19 = vpop.f32.mrf.mxu0 }
 0x160   :  { %v1461_v20 = vadd.f32 %v1460_v18, %v1172_v17  ;;  %v1462_v21 = vpop.f32.mrf.mxu1 }
 0x161   :  { %v1176_v22 = vpop.f32.mrf.mxu0 }
 0x162   :  { %v1647_v24 = vmax.f32 %v1461_v20, 0.0  ;;  %v1177_v25 = vadd.f32 %v3173_v6, %v1176_v22  ;;  %v1465_v26 = vpop.f32.mrf.mxu1 }
 0x163   :  { %v1178_v27 = vpop.f32.mrf.mxu0 }
 0x164   :  { %v2359_v28 = vpack.c.bf16 %v1647_v24, %v1646_v23  ;;  %v1467_v29 = vpop.f32.mrf.mxu1  ;;  %v1466_v31 = vadd.f32 %v1465_v26, %v1177_v25 }
 0x165   :  { %v1179_v30 = vpop.f32.mrf.mxu0 }
 0x166   :  { %2471 = vst [vmem:[%s3415_s3 + $0x58] sm:$0xff] %v2359_v28   ;;  %v1180_v32 = vadd.f32 %v3173_v6, %v1179_v30  ;;  %v1468_v33 = vpop.f32.mrf.mxu1  ;;  %v1648_v38 = vmax.f32 %v1466_v31, 0.0 }
 0x167   :  { %v1181_v34 = vpop.f32.mrf.mxu0 }
 0x168   :  { %v1469_v35 = vadd.f32 %v1468_v33, %v1180_v32  ;;  %v1470_v36 = vpop.f32.mrf.mxu1 }
 0x169   :  { %v1184_v37 = vpop.f32.mrf.mxu0 }
 0x16a   :  { %v1649_v39 = vmax.f32 %v1469_v35, 0.0  ;;  %v1185_v40 = vadd.f32 %v3173_v6, %v1184_v37  ;;  %v1473_v41 = vpop.f32.mrf.mxu1 }
 0x16b   :  { %v1186_v42 = vpop.f32.mrf.mxu0 }
 0x16c   :  { %v2364_v43 = vpack.c.bf16 %v1649_v39, %v1648_v38  ;;  %v1475_v44 = vpop.f32.mrf.mxu1  ;;  %v1474_v46 = vadd.f32 %v1473_v41, %v1185_v40 }
 0x16d   :  { %v1187_v45 = vpop.f32.mrf.mxu0 }
 0x16e   :  { %2472 = vst [vmem:[%s3415_s3 + $0x60] sm:$0xff] %v2364_v43   ;;  %v1188_v47 = vadd.f32 %v3173_v6, %v1187_v45  ;;  %v1476_v48 = vpop.f32.mrf.mxu1  ;;  %v1650_v53 = vmax.f32 %v1474_v46, 0.0 }
 0x16f   :  { %v1189_v49 = vpop.f32.mrf.mxu0 }
 0x170   :  { %v1477_v50 = vadd.f32 %v1476_v48, %v1188_v47  ;;  %v1478_v51 = vpop.f32.mrf.mxu1 }
 0x171   :  { %v1192_v52 = vpop.f32.mrf.mxu0 }
 0x172   :  { %v1651_v54 = vmax.f32 %v1477_v50, 0.0  ;;  %v1193_v55 = vadd.f32 %v3173_v6, %v1192_v52  ;;  %v1481_v56 = vpop.f32.mrf.mxu1 }
 0x173   :  { %v1194_v57 = vpop.f32.mrf.mxu0 }
 0x174   :  { %v2369_v58 = vpack.c.bf16 %v1651_v54, %v1650_v53  ;;  %v1483_v59 = vpop.f32.mrf.mxu1  ;;  %v1482_v61 = vadd.f32 %v1481_v56, %v1193_v55 }
 0x175   :  { %v1195_v60 = vpop.f32.mrf.mxu0 }
 0x176   :  { %2473 = vst [vmem:[%s3415_s3 + $0x68] sm:$0xff] %v2369_v58   ;;  %v1196_v62 = vadd.f32 %v3173_v6, %v1195_v60  ;;  %v1484_v63 = vpop.f32.mrf.mxu1  ;;  %v1652_v4 = vmax.f32 %v1482_v61, 0.0 }
 0x177   :  { %v1197_v0 = vpop.f32.mrf.mxu0 }
 0x178   :  { %v1485_v1 = vadd.f32 %v1484_v63, %v1196_v62  ;;  %v1486_v2 = vpop.f32.mrf.mxu1 }
 0x179   :  { %v1200_v3 = vpop.f32.mrf.mxu0 }
 0x17a   :  { %v1653_v5 = vmax.f32 %v1485_v1, 0.0  ;;  %v1201_v7 = vadd.f32 %v3173_v6, %v1200_v3  ;;  %v1489_v8 = vpop.f32.mrf.mxu1 }
 0x17b   :  { %v1202_v9 = vpop.f32.mrf.mxu0 }
 0x17c   :  { %v2374_v10 = vpack.c.bf16 %v1653_v5, %v1652_v4  ;;  %v1491_v11 = vpop.f32.mrf.mxu1  ;;  %v1490_v13 = vadd.f32 %v1489_v8, %v1201_v7 }
 0x17d   :  { %v1203_v12 = vpop.f32.mrf.mxu0 }
 0x17e   :  { %2474 = vst [vmem:[%s3415_s3 + $0x70] sm:$0xff] %v2374_v10   ;;  %v1204_v14 = vadd.f32 %v3173_v6, %v1203_v12  ;;  %v1492_v15 = vpop.f32.mrf.mxu1  ;;  %v1654_v20 = vmax.f32 %v1490_v13, 0.0 }
 0x17f   :  { %v1205_v16 = vpop.f32.mrf.mxu0 }
 0x180   :  { %v1493_v17 = vadd.f32 %v1492_v15, %v1204_v14  ;;  %v1494_v18 = vpop.f32.mrf.mxu1 }
 0x181   :  { %v1208_v19 = vpop.f32.mrf.mxu0 }
 0x182   :  { %v1655_v21 = vmax.f32 %v1493_v17, 0.0  ;;  %v1209_v22 = vadd.f32 %v3173_v6, %v1208_v19  ;;  %v1497_v23 = vpop.f32.mrf.mxu1 }
 0x183   :  { %v1210_v24 = vpop.f32.mrf.mxu0 }
 0x184   :  { %v2379_v25 = vpack.c.bf16 %v1655_v21, %v1654_v20  ;;  %v1499_v26 = vpop.f32.mrf.mxu1  ;;  %v1498_v28 = vadd.f32 %v1497_v23, %v1209_v22 }
 0x185   :  { %v1211_v27 = vpop.f32.mrf.mxu0 }
 0x186   :  { %2475 = vst [vmem:[%s3415_s3 + $0x78] sm:$0xff] %v2379_v25   ;;  %v1212_v29 = vadd.f32 %v3173_v6, %v1211_v27  ;;  %v1500_v30 = vpop.f32.mrf.mxu1  ;;  %v1656_v35 = vmax.f32 %v1498_v28, 0.0 }
 0x187   :  { %v1213_v31 = vpop.f32.mrf.mxu0 }
 0x188   :  { %v1501_v32 = vadd.f32 %v1500_v30, %v1212_v29  ;;  %v1502_v33 = vpop.f32.mrf.mxu1 }
 0x189   :  { %v1216_v34 = vpop.f32.mrf.mxu0 }
 0x18a   :  { %v1657_v36 = vmax.f32 %v1501_v32, 0.0  ;;  %v1217_v37 = vadd.f32 %v3173_v6, %v1216_v34  ;;  %v1505_v38 = vpop.f32.mrf.mxu1 }
 0x18b   :  { %v1218_v39 = vpop.f32.mrf.mxu0 }
 0x18c   :  { %v2384_v40 = vpack.c.bf16 %v1657_v36, %v1656_v35  ;;  %v1507_v41 = vpop.f32.mrf.mxu1  ;;  %v1506_v43 = vadd.f32 %v1505_v38, %v1217_v37 }
 0x18d   :  { %v1219_v42 = vpop.f32.mrf.mxu0 }
 0x18e   :  { %2476 = vst [vmem:[%s3415_s3 + $0x80] sm:$0xff] %v2384_v40   ;;  %v1220_v44 = vadd.f32 %v3173_v6, %v1219_v42  ;;  %v1508_v45 = vpop.f32.mrf.mxu1  ;;  %v1658_v50 = vmax.f32 %v1506_v43, 0.0 }
 0x18f   :  { %v1221_v46 = vpop.f32.mrf.mxu0 }
 0x190   :  { %v1509_v47 = vadd.f32 %v1508_v45, %v1220_v44  ;;  %v1510_v48 = vpop.f32.mrf.mxu1 }
 0x191   :  { %v1224_v49 = vpop.f32.mrf.mxu0 }
 0x192   :  { %v1659_v51 = vmax.f32 %v1509_v47, 0.0  ;;  %v1225_v52 = vadd.f32 %v3173_v6, %v1224_v49  ;;  %v1513_v53 = vpop.f32.mrf.mxu1 }
 0x193   :  { %v1226_v54 = vpop.f32.mrf.mxu0 }
 0x194   :  { %v2389_v55 = vpack.c.bf16 %v1659_v51, %v1658_v50  ;;  %v1515_v56 = vpop.f32.mrf.mxu1  ;;  %v1514_v58 = vadd.f32 %v1513_v53, %v1225_v52 }
 0x195   :  { %v1227_v57 = vpop.f32.mrf.mxu0 }
 0x196   :  { %2477 = vst [vmem:[%s3415_s3 + $0x88] sm:$0xff] %v2389_v55   ;;  %v1228_v59 = vadd.f32 %v3173_v6, %v1227_v57  ;;  %v1516_v60 = vpop.f32.mrf.mxu1  ;;  %v1660_v1 = vmax.f32 %v1514_v58, 0.0 }
 0x197   :  { %v1229_v61 = vpop.f32.mrf.mxu0 }
 0x198   :  { %v1517_v62 = vadd.f32 %v1516_v60, %v1228_v59  ;;  %v1518_v63 = vpop.f32.mrf.mxu1 }
 0x199   :  { %v1232_v0 = vpop.f32.mrf.mxu0 }
 0x19a   :  { %v1661_v2 = vmax.f32 %v1517_v62, 0.0  ;;  %v1233_v3 = vadd.f32 %v3173_v6, %v1232_v0  ;;  %v1521_v4 = vpop.f32.mrf.mxu1 }
 0x19b   :  { %v1234_v5 = vpop.f32.mrf.mxu0 }
 0x19c   :  { %v2394_v7 = vpack.c.bf16 %v1661_v2, %v1660_v1  ;;  %v1523_v8 = vpop.f32.mrf.mxu1  ;;  %v1522_v10 = vadd.f32 %v1521_v4, %v1233_v3 }
 0x19d   :  { %v1235_v9 = vpop.f32.mrf.mxu0 }
 0x19e   :  { %2478 = vst [vmem:[%s3415_s3 + $0x90] sm:$0xff] %v2394_v7   ;;  %v1236_v11 = vadd.f32 %v3173_v6, %v1235_v9  ;;  %v1524_v12 = vpop.f32.mrf.mxu1  ;;  %v1662_v17 = vmax.f32 %v1522_v10, 0.0 }
 0x19f   :  { %v1237_v13 = vpop.f32.mrf.mxu0 }
 0x1a0   :  { %v1525_v14 = vadd.f32 %v1524_v12, %v1236_v11  ;;  %v1526_v15 = vpop.f32.mrf.mxu1 }
 0x1a1   :  { %v1240_v16 = vpop.f32.mrf.mxu0 }
 0x1a2   :  { %v1663_v18 = vmax.f32 %v1525_v14, 0.0  ;;  %v1241_v19 = vadd.f32 %v3173_v6, %v1240_v16  ;;  %v1529_v20 = vpop.f32.mrf.mxu1 }
 0x1a3   :  { %v1242_v21 = vpop.f32.mrf.mxu0 }
 0x1a4   :  { %v2399_v22 = vpack.c.bf16 %v1663_v18, %v1662_v17  ;;  %v1531_v23 = vpop.f32.mrf.mxu1  ;;  %v1530_v25 = vadd.f32 %v1529_v20, %v1241_v19 }
 0x1a5   :  { %v1243_v24 = vpop.f32.mrf.mxu0 }
 0x1a6   :  { %2479 = vst [vmem:[%s3415_s3 + $0x98] sm:$0xff] %v2399_v22   ;;  %v1244_v26 = vadd.f32 %v3173_v6, %v1243_v24  ;;  %v1532_v27 = vpop.f32.mrf.mxu1  ;;  %v1664_v32 = vmax.f32 %v1530_v25, 0.0 }
 0x1a7   :  { %v1245_v28 = vpop.f32.mrf.mxu0 }
 0x1a8   :  { %v1533_v29 = vadd.f32 %v1532_v27, %v1244_v26  ;;  %v1534_v30 = vpop.f32.mrf.mxu1 }
 0x1a9   :  { %v1248_v31 = vpop.f32.mrf.mxu0 }
 0x1aa   :  { %v1665_v33 = vmax.f32 %v1533_v29, 0.0  ;;  %v1249_v34 = vadd.f32 %v3173_v6, %v1248_v31  ;;  %v1537_v35 = vpop.f32.mrf.mxu1 }
 0x1ab   :  { %v1250_v36 = vpop.f32.mrf.mxu0 }
 0x1ac   :  { %v2404_v37 = vpack.c.bf16 %v1665_v33, %v1664_v32  ;;  %v1539_v38 = vpop.f32.mrf.mxu1  ;;  %v1538_v40 = vadd.f32 %v1537_v35, %v1249_v34 }
 0x1ad   :  { %v1251_v39 = vpop.f32.mrf.mxu0 }
 0x1ae   :  { %2480 = vst [vmem:[%s3415_s3 + $0xa0] sm:$0xff] %v2404_v37   ;;  %v1252_v41 = vadd.f32 %v3173_v6, %v1251_v39  ;;  %v1540_v42 = vpop.f32.mrf.mxu1  ;;  %v1666_v47 = vmax.f32 %v1538_v40, 0.0 }
 0x1af   :  { %v1253_v43 = vpop.f32.mrf.mxu0 }
 0x1b0   :  { %v1541_v44 = vadd.f32 %v1540_v42, %v1252_v41  ;;  %v1542_v45 = vpop.f32.mrf.mxu1 }
 0x1b1   :  { %v1256_v46 = vpop.f32.mrf.mxu0 }
 0x1b2   :  { %v1667_v48 = vmax.f32 %v1541_v44, 0.0  ;;  %v1257_v49 = vadd.f32 %v3173_v6, %v1256_v46  ;;  %v1545_v50 = vpop.f32.mrf.mxu1 }
 0x1b3   :  { %v1258_v51 = vpop.f32.mrf.mxu0 }
 0x1b4   :  { %v2409_v52 = vpack.c.bf16 %v1667_v48, %v1666_v47  ;;  %v1547_v53 = vpop.f32.mrf.mxu1  ;;  %v1546_v55 = vadd.f32 %v1545_v50, %v1257_v49 }
 0x1b5   :  { %v1259_v54 = vpop.f32.mrf.mxu0 }
 0x1b6   :  { %2481 = vst [vmem:[%s3415_s3 + $0xa8] sm:$0xff] %v2409_v52   ;;  %v1260_v56 = vadd.f32 %v3173_v6, %v1259_v54  ;;  %v1548_v57 = vpop.f32.mrf.mxu1  ;;  %v1668_v62 = vmax.f32 %v1546_v55, 0.0 }
 0x1b7   :  { %v1261_v58 = vpop.f32.mrf.mxu0 }
 0x1b8   :  { %v1549_v59 = vadd.f32 %v1548_v57, %v1260_v56  ;;  %v1550_v60 = vpop.f32.mrf.mxu1 }
 0x1b9   :  { %v1264_v61 = vpop.f32.mrf.mxu0 }
 0x1ba   :  { %v1669_v63 = vmax.f32 %v1549_v59, 0.0  ;;  %v1265_v0 = vadd.f32 %v3173_v6, %v1264_v61  ;;  %v1553_v1 = vpop.f32.mrf.mxu1 }
 0x1bb   :  { %v1266_v2 = vpop.f32.mrf.mxu0 }
 0x1bc   :  { %v2414_v3 = vpack.c.bf16 %v1669_v63, %v1668_v62  ;;  %v1555_v4 = vpop.f32.mrf.mxu1  ;;  %v1554_v7 = vadd.f32 %v1553_v1, %v1265_v0 }
 0x1bd   :  { %v1267_v5 = vpop.f32.mrf.mxu0 }
 0x1be   :  { %2482 = vst [vmem:[%s3415_s3 + $0xb0] sm:$0xff] %v2414_v3   ;;  %v1268_v8 = vadd.f32 %v3173_v6, %v1267_v5  ;;  %v1556_v9 = vpop.f32.mrf.mxu1  ;;  %v1670_v14 = vmax.f32 %v1554_v7, 0.0 }
 0x1bf   :  { %v1269_v10 = vpop.f32.mrf.mxu0 }
 0x1c0   :  { %v1557_v11 = vadd.f32 %v1556_v9, %v1268_v8  ;;  %v1558_v12 = vpop.f32.mrf.mxu1 }
 0x1c1   :  { %v1272_v13 = vpop.f32.mrf.mxu0 }
 0x1c2   :  { %v1671_v15 = vmax.f32 %v1557_v11, 0.0  ;;  %v1273_v16 = vadd.f32 %v3173_v6, %v1272_v13  ;;  %v1561_v17 = vpop.f32.mrf.mxu1 }
 0x1c3   :  { %v1274_v18 = vpop.f32.mrf.mxu0 }
 0x1c4   :  { %v2419_v19 = vpack.c.bf16 %v1671_v15, %v1670_v14  ;;  %v1563_v20 = vpop.f32.mrf.mxu1  ;;  %v1562_v22 = vadd.f32 %v1561_v17, %v1273_v16 }
 0x1c5   :  { %v1275_v21 = vpop.f32.mrf.mxu0  ;;  %v2717_v20 = vld [vmem:[%s3414_s2] ss:$0 sm:$0xff] }
 0x1c6   :  { %2483 = vst [vmem:[%s3415_s3 + $0xb8] sm:$0xff] %v2419_v19   ;;  %v1276_v23 = vadd.f32 %v3173_v6, %v1275_v21  ;;  %v1564_v24 = vpop.f32.mrf.mxu1  ;;  %v1672_v29 = vmax.f32 %v1562_v22, 0.0 }
 0x1c7   :  { %v1277_v25 = vpop.f32.mrf.mxu0 }
 0x1c8   :  { %v1565_v26 = vadd.f32 %v1564_v24, %v1276_v23  ;;  %v1566_v27 = vpop.f32.mrf.mxu1 }
 0x1c9   :  { %v1280_v28 = vpop.f32.mrf.mxu0 }
 0x1ca   :  { %v1673_v30 = vmax.f32 %v1565_v26, 0.0  ;;  %v1281_v31 = vadd.f32 %v3173_v6, %v1280_v28  ;;  %v1569_v32 = vpop.f32.mrf.mxu1 }
 0x1cb   :  { %v1282_v33 = vpop.f32.mrf.mxu0 }
 0x1cc   :  { %v2424_v34 = vpack.c.bf16 %v1673_v30, %v1672_v29  ;;  %v1571_v35 = vpop.f32.mrf.mxu1  ;;  %v1570_v37 = vadd.f32 %v1569_v32, %v1281_v31 }
 0x1cd   :  { %v1283_v36 = vpop.f32.mrf.mxu0 }
 0x1ce   :  { %2484 = vst [vmem:[%s3415_s3 + $0xc0] sm:$0xff] %v2424_v34   ;;  %v1284_v38 = vadd.f32 %v3173_v6, %v1283_v36  ;;  %v1572_v39 = vpop.f32.mrf.mxu1  ;;  %v1674_v44 = vmax.f32 %v1570_v37, 0.0 }
 0x1cf   :  { %v1285_v40 = vpop.f32.mrf.mxu0 }
 0x1d0   :  { %v1573_v41 = vadd.f32 %v1572_v39, %v1284_v38  ;;  %v1574_v42 = vpop.f32.mrf.mxu1 }
 0x1d1   :  { %v1288_v43 = vpop.f32.mrf.mxu0 }
 0x1d2   :  { %v1675_v45 = vmax.f32 %v1573_v41, 0.0  ;;  %v1289_v46 = vadd.f32 %v3173_v6, %v1288_v43  ;;  %v1577_v47 = vpop.f32.mrf.mxu1 }
 0x1d3   :  { %v1290_v48 = vpop.f32.mrf.mxu0 }
 0x1d4   :  { %v2429_v49 = vpack.c.bf16 %v1675_v45, %v1674_v44  ;;  %v1579_v50 = vpop.f32.mrf.mxu1  ;;  %v1578_v52 = vadd.f32 %v1577_v47, %v1289_v46 }
 0x1d5   :  { %v1291_v51 = vpop.f32.mrf.mxu0 }
 0x1d6   :  { %2485 = vst [vmem:[%s3415_s3 + $0xc8] sm:$0xff] %v2429_v49   ;;  %v1292_v53 = vadd.f32 %v3173_v6, %v1291_v51  ;;  %v1580_v54 = vpop.f32.mrf.mxu1  ;;  %v1676_v59 = vmax.f32 %v1578_v52, 0.0 }
 0x1d7   :  { %v1293_v55 = vpop.f32.mrf.mxu0 }
 0x1d8   :  { %v1581_v56 = vadd.f32 %v1580_v54, %v1292_v53  ;;  %v1582_v57 = vpop.f32.mrf.mxu1 }
 0x1d9   :  { %v1296_v58 = vpop.f32.mrf.mxu0 }
 0x1da   :  { %v1677_v60 = vmax.f32 %v1581_v56, 0.0  ;;  %v1297_v61 = vadd.f32 %v3173_v6, %v1296_v58  ;;  %v1585_v62 = vpop.f32.mrf.mxu1 }
 0x1db   :  { %v1298_v63 = vpop.f32.mrf.mxu0 }
 0x1dc   :  { %v2434_v0 = vpack.c.bf16 %v1677_v60, %v1676_v59  ;;  %v1587_v1 = vpop.f32.mrf.mxu1  ;;  %v1586_v3 = vadd.f32 %v1585_v62, %v1297_v61 }
 0x1dd   :  { %v1299_v2 = vpop.f32.mrf.mxu0 }
 0x1de   :  { %2486 = vst [vmem:[%s3415_s3 + $0xd0] sm:$0xff] %v2434_v0   ;;  %v1300_v4 = vadd.f32 %v3173_v6, %v1299_v2  ;;  %v1588_v5 = vpop.f32.mrf.mxu1  ;;  %v1678_v11 = vmax.f32 %v1586_v3, 0.0 }
 0x1df   :  { %v1301_v7 = vpop.f32.mrf.mxu0 }
 0x1e0   :  { %v1589_v8 = vadd.f32 %v1588_v5, %v1300_v4  ;;  %v1590_v9 = vpop.f32.mrf.mxu1 }
 0x1e1   :  { %v1304_v10 = vpop.f32.mrf.mxu0 }
 0x1e2   :  { %v1679_v12 = vmax.f32 %v1589_v8, 0.0  ;;  %v1305_v13 = vadd.f32 %v3173_v6, %v1304_v10  ;;  %v1593_v14 = vpop.f32.mrf.mxu1 }
 0x1e3   :  { %v1306_v15 = vpop.f32.mrf.mxu0 }
 0x1e4   :  { %v2439_v16 = vpack.c.bf16 %v1679_v12, %v1678_v11  ;;  %v1595_v17 = vpop.f32.mrf.mxu1  ;;  %v1594_v19 = vadd.f32 %v1593_v14, %v1305_v13 }
 0x1e5   :  { %v1307_v18 = vpop.f32.mrf.mxu0 }
 0x1e6   :  { %2487 = vst [vmem:[%s3415_s3 + $0xd8] sm:$0xff] %v2439_v16   ;;  %v1308_v21 = vadd.f32 %v2717_v20, %v1307_v18  ;;  %v1596_v22 = vpop.f32.mrf.mxu1  ;;  %v1680_v26 = vmax.f32 %v1594_v19, 0.0 }
 0x1e7   :  { %v1309_v23 = vpop.f32.mrf.mxu0 }
 0x1e8   :  { %v1597_v24 = vadd.f32 %v1596_v22, %v1308_v21  ;;  %v1598_v25 = vpop.f32.mrf.mxu1 }
 0x1e9   :  { %v1312_v6 = vpop.f32.mrf.mxu0 }
 0x1ea   :  { %v1681_v27 = vmax.f32 %v1597_v24, 0.0  ;;  %v1313_v28 = vadd.f32 %v2717_v20, %v1312_v6  ;;  %v1601_v29 = vpop.f32.mrf.mxu1 }
 0x1eb   :  { %v1314_v30 = vpop.f32.mrf.mxu0 }
 0x1ec   :  { %v2444_v31 = vpack.c.bf16 %v1681_v27, %v1680_v26  ;;  %v1603_v32 = vpop.f32.mrf.mxu1  ;;  %v1602_v34 = vadd.f32 %v1601_v29, %v1313_v28 }
 0x1ed   :  { %v1315_v33 = vpop.f32.mrf.mxu0 }
 0x1ee   :  { %2488 = vst [vmem:[%s3415_s3 + $0xe0] sm:$0xff] %v2444_v31   ;;  %v1316_v35 = vadd.f32 %v2717_v20, %v1315_v33  ;;  %v1604_v36 = vpop.f32.mrf.mxu1  ;;  %v1682_v41 = vmax.f32 %v1602_v34, 0.0 }
 0x1ef   :  { %v1317_v37 = vpop.f32.mrf.mxu0 }
 0x1f0   :  { %v1605_v38 = vadd.f32 %v1604_v36, %v1316_v35  ;;  %v1606_v39 = vpop.f32.mrf.mxu1 }
 0x1f1   :  { %v1320_v40 = vpop.f32.mrf.mxu0 }
 0x1f2   :  { %v1683_v42 = vmax.f32 %v1605_v38, 0.0  ;;  %v1321_v43 = vadd.f32 %v2717_v20, %v1320_v40  ;;  %v1609_v44 = vpop.f32.mrf.mxu1 }
 0x1f3   :  { %v1322_v45 = vpop.f32.mrf.mxu0 }
 0x1f4   :  { %v2449_v46 = vpack.c.bf16 %v1683_v42, %v1682_v41  ;;  %v1611_v47 = vpop.f32.mrf.mxu1  ;;  %v1610_v49 = vadd.f32 %v1609_v44, %v1321_v43 }
 0x1f5   :  { %v1323_v48 = vpop.f32.mrf.mxu0 }
 0x1f6   :  { %2489 = vst [vmem:[%s3415_s3 + $0xe8] sm:$0xff] %v2449_v46   ;;  %v1324_v50 = vadd.f32 %v2717_v20, %v1323_v48  ;;  %v1612_v51 = vpop.f32.mrf.mxu1  ;;  %v1684_v56 = vmax.f32 %v1610_v49, 0.0 }
 0x1f7   :  { %v1325_v52 = vpop.f32.mrf.mxu0 }
 0x1f8   :  { %v1613_v53 = vadd.f32 %v1612_v51, %v1324_v50  ;;  %v1614_v54 = vpop.f32.mrf.mxu1 }
 0x1f9   :  { %v1328_v55 = vpop.f32.mrf.mxu0 }
 0x1fa   :  { %v1685_v57 = vmax.f32 %v1613_v53, 0.0  ;;  %v1329_v58 = vadd.f32 %v2717_v20, %v1328_v55  ;;  %v1617_v59 = vpop.f32.mrf.mxu1 }
 0x1fb   :  { %v1330_v60 = vpop.f32.mrf.mxu0 }
 0x1fc   :  { %v2454_v61 = vpack.c.bf16 %v1685_v57, %v1684_v56  ;;  %v1619_v62 = vpop.f32.mrf.mxu1  ;;  %v1618_v0 = vadd.f32 %v1617_v59, %v1329_v58 }
 0x1fd   :  { %v1331_v63 = vpop.f32.mrf.mxu0 }
 0x1fe   :  { %2490 = vst [vmem:[%s3415_s3 + $0xf0] sm:$0xff] %v2454_v61   ;;  %v1332_v1 = vadd.f32 %v2717_v20, %v1331_v63  ;;  %v1620_v2 = vpop.f32.mrf.mxu1  ;;  %v1686_v7 = vmax.f32 %v1618_v0, 0.0 }
 0x1ff   :  { %v1333_v3 = vpop.f32.mrf.mxu0 }
 0x200   :  { %v1621_v4 = vadd.f32 %v1620_v2, %v1332_v1  ;;  %v1622_v5 = vpop.f32.mrf.mxu1 }
 0x202   :  { %v1687_v8 = vmax.f32 %v1621_v4, 0.0 }
 0x204   :  { %v2459_v9 = vpack.c.bf16 %v1687_v8, %v1686_v7 }
 0x206   :  { %2491 = vst [vmem:[%s3415_s3 + $0xf8] sm:$0xff] %v2459_v9  }

// kernel: beta_vae_h_forward.11
= control target key start
LH: loop header
LB: loop body
LE: loop exit
PB: predicated region body
PF: predicated region fallthrough
CT: control target
= control target key end

     0   :  { %s1373_s1 = inlined_call_operand.vmem [shape: bf16[512,128], index: 1, kind: input, shape index: {}]   ;;  %s1374_s0 = inlined_call_operand.vmem [shape: bf16[128,512], index: 0, kind: input, shape index: {}]   ;;  %s1375_s2 = inlined_call_operand.vmem [shape: f32[1,128], index: 2, kind: input, shape index: {}]   ;;  %s1376_s3 = inlined_call_operand.vmem [shape: bf16[128,128], index: 3, kind: output, shape index: {}]  }
   0x1   :  { %v1036_v0 = vld [vmem:[%s1373_s1 + $0x78] sm:$0xff]   ;;  %v1040_v4 = vld [vmem:[%s1373_s1 + $0x70] sm:$0xff]   ;;  %v1044_v8 = vld [vmem:[%s1373_s1 + $0x68] sm:$0xff]  }
   0x2   :  { %v1037_v1 = vld [vmem:[%s1373_s1 + $0xf8] sm:$0xff]   ;;  %908 = vmatprep.subr.bf16.mxu0 %v1036_v0  ;;  %v1041_v5 = vld [vmem:[%s1373_s1 + $0xf0] sm:$0xff]   ;;  %v1045_v9 = vld [vmem:[%s1373_s1 + $0xe8] sm:$0xff]  }
   0x3   :  { %v1038_v2 = vld [vmem:[%s1373_s1 + $0x38] sm:$0xff]   ;;  %972 = vmatprep.subr.bf16.mxu1 %v1037_v1  ;;  %v1042_v6 = vld [vmem:[%s1373_s1 + $0x30] sm:$0xff]   ;;  %v1046_v10 = vld [vmem:[%s1373_s1 + $0x28] sm:$0xff]  }
   0x4   :  { %v1039_v3 = vld [vmem:[%s1373_s1 + $0xb8] sm:$0xff]   ;;  %909 = vmatpush3.bf16.msra.mxu0 %v1038_v2  ;;  %v1043_v7 = vld [vmem:[%s1373_s1 + $0xb0] sm:$0xff]   ;;  %v1047_v11 = vld [vmem:[%s1373_s1 + $0xa8] sm:$0xff]  }
   0x5   :  { %973 = vmatpush3.bf16.msra.mxu1 %v1039_v3  ;;  %910 = vmatprep.subr.bf16.mxu0 %v1040_v4  ;;  %v1048_v12 = vld [vmem:[%s1373_s1 + $0x60] sm:$0xff]   ;;  %v1052_v16 = vld [vmem:[%s1373_s1 + $0x58] sm:$0xff]   ;;  %v1056_v20 = vld [vmem:[%s1373_s1 + $0x50] sm:$0xff]  }
   0x6   :  { %974 = vmatprep.subr.bf16.mxu1 %v1041_v5  ;;  %v1049_v13 = vld [vmem:[%s1373_s1 + $0xe0] sm:$0xff]   ;;  %v1053_v17 = vld [vmem:[%s1373_s1 + $0xd8] sm:$0xff]   ;;  %v1057_v21 = vld [vmem:[%s1373_s1 + $0xd0] sm:$0xff]  }
   0x7   :  { %v1050_v14 = vld [vmem:[%s1373_s1 + $0x20] sm:$0xff]   ;;  %v1054_v18 = vld [vmem:[%s1373_s1 + $0x18] sm:$0xff]   ;;  %v1058_v22 = vld [vmem:[%s1373_s1 + $0x10] sm:$0xff]  }
   0x8   :  { %911 = vmatpush3.bf16.msra.mxu0 %v1042_v6  ;;  %v1051_v15 = vld [vmem:[%s1373_s1 + $0xa0] sm:$0xff]   ;;  %v1055_v19 = vld [vmem:[%s1373_s1 + $0x98] sm:$0xff]   ;;  %v1059_v23 = vld [vmem:[%s1373_s1 + $0x90] sm:$0xff]  }
   0x9   :  { %975 = vmatpush3.bf16.msra.mxu1 %v1043_v7  ;;  %912 = vmatprep.subr.bf16.mxu0 %v1044_v8  ;;  %v1060_v24 = vld [vmem:[%s1373_s1 + $0x48] sm:$0xff]   ;;  %v1064_v28 = vld [vmem:[%s1373_s1 + $0x40] sm:$0xff]  }
   0xa   :  { %976 = vmatprep.subr.bf16.mxu1 %v1045_v9  ;;  %v1061_v25 = vld [vmem:[%s1373_s1 + $0xc8] sm:$0xff]   ;;  %v1065_v29 = vld [vmem:[%s1373_s1 + $0xc0] sm:$0xff]  }
   0xb   :  { %v1062_v26 = vld [vmem:[%s1373_s1 + $0x8] sm:$0xff]   ;;  %v1066_v30 = vld [vmem:[%s1373_s1] sm:$0xff]  }
   0xc   :  { %913 = vmatpush3.bf16.msra.mxu0 %v1046_v10  ;;  %v1063_v27 = vld [vmem:[%s1373_s1 + $0x88] sm:$0xff]   ;;  %v1067_v31 = vld [vmem:[%s1373_s1 + $0x80] sm:$0xff]  }
   0xd   :  { %977 = vmatpush3.bf16.msra.mxu1 %v1047_v11  ;;  %914 = vmatprep.subr.bf16.mxu0 %v1048_v12  ;;  %v1068_v32 = vld [vmem:[%s1374_s0] ss:$16 sps:$4 sm:$0xff]   ;;  %v1070_v33 = vld [vmem:[%s1374_s0 + $0x4] ss:$16 sps:$4 sm:$0xff]   ;;  %v1071_v34 = vld [vmem:[%s1374_s0 + $0x8] ss:$16 sps:$4 sm:$0xff]  }
   0xe   :  { %978 = vmatprep.subr.bf16.mxu1 %v1049_v13  ;;  %v1073_v35 = vld [vmem:[%s1374_s0 + $0xc] ss:$16 sps:$4 sm:$0xff]   ;;  %502 = vmatprep.mubr.bf16.mxu0 %v1070_v33  ;;  %v1074_v36 = vld [vmem:[%s1374_s0 + $0x24] ss:$16 sps:$4 sm:$0xff]   ;;  %v1078_v38 = vld [vmem:[%s1374_s0 + $0x20] ss:$16 sps:$4 sm:$0xff]  }
   0xf   :  { %599 = vmatprep.mubr.bf16.mxu1 %v1073_v35  ;;  %v1076_v37 = vld [vmem:[%s1374_s0 + $0x2c] ss:$16 sps:$4 sm:$0xff]   ;;  %v1079_v39 = vld [vmem:[%s1374_s0 + $0x28] ss:$16 sps:$4 sm:$0xff]   ;;  %v1080_v40 = vld [vmem:[%s1374_s0 + $0x44] ss:$16 sps:$4 sm:$0xff]  }
  0x10   :  { %915 = vmatpush3.bf16.msra.mxu0 %v1050_v14  ;;  %v1082_v41 = vld [vmem:[%s1374_s0 + $0x4c] ss:$16 sps:$4 sm:$0xff]   ;;  %v1084_v42 = vld [vmem:[%s1374_s0 + $0x40] ss:$16 sps:$4 sm:$0xff]   ;;  %v1085_v43 = vld [vmem:[%s1374_s0 + $0x48] ss:$16 sps:$4 sm:$0xff]  }
  0x11   :  { %979 = vmatpush3.bf16.msra.mxu1 %v1051_v15  ;;  %916 = vmatprep.subr.bf16.mxu0 %v1052_v16  ;;  %v1086_v44 = vld [vmem:[%s1374_s0 + $0x64] ss:$16 sps:$4 sm:$0xff]   ;;  %v1088_v45 = vld [vmem:[%s1374_s0 + $0x6c] ss:$16 sps:$4 sm:$0xff]   ;;  %v1090_v46 = vld [vmem:[%s1374_s0 + $0x60] ss:$16 sps:$4 sm:$0xff]  }
  0x12   :  { %980 = vmatprep.subr.bf16.mxu1 %v1053_v17  ;;  %v1091_v47 = vld [vmem:[%s1374_s0 + $0x68] ss:$16 sps:$4 sm:$0xff]   ;;  %v1092_v48 = vld [vmem:[%s1374_s0 + $0x84] ss:$16 sps:$4 sm:$0xff]   ;;  %v1094_v49 = vld [vmem:[%s1374_s0 + $0x8c] ss:$16 sps:$4 sm:$0xff]  }
  0x13   :  { %v1096_v50 = vld [vmem:[%s1374_s0 + $0x80] ss:$16 sps:$4 sm:$0xff]   ;;  %v1097_v51 = vld [vmem:[%s1374_s0 + $0x88] ss:$16 sps:$4 sm:$0xff]   ;;  %v1098_v52 = vld [vmem:[%s1374_s0 + $0xa4] ss:$16 sps:$4 sm:$0xff]  }
  0x14   :  { %917 = vmatpush3.bf16.msra.mxu0 %v1054_v18  ;;  %v1100_v53 = vld [vmem:[%s1374_s0 + $0xac] ss:$16 sps:$4 sm:$0xff]   ;;  %v1102_v54 = vld [vmem:[%s1374_s0 + $0xa0] ss:$16 sps:$4 sm:$0xff]   ;;  %v1103_v55 = vld [vmem:[%s1374_s0 + $0xa8] ss:$16 sps:$4 sm:$0xff]  }
  0x15   :  { %981 = vmatpush3.bf16.msra.mxu1 %v1055_v19  ;;  %918 = vmatprep.subr.bf16.mxu0 %v1056_v20  ;;  %v1104_v56 = vld [vmem:[%s1374_s0 + $0xc4] ss:$16 sps:$4 sm:$0xff]   ;;  %v1106_v57 = vld [vmem:[%s1374_s0 + $0xcc] ss:$16 sps:$4 sm:$0xff]   ;;  %v1108_v58 = vld [vmem:[%s1374_s0 + $0xc0] ss:$16 sps:$4 sm:$0xff]  }
  0x16   :  { %982 = vmatprep.subr.bf16.mxu1 %v1057_v21  ;;  %v1109_v59 = vld [vmem:[%s1374_s0 + $0xc8] ss:$16 sps:$4 sm:$0xff]   ;;  %v1110_v60 = vld [vmem:[%s1374_s0 + $0xe4] ss:$16 sps:$4 sm:$0xff]   ;;  %v1112_v61 = vld [vmem:[%s1374_s0 + $0xec] ss:$16 sps:$4 sm:$0xff]  }
  0x17   :  { %v1114_v62 = vld [vmem:[%s1374_s0 + $0xe0] ss:$16 sps:$4 sm:$0xff]   ;;  %v1115_v63 = vld [vmem:[%s1374_s0 + $0xe8] ss:$16 sps:$4 sm:$0xff]  }
  0x18   :  { %919 = vmatpush3.bf16.msra.mxu0 %v1058_v22  ;;  %v1331_v2 = vld [vmem:[%s1375_s2] ss:$0 sm:$0xff] }
  0x19   :  { %983 = vmatpush3.bf16.msra.mxu1 %v1059_v23  ;;  %920 = vmatprep.subr.bf16.mxu0 %v1060_v24 }
  0x1a   :  { %984 = vmatprep.subr.bf16.mxu1 %v1061_v25 }
  0x1c   :  { %921 = vmatpush3.bf16.msra.mxu0 %v1062_v26 }
  0x1d   :  { %985 = vmatpush3.bf16.msra.mxu1 %v1063_v27  ;;  %922 = vmatprep.subr.bf16.mxu0 %v1064_v28 }
  0x1e   :  { %986 = vmatprep.subr.bf16.mxu1 %v1065_v29 }
  0x20   :  { %923 = vmatpush3.bf16.msra.mxu0 %v1066_v30 }
  0x21   :  { %987 = vmatpush3.bf16.msra.mxu1 %v1067_v31 }
  0x23   :  { %503 = vmatmul.mubr.bf16.vlgmr.msra.gmra.mxu0 %v1068_v32 }
  0x24   :  { %600 = vmatmul.mubr.bf16.vlgmr.msra.gmra.mxu1 %v1071_v34  ;;  %510 = vmatprep.mubr.bf16.mxu0 %v1074_v36 }
  0x25   :  { %607 = vmatprep.mubr.bf16.mxu1 %v1076_v37 }
  0x2b   :  { %511 = vmatmul.mubr.bf16.gmra.mxu0 %v1078_v38 }
  0x2c   :  { %608 = vmatmul.mubr.bf16.gmra.mxu1 %v1079_v39  ;;  %518 = vmatprep.mubr.bf16.mxu0 %v1080_v40 }
  0x2d   :  { %615 = vmatprep.mubr.bf16.mxu1 %v1082_v41 }
  0x33   :  { %519 = vmatmul.mubr.bf16.gmra.mxu0 %v1084_v42 }
  0x34   :  { %616 = vmatmul.mubr.bf16.gmra.mxu1 %v1085_v43  ;;  %526 = vmatprep.mubr.bf16.mxu0 %v1086_v44 }
  0x35   :  { %623 = vmatprep.mubr.bf16.mxu1 %v1088_v45 }
  0x3b   :  { %527 = vmatmul.mubr.bf16.gmra.mxu0 %v1090_v46 }
  0x3c   :  { %624 = vmatmul.mubr.bf16.gmra.mxu1 %v1091_v47  ;;  %534 = vmatprep.mubr.bf16.mxu0 %v1092_v48 }
  0x3d   :  { %631 = vmatprep.mubr.bf16.mxu1 %v1094_v49 }
  0x43   :  { %535 = vmatmul.mubr.bf16.gmra.mxu0 %v1096_v50 }
  0x44   :  { %632 = vmatmul.mubr.bf16.gmra.mxu1 %v1097_v51  ;;  %542 = vmatprep.mubr.bf16.mxu0 %v1098_v52 }
  0x45   :  { %639 = vmatprep.mubr.bf16.mxu1 %v1100_v53 }
  0x4b   :  { %543 = vmatmul.mubr.bf16.gmra.mxu0 %v1102_v54 }
  0x4c   :  { %640 = vmatmul.mubr.bf16.gmra.mxu1 %v1103_v55  ;;  %550 = vmatprep.mubr.bf16.mxu0 %v1104_v56 }
  0x4d   :  { %647 = vmatprep.mubr.bf16.mxu1 %v1106_v57 }
  0x53   :  { %551 = vmatmul.mubr.bf16.gmra.mxu0 %v1108_v58 }
  0x54   :  { %648 = vmatmul.mubr.bf16.gmra.mxu1 %v1109_v59  ;;  %558 = vmatprep.mubr.bf16.mxu0 %v1110_v60 }
  0x55   :  { %655 = vmatprep.mubr.bf16.mxu1 %v1112_v61 }
  0x5b   :  { %559 = vmatmul.mubr.bf16.gmra.mxu0 %v1114_v62 }
  0x5c   :  { %656 = vmatmul.mubr.bf16.gmra.mxu1 %v1115_v63 }
  0xe3   :  { %v924_v0 = vpop.f32.mrf.mxu0 }
  0xe4   :  { %v988_v1 = vpop.f32.mrf.mxu1 }
  0xe5   :  { %v925_v3 = vpop.f32.mrf.mxu0 }
  0xe6   :  { %v926_v4 = vadd.f32 %v925_v3, %v924_v0  ;;  %v989_v5 = vpop.f32.mrf.mxu1 }
  0xe7   :  { %v927_v6 = vpop.f32.mrf.mxu0  ;;  %v990_v10 = vadd.f32 %v989_v5, %v988_v1 }
  0xe8   :  { %v505_v7 = vadd.f32 %v926_v4, %v1331_v2  ;;  %v991_v8 = vpop.f32.mrf.mxu1 }
  0xe9   :  { %v928_v9 = vpop.f32.mrf.mxu0 }
  0xea   :  { %v929_v11 = vadd.f32 %v928_v9, %v927_v6  ;;  %v992_v12 = vpop.f32.mrf.mxu1  ;;  %v602_v14 = vadd.f32 %v990_v10, %v505_v7 }
  0xeb   :  { %v930_v13 = vpop.f32.mrf.mxu0  ;;  %v993_v16 = vadd.f32 %v992_v12, %v991_v8 }
  0xec   :  { %v508_v15 = vadd.f32 %v929_v11, %v1331_v2  ;;  %v994_v17 = vpop.f32.mrf.mxu1  ;;  %v664_v23 = vmax.f32 %v602_v14, 0.0 }
  0xed   :  { %v931_v18 = vpop.f32.mrf.mxu0 }
  0xee   :  { %v605_v19 = vadd.f32 %v993_v16, %v508_v15  ;;  %v932_v20 = vadd.f32 %v931_v18, %v930_v13  ;;  %v995_v21 = vpop.f32.mrf.mxu1 }
  0xef   :  { %v933_v22 = vpop.f32.mrf.mxu0  ;;  %v996_v29 = vadd.f32 %v995_v21, %v994_v17 }
  0xf0   :  { %v665_v24 = vmax.f32 %v605_v19, 0.0  ;;  %v513_v25 = vadd.f32 %v932_v20, %v1331_v2  ;;  %v997_v26 = vpop.f32.mrf.mxu1 }
  0xf1   :  { %v934_v27 = vpop.f32.mrf.mxu0 }
  0xf2   :  { %v864_v28 = vpack.c.bf16 %v665_v24, %v664_v23  ;;  %v935_v30 = vadd.f32 %v934_v27, %v933_v22  ;;  %v998_v31 = vpop.f32.mrf.mxu1  ;;  %v610_v33 = vadd.f32 %v996_v29, %v513_v25 }
  0xf3   :  { %v936_v32 = vpop.f32.mrf.mxu0  ;;  %v999_v35 = vadd.f32 %v998_v31, %v997_v26 }
  0xf4   :  { %865 = vst [vmem:[%s1376_s3] sm:$0xff] %v864_v28   ;;  %v516_v34 = vadd.f32 %v935_v30, %v1331_v2  ;;  %v1000_v36 = vpop.f32.mrf.mxu1  ;;  %v666_v42 = vmax.f32 %v610_v33, 0.0 }
  0xf5   :  { %v937_v37 = vpop.f32.mrf.mxu0 }
  0xf6   :  { %v613_v38 = vadd.f32 %v999_v35, %v516_v34  ;;  %v938_v39 = vadd.f32 %v937_v37, %v936_v32  ;;  %v1001_v40 = vpop.f32.mrf.mxu1 }
  0xf7   :  { %v939_v41 = vpop.f32.mrf.mxu0  ;;  %v1002_v48 = vadd.f32 %v1001_v40, %v1000_v36 }
  0xf8   :  { %v667_v43 = vmax.f32 %v613_v38, 0.0  ;;  %v521_v44 = vadd.f32 %v938_v39, %v1331_v2  ;;  %v1003_v45 = vpop.f32.mrf.mxu1 }
  0xf9   :  { %v940_v46 = vpop.f32.mrf.mxu0 }
  0xfa   :  { %v869_v47 = vpack.c.bf16 %v667_v43, %v666_v42  ;;  %v941_v49 = vadd.f32 %v940_v46, %v939_v41  ;;  %v1004_v50 = vpop.f32.mrf.mxu1  ;;  %v618_v52 = vadd.f32 %v1002_v48, %v521_v44 }
  0xfb   :  { %v942_v51 = vpop.f32.mrf.mxu0  ;;  %v1005_v54 = vadd.f32 %v1004_v50, %v1003_v45 }
  0xfc   :  { %901 = vst [vmem:[%s1376_s3 + $0x8] sm:$0xff] %v869_v47   ;;  %v524_v53 = vadd.f32 %v941_v49, %v1331_v2  ;;  %v1006_v55 = vpop.f32.mrf.mxu1  ;;  %v668_v61 = vmax.f32 %v618_v52, 0.0 }
  0xfd   :  { %v943_v56 = vpop.f32.mrf.mxu0 }
  0xfe   :  { %v621_v57 = vadd.f32 %v1005_v54, %v524_v53  ;;  %v944_v58 = vadd.f32 %v943_v56, %v942_v51  ;;  %v1007_v59 = vpop.f32.mrf.mxu1 }
  0xff   :  { %v945_v60 = vpop.f32.mrf.mxu0  ;;  %v1008_v4 = vadd.f32 %v1007_v59, %v1006_v55 }
 0x100   :  { %v669_v62 = vmax.f32 %v621_v57, 0.0  ;;  %v529_v63 = vadd.f32 %v944_v58, %v1331_v2  ;;  %v1009_v0 = vpop.f32.mrf.mxu1 }
 0x101   :  { %v946_v1 = vpop.f32.mrf.mxu0 }
 0x102   :  { %v874_v3 = vpack.c.bf16 %v669_v62, %v668_v61  ;;  %v947_v5 = vadd.f32 %v946_v1, %v945_v60  ;;  %v1010_v6 = vpop.f32.mrf.mxu1  ;;  %v626_v8 = vadd.f32 %v1008_v4, %v529_v63 }
 0x103   :  { %v948_v7 = vpop.f32.mrf.mxu0  ;;  %v1011_v10 = vadd.f32 %v1010_v6, %v1009_v0 }
 0x104   :  { %902 = vst [vmem:[%s1376_s3 + $0x10] sm:$0xff] %v874_v3   ;;  %v532_v9 = vadd.f32 %v947_v5, %v1331_v2  ;;  %v1012_v11 = vpop.f32.mrf.mxu1  ;;  %v670_v17 = vmax.f32 %v626_v8, 0.0 }
 0x105   :  { %v949_v12 = vpop.f32.mrf.mxu0 }
 0x106   :  { %v629_v13 = vadd.f32 %v1011_v10, %v532_v9  ;;  %v950_v14 = vadd.f32 %v949_v12, %v948_v7  ;;  %v1013_v15 = vpop.f32.mrf.mxu1 }
 0x107   :  { %v951_v16 = vpop.f32.mrf.mxu0  ;;  %v1014_v23 = vadd.f32 %v1013_v15, %v1012_v11 }
 0x108   :  { %v671_v18 = vmax.f32 %v629_v13, 0.0  ;;  %v537_v19 = vadd.f32 %v950_v14, %v1331_v2  ;;  %v1015_v20 = vpop.f32.mrf.mxu1 }
 0x109   :  { %v952_v21 = vpop.f32.mrf.mxu0 }
 0x10a   :  { %v879_v22 = vpack.c.bf16 %v671_v18, %v670_v17  ;;  %v953_v24 = vadd.f32 %v952_v21, %v951_v16  ;;  %v1016_v25 = vpop.f32.mrf.mxu1  ;;  %v634_v27 = vadd.f32 %v1014_v23, %v537_v19 }
 0x10b   :  { %v954_v26 = vpop.f32.mrf.mxu0  ;;  %v1017_v29 = vadd.f32 %v1016_v25, %v1015_v20 }
 0x10c   :  { %903 = vst [vmem:[%s1376_s3 + $0x18] sm:$0xff] %v879_v22   ;;  %v540_v28 = vadd.f32 %v953_v24, %v1331_v2  ;;  %v1018_v30 = vpop.f32.mrf.mxu1  ;;  %v672_v36 = vmax.f32 %v634_v27, 0.0 }
 0x10d   :  { %v955_v31 = vpop.f32.mrf.mxu0 }
 0x10e   :  { %v637_v32 = vadd.f32 %v1017_v29, %v540_v28  ;;  %v956_v33 = vadd.f32 %v955_v31, %v954_v26  ;;  %v1019_v34 = vpop.f32.mrf.mxu1 }
 0x10f   :  { %v957_v35 = vpop.f32.mrf.mxu0  ;;  %v1020_v42 = vadd.f32 %v1019_v34, %v1018_v30 }
 0x110   :  { %v673_v37 = vmax.f32 %v637_v32, 0.0  ;;  %v545_v38 = vadd.f32 %v956_v33, %v1331_v2  ;;  %v1021_v39 = vpop.f32.mrf.mxu1 }
 0x111   :  { %v958_v40 = vpop.f32.mrf.mxu0 }
 0x112   :  { %v884_v41 = vpack.c.bf16 %v673_v37, %v672_v36  ;;  %v959_v43 = vadd.f32 %v958_v40, %v957_v35  ;;  %v1022_v44 = vpop.f32.mrf.mxu1  ;;  %v642_v46 = vadd.f32 %v1020_v42, %v545_v38 }
 0x113   :  { %v960_v45 = vpop.f32.mrf.mxu0  ;;  %v1023_v48 = vadd.f32 %v1022_v44, %v1021_v39 }
 0x114   :  { %904 = vst [vmem:[%s1376_s3 + $0x20] sm:$0xff] %v884_v41   ;;  %v548_v47 = vadd.f32 %v959_v43, %v1331_v2  ;;  %v1024_v49 = vpop.f32.mrf.mxu1  ;;  %v674_v55 = vmax.f32 %v642_v46, 0.0 }
 0x115   :  { %v961_v50 = vpop.f32.mrf.mxu0 }
 0x116   :  { %v645_v51 = vadd.f32 %v1023_v48, %v548_v47  ;;  %v962_v52 = vadd.f32 %v961_v50, %v960_v45  ;;  %v1025_v53 = vpop.f32.mrf.mxu1 }
 0x117   :  { %v963_v54 = vpop.f32.mrf.mxu0  ;;  %v1026_v61 = vadd.f32 %v1025_v53, %v1024_v49 }
 0x118   :  { %v675_v56 = vmax.f32 %v645_v51, 0.0  ;;  %v553_v57 = vadd.f32 %v962_v52, %v1331_v2  ;;  %v1027_v58 = vpop.f32.mrf.mxu1 }
 0x119   :  { %v964_v59 = vpop.f32.mrf.mxu0 }
 0x11a   :  { %v889_v60 = vpack.c.bf16 %v675_v56, %v674_v55  ;;  %v965_v62 = vadd.f32 %v964_v59, %v963_v54  ;;  %v1028_v63 = vpop.f32.mrf.mxu1  ;;  %v650_v1 = vadd.f32 %v1026_v61, %v553_v57 }
 0x11b   :  { %v966_v0 = vpop.f32.mrf.mxu0  ;;  %v1029_v4 = vadd.f32 %v1028_v63, %v1027_v58 }
 0x11c   :  { %905 = vst [vmem:[%s1376_s3 + $0x28] sm:$0xff] %v889_v60   ;;  %v556_v3 = vadd.f32 %v965_v62, %v1331_v2  ;;  %v1030_v5 = vpop.f32.mrf.mxu1  ;;  %v676_v11 = vmax.f32 %v650_v1, 0.0 }
 0x11d   :  { %v967_v6 = vpop.f32.mrf.mxu0 }
 0x11e   :  { %v653_v7 = vadd.f32 %v1029_v4, %v556_v3  ;;  %v968_v8 = vadd.f32 %v967_v6, %v966_v0  ;;  %v1031_v9 = vpop.f32.mrf.mxu1 }
 0x11f   :  { %v969_v10 = vpop.f32.mrf.mxu0  ;;  %v1032_v17 = vadd.f32 %v1031_v9, %v1030_v5 }
 0x120   :  { %v677_v12 = vmax.f32 %v653_v7, 0.0  ;;  %v561_v13 = vadd.f32 %v968_v8, %v1331_v2  ;;  %v1033_v14 = vpop.f32.mrf.mxu1 }
 0x121   :  { %v970_v15 = vpop.f32.mrf.mxu0 }
 0x122   :  { %v894_v16 = vpack.c.bf16 %v677_v12, %v676_v11  ;;  %v971_v18 = vadd.f32 %v970_v15, %v969_v10  ;;  %v1034_v19 = vpop.f32.mrf.mxu1  ;;  %v658_v20 = vadd.f32 %v1032_v17, %v561_v13 }
 0x123   :  { %v1035_v22 = vadd.f32 %v1034_v19, %v1033_v14 }
 0x124   :  { %906 = vst [vmem:[%s1376_s3 + $0x30] sm:$0xff] %v894_v16   ;;  %v564_v21 = vadd.f32 %v971_v18, %v1331_v2  ;;  %v678_v24 = vmax.f32 %v658_v20, 0.0 }
 0x126   :  { %v661_v23 = vadd.f32 %v1035_v22, %v564_v21 }
 0x128   :  { %v679_v25 = vmax.f32 %v661_v23, 0.0 }
 0x12a   :  { %v899_v26 = vpack.c.bf16 %v679_v25, %v678_v24 }
 0x12c   :  { %907 = vst [vmem:[%s1376_s3 + $0x38] sm:$0xff] %v899_v26  }

// kernel: beta_vae_h_forward.12
= control target key start
LH: loop header
LB: loop body
LE: loop exit
PB: predicated region body
PF: predicated region fallthrough
CT: control target
= control target key end

     0   :  { %s1399_s1 = inlined_call_operand.vmem [shape: bf16[1024,128], index: 1, kind: input, shape index: {}]   ;;  %s1400_s0 = inlined_call_operand.vmem [shape: bf16[32,1024], index: 0, kind: input, shape index: {}]   ;;  %s1401_s2 = inlined_call_operand.vmem [shape: f32[1,128], index: 2, kind: input, shape index: {}]   ;;  %s1402_s3 = inlined_call_operand.vmem [shape: bf16[32,128], index: 3, kind: output, shape index: {}]  }
   0x1   :  { %v1066_v0 = vld [vmem:[%s1399_s1 + $0x78] sm:$0xff]   ;;  %v1070_v4 = vld [vmem:[%s1399_s1 + $0x70] sm:$0xff]   ;;  %v1074_v8 = vld [vmem:[%s1399_s1 + $0x68] sm:$0xff]  }
   0x2   :  { %v1067_v1 = vld [vmem:[%s1399_s1 + $0xf8] sm:$0xff]   ;;  %954 = vmatprep.subr.bf16.mxu0 %v1066_v0  ;;  %v1071_v5 = vld [vmem:[%s1399_s1 + $0xf0] sm:$0xff]   ;;  %v1075_v9 = vld [vmem:[%s1399_s1 + $0xe8] sm:$0xff]  }
   0x3   :  { %v1068_v2 = vld [vmem:[%s1399_s1 + $0x38] sm:$0xff]   ;;  %982 = vmatprep.subr.bf16.mxu1 %v1067_v1  ;;  %v1072_v6 = vld [vmem:[%s1399_s1 + $0x30] sm:$0xff]   ;;  %v1076_v10 = vld [vmem:[%s1399_s1 + $0x28] sm:$0xff]  }
   0x4   :  { %v1069_v3 = vld [vmem:[%s1399_s1 + $0xb8] sm:$0xff]   ;;  %955 = vmatpush3.bf16.msra.mxu0 %v1068_v2  ;;  %v1073_v7 = vld [vmem:[%s1399_s1 + $0xb0] sm:$0xff]   ;;  %v1077_v11 = vld [vmem:[%s1399_s1 + $0xa8] sm:$0xff]  }
   0x5   :  { %983 = vmatpush3.bf16.msra.mxu1 %v1069_v3  ;;  %956 = vmatprep.subr.bf16.mxu0 %v1070_v4  ;;  %v1078_v12 = vld [vmem:[%s1399_s1 + $0x60] sm:$0xff]   ;;  %v1082_v16 = vld [vmem:[%s1399_s1 + $0x58] sm:$0xff]   ;;  %v1086_v20 = vld [vmem:[%s1399_s1 + $0x50] sm:$0xff]  }
   0x6   :  { %984 = vmatprep.subr.bf16.mxu1 %v1071_v5  ;;  %v1079_v13 = vld [vmem:[%s1399_s1 + $0xe0] sm:$0xff]   ;;  %v1083_v17 = vld [vmem:[%s1399_s1 + $0xd8] sm:$0xff]   ;;  %v1087_v21 = vld [vmem:[%s1399_s1 + $0xd0] sm:$0xff]  }
   0x7   :  { %v1080_v14 = vld [vmem:[%s1399_s1 + $0x20] sm:$0xff]   ;;  %v1084_v18 = vld [vmem:[%s1399_s1 + $0x18] sm:$0xff]   ;;  %v1088_v22 = vld [vmem:[%s1399_s1 + $0x10] sm:$0xff]  }
   0x8   :  { %957 = vmatpush3.bf16.msra.mxu0 %v1072_v6  ;;  %v1081_v15 = vld [vmem:[%s1399_s1 + $0xa0] sm:$0xff]   ;;  %v1085_v19 = vld [vmem:[%s1399_s1 + $0x98] sm:$0xff]   ;;  %v1089_v23 = vld [vmem:[%s1399_s1 + $0x90] sm:$0xff]  }
   0x9   :  { %985 = vmatpush3.bf16.msra.mxu1 %v1073_v7  ;;  %958 = vmatprep.subr.bf16.mxu0 %v1074_v8  ;;  %v1090_v24 = vld [vmem:[%s1399_s1 + $0x48] sm:$0xff]   ;;  %v1094_v28 = vld [vmem:[%s1399_s1 + $0x40] sm:$0xff]   ;;  %v1098_v40 = vld [vmem:[%s1399_s1 + $0x178] sm:$0xff]  }
   0xa   :  { %986 = vmatprep.subr.bf16.mxu1 %v1075_v9  ;;  %v1091_v25 = vld [vmem:[%s1399_s1 + $0xc8] sm:$0xff]   ;;  %v1095_v29 = vld [vmem:[%s1399_s1 + $0xc0] sm:$0xff]   ;;  %v1099_v41 = vld [vmem:[%s1399_s1 + $0x1f8] sm:$0xff]  }
   0xb   :  { %v1092_v26 = vld [vmem:[%s1399_s1 + $0x8] sm:$0xff]   ;;  %v1096_v30 = vld [vmem:[%s1399_s1] sm:$0xff]   ;;  %v1100_v42 = vld [vmem:[%s1399_s1 + $0x138] sm:$0xff]  }
   0xc   :  { %959 = vmatpush3.bf16.msra.mxu0 %v1076_v10  ;;  %v1093_v27 = vld [vmem:[%s1399_s1 + $0x88] sm:$0xff]   ;;  %v1097_v31 = vld [vmem:[%s1399_s1 + $0x80] sm:$0xff]   ;;  %v1101_v43 = vld [vmem:[%s1399_s1 + $0x1b8] sm:$0xff]  }
   0xd   :  { %987 = vmatpush3.bf16.msra.mxu1 %v1077_v11  ;;  %960 = vmatprep.subr.bf16.mxu0 %v1078_v12  ;;  %v15_v32 = vld [vmem:[%s1400_s0] sm:$0xff]  ;;  %v16_v34 = vld [vmem:[%s1400_s0 + $0x8] sm:$0xff]  ;;  %v1102_v44 = vld [vmem:[%s1399_s1 + $0x170] sm:$0xff]  }
   0xe   :  { %988 = vmatprep.subr.bf16.mxu1 %v1079_v13  ;;  %v19_v33 = vld [vmem:[%s1400_s0 + $0x20] sm:$0xff]  ;;  %v20_v37 = vld [vmem:[%s1400_s0 + $0x28] sm:$0xff]  ;;  %v1103_v45 = vld [vmem:[%s1399_s1 + $0x1f0] sm:$0xff]  }
   0xf   :  { %v855_v35 = vcombine.low %v15_v32, %v19_v33  ;;  %v856_v36 = vcombine.high %v15_v32, %v19_v33  ;;  %v857_v38 = vcombine.low %v16_v34, %v20_v37  ;;  %v858_v39 = vcombine.high %v16_v34, %v20_v37  ;;  %v1104_v46 = vld [vmem:[%s1399_s1 + $0x130] sm:$0xff]   ;;  %v1106_v48 = vld [vmem:[%s1399_s1 + $0x168] sm:$0xff]   ;;  %v1110_v52 = vld [vmem:[%s1399_s1 + $0x160] sm:$0xff]  }
  0x10   :  { %961 = vmatpush3.bf16.msra.mxu0 %v1080_v14  ;;  %v1105_v47 = vld [vmem:[%s1399_s1 + $0x1b0] sm:$0xff]   ;;  %v1107_v49 = vld [vmem:[%s1399_s1 + $0x1e8] sm:$0xff]   ;;  %v1111_v53 = vld [vmem:[%s1399_s1 + $0x1e0] sm:$0xff]  }
  0x11   :  { %989 = vmatpush3.bf16.msra.mxu1 %v1081_v15  ;;  %962 = vmatprep.subr.bf16.mxu0 %v1082_v16  ;;  %v1108_v50 = vld [vmem:[%s1399_s1 + $0x128] sm:$0xff]   ;;  %v1112_v54 = vld [vmem:[%s1399_s1 + $0x120] sm:$0xff]   ;;  %v1114_v56 = vld [vmem:[%s1399_s1 + $0x158] sm:$0xff]  }
  0x12   :  { %990 = vmatprep.subr.bf16.mxu1 %v1083_v17  ;;  %662 = vmatprep.mubr.bf16.mxu0 %v856_v36  ;;  %v1109_v51 = vld [vmem:[%s1399_s1 + $0x1a8] sm:$0xff]   ;;  %v1113_v55 = vld [vmem:[%s1399_s1 + $0x1a0] sm:$0xff]   ;;  %v1115_v57 = vld [vmem:[%s1399_s1 + $0x1d8] sm:$0xff]  }
  0x13   :  { %711 = vmatprep.mubr.bf16.mxu1 %v858_v39  ;;  %v23_v58 = vld [vmem:[%s1400_s0 + $0x40] sm:$0xff]  ;;  %v1116_v61 = vld [vmem:[%s1399_s1 + $0x118] sm:$0xff]   ;;  %v24_v0 = vld [vmem:[%s1400_s0 + $0x48] sm:$0xff] }
  0x14   :  { %963 = vmatpush3.bf16.msra.mxu0 %v1084_v18  ;;  %v27_v59 = vld [vmem:[%s1400_s0 + $0x60] sm:$0xff]  ;;  %v1117_v63 = vld [vmem:[%s1399_s1 + $0x198] sm:$0xff]   ;;  %v28_v1 = vld [vmem:[%s1400_s0 + $0x68] sm:$0xff] }
  0x15   :  { %991 = vmatpush3.bf16.msra.mxu1 %v1085_v19  ;;  %964 = vmatprep.subr.bf16.mxu0 %v1086_v20  ;;  %v864_v60 = vcombine.high %v23_v58, %v27_v59  ;;  %v863_v62 = vcombine.low %v23_v58, %v27_v59  ;;  %v866_v2 = vcombine.high %v24_v0, %v28_v1  ;;  %v1118_v4 = vld [vmem:[%s1399_s1 + $0x150] sm:$0xff]   ;;  %v1122_v8 = vld [vmem:[%s1399_s1 + $0x148] sm:$0xff]   ;;  %v1126_v12 = vld [vmem:[%s1399_s1 + $0x140] sm:$0xff]  }
  0x16   :  { %992 = vmatprep.subr.bf16.mxu1 %v1087_v21  ;;  %v865_v3 = vcombine.low %v24_v0, %v28_v1  ;;  %v1119_v5 = vld [vmem:[%s1399_s1 + $0x1d0] sm:$0xff]   ;;  %v1123_v9 = vld [vmem:[%s1399_s1 + $0x1c8] sm:$0xff]   ;;  %v1127_v13 = vld [vmem:[%s1399_s1 + $0x1c0] sm:$0xff]  }
  0x17   :  { %v1120_v6 = vld [vmem:[%s1399_s1 + $0x110] sm:$0xff]   ;;  %v1124_v10 = vld [vmem:[%s1399_s1 + $0x108] sm:$0xff]   ;;  %v1128_v14 = vld [vmem:[%s1399_s1 + $0x100] sm:$0xff]  }
  0x18   :  { %965 = vmatpush3.bf16.msra.mxu0 %v1088_v22  ;;  %v1121_v7 = vld [vmem:[%s1399_s1 + $0x190] sm:$0xff]   ;;  %v1125_v11 = vld [vmem:[%s1399_s1 + $0x188] sm:$0xff]   ;;  %v1129_v15 = vld [vmem:[%s1399_s1 + $0x180] sm:$0xff]  }
  0x19   :  { %993 = vmatpush3.bf16.msra.mxu1 %v1089_v23  ;;  %966 = vmatprep.subr.bf16.mxu0 %v1090_v24  ;;  %v17_v16 = vld [vmem:[%s1400_s0 + $0x10] sm:$0xff]  ;;  %v18_v18 = vld [vmem:[%s1400_s0 + $0x18] sm:$0xff] }
  0x1a   :  { %994 = vmatprep.subr.bf16.mxu1 %v1091_v25  ;;  %v21_v17 = vld [vmem:[%s1400_s0 + $0x30] sm:$0xff]  ;;  %v22_v19 = vld [vmem:[%s1400_s0 + $0x38] sm:$0xff] }
  0x1b   :  { %v859_v20 = vcombine.low %v17_v16, %v21_v17  ;;  %v860_v21 = vcombine.high %v17_v16, %v21_v17  ;;  %v861_v22 = vcombine.low %v18_v18, %v22_v19  ;;  %v862_v23 = vcombine.high %v18_v18, %v22_v19  ;;  %v25_v24 = vld [vmem:[%s1400_s0 + $0x50] sm:$0xff] }
  0x1c   :  { %967 = vmatpush3.bf16.msra.mxu0 %v1092_v26  ;;  %v29_v25 = vld [vmem:[%s1400_s0 + $0x70] sm:$0xff]  ;;  %v26_v26 = vld [vmem:[%s1400_s0 + $0x58] sm:$0xff] }
  0x1d   :  { %995 = vmatpush3.bf16.msra.mxu1 %v1093_v27  ;;  %968 = vmatprep.subr.bf16.mxu0 %v1094_v28  ;;  %v868_v27 = vcombine.high %v25_v24, %v29_v25  ;;  %v30_v28 = vld [vmem:[%s1400_s0 + $0x78] sm:$0xff] }
  0x1e   :  { %996 = vmatprep.subr.bf16.mxu1 %v1095_v29  ;;  %v870_v29 = vcombine.high %v26_v26, %v30_v28 }
  0x20   :  { %969 = vmatpush3.bf16.msra.mxu0 %v1096_v30  ;;  %v867_v30 = vcombine.low %v25_v24, %v29_v25 }
  0x21   :  { %997 = vmatpush3.bf16.msra.mxu1 %v1097_v31  ;;  %1010 = vmatprep.subr.bf16.mxu0 %v1098_v40  ;;  %v869_v31 = vcombine.low %v26_v26, %v30_v28 }
  0x22   :  { %1038 = vmatprep.subr.bf16.mxu1 %v1099_v41 }
  0x23   :  { %663 = vmatmul.mubr.bf16.vlgmr.msra.gmra.mxu0 %v855_v35 }
  0x24   :  { %712 = vmatmul.mubr.bf16.vlgmr.msra.gmra.mxu1 %v857_v38  ;;  %1011 = vmatpush3.bf16.msra.mxu0 %v1100_v42 }
  0x25   :  { %1039 = vmatpush3.bf16.msra.mxu1 %v1101_v43  ;;  %1012 = vmatprep.subr.bf16.mxu0 %v1102_v44 }
  0x26   :  { %1040 = vmatprep.subr.bf16.mxu1 %v1103_v45  ;;  %670 = vmatprep.mubr.bf16.mxu0 %v864_v60 }
  0x27   :  { %719 = vmatprep.mubr.bf16.mxu1 %v866_v2 }
  0x28   :  { %1013 = vmatpush3.bf16.msra.mxu0 %v1104_v46 }
  0x29   :  { %1041 = vmatpush3.bf16.msra.mxu1 %v1105_v47  ;;  %1014 = vmatprep.subr.bf16.mxu0 %v1106_v48  ;;  %v854_v47 = vld [vmem:[%s1401_s2] ss:$0 sm:$0xff] }
  0x2a   :  { %1042 = vmatprep.subr.bf16.mxu1 %v1107_v49 }
  0x2b   :  { %671 = vmatmul.mubr.bf16.gmra.mxu0 %v863_v62 }
  0x2c   :  { %1015 = vmatpush3.bf16.msra.mxu0 %v1108_v50  ;;  %720 = vmatmul.mubr.bf16.gmra.mxu1 %v865_v3 }
  0x2d   :  { %1043 = vmatpush3.bf16.msra.mxu1 %v1109_v51  ;;  %1016 = vmatprep.subr.bf16.mxu0 %v1110_v52 }
  0x2e   :  { %1044 = vmatprep.subr.bf16.mxu1 %v1111_v53  ;;  %760 = vmatprep.mubr.bf16.mxu0 %v860_v21 }
  0x2f   :  { %809 = vmatprep.mubr.bf16.mxu1 %v862_v23 }
  0x30   :  { %1017 = vmatpush3.bf16.msra.mxu0 %v1112_v54 }
  0x31   :  { %1045 = vmatpush3.bf16.msra.mxu1 %v1113_v55  ;;  %1018 = vmatprep.subr.bf16.mxu0 %v1114_v56 }
  0x32   :  { %1046 = vmatprep.subr.bf16.mxu1 %v1115_v57 }
  0x34   :  { %1019 = vmatpush3.bf16.msra.mxu0 %v1116_v61 }
  0x35   :  { %1047 = vmatpush3.bf16.msra.mxu1 %v1117_v63  ;;  %1020 = vmatprep.subr.bf16.mxu0 %v1118_v4 }
  0x36   :  { %1048 = vmatprep.subr.bf16.mxu1 %v1119_v5 }
  0x38   :  { %1021 = vmatpush3.bf16.msra.mxu0 %v1120_v6 }
  0x39   :  { %1049 = vmatpush3.bf16.msra.mxu1 %v1121_v7  ;;  %1022 = vmatprep.subr.bf16.mxu0 %v1122_v8 }
  0x3a   :  { %1050 = vmatprep.subr.bf16.mxu1 %v1123_v9 }
  0x3c   :  { %1023 = vmatpush3.bf16.msra.mxu0 %v1124_v10 }
  0x3d   :  { %1051 = vmatpush3.bf16.msra.mxu1 %v1125_v11  ;;  %1024 = vmatprep.subr.bf16.mxu0 %v1126_v12 }
  0x3e   :  { %1052 = vmatprep.subr.bf16.mxu1 %v1127_v13 }
  0x40   :  { %1025 = vmatpush3.bf16.msra.mxu0 %v1128_v14 }
  0x41   :  { %1053 = vmatpush3.bf16.msra.mxu1 %v1129_v15 }
  0x43   :  { %761 = vmatmul.mubr.bf16.vlgmr.msra.gmra.mxu0 %v859_v20 }
  0x44   :  { %810 = vmatmul.mubr.bf16.vlgmr.msra.gmra.mxu1 %v861_v22  ;;  %768 = vmatprep.mubr.bf16.mxu0 %v868_v27 }
  0x45   :  { %817 = vmatprep.mubr.bf16.mxu1 %v870_v29 }
  0x4b   :  { %769 = vmatmul.mubr.bf16.gmra.mxu0 %v867_v30 }
  0x4c   :  { %818 = vmatmul.mubr.bf16.gmra.mxu1 %v869_v31 }
  0xe3   :  { %v970_v32 = vpop.f32.mrf.mxu0 }
  0xe4   :  { %v998_v33 = vpop.f32.mrf.mxu1 }
  0xe5   :  { %v971_v34 = vpop.f32.mrf.mxu0 }
  0xe6   :  { %v999_v35 = vpop.f32.mrf.mxu1  ;;  %v972_v46 = vadd.f32 %v971_v34, %v970_v32 }
  0xe7   :  { %v973_v36 = vpop.f32.mrf.mxu0  ;;  %v1000_v51 = vadd.f32 %v999_v35, %v998_v33 }
  0xe8   :  { %v1001_v37 = vpop.f32.mrf.mxu1  ;;  %v665_v50 = vadd.f32 %v972_v46, %v854_v47 }
  0xe9   :  { %v974_v38 = vpop.f32.mrf.mxu0 }
  0xea   :  { %v1002_v39 = vpop.f32.mrf.mxu1  ;;  %v975_v52 = vadd.f32 %v974_v38, %v973_v36  ;;  %v714_v58 = vadd.f32 %v1000_v51, %v665_v50 }
  0xeb   :  { %v976_v40 = vpop.f32.mrf.mxu0  ;;  %v1003_v63 = vadd.f32 %v1002_v39, %v1001_v37 }
  0xec   :  { %v1004_v41 = vpop.f32.mrf.mxu1  ;;  %v668_v59 = vadd.f32 %v975_v52, %v854_v47 }
  0xed   :  { %v977_v42 = vpop.f32.mrf.mxu0 }
  0xee   :  { %v1005_v43 = vpop.f32.mrf.mxu1  ;;  %v978_v55 = vadd.f32 %v977_v42, %v976_v40  ;;  %v717_v5 = vadd.f32 %v1003_v63, %v668_v59 }
  0xef   :  { %v979_v44 = vpop.f32.mrf.mxu0  ;;  %v1006_v2 = vadd.f32 %v1005_v43, %v1004_v41 }
  0xf0   :  { %v1007_v45 = vpop.f32.mrf.mxu1  ;;  %v673_v1 = vadd.f32 %v978_v55, %v854_v47 }
  0xf1   :  { %v980_v48 = vpop.f32.mrf.mxu0 }
  0xf2   :  { %v1008_v49 = vpop.f32.mrf.mxu1  ;;  %v981_v6 = vadd.f32 %v980_v48, %v979_v44  ;;  %v722_v14 = vadd.f32 %v1006_v2, %v673_v1 }
  0xf3   :  { %v1009_v18 = vadd.f32 %v1008_v49, %v1007_v45 }
  0xf4   :  { %v676_v17 = vadd.f32 %v981_v6, %v854_v47 }
  0xf6   :  { %v725_v28 = vadd.f32 %v1009_v18, %v676_v17 }
 0x103   :  { %v1026_v53 = vpop.f32.mrf.mxu0 }
 0x104   :  { %v1054_v54 = vpop.f32.mrf.mxu1 }
 0x105   :  { %v1027_v56 = vpop.f32.mrf.mxu0 }
 0x106   :  { %v1055_v57 = vpop.f32.mrf.mxu1  ;;  %v1028_v60 = vadd.f32 %v1027_v56, %v1026_v53 }
 0x107   :  { %v1029_v61 = vpop.f32.mrf.mxu0  ;;  %v1056_v7 = vadd.f32 %v1055_v57, %v1054_v54 }
 0x108   :  { %v1057_v62 = vpop.f32.mrf.mxu1  ;;  %v763_v0 = vadd.f32 %v1028_v60, %v714_v58 }
 0x109   :  { %v1030_v3 = vpop.f32.mrf.mxu0 }
 0x10a   :  { %v1058_v4 = vpop.f32.mrf.mxu1  ;;  %v1031_v8 = vadd.f32 %v1030_v3, %v1029_v61  ;;  %v812_v11 = vadd.f32 %v1056_v7, %v763_v0 }
 0x10b   :  { %v1032_v9 = vpop.f32.mrf.mxu0  ;;  %v1059_v13 = vadd.f32 %v1058_v4, %v1057_v62 }
 0x10c   :  { %v1060_v10 = vpop.f32.mrf.mxu1  ;;  %v766_v12 = vadd.f32 %v1031_v8, %v717_v5  ;;  %v826_v23 = vmax.f32 %v812_v11, 0.0 }
 0x10d   :  { %v1033_v15 = vpop.f32.mrf.mxu0 }
 0x10e   :  { %v1061_v16 = vpop.f32.mrf.mxu1  ;;  %v815_v19 = vadd.f32 %v1059_v13, %v766_v12  ;;  %v1034_v20 = vadd.f32 %v1033_v15, %v1032_v9 }
 0x10f   :  { %v1035_v21 = vpop.f32.mrf.mxu0  ;;  %v1062_v30 = vadd.f32 %v1061_v16, %v1060_v10 }
 0x110   :  { %v1063_v22 = vpop.f32.mrf.mxu1  ;;  %v827_v24 = vmax.f32 %v815_v19, 0.0  ;;  %v771_v25 = vadd.f32 %v1034_v20, %v722_v14 }
 0x111   :  { %v1036_v26 = vpop.f32.mrf.mxu0 }
 0x112   :  { %v1064_v27 = vpop.f32.mrf.mxu1  ;;  %v946_v29 = vpack.c.bf16 %v827_v24, %v826_v23  ;;  %v1037_v31 = vadd.f32 %v1036_v26, %v1035_v21  ;;  %v820_v32 = vadd.f32 %v1062_v30, %v771_v25 }
 0x113   :  { %v1065_v34 = vadd.f32 %v1064_v27, %v1063_v22 }
 0x114   :  { %947 = vst [vmem:[%s1402_s3] sm:$0xff] %v946_v29   ;;  %v774_v33 = vadd.f32 %v1037_v31, %v725_v28  ;;  %v828_v36 = vmax.f32 %v820_v32, 0.0 }
 0x116   :  { %v823_v35 = vadd.f32 %v1065_v34, %v774_v33 }
 0x118   :  { %v829_v37 = vmax.f32 %v823_v35, 0.0 }
 0x11a   :  { %v951_v38 = vpack.c.bf16 %v829_v37, %v828_v36 }
 0x11c   :  { %953 = vst [vmem:[%s1402_s3 + $0x8] sm:$0xff] %v951_v38  }

// kernel: tile.29
= control target key start
LH: loop header
LB: loop body
LE: loop exit
PB: predicated region body
PF: predicated region fallthrough
CT: control target
= control target key end

     0   :  { %vm3_vm0 = vcmask 523264   ;;  %vm10_vm1 = vcmask 1048064   ;;  %s125_s0 = inlined_call_operand.vmem [shape: f32[16,64], index: 0, kind: input, shape index: {}]   ;;  %s126_s1 = inlined_call_operand.vmem [shape: f32[1,1024], index: 1, kind: output, shape index: {}]  }
   0x1   :  { %v75_v0 = vld [vmem:[%s125_s0 + $0x1] ss:$2 sm:$0xff]   ;;  %v2_v1 = vld [vmem:[%s125_s0] ss:$2 sm:$0xff]   ;;  %s84_s0 = smov 64  }
   0x2   :  { %8 = vrot.lane.b32.xlu0 %v75_v0, %s84_s0  ;;  %4 = vst.msk [vmem:[#allocation0] ss:$8 sm:$0xf] %vm3_vm0, %v2_v1   ;;  %5 = vst.msk [vmem:[#allocation0] ss:$8 sm:$0xf0] %vm3_vm0, %v2_v1  }
  0x74   :  { %v9_v2 = vpop.permute.xlu0 %8  }
  0x75   :  { %11 = vst.msk [vmem:[#allocation0] ss:$8 sm:$0xf] %vm10_vm1, %v9_v2   ;;  %12 = vst.msk [vmem:[#allocation0] ss:$8 sm:$0xf0] %vm10_vm1, %v9_v2  }
  0x7c   :  { %v17_v3 = vld [vmem:[#allocation0] sm:$0x1]  ;;  %v22_v4 = vld [vmem:[#allocation0 + $0x8] sm:$0x1]  ;;  %v28_v5 = vld [vmem:[#allocation0 + $0x10] sm:$0x1] }
  0x7d   :  { %20 = vst [vmem:[%s126_s1] sm:$0x1] %v17_v3  ;;  %76 = vst [vmem:[%s126_s1 + $0x1] sm:$0x1] %v22_v4  ;;  %v35_v6 = vld [vmem:[#allocation0 + $0x18] sm:$0x1] }
  0x7e   :  { %77 = vst [vmem:[%s126_s1 + $0x2] sm:$0x1] %v28_v5  ;;  %v42_v7 = vld [vmem:[#allocation0 + $0x20] sm:$0x1]  ;;  %v49_v8 = vld [vmem:[#allocation0 + $0x28] sm:$0x1] }
  0x7f   :  { %78 = vst [vmem:[%s126_s1 + $0x3] sm:$0x1] %v35_v6  ;;  %79 = vst [vmem:[%s126_s1 + $0x4] sm:$0x1] %v42_v7  ;;  %v56_v9 = vld [vmem:[#allocation0 + $0x30] sm:$0x1] }
  0x80   :  { %80 = vst [vmem:[%s126_s1 + $0x5] sm:$0x1] %v49_v8  ;;  %v63_v10 = vld [vmem:[#allocation0 + $0x38] sm:$0x1]  ;;  %81 = vst [vmem:[%s126_s1 + $0x6] sm:$0x1] %v56_v9 }
  0x81   :  { %82 = vst [vmem:[%s126_s1 + $0x7] sm:$0x1] %v63_v10 }

// kernel: tile.28
= control target key start
LH: loop header
LB: loop body
LE: loop exit
PB: predicated region body
PF: predicated region fallthrough
CT: control target
= control target key end

     0   :  { %s28_s0 = inlined_call_operand.vmem [shape: f32[64], index: 0, kind: input, shape index: {}]   ;;  %s29_s1 = inlined_call_operand.vmem [shape: f32[16,64], index: 1, kind: output, shape index: {}]  }
   0x1   :  { %v4_v0 = vld [vmem:[%s28_s0] ss:$0 sm:$0xff] }
   0x2   :  { %5 = vst [vmem:[%s29_s1] sm:$0xff] %v4_v0  ;;  %8 = vst [vmem:[%s29_s1 + $0x8] sm:$0xff] %v4_v0 }

// kernel: beta_vae_h_forward.13
= control target key start
LH: loop header
LB: loop body
LE: loop exit
PB: predicated region body
PF: predicated region fallthrough
CT: control target
= control target key end

     0   :  { %18 = vsyncpa [#allocation3], 0  ;;  %s3453_s0 = inlined_call_operand.vmem [shape: bf16[2,1024], index: 0, kind: input, shape index: {}]   ;;  %s3454_s1 = inlined_call_operand.vmem [shape: f32[1024,256], index: 1, kind: input, shape index: {}]   ;;  %s3455_s2 = inlined_call_operand.vmem [shape: f32[1,256], index: 2, kind: input, shape index: {}]   ;;  %s3456_s3 = inlined_call_operand.vmem [shape: f32[256,20], index: 3, kind: input, shape index: {}]   ;;  %s3457_s4 = inlined_call_operand.vmem [shape: f32[1,20], index: 4, kind: input, shape index: {}]   ;;  %s3458_s5 = inlined_call_operand.vmem [shape: f32[2,10], index: 5, kind: input, shape index: {}]   ;;  %s3459_s6 = inlined_call_operand.vmem [shape: f32[10,256], index: 6, kind: input, shape index: {}]   ;;  %s3460_s7 = inlined_call_operand.vmem [shape: f32[1,256], index: 7, kind: input, shape index: {}]   ;;  %s3461_s8 = inlined_call_operand.vmem [shape: f32[256,1024], index: 8, kind: input, shape index: {}]   ;;  %s3462_s9 = inlined_call_operand.vmem [shape: f32[1,1024], index: 9, kind: input, shape index: {}]   ;;  %s3463_s10 = inlined_call_operand.hbm [shape: f32[2,10], index: 10, kind: output, shape index: {0}]   ;;  %s3464_s11 = inlined_call_operand.hbm [shape: f32[2,10], index: 11, kind: output, shape index: {1}]   ;;  %s3465_s12 = inlined_call_operand.vmem [shape: bf16[2,1024], index: 12, kind: output, shape index: {2}]  }
   0x1   :  { %v74_v0 = vld [vmem:[%s3454_s1 + $0xf8] sm:$0xff]  ;;  %v73_v2 = vld [vmem:[%s3454_s1 + $0xf0] sm:$0xff]  ;;  %v72_v4 = vld [vmem:[%s3454_s1 + $0xe8] sm:$0xff] }
   0x2   :  { %v138_v1 = vld [vmem:[%s3454_s1 + $0x2f8] sm:$0xff]  ;;  %355 = vmatprep.subr.mxu0 %v74_v0  ;;  %v137_v3 = vld [vmem:[%s3454_s1 + $0x2f0] sm:$0xff]  ;;  %v136_v5 = vld [vmem:[%s3454_s1 + $0x2e8] sm:$0xff] }
   0x3   :  { %426 = vmatprep.subr.mxu1 %v138_v1  ;;  %356 = vmatpush1.msra.mxu0 %v73_v2  ;;  %v71_v6 = vld [vmem:[%s3454_s1 + $0xe0] sm:$0xff]  ;;  %v70_v8 = vld [vmem:[%s3454_s1 + $0xd8] sm:$0xff]  ;;  %v69_v10 = vld [vmem:[%s3454_s1 + $0xd0] sm:$0xff] }
   0x4   :  { %427 = vmatpush1.msra.mxu1 %v137_v3  ;;  %v135_v7 = vld [vmem:[%s3454_s1 + $0x2e0] sm:$0xff]  ;;  %357 = vmatprep.subr.mxu0 %v72_v4  ;;  %v134_v9 = vld [vmem:[%s3454_s1 + $0x2d8] sm:$0xff]  ;;  %v133_v11 = vld [vmem:[%s3454_s1 + $0x2d0] sm:$0xff] }
   0x5   :  { %428 = vmatprep.subr.mxu1 %v136_v5  ;;  %358 = vmatpush1.msra.mxu0 %v71_v6  ;;  %v68_v12 = vld [vmem:[%s3454_s1 + $0xc8] sm:$0xff]  ;;  %v67_v14 = vld [vmem:[%s3454_s1 + $0xc0] sm:$0xff]  ;;  %v66_v16 = vld [vmem:[%s3454_s1 + $0xb8] sm:$0xff] }
   0x6   :  { %429 = vmatpush1.msra.mxu1 %v135_v7  ;;  %v132_v13 = vld [vmem:[%s3454_s1 + $0x2c8] sm:$0xff]  ;;  %359 = vmatprep.subr.mxu0 %v70_v8  ;;  %v131_v15 = vld [vmem:[%s3454_s1 + $0x2c0] sm:$0xff]  ;;  %v130_v17 = vld [vmem:[%s3454_s1 + $0x2b8] sm:$0xff] }
   0x7   :  { %430 = vmatprep.subr.mxu1 %v134_v9  ;;  %360 = vmatpush1.msra.mxu0 %v69_v10  ;;  %v65_v18 = vld [vmem:[%s3454_s1 + $0xb0] sm:$0xff]  ;;  %v64_v20 = vld [vmem:[%s3454_s1 + $0xa8] sm:$0xff]  ;;  %v63_v22 = vld [vmem:[%s3454_s1 + $0xa0] sm:$0xff] }
   0x8   :  { %431 = vmatpush1.msra.mxu1 %v133_v11  ;;  %361 = vmatprep.subr.mxu0 %v68_v12  ;;  %v129_v19 = vld [vmem:[%s3454_s1 + $0x2b0] sm:$0xff]  ;;  %v128_v21 = vld [vmem:[%s3454_s1 + $0x2a8] sm:$0xff]  ;;  %v127_v23 = vld [vmem:[%s3454_s1 + $0x2a0] sm:$0xff]  ;;  %v301_v12 = vlaneseq }
   0x9   :  { %432 = vmatprep.subr.mxu1 %v132_v13  ;;  %362 = vmatpush1.msra.mxu0 %v67_v14  ;;  %v62_v24 = vld [vmem:[%s3454_s1 + $0x98] sm:$0xff]  ;;  %v61_v26 = vld [vmem:[%s3454_s1 + $0x90] sm:$0xff]  ;;  %v60_v28 = vld [vmem:[%s3454_s1 + $0x88] sm:$0xff]  ;;  %v1656_v13 = vmov 1983009808  }
   0xa   :  { %433 = vmatpush1.msra.mxu1 %v131_v15  ;;  %363 = vmatprep.subr.mxu0 %v66_v16  ;;  %v126_v25 = vld [vmem:[%s3454_s1 + $0x298] sm:$0xff]  ;;  %v125_v27 = vld [vmem:[%s3454_s1 + $0x290] sm:$0xff]  ;;  %v124_v29 = vld [vmem:[%s3454_s1 + $0x288] sm:$0xff]  ;;  %v315_v14 = vunpack.c.l.s4 %v1656_v13 }
   0xb   :  { %434 = vmatprep.subr.mxu1 %v130_v17  ;;  %364 = vmatpush1.msra.mxu0 %v65_v18  ;;  %v59_v30 = vld [vmem:[%s3454_s1 + $0x80] sm:$0xff]  ;;  %v58_v32 = vld [vmem:[%s3454_s1 + $0x78] sm:$0xff]  ;;  %v57_v34 = vld [vmem:[%s3454_s1 + $0x70] sm:$0xff] }
   0xc   :  { %435 = vmatpush1.msra.mxu1 %v129_v19  ;;  %365 = vmatprep.subr.mxu0 %v64_v20  ;;  %v123_v31 = vld [vmem:[%s3454_s1 + $0x280] sm:$0xff]  ;;  %v122_v33 = vld [vmem:[%s3454_s1 + $0x278] sm:$0xff]  ;;  %v121_v35 = vld [vmem:[%s3454_s1 + $0x270] sm:$0xff] }
   0xd   :  { %436 = vmatprep.subr.mxu1 %v128_v21  ;;  %366 = vmatpush1.msra.mxu0 %v63_v22  ;;  %v56_v36 = vld [vmem:[%s3454_s1 + $0x68] sm:$0xff]  ;;  %v55_v38 = vld [vmem:[%s3454_s1 + $0x60] sm:$0xff]  ;;  %v54_v40 = vld [vmem:[%s3454_s1 + $0x58] sm:$0xff] }
   0xe   :  { %437 = vmatpush1.msra.mxu1 %v127_v23  ;;  %367 = vmatprep.subr.mxu0 %v62_v24  ;;  %v120_v37 = vld [vmem:[%s3454_s1 + $0x268] sm:$0xff]  ;;  %v119_v39 = vld [vmem:[%s3454_s1 + $0x260] sm:$0xff]  ;;  %v118_v41 = vld [vmem:[%s3454_s1 + $0x258] sm:$0xff]  ;;  %v1980_v23 = vshrl.u32 %v301_v12, 7  ;;  %v316_v24 = vunpack.c.0.s8 %v315_v14 }
   0xf   :  { %438 = vmatprep.subr.mxu1 %v126_v25  ;;  %368 = vmatpush1.msra.mxu0 %v61_v26  ;;  %v53_v42 = vld [vmem:[%s3454_s1 + $0x50] sm:$0xff]  ;;  %v52_v44 = vld [vmem:[%s3454_s1 + $0x48] sm:$0xff]  ;;  %v51_v46 = vld [vmem:[%s3454_s1 + $0x40] sm:$0xff] }
  0x10   :  { %439 = vmatpush1.msra.mxu1 %v125_v27  ;;  %369 = vmatprep.subr.mxu0 %v60_v28  ;;  %v117_v43 = vld [vmem:[%s3454_s1 + $0x250] sm:$0xff]  ;;  %v116_v45 = vld [vmem:[%s3454_s1 + $0x248] sm:$0xff]  ;;  %v115_v47 = vld [vmem:[%s3454_s1 + $0x240] sm:$0xff] }
  0x11   :  { %440 = vmatprep.subr.mxu1 %v124_v29  ;;  %370 = vmatpush1.msra.mxu0 %v59_v30  ;;  %v50_v48 = vld [vmem:[%s3454_s1 + $0x38] sm:$0xff]  ;;  %v49_v50 = vld [vmem:[%s3454_s1 + $0x30] sm:$0xff]  ;;  %v48_v52 = vld [vmem:[%s3454_s1 + $0x28] sm:$0xff] }
  0x12   :  { %441 = vmatpush1.msra.mxu1 %v123_v31  ;;  %371 = vmatprep.subr.mxu0 %v58_v32  ;;  %v114_v49 = vld [vmem:[%s3454_s1 + $0x238] sm:$0xff]  ;;  %v113_v51 = vld [vmem:[%s3454_s1 + $0x230] sm:$0xff]  ;;  %v112_v53 = vld [vmem:[%s3454_s1 + $0x228] sm:$0xff] }
  0x13   :  { %442 = vmatprep.subr.mxu1 %v122_v33  ;;  %372 = vmatpush1.msra.mxu0 %v57_v34  ;;  %v47_v54 = vld [vmem:[%s3454_s1 + $0x20] sm:$0xff]  ;;  %v46_v56 = vld [vmem:[%s3454_s1 + $0x18] sm:$0xff]  ;;  %v45_v58 = vld [vmem:[%s3454_s1 + $0x10] sm:$0xff] }
  0x14   :  { %443 = vmatpush1.msra.mxu1 %v121_v35  ;;  %373 = vmatprep.subr.mxu0 %v56_v36  ;;  %v111_v55 = vld [vmem:[%s3454_s1 + $0x220] sm:$0xff]  ;;  %v110_v57 = vld [vmem:[%s3454_s1 + $0x218] sm:$0xff]  ;;  %v109_v59 = vld [vmem:[%s3454_s1 + $0x210] sm:$0xff]  ;;  %v2010_v35 = vsub.s32 %v316_v24, %v1980_v23 }
  0x15   :  { %444 = vmatprep.subr.mxu1 %v120_v37  ;;  %374 = vmatpush1.msra.mxu0 %v55_v38  ;;  %v44_v60 = vld [vmem:[%s3454_s1 + $0x8] sm:$0xff]  ;;  %v43_v62 = vld [vmem:[%s3454_s1] sm:$0xff]  ;;  %v106_v0 = vld [vmem:[%s3454_s1 + $0x1f8] sm:$0xff] }
  0x16   :  { %445 = vmatpush1.msra.mxu1 %v119_v39  ;;  %375 = vmatprep.subr.mxu0 %v54_v40  ;;  %v108_v61 = vld [vmem:[%s3454_s1 + $0x208] sm:$0xff]  ;;  %v107_v63 = vld [vmem:[%s3454_s1 + $0x200] sm:$0xff]  ;;  %v170_v1 = vld [vmem:[%s3454_s1 + $0x3f8] sm:$0xff] }
  0x17   :  { %446 = vmatprep.subr.mxu1 %v118_v41  ;;  %376 = vmatpush1.msra.mxu0 %v53_v42  ;;  %v105_v2 = vld [vmem:[%s3454_s1 + $0x1f0] sm:$0xff]  ;;  %v104_v4 = vld [vmem:[%s3454_s1 + $0x1e8] sm:$0xff]  ;;  %v103_v6 = vld [vmem:[%s3454_s1 + $0x1e0] sm:$0xff] }
  0x18   :  { %447 = vmatpush1.msra.mxu1 %v117_v43  ;;  %377 = vmatprep.subr.mxu0 %v52_v44  ;;  %v169_v3 = vld [vmem:[%s3454_s1 + $0x3f0] sm:$0xff]  ;;  %v168_v5 = vld [vmem:[%s3454_s1 + $0x3e8] sm:$0xff]  ;;  %v167_v7 = vld [vmem:[%s3454_s1 + $0x3e0] sm:$0xff] }
  0x19   :  { %448 = vmatprep.subr.mxu1 %v116_v45  ;;  %378 = vmatpush1.msra.mxu0 %v51_v46  ;;  %v102_v8 = vld [vmem:[%s3454_s1 + $0x1d8] sm:$0xff]  ;;  %v101_v10 = vld [vmem:[%s3454_s1 + $0x1d0] sm:$0xff]  ;;  %v100_v15 = vld [vmem:[%s3454_s1 + $0x1c8] sm:$0xff] }
  0x1a   :  { %449 = vmatpush1.msra.mxu1 %v115_v47  ;;  %379 = vmatprep.subr.mxu0 %v50_v48  ;;  %v166_v9 = vld [vmem:[%s3454_s1 + $0x3d8] sm:$0xff]  ;;  %v165_v11 = vld [vmem:[%s3454_s1 + $0x3d0] sm:$0xff]  ;;  %v164_v16 = vld [vmem:[%s3454_s1 + $0x3c8] sm:$0xff] }
  0x1b   :  { %450 = vmatprep.subr.mxu1 %v114_v49  ;;  %380 = vmatpush1.msra.mxu0 %v49_v50  ;;  %v99_v17 = vld [vmem:[%s3454_s1 + $0x1c0] sm:$0xff]  ;;  %v98_v19 = vld [vmem:[%s3454_s1 + $0x1b8] sm:$0xff]  ;;  %v97_v21 = vld [vmem:[%s3454_s1 + $0x1b0] sm:$0xff] }
  0x1c   :  { %451 = vmatpush1.msra.mxu1 %v113_v51  ;;  %381 = vmatprep.subr.mxu0 %v48_v52  ;;  %v163_v18 = vld [vmem:[%s3454_s1 + $0x3c0] sm:$0xff]  ;;  %v162_v20 = vld [vmem:[%s3454_s1 + $0x3b8] sm:$0xff]  ;;  %v161_v22 = vld [vmem:[%s3454_s1 + $0x3b0] sm:$0xff] }
  0x1d   :  { %452 = vmatprep.subr.mxu1 %v112_v53  ;;  %382 = vmatpush1.msra.mxu0 %v47_v54  ;;  %v96_v25 = vld [vmem:[%s3454_s1 + $0x1a8] sm:$0xff]  ;;  %v95_v27 = vld [vmem:[%s3454_s1 + $0x1a0] sm:$0xff]  ;;  %v94_v29 = vld [vmem:[%s3454_s1 + $0x198] sm:$0xff] }
  0x1e   :  { %453 = vmatpush1.msra.mxu1 %v111_v55  ;;  %383 = vmatprep.subr.mxu0 %v46_v56  ;;  %v160_v26 = vld [vmem:[%s3454_s1 + $0x3a8] sm:$0xff]  ;;  %v159_v28 = vld [vmem:[%s3454_s1 + $0x3a0] sm:$0xff]  ;;  %v158_v30 = vld [vmem:[%s3454_s1 + $0x398] sm:$0xff] }
  0x1f   :  { %454 = vmatprep.subr.mxu1 %v110_v57  ;;  %384 = vmatpush1.msra.mxu0 %v45_v58  ;;  %v40_v31 = vld [vmem:[%s3453_s0] sm:$0xff]  ;;  %v93_v32 = vld [vmem:[%s3454_s1 + $0x190] sm:$0xff]  ;;  %v92_v36 = vld [vmem:[%s3454_s1 + $0x188] sm:$0xff] }
  0x20   :  { %455 = vmatpush1.msra.mxu1 %v109_v59  ;;  %385 = vmatprep.subr.mxu0 %v44_v60  ;;  %v157_v33 = vld [vmem:[%s3454_s1 + $0x390] sm:$0xff]  ;;  %v42_v34 = vunpack.c.h.bf16 %v40_v31  ;;  %v156_v37 = vld [vmem:[%s3454_s1 + $0x388] sm:$0xff]  ;;  %v91_v38 = vld [vmem:[%s3454_s1 + $0x180] sm:$0xff]  ;;  %v41_v53 = vunpack.c.l.bf16 %v40_v31 }
  0x21   :  { %456 = vmatprep.subr.mxu1 %v108_v61  ;;  %386 = vmatpush1.msra.mxu0 %v43_v62  ;;  %v155_v39 = vld [vmem:[%s3454_s1 + $0x380] sm:$0xff]  ;;  %v90_v41 = vld [vmem:[%s3454_s1 + $0x178] sm:$0xff]  ;;  %v89_v44 = vld [vmem:[%s3454_s1 + $0x170] sm:$0xff] }
  0x22   :  { %457 = vmatpush1.msra.mxu1 %v107_v63  ;;  %387 = vmatprep.subr.mxu0 %v106_v0  ;;  %v2025_v40 = vrot.slane %v42_v34, %v2010_v35  ;;  %v154_v42 = vld [vmem:[%s3454_s1 + $0x378] sm:$0xff]  ;;  %v330_v43 = vcombine.high %v42_v34, %v42_v34  ;;  %v153_v45 = vld [vmem:[%s3454_s1 + $0x370] sm:$0xff]  ;;  %v88_v46 = vld [vmem:[%s3454_s1 + $0x168] sm:$0xff]  ;;  %v313_v62 = vcombine.high %v41_v53, %v41_v53 }
  0x23   :  { %458 = vmatprep.subr.mxu1 %v170_v1  ;;  %388 = vmatpush2.msra.mxu0 %v105_v2  ;;  %v152_v47 = vld [vmem:[%s3454_s1 + $0x368] sm:$0xff]  ;;  %v87_v49 = vld [vmem:[%s3454_s1 + $0x160] sm:$0xff]  ;;  %v86_v51 = vld [vmem:[%s3454_s1 + $0x158] sm:$0xff] }
  0x24   :  { %459 = vmatpush2.msra.mxu1 %v169_v3  ;;  %389 = vmatprep.subr.mxu0 %v104_v4  ;;  %v2046_v48 = vrot.slane %v330_v43, %v2010_v35  ;;  %v151_v50 = vld [vmem:[%s3454_s1 + $0x360] sm:$0xff]  ;;  %v150_v52 = vld [vmem:[%s3454_s1 + $0x358] sm:$0xff]  ;;  %v85_v54 = vld [vmem:[%s3454_s1 + $0x150] sm:$0xff]  ;;  %v320_v3 = vrot.slane %v41_v53, %v2010_v35 }
  0x25   :  { %460 = vmatprep.subr.mxu1 %v168_v5  ;;  %390 = vmatpush2.msra.mxu0 %v103_v6  ;;  %v149_v55 = vld [vmem:[%s3454_s1 + $0x350] sm:$0xff]  ;;  %v84_v56 = vld [vmem:[%s3454_s1 + $0x148] sm:$0xff]  ;;  %v83_v58 = vld [vmem:[%s3454_s1 + $0x140] sm:$0xff] }
  0x26   :  { %461 = vmatpush2.msra.mxu1 %v167_v7  ;;  %391 = vmatprep.subr.mxu0 %v102_v8  ;;  %v148_v57 = vld [vmem:[%s3454_s1 + $0x348] sm:$0xff]  ;;  %v147_v59 = vld [vmem:[%s3454_s1 + $0x340] sm:$0xff]  ;;  %v82_v60 = vld [vmem:[%s3454_s1 + $0x138] sm:$0xff]  ;;  %v327_v8 = vrot.slane %v313_v62, %v2010_v35  ;;  %v328_v13 = vcombine.high %v320_v3, %v320_v3 }
  0x27   :  { %462 = vmatprep.subr.mxu1 %v166_v9  ;;  %392 = vmatpush2.msra.mxu0 %v101_v10  ;;  %v146_v61 = vld [vmem:[%s3454_s1 + $0x338] sm:$0xff]  ;;  %v81_v63 = vld [vmem:[%s3454_s1 + $0x130] sm:$0xff]  ;;  %v80_v1 = vld [vmem:[%s3454_s1 + $0x128] sm:$0xff] }
  0x28   :  { %463 = vmatpush2.msra.mxu1 %v165_v11  ;;  %393 = vmatprep.subr.mxu0 %v100_v15  ;;  %v145_v0 = vld [vmem:[%s3454_s1 + $0x330] sm:$0xff]  ;;  %v144_v2 = vld [vmem:[%s3454_s1 + $0x328] sm:$0xff]  ;;  %v79_v4 = vld [vmem:[%s3454_s1 + $0x120] sm:$0xff] }
  0x29   :  { %464 = vmatprep.subr.mxu1 %v164_v16  ;;  %394 = vmatpush2.msra.mxu0 %v99_v17  ;;  %v143_v5 = vld [vmem:[%s3454_s1 + $0x320] sm:$0xff]  ;;  %v78_v6 = vld [vmem:[%s3454_s1 + $0x118] sm:$0xff]  ;;  %v77_v9 = vld [vmem:[%s3454_s1 + $0x110] sm:$0xff]  ;;  %v329_v16 = vcombine.high %v327_v8, %v327_v8 }
  0x2a   :  { %465 = vmatpush2.msra.mxu1 %v163_v18  ;;  %395 = vmatprep.subr.mxu0 %v98_v19  ;;  %v142_v7 = vld [vmem:[%s3454_s1 + $0x318] sm:$0xff]  ;;  %v141_v10 = vld [vmem:[%s3454_s1 + $0x310] sm:$0xff]  ;;  %v76_v11 = vld [vmem:[%s3454_s1 + $0x108] sm:$0xff] }
  0x2b   :  { %466 = vmatprep.subr.mxu1 %v162_v20  ;;  %396 = vmatpush2.msra.mxu0 %v97_v21  ;;  %v140_v12 = vld [vmem:[%s3454_s1 + $0x308] sm:$0xff]  ;;  %v75_v14 = vld [vmem:[%s3454_s1 + $0x100] sm:$0xff]  ;;  %v202_v17 = vld [vmem:[%s3454_s1 + $0x4f8] sm:$0xff] }
  0x2c   :  { %467 = vmatpush2.msra.mxu1 %v161_v22  ;;  %397 = vmatprep.subr.mxu0 %v96_v25  ;;  %v139_v15 = vld [vmem:[%s3454_s1 + $0x300] sm:$0xff]  ;;  %v266_v18 = vld [vmem:[%s3454_s1 + $0x6f8] sm:$0xff]  ;;  %v201_v19 = vld [vmem:[%s3454_s1 + $0x4f0] sm:$0xff] }
  0x2d   :  { %468 = vmatprep.subr.mxu1 %v160_v26  ;;  %398 = vmatpush2.msra.mxu0 %v95_v27  ;;  %v265_v20 = vld [vmem:[%s3454_s1 + $0x6f0] sm:$0xff]  ;;  %v200_v21 = vld [vmem:[%s3454_s1 + $0x4e8] sm:$0xff]  ;;  %v199_v24 = vld [vmem:[%s3454_s1 + $0x4e0] sm:$0xff] }
  0x2e   :  { %469 = vmatpush2.msra.mxu1 %v159_v28  ;;  %399 = vmatprep.subr.mxu0 %v94_v29  ;;  %v264_v22 = vld [vmem:[%s3454_s1 + $0x6e8] sm:$0xff]  ;;  %v263_v25 = vld [vmem:[%s3454_s1 + $0x6e0] sm:$0xff]  ;;  %v198_v26 = vld [vmem:[%s3454_s1 + $0x4d8] sm:$0xff] }
  0x2f   :  { %470 = vmatprep.subr.mxu1 %v158_v30  ;;  %400 = vmatpush2.msra.mxu0 %v93_v32  ;;  %v262_v27 = vld [vmem:[%s3454_s1 + $0x6d8] sm:$0xff]  ;;  %v197_v28 = vld [vmem:[%s3454_s1 + $0x4d0] sm:$0xff]  ;;  %v196_v30 = vld [vmem:[%s3454_s1 + $0x4c8] sm:$0xff] }
  0x30   :  { %471 = vmatpush2.msra.mxu1 %v157_v33  ;;  %401 = vmatprep.subr.mxu0 %v92_v36  ;;  %v261_v29 = vld [vmem:[%s3454_s1 + $0x6d0] sm:$0xff]  ;;  %v260_v31 = vld [vmem:[%s3454_s1 + $0x6c8] sm:$0xff]  ;;  %v195_v32 = vld [vmem:[%s3454_s1 + $0x4c0] sm:$0xff] }
  0x31   :  { %472 = vmatprep.subr.mxu1 %v156_v37  ;;  %402 = vmatpush2.msra.mxu0 %v91_v38  ;;  %v259_v33 = vld [vmem:[%s3454_s1 + $0x6c0] sm:$0xff]  ;;  %v194_v34 = vld [vmem:[%s3454_s1 + $0x4b8] sm:$0xff]  ;;  %v193_v36 = vld [vmem:[%s3454_s1 + $0x4b0] sm:$0xff] }
  0x32   :  { %473 = vmatpush2.msra.mxu1 %v155_v39  ;;  %403 = vmatprep.subr.mxu0 %v90_v41  ;;  %v258_v35 = vld [vmem:[%s3454_s1 + $0x6b8] sm:$0xff]  ;;  %v257_v37 = vld [vmem:[%s3454_s1 + $0x6b0] sm:$0xff]  ;;  %v192_v38 = vld [vmem:[%s3454_s1 + $0x4a8] sm:$0xff] }
  0x33   :  { %474 = vmatprep.subr.mxu1 %v154_v42  ;;  %404 = vmatpush2.msra.mxu0 %v89_v44  ;;  %v256_v39 = vld [vmem:[%s3454_s1 + $0x6a8] sm:$0xff]  ;;  %v191_v41 = vld [vmem:[%s3454_s1 + $0x4a0] sm:$0xff]  ;;  %v190_v43 = vld [vmem:[%s3454_s1 + $0x498] sm:$0xff] }
  0x34   :  { %475 = vmatpush2.msra.mxu1 %v153_v45  ;;  %405 = vmatprep.subr.mxu0 %v88_v46  ;;  %v255_v42 = vld [vmem:[%s3454_s1 + $0x6a0] sm:$0xff]  ;;  %v254_v44 = vld [vmem:[%s3454_s1 + $0x698] sm:$0xff]  ;;  %v189_v45 = vld [vmem:[%s3454_s1 + $0x490] sm:$0xff] }
  0x35   :  { %476 = vmatprep.subr.mxu1 %v152_v47  ;;  %406 = vmatpush2.msra.mxu0 %v87_v49  ;;  %v253_v46 = vld [vmem:[%s3454_s1 + $0x690] sm:$0xff]  ;;  %v188_v47 = vld [vmem:[%s3454_s1 + $0x488] sm:$0xff]  ;;  %v250_v53 = vld [vmem:[%s3454_s1 + $0x678] sm:$0xff] }
  0x36   :  { %477 = vmatpush2.msra.mxu1 %v151_v50  ;;  %407 = vmatprep.subr.mxu0 %v86_v51  ;;  %v252_v49 = vld [vmem:[%s3454_s1 + $0x688] sm:$0xff]  ;;  %v187_v50 = vld [vmem:[%s3454_s1 + $0x480] sm:$0xff]  ;;  %v181_v62 = vld [vmem:[%s3454_s1 + $0x450] sm:$0xff] }
  0x37   :  { %478 = vmatprep.subr.mxu1 %v150_v52  ;;  %408 = vmatpush2.msra.mxu0 %v85_v54  ;;  %v251_v51 = vld [vmem:[%s3454_s1 + $0x680] sm:$0xff]  ;;  %v186_v52 = vld [vmem:[%s3454_s1 + $0x478] sm:$0xff]  ;;  %v185_v54 = vld [vmem:[%s3454_s1 + $0x470] sm:$0xff] }
  0x38   :  { %479 = vmatpush2.msra.mxu1 %v149_v55  ;;  %409 = vmatprep.subr.mxu0 %v84_v56  ;;  %v249_v55 = vld [vmem:[%s3454_s1 + $0x670] sm:$0xff]  ;;  %v184_v56 = vld [vmem:[%s3454_s1 + $0x468] sm:$0xff] }
  0x39   :  { %480 = vmatprep.subr.mxu1 %v148_v57  ;;  %410 = vmatpush2.msra.mxu0 %v83_v58  ;;  %v248_v57 = vld [vmem:[%s3454_s1 + $0x668] sm:$0xff]  ;;  %v183_v58 = vld [vmem:[%s3454_s1 + $0x460] sm:$0xff] }
  0x3a   :  { %481 = vmatpush2.msra.mxu1 %v147_v59  ;;  %411 = vmatprep.subr.mxu0 %v82_v60  ;;  %v247_v59 = vld [vmem:[%s3454_s1 + $0x660] sm:$0xff]  ;;  %v182_v60 = vld [vmem:[%s3454_s1 + $0x458] sm:$0xff] }
  0x3b   :  { %482 = vmatprep.subr.mxu1 %v146_v61  ;;  %412 = vmatpush2.msra.mxu0 %v81_v63  ;;  %v246_v61 = vld [vmem:[%s3454_s1 + $0x658] sm:$0xff]  ;;  %v245_v63 = vld [vmem:[%s3454_s1 + $0x650] sm:$0xff] }
  0x3c   :  { %483 = vmatpush2.msra.mxu1 %v145_v0  ;;  %413 = vmatprep.subr.mxu0 %v80_v1  ;;  %v180_v0 = vld [vmem:[%s3454_s1 + $0x448] sm:$0xff] }
  0x3d   :  { %484 = vmatprep.subr.mxu1 %v144_v2  ;;  %414 = vmatpush2.msra.mxu0 %v79_v4  ;;  %v244_v1 = vld [vmem:[%s3454_s1 + $0x648] sm:$0xff] }
  0x3e   :  { %485 = vmatpush2.msra.mxu1 %v143_v5  ;;  %415 = vmatprep.subr.mxu0 %v78_v6 }
  0x3f   :  { %486 = vmatprep.subr.mxu1 %v142_v7  ;;  %416 = vmatpush2.msra.mxu0 %v77_v9 }
  0x40   :  { %487 = vmatpush2.msra.mxu1 %v141_v10  ;;  %417 = vmatprep.subr.mxu0 %v76_v11 }
  0x41   :  { %488 = vmatprep.subr.mxu1 %v140_v12  ;;  %418 = vmatpush2.msra.mxu0 %v75_v14 }
  0x42   :  { %419 = vmatprep.mubr.f32.mxu0 %v328_v13  ;;  %489 = vmatpush2.msra.mxu1 %v139_v15 }
  0x43   :  { %420 = vmatmul.mubr.f32.vlgmr.msra.gmra.mxu0 %v320_v3  ;;  %490 = vmatprep.mubr.f32.mxu1 %v329_v16 }
  0x44   :  { %497 = vmatprep.subr.mxu0 %v202_v17  ;;  %568 = vmatprep.subr.mxu1 %v266_v18 }
  0x45   :  { %491 = vmatmul.mubr.f32.vlgmr.msra.gmra.mxu1 %v327_v8  ;;  %498 = vmatpush1.msra.mxu0 %v201_v19 }
  0x46   :  { %569 = vmatpush1.msra.mxu1 %v265_v20  ;;  %499 = vmatprep.subr.mxu0 %v200_v21 }
  0x47   :  { %570 = vmatprep.subr.mxu1 %v264_v22  ;;  %500 = vmatpush1.msra.mxu0 %v199_v24 }
  0x48   :  { %571 = vmatpush1.msra.mxu1 %v263_v25  ;;  %501 = vmatprep.subr.mxu0 %v198_v26 }
  0x49   :  { %572 = vmatprep.subr.mxu1 %v262_v27  ;;  %502 = vmatpush1.msra.mxu0 %v197_v28 }
  0x4a   :  { %573 = vmatpush1.msra.mxu1 %v261_v29  ;;  %503 = vmatprep.subr.mxu0 %v196_v30 }
  0x4b   :  { %574 = vmatprep.subr.mxu1 %v260_v31  ;;  %504 = vmatpush1.msra.mxu0 %v195_v32 }
  0x4c   :  { %575 = vmatpush1.msra.mxu1 %v259_v33  ;;  %505 = vmatprep.subr.mxu0 %v194_v34 }
  0x4d   :  { %576 = vmatprep.subr.mxu1 %v258_v35  ;;  %506 = vmatpush1.msra.mxu0 %v193_v36 }
  0x4e   :  { %577 = vmatpush1.msra.mxu1 %v257_v37  ;;  %507 = vmatprep.subr.mxu0 %v192_v38 }
  0x4f   :  { %578 = vmatprep.subr.mxu1 %v256_v39  ;;  %508 = vmatpush1.msra.mxu0 %v191_v41 }
  0x50   :  { %579 = vmatpush1.msra.mxu1 %v255_v42  ;;  %509 = vmatprep.subr.mxu0 %v190_v43 }
  0x51   :  { %580 = vmatprep.subr.mxu1 %v254_v44  ;;  %510 = vmatpush1.msra.mxu0 %v189_v45 }
  0x52   :  { %581 = vmatpush1.msra.mxu1 %v253_v46  ;;  %511 = vmatprep.subr.mxu0 %v188_v47 }
  0x53   :  { %582 = vmatprep.subr.mxu1 %v252_v49  ;;  %512 = vmatpush1.msra.mxu0 %v187_v50 }
  0x54   :  { %583 = vmatpush1.msra.mxu1 %v251_v51  ;;  %513 = vmatprep.subr.mxu0 %v186_v52 }
  0x55   :  { %584 = vmatprep.subr.mxu1 %v250_v53  ;;  %514 = vmatpush1.msra.mxu0 %v185_v54 }
  0x56   :  { %585 = vmatpush1.msra.mxu1 %v249_v55  ;;  %515 = vmatprep.subr.mxu0 %v184_v56 }
  0x57   :  { %586 = vmatprep.subr.mxu1 %v248_v57  ;;  %516 = vmatpush1.msra.mxu0 %v183_v58 }
  0x58   :  { %587 = vmatpush1.msra.mxu1 %v247_v59 }
  0x59   :  { %19 = vsyncpa [#allocation5], 0  ;;  %517 = vmatprep.subr.mxu0 %v182_v60  ;;  %588 = vmatprep.subr.mxu1 %v246_v61  ;;  %v179_v2 = vld [vmem:[%s3454_s1 + $0x440] sm:$0xff]  ;;  %v178_v4 = vld [vmem:[%s3454_s1 + $0x438] sm:$0xff]  ;;  %s1657_s18 = smov 10   ;;  %vm791_vm0 = vcmask 1041408  }
  0x5a   :  { %v243_v3 = vld [vmem:[%s3454_s1 + $0x640] sm:$0xff]  ;;  %518 = vmatpush1.msra.mxu0 %v181_v62  ;;  %589 = vmatpush1.msra.mxu1 %v245_v63  ;;  %v242_v5 = vld [vmem:[%s3454_s1 + $0x638] sm:$0xff]  ;;  %v177_v6 = vld [vmem:[%s3454_s1 + $0x430] sm:$0xff]  ;;  %vm750_vm1 = vcmask 74752   ;;  %s1658_s26 = smov 118   ;;  %vm787_vm2 = vcmask 80896  }
  0x5b   :  { %519 = vmatprep.subr.mxu0 %v180_v0  ;;  %590 = vmatprep.subr.mxu1 %v244_v1  ;;  %v241_v7 = vld [vmem:[%s3454_s1 + $0x630] sm:$0xff]  ;;  %v176_v8 = vld [vmem:[%s3454_s1 + $0x428] sm:$0xff]  ;;  %v175_v10 = vld [vmem:[%s3454_s1 + $0x420] sm:$0xff]  ;;  %s1660_s14 = smov [#allocation2]  }
  0x5c   :  { %520 = vmatpush1.msra.mxu0 %v179_v2  ;;  %591 = vmatpush1.msra.mxu1 %v243_v3  ;;  %v240_v9 = vld [vmem:[%s3454_s1 + $0x628] sm:$0xff]  ;;  %v239_v11 = vld [vmem:[%s3454_s1 + $0x620] sm:$0xff]  ;;  %v174_v12 = vld [vmem:[%s3454_s1 + $0x418] sm:$0xff]  ;;  %s1534_s15 = sshll.u32 %s1660_s14, 4  ;;  %s1535_s15 = int_to_ptr.vmem [resolvable:$true] %s1534_s15 }
  0x5d   :  { %521 = vmatprep.subr.mxu0 %v178_v4  ;;  %592 = vmatprep.subr.mxu1 %v242_v5  ;;  %v238_v13 = vld [vmem:[%s3454_s1 + $0x618] sm:$0xff]  ;;  %v173_v14 = vld [vmem:[%s3454_s1 + $0x410] sm:$0xff]  ;;  %v172_v16 = vld [vmem:[%s3454_s1 + $0x408] sm:$0xff]  ;;  %s1612_s16 = scalar_lea.vmem %s1535_s15, 32  ;;  %p1617_p1 = scmp.lt.s32.totalorder %s1535_s15, %s1535_s15 }
  0x5e   :  { %522 = vmatpush1.msra.mxu0 %v177_v6  ;;  %593 = vmatpush1.msra.mxu1 %v241_v7  ;;  %v237_v15 = vld [vmem:[%s3454_s1 + $0x610] sm:$0xff]  ;;  %v236_v17 = vld [vmem:[%s3454_s1 + $0x608] sm:$0xff]  ;;  %v171_v18 = vld [vmem:[%s3454_s1 + $0x400] sm:$0xff]  ;;  %p1613_p0 = scmp.ne.s32.totalorder %s1535_s15, %s1612_s16  ;;  %p1618_p2 = scmp.lt.s32.totalorder %s1612_s16, %s1612_s16 }
  0x5f   :  { %523 = vmatprep.subr.mxu0 %v176_v8  ;;  %594 = vmatprep.subr.mxu1 %v240_v9  ;;  %v235_v19 = vld [vmem:[%s3454_s1 + $0x600] sm:$0xff]  ;;  %v234_v20 = vld [vmem:[%s3454_s1 + $0x5f8] sm:$0xff]  ;;  %v233_v22 = vld [vmem:[%s3454_s1 + $0x5f0] sm:$0xff] }
  0x60   :  { %524 = vmatpush1.msra.mxu0 %v175_v10  ;;  %595 = vmatpush1.msra.mxu1 %v239_v11  ;;  %v298_v21 = vld [vmem:[%s3454_s1 + $0x7f8] sm:$0xff]  ;;  %v297_v24 = vld [vmem:[%s3454_s1 + $0x7f0] sm:$0xff]  ;;  %v232_v25 = vld [vmem:[%s3454_s1 + $0x5e8] sm:$0xff]  ;;  %p1619_p3 = por %p1618_p2, %p1617_p1 }
  0x61   :  { %525 = vmatprep.subr.mxu0 %v174_v12  ;;  %596 = vmatprep.subr.mxu1 %v238_v13  ;;  %v296_v26 = vld [vmem:[%s3454_s1 + $0x7e8] sm:$0xff]  ;;  %v231_v27 = vld [vmem:[%s3454_s1 + $0x5e0] sm:$0xff]  ;;  %v230_v29 = vld [vmem:[%s3454_s1 + $0x5d8] sm:$0xff] }
  0x62   :  { %526 = vmatpush1.msra.mxu0 %v173_v14  ;;  %597 = vmatpush1.msra.mxu1 %v237_v15  ;;  %v295_v28 = vld [vmem:[%s3454_s1 + $0x7e0] sm:$0xff]  ;;  %v294_v30 = vld [vmem:[%s3454_s1 + $0x7d8] sm:$0xff]  ;;  %v229_v31 = vld [vmem:[%s3454_s1 + $0x5d0] sm:$0xff]  ;;  %p1620_p4 = pnand %p1619_p3, %p1613_p0 }
  0x63   :  { %527 = vmatprep.subr.mxu0 %v172_v16  ;;  %598 = vmatprep.subr.mxu1 %v236_v17  ;;  %v293_v32 = vld [vmem:[%s3454_s1 + $0x7d0] sm:$0xff]  ;;  %v228_v33 = vld [vmem:[%s3454_s1 + $0x5c8] sm:$0xff]  ;;  %v227_v35 = vld [vmem:[%s3454_s1 + $0x5c0] sm:$0xff] }
  0x64   :  { %528 = vmatpush1.msra.mxu0 %v171_v18  ;;  %599 = vmatpush1.msra.mxu1 %v235_v19  ;;  %v292_v34 = vld [vmem:[%s3454_s1 + $0x7c8] sm:$0xff]  ;;  %v291_v36 = vld [vmem:[%s3454_s1 + $0x7c0] sm:$0xff]  ;;  %v226_v37 = vld [vmem:[%s3454_s1 + $0x5b8] sm:$0xff] }
  0x65   :  { %529 = vmatprep.subr.mxu0 %v234_v20  ;;  %600 = vmatprep.subr.mxu1 %v298_v21  ;;  %v290_v38 = vld [vmem:[%s3454_s1 + $0x7b8] sm:$0xff]  ;;  %v225_v39 = vld [vmem:[%s3454_s1 + $0x5b0] sm:$0xff]  ;;  %v224_v42 = vld [vmem:[%s3454_s1 + $0x5a8] sm:$0xff]  ;;  %v345_v21 = vcombine.high %v2025_v40, %v2025_v40 }
  0x66   :  { %530 = vmatpush2.msra.mxu0 %v233_v22  ;;  %601 = vmatpush2.msra.mxu1 %v297_v24  ;;  %v289_v41 = vld [vmem:[%s3454_s1 + $0x7b0] sm:$0xff]  ;;  %v288_v43 = vld [vmem:[%s3454_s1 + $0x7a8] sm:$0xff]  ;;  %v223_v44 = vld [vmem:[%s3454_s1 + $0x5a0] sm:$0xff]  ;;  %v346_v24 = vcombine.high %v2046_v48, %v2046_v48 }
  0x67   :  { %531 = vmatprep.subr.mxu0 %v232_v25  ;;  %602 = vmatprep.subr.mxu1 %v296_v26  ;;  %v287_v45 = vld [vmem:[%s3454_s1 + $0x7a0] sm:$0xff]  ;;  %v222_v46 = vld [vmem:[%s3454_s1 + $0x598] sm:$0xff]  ;;  %v221_v49 = vld [vmem:[%s3454_s1 + $0x590] sm:$0xff] }
  0x68   :  { %532 = vmatpush2.msra.mxu0 %v231_v27  ;;  %603 = vmatpush2.msra.mxu1 %v295_v28  ;;  %v286_v47 = vld [vmem:[%s3454_s1 + $0x798] sm:$0xff]  ;;  %v285_v50 = vld [vmem:[%s3454_s1 + $0x790] sm:$0xff]  ;;  %v220_v51 = vld [vmem:[%s3454_s1 + $0x588] sm:$0xff] }
  0x69   :  { %533 = vmatprep.subr.mxu0 %v230_v29  ;;  %604 = vmatprep.subr.mxu1 %v294_v30  ;;  %v284_v52 = vld [vmem:[%s3454_s1 + $0x788] sm:$0xff]  ;;  %v219_v53 = vld [vmem:[%s3454_s1 + $0x580] sm:$0xff]  ;;  %v218_v55 = vld [vmem:[%s3454_s1 + $0x578] sm:$0xff] }
  0x6a   :  { %534 = vmatpush2.msra.mxu0 %v229_v31  ;;  %605 = vmatpush2.msra.mxu1 %v293_v32  ;;  %v283_v54 = vld [vmem:[%s3454_s1 + $0x780] sm:$0xff]  ;;  %v282_v56 = vld [vmem:[%s3454_s1 + $0x778] sm:$0xff]  ;;  %v217_v57 = vld [vmem:[%s3454_s1 + $0x570] sm:$0xff] }
  0x6b   :  { %535 = vmatprep.subr.mxu0 %v228_v33  ;;  %606 = vmatprep.subr.mxu1 %v292_v34  ;;  %v281_v58 = vld [vmem:[%s3454_s1 + $0x770] sm:$0xff]  ;;  %v216_v59 = vld [vmem:[%s3454_s1 + $0x568] sm:$0xff]  ;;  %v215_v61 = vld [vmem:[%s3454_s1 + $0x560] sm:$0xff] }
  0x6c   :  { %536 = vmatpush2.msra.mxu0 %v227_v35  ;;  %607 = vmatpush2.msra.mxu1 %v291_v36  ;;  %v280_v60 = vld [vmem:[%s3454_s1 + $0x768] sm:$0xff]  ;;  %v279_v62 = vld [vmem:[%s3454_s1 + $0x760] sm:$0xff]  ;;  %v214_v63 = vld [vmem:[%s3454_s1 + $0x558] sm:$0xff] }
  0x6d   :  { %537 = vmatprep.subr.mxu0 %v226_v37  ;;  %608 = vmatprep.subr.mxu1 %v290_v38  ;;  %v278_v0 = vld [vmem:[%s3454_s1 + $0x758] sm:$0xff]  ;;  %v213_v1 = vld [vmem:[%s3454_s1 + $0x550] sm:$0xff]  ;;  %v212_v3 = vld [vmem:[%s3454_s1 + $0x548] sm:$0xff] }
  0x6e   :  { %538 = vmatpush2.msra.mxu0 %v225_v39  ;;  %609 = vmatpush2.msra.mxu1 %v289_v41  ;;  %v277_v2 = vld [vmem:[%s3454_s1 + $0x750] sm:$0xff]  ;;  %v276_v4 = vld [vmem:[%s3454_s1 + $0x748] sm:$0xff]  ;;  %v211_v5 = vld [vmem:[%s3454_s1 + $0x540] sm:$0xff] }
  0x6f   :  { %539 = vmatprep.subr.mxu0 %v224_v42  ;;  %610 = vmatprep.subr.mxu1 %v288_v43  ;;  %v275_v6 = vld [vmem:[%s3454_s1 + $0x740] sm:$0xff]  ;;  %v210_v7 = vld [vmem:[%s3454_s1 + $0x538] sm:$0xff]  ;;  %v209_v9 = vld [vmem:[%s3454_s1 + $0x530] sm:$0xff] }
  0x70   :  { %540 = vmatpush2.msra.mxu0 %v223_v44  ;;  %611 = vmatpush2.msra.mxu1 %v287_v45  ;;  %v274_v8 = vld [vmem:[%s3454_s1 + $0x738] sm:$0xff]  ;;  %v273_v10 = vld [vmem:[%s3454_s1 + $0x730] sm:$0xff]  ;;  %v208_v11 = vld [vmem:[%s3454_s1 + $0x528] sm:$0xff] }
  0x71   :  { %541 = vmatprep.subr.mxu0 %v222_v46  ;;  %612 = vmatprep.subr.mxu1 %v286_v47  ;;  %v272_v12 = vld [vmem:[%s3454_s1 + $0x728] sm:$0xff]  ;;  %v207_v13 = vld [vmem:[%s3454_s1 + $0x520] sm:$0xff]  ;;  %v206_v15 = vld [vmem:[%s3454_s1 + $0x518] sm:$0xff] }
  0x72   :  { %542 = vmatpush2.msra.mxu0 %v221_v49  ;;  %613 = vmatpush2.msra.mxu1 %v285_v50  ;;  %v271_v14 = vld [vmem:[%s3454_s1 + $0x720] sm:$0xff]  ;;  %v270_v16 = vld [vmem:[%s3454_s1 + $0x718] sm:$0xff]  ;;  %v205_v17 = vld [vmem:[%s3454_s1 + $0x510] sm:$0xff] }
  0x73   :  { %543 = vmatprep.subr.mxu0 %v220_v51  ;;  %614 = vmatprep.subr.mxu1 %v284_v52  ;;  %v269_v18 = vld [vmem:[%s3454_s1 + $0x710] sm:$0xff]  ;;  %v204_v19 = vld [vmem:[%s3454_s1 + $0x508] sm:$0xff]  ;;  %v203_v22 = vld [vmem:[%s3454_s1 + $0x500] sm:$0xff] }
  0x74   :  { %544 = vmatpush2.msra.mxu0 %v219_v53  ;;  %615 = vmatpush2.msra.mxu1 %v283_v54  ;;  %v268_v20 = vld [vmem:[%s3454_s1 + $0x708] sm:$0xff]  ;;  %v267_v25 = vld [vmem:[%s3454_s1 + $0x700] sm:$0xff]  ;;  %v672_v26 = vld [vmem:[%s3456_s3 + $0xf8] sm:$0xff] }
  0x75   :  { %545 = vmatprep.subr.mxu0 %v218_v55  ;;  %616 = vmatprep.subr.mxu1 %v282_v56  ;;  %v656_v27 = vld [vmem:[%s3456_s3 + $0x78] sm:$0xff]  ;;  %v671_v28 = vld [vmem:[%s3456_s3 + $0xf0] sm:$0xff]  ;;  %v669_v30 = vld [vmem:[%s3456_s3 + $0xe0] sm:$0xff] }
  0x76   :  { %546 = vmatpush2.msra.mxu0 %v217_v57  ;;  %617 = vmatpush2.msra.mxu1 %v281_v58  ;;  %v655_v29 = vld [vmem:[%s3456_s3 + $0x70] sm:$0xff]  ;;  %v653_v31 = vld [vmem:[%s3456_s3 + $0x60] sm:$0xff]  ;;  %v668_v32 = vld [vmem:[%s3456_s3 + $0xd8] sm:$0xff] }
  0x77   :  { %547 = vmatprep.subr.mxu0 %v216_v59  ;;  %618 = vmatprep.subr.mxu1 %v280_v60  ;;  %v652_v33 = vld [vmem:[%s3456_s3 + $0x58] sm:$0xff]  ;;  %v667_v34 = vld [vmem:[%s3456_s3 + $0xd0] sm:$0xff]  ;;  %v666_v36 = vld [vmem:[%s3456_s3 + $0xc8] sm:$0xff]  ;;  %v2618_v59 = vsub.s32 0, %v1980_v23 }
  0x78   :  { %548 = vmatpush2.msra.mxu0 %v215_v61  ;;  %619 = vmatpush2.msra.mxu1 %v279_v62  ;;  %v651_v35 = vld [vmem:[%s3456_s3 + $0x50] sm:$0xff]  ;;  %v650_v37 = vld [vmem:[%s3456_s3 + $0x48] sm:$0xff]  ;;  %v665_v38 = vld [vmem:[%s3456_s3 + $0xc0] sm:$0xff]  ;;  %v2624_v61 = vsub.s32 1, %v1980_v23 }
  0x79   :  { %549 = vmatprep.subr.mxu0 %v214_v63  ;;  %620 = vmatprep.subr.mxu1 %v278_v0  ;;  %v649_v39 = vld [vmem:[%s3456_s3 + $0x40] sm:$0xff]  ;;  %v664_v41 = vld [vmem:[%s3456_s3 + $0xb8] sm:$0xff]  ;;  %v663_v43 = vld [vmem:[%s3456_s3 + $0xb0] sm:$0xff] }
  0x7a   :  { %550 = vmatpush2.msra.mxu0 %v213_v1  ;;  %621 = vmatpush2.msra.mxu1 %v277_v2  ;;  %v648_v42 = vld [vmem:[%s3456_s3 + $0x38] sm:$0xff]  ;;  %v647_v44 = vld [vmem:[%s3456_s3 + $0x30] sm:$0xff]  ;;  %v662_v45 = vld [vmem:[%s3456_s3 + $0xa8] sm:$0xff] }
  0x7b   :  { %551 = vmatprep.subr.mxu0 %v212_v3  ;;  %622 = vmatprep.subr.mxu1 %v276_v4  ;;  %v646_v46 = vld [vmem:[%s3456_s3 + $0x28] sm:$0xff]  ;;  %v661_v47 = vld [vmem:[%s3456_s3 + $0xa0] sm:$0xff]  ;;  %v660_v50 = vld [vmem:[%s3456_s3 + $0x98] sm:$0xff] }
  0x7c   :  { %552 = vmatpush2.msra.mxu0 %v211_v5  ;;  %623 = vmatpush2.msra.mxu1 %v275_v6  ;;  %v645_v49 = vld [vmem:[%s3456_s3 + $0x20] sm:$0xff]  ;;  %v644_v51 = vld [vmem:[%s3456_s3 + $0x18] sm:$0xff]  ;;  %v659_v52 = vld [vmem:[%s3456_s3 + $0x90] sm:$0xff] }
  0x7d   :  { %553 = vmatprep.subr.mxu0 %v210_v7  ;;  %624 = vmatprep.subr.mxu1 %v274_v8  ;;  %v643_v53 = vld [vmem:[%s3456_s3 + $0x10] sm:$0xff]  ;;  %v658_v54 = vld [vmem:[%s3456_s3 + $0x88] sm:$0xff]  ;;  %v657_v56 = vld [vmem:[%s3456_s3 + $0x80] sm:$0xff] }
  0x7e   :  { %554 = vmatpush2.msra.mxu0 %v209_v9  ;;  %625 = vmatpush2.msra.mxu1 %v273_v10  ;;  %v642_v55 = vld [vmem:[%s3456_s3 + $0x8] sm:$0xff]  ;;  %v641_v57 = vld [vmem:[%s3456_s3] sm:$0xff] }
  0x7f   :  { %555 = vmatprep.subr.mxu0 %v208_v11  ;;  %626 = vmatprep.subr.mxu1 %v272_v12  ;;  %v760_v58 = vld [vmem:[%s3458_s5] sm:$0x3] }
  0x80   :  { %556 = vmatpush2.msra.mxu0 %v207_v13  ;;  %627 = vmatpush2.msra.mxu1 %v271_v14  ;;  %v299_v60 = vld [vmem:[%s3455_s2] sm:$0x3] }
  0x81   :  { %557 = vmatprep.subr.mxu0 %v206_v15  ;;  %628 = vmatprep.subr.mxu1 %v270_v16  ;;  %v304_v63 = vrot.slane %v299_v60, %v2618_v59  ;;  %v308_v0 = vrot.slane %v299_v60, %v2624_v61  ;;  %v898_v60 = vld [vmem:[%s3461_s8 + $0xd8] sm:$0xff] }
  0x82   :  { %558 = vmatpush2.msra.mxu0 %v205_v17  ;;  %629 = vmatpush2.msra.mxu1 %v269_v18  ;;  %v774_v18 = vld [vmem:[%s3459_s6 + $0x18] sm:$0x3] }
  0x83   :  { %559 = vmatprep.subr.mxu0 %v204_v19  ;;  %630 = vmatprep.subr.mxu1 %v268_v20  ;;  %v773_v19 = vld [vmem:[%s3459_s6 + $0x10] sm:$0x3]  ;;  %v772_v20 = vld [vmem:[%s3459_s6 + $0x8] sm:$0xff] }
  0x84   :  { %560 = vmatpush2.msra.mxu0 %v203_v22  ;;  %561 = vmatprep.mubr.f32.mxu0 %v345_v21  ;;  %v1560_v22 = vld [vmem:[%s3457_s4] ss:$0 sm:$0xff] }
  0x85   :  { %631 = vmatpush2.msra.mxu1 %v267_v25  ;;  %632 = vmatprep.mubr.f32.mxu1 %v346_v24 }
  0x86   :  { %562 = vmatmul.mubr.f32.vlgmr.msra.gmra.mxu0 %v2025_v40  ;;  %633 = vmatmul.mubr.f32.vlgmr.msra.gmra.mxu1 %v2046_v48  ;;  %v670_v40 = vld [vmem:[%s3456_s3 + $0xe8] sm:$0xff] }
  0x87   :  { %1568 = vmatprep.subr.mxu0 %v672_v26  ;;  %v654_v48 = vld [vmem:[%s3456_s3 + $0x68] sm:$0xff]  ;;  %762 = vrot.lane.b32.xlu0 %v760_v58, %s1657_s18  ;;  %v905_v58 = vld [vmem:[%s3461_s8 + $0x110] sm:$0xff] }
  0x88   :  { %1569 = vmatpush3.msra.mxu0 %v656_v27  ;;  %1561 = vmatprep.subr.msk.mxu1 %vm791_vm0, %v774_v18  ;;  %v1073_v18 = vld [vmem:[%s3461_s8 + $0x650] sm:$0xff] }
  0x89   :  { %1570 = vmatprep.subr.mxu0 %v671_v28  ;;  %1562 = vmatpush1.msk.msra.mxu1 %vm791_vm0, %v773_v19  ;;  %v1066_v19 = vld [vmem:[%s3461_s8 + $0x618] sm:$0xff] }
  0x8a   :  { %1571 = vmatpush3.msra.mxu0 %v655_v29  ;;  %828 = vmatprep.subr.mxu1 %v772_v20  ;;  %v771_v29 = vld [vmem:[%s3459_s6] sm:$0xff]  ;;  %v1065_v20 = vld [vmem:[%s3461_s8 + $0x610] sm:$0xff]  ;;  %s1661_s6 = smov [#allocation4]  }
  0x8b   :  { %1572 = vmatprep.subr.mxu0 %v670_v40  ;;  %829 = vmatpush1.msra.mxu1 %v771_v29  ;;  %v1659_v40 = vmov 0.0   ;;  %v1034_v29 = vld [vmem:[%s3461_s8 + $0x518] sm:$0xff] }
  0x8c   :  { %1573 = vmatpush3.msra.mxu0 %v654_v48  ;;  %862 = vmatprep.mubr.f32.mxu1 %v1659_v40  ;;  %v992_v48 = vld [vmem:[%s3461_s8 + $0x3c8] sm:$0xff]  ;;  %v1033_v40 = vld [vmem:[%s3461_s8 + $0x510] sm:$0xff] }
  0x8d   :  { %1574 = vmatprep.subr.mxu0 %v669_v30  ;;  %v994_v30 = vld [vmem:[%s3461_s8 + $0x3d8] sm:$0xff]  ;;  %1169 = vmatprep.subr.mxu1 %v992_v48 }
  0x8e   :  { %1575 = vmatpush3.msra.mxu0 %v653_v31  ;;  %v993_v31 = vld [vmem:[%s3461_s8 + $0x3d0] sm:$0xff]  ;;  %v1026_v48 = vld [vmem:[%s3461_s8 + $0x4d8] sm:$0xff] }
  0x8f   :  { %1576 = vmatprep.subr.mxu0 %v668_v32  ;;  %v986_v32 = vld [vmem:[%s3461_s8 + $0x398] sm:$0xff] }
  0x90   :  { %1577 = vmatpush3.msra.mxu0 %v652_v33  ;;  %v985_v33 = vld [vmem:[%s3461_s8 + $0x390] sm:$0xff] }
  0x91   :  { %1578 = vmatprep.subr.mxu0 %v667_v34  ;;  %v978_v34 = vld [vmem:[%s3461_s8 + $0x358] sm:$0xff] }
  0x92   :  { %1579 = vmatpush3.msra.mxu0 %v651_v35  ;;  %v977_v35 = vld [vmem:[%s3461_s8 + $0x350] sm:$0xff] }
  0x93   :  { %1580 = vmatprep.subr.mxu0 %v666_v36 }
  0x94   :  { %1581 = vmatpush3.msra.mxu0 %v650_v37  ;;  %v970_v37 = vld [vmem:[%s3461_s8 + $0x318] sm:$0xff] }
  0x95   :  { %1582 = vmatprep.subr.mxu0 %v665_v38  ;;  %v969_v38 = vld [vmem:[%s3461_s8 + $0x310] sm:$0xff] }
  0x96   :  { %1583 = vmatpush3.msra.mxu0 %v649_v39 }
  0x97   :  { %1584 = vmatprep.subr.mxu0 %v664_v41  ;;  %v962_v41 = vld [vmem:[%s3461_s8 + $0x2d8] sm:$0xff] }
  0x98   :  { %1585 = vmatpush3.msra.mxu0 %v648_v42 }
  0x99   :  { %1586 = vmatprep.subr.mxu0 %v663_v43  ;;  %v961_v43 = vld [vmem:[%s3461_s8 + $0x2d0] sm:$0xff] }
  0x9a   :  { %1587 = vmatpush3.msra.mxu0 %v647_v44  ;;  %v954_v44 = vld [vmem:[%s3461_s8 + $0x298] sm:$0xff] }
  0x9b   :  { %1588 = vmatprep.subr.mxu0 %v662_v45  ;;  %v953_v45 = vld [vmem:[%s3461_s8 + $0x290] sm:$0xff] }
  0x9c   :  { %1589 = vmatpush3.msra.mxu0 %v646_v46  ;;  %v946_v46 = vld [vmem:[%s3461_s8 + $0x258] sm:$0xff] }
  0x9d   :  { %1590 = vmatprep.subr.mxu0 %v661_v47  ;;  %v945_v47 = vld [vmem:[%s3461_s8 + $0x250] sm:$0xff] }
  0x9e   :  { %1591 = vmatpush3.msra.mxu0 %v645_v49  ;;  %v938_v49 = vld [vmem:[%s3461_s8 + $0x218] sm:$0xff] }
  0x9f   :  { %1592 = vmatprep.subr.mxu0 %v660_v50  ;;  %v937_v50 = vld [vmem:[%s3461_s8 + $0x210] sm:$0xff] }
  0xa0   :  { %1593 = vmatpush3.msra.mxu0 %v644_v51  ;;  %v930_v51 = vld [vmem:[%s3461_s8 + $0x1d8] sm:$0xff] }
  0xa1   :  { %1594 = vmatprep.subr.mxu0 %v659_v52  ;;  %v929_v52 = vld [vmem:[%s3461_s8 + $0x1d0] sm:$0xff] }
  0xa2   :  { %1595 = vmatpush3.msra.mxu0 %v643_v53  ;;  %v922_v53 = vld [vmem:[%s3461_s8 + $0x198] sm:$0xff] }
  0xa3   :  { %1596 = vmatprep.subr.mxu0 %v658_v54  ;;  %v921_v54 = vld [vmem:[%s3461_s8 + $0x190] sm:$0xff] }
  0xa4   :  { %1597 = vmatpush3.msra.mxu0 %v642_v55  ;;  %v914_v55 = vld [vmem:[%s3461_s8 + $0x158] sm:$0xff] }
  0xa5   :  { %1598 = vmatprep.subr.mxu0 %v657_v56  ;;  %v913_v56 = vld [vmem:[%s3461_s8 + $0x150] sm:$0xff] }
  0xa6   :  { %1599 = vmatpush3.msra.mxu0 %v641_v57  ;;  %v906_v57 = vld [vmem:[%s3461_s8 + $0x118] sm:$0xff] }
  0xa7   :  { %1240 = vmatprep.subr.mxu0 %v994_v30 }
  0xf9   :  { %v763_v36 = vpop.permute.xlu0 %762 }
 0x103   :  { %v421_v62 = vpop.f32.mrf.mxu0 }
 0x104   :  { %v422_v3 = vadd.f32 %v421_v62, %v304_v63  ;;  %v897_v62 = vld [vmem:[%s3461_s8 + $0xd0] sm:$0xff]  ;;  %v890_v63 = vld [vmem:[%s3461_s8 + $0x98] sm:$0xff] }
 0x105   :  { %v492_v1 = vpop.f32.mrf.mxu1  ;;  %v423_v2 = vpop.f32.mrf.mxu0 }
 0x106   :  { %v424_v4 = vadd.f32 %v423_v2, %v308_v0  ;;  %v493_v6 = vadd.f32 %v492_v1, %v422_v3  ;;  %v889_v0 = vld [vmem:[%s3461_s8 + $0x90] sm:$0xff]  ;;  %v882_v1 = vld [vmem:[%s3461_s8 + $0x58] sm:$0xff] }
 0x107   :  { %v494_v5 = vpop.f32.mrf.mxu1  ;;  %v881_v2 = vld [vmem:[%s3461_s8 + $0x50] sm:$0xff]  ;;  %v874_v3 = vld [vmem:[%s3461_s8 + $0x18] sm:$0xff] }
 0x108   :  { %v495_v9 = vadd.f32 %v494_v5, %v424_v4  ;;  %v873_v4 = vld [vmem:[%s3461_s8 + $0x10] sm:$0xff]  ;;  %v1122_v5 = vld [vmem:[%s3461_s8 + $0x7d8] sm:$0xff] }
 0x146   :  { %v563_v7 = vpop.f32.mrf.mxu0  ;;  %v634_v8 = vpop.f32.mrf.mxu1 }
 0x147   :  { %v564_v10 = vadd.f32 %v563_v7, %v493_v6  ;;  %v1121_v6 = vld [vmem:[%s3461_s8 + $0x7d0] sm:$0xff]  ;;  %v1114_v7 = vld [vmem:[%s3461_s8 + $0x798] sm:$0xff] }
 0x148   :  { %v565_v11 = vpop.f32.mrf.mxu0  ;;  %v636_v14 = vpop.f32.mrf.mxu1 }
 0x149   :  { %v566_v12 = vadd.f32 %v565_v11, %v495_v9  ;;  %v635_v13 = vadd.f32 %v634_v8, %v564_v10  ;;  %v1113_v8 = vld [vmem:[%s3461_s8 + $0x790] sm:$0xff]  ;;  %v1106_v9 = vld [vmem:[%s3461_s8 + $0x758] sm:$0xff] }
 0x14a   :  { %v1105_v10 = vld [vmem:[%s3461_s8 + $0x750] sm:$0xff]  ;;  %v1098_v11 = vld [vmem:[%s3461_s8 + $0x718] sm:$0xff] }
 0x14b   :  { %v637_v15 = vadd.f32 %v636_v14, %v566_v12  ;;  %v639_v17 = vmax.f32 %v635_v13, 0.0  ;;  %v1097_v12 = vld [vmem:[%s3461_s8 + $0x710] sm:$0xff]  ;;  %v1090_v13 = vld [vmem:[%s3461_s8 + $0x6d8] sm:$0xff] }
 0x14c   :  { %v1089_v14 = vld [vmem:[%s3461_s8 + $0x6d0] sm:$0xff] }
 0x14d   :  { %v640_v16 = vmax.f32 %v637_v15, 0.0  ;;  %v1082_v15 = vld [vmem:[%s3461_s8 + $0x698] sm:$0xff] }
 0x14f   :  { %744 = vmatprep.mubr.f32.mxu0 %v640_v16  ;;  %v1081_v16 = vld [vmem:[%s3461_s8 + $0x690] sm:$0xff] }
 0x150   :  { %745 = vmatmul.mubr.f32.vlgmr.msra.gmra.mxu0 %v639_v17  ;;  %v1074_v17 = vld [vmem:[%s3461_s8 + $0x658] sm:$0xff] }
 0x151   :  { %1241 = vmatpush1.msra.mxu0 %v993_v31 }
 0x152   :  { %1242 = vmatprep.subr.mxu0 %v986_v32 }
 0x153   :  { %1243 = vmatpush1.msra.mxu0 %v985_v33  ;;  %v991_v33 = vld [vmem:[%s3461_s8 + $0x3c0] sm:$0xff] }
 0x154   :  { %1244 = vmatprep.subr.mxu0 %v978_v34  ;;  %v984_v34 = vld [vmem:[%s3461_s8 + $0x388] sm:$0xff] }
 0x155   :  { %1245 = vmatpush1.msra.mxu0 %v977_v35  ;;  %v983_v35 = vld [vmem:[%s3461_s8 + $0x380] sm:$0xff] }
 0x156   :  { %1246 = vmatprep.subr.mxu0 %v970_v37  ;;  %v968_v37 = vld [vmem:[%s3461_s8 + $0x308] sm:$0xff] }
 0x157   :  { %1247 = vmatpush1.msra.mxu0 %v969_v38  ;;  %v967_v38 = vld [vmem:[%s3461_s8 + $0x300] sm:$0xff] }
 0x158   :  { %1248 = vmatprep.subr.mxu0 %v962_v41  ;;  %v959_v41 = vld [vmem:[%s3461_s8 + $0x2c0] sm:$0xff] }
 0x159   :  { %1249 = vmatpush1.msra.mxu0 %v961_v43  ;;  %v951_v43 = vld [vmem:[%s3461_s8 + $0x280] sm:$0xff] }
 0x15a   :  { %1250 = vmatprep.subr.mxu0 %v954_v44  ;;  %v944_v44 = vld [vmem:[%s3461_s8 + $0x248] sm:$0xff] }
 0x15b   :  { %1251 = vmatpush1.msra.mxu0 %v953_v45  ;;  %v943_v45 = vld [vmem:[%s3461_s8 + $0x240] sm:$0xff] }
 0x15c   :  { %1252 = vmatprep.subr.mxu0 %v946_v46  ;;  %v936_v46 = vld [vmem:[%s3461_s8 + $0x208] sm:$0xff] }
 0x15d   :  { %1253 = vmatpush1.msra.mxu0 %v945_v47  ;;  %v935_v47 = vld [vmem:[%s3461_s8 + $0x200] sm:$0xff] }
 0x15e   :  { %1254 = vmatprep.subr.mxu0 %v938_v49  ;;  %v928_v49 = vld [vmem:[%s3461_s8 + $0x1c8] sm:$0xff] }
 0x15f   :  { %1255 = vmatpush1.msra.mxu0 %v937_v50  ;;  %v927_v50 = vld [vmem:[%s3461_s8 + $0x1c0] sm:$0xff] }
 0x160   :  { %1256 = vmatprep.subr.mxu0 %v930_v51  ;;  %v920_v51 = vld [vmem:[%s3461_s8 + $0x188] sm:$0xff] }
 0x161   :  { %1257 = vmatpush1.msra.mxu0 %v929_v52  ;;  %v919_v52 = vld [vmem:[%s3461_s8 + $0x180] sm:$0xff] }
 0x162   :  { %1258 = vmatprep.subr.mxu0 %v922_v53  ;;  %v912_v53 = vld [vmem:[%s3461_s8 + $0x148] sm:$0xff] }
 0x163   :  { %1259 = vmatpush1.msra.mxu0 %v921_v54  ;;  %v911_v54 = vld [vmem:[%s3461_s8 + $0x140] sm:$0xff] }
 0x164   :  { %1260 = vmatprep.subr.mxu0 %v914_v55  ;;  %v904_v55 = vld [vmem:[%s3461_s8 + $0x108] sm:$0xff] }
 0x165   :  { %1261 = vmatpush1.msra.mxu0 %v913_v56  ;;  %v903_v56 = vld [vmem:[%s3461_s8 + $0x100] sm:$0xff] }
 0x166   :  { %1262 = vmatprep.subr.mxu0 %v906_v57  ;;  %v896_v57 = vld [vmem:[%s3461_s8 + $0xc8] sm:$0xff] }
 0x167   :  { %1263 = vmatpush1.msra.mxu0 %v905_v58  ;;  %v895_v58 = vld [vmem:[%s3461_s8 + $0xc0] sm:$0xff] }
 0x168   :  { %1264 = vmatprep.subr.mxu0 %v898_v60  ;;  %v888_v60 = vld [vmem:[%s3461_s8 + $0x88] sm:$0xff] }
 0x169   :  { %1265 = vmatpush1.msra.mxu0 %v897_v62  ;;  %v887_v62 = vld [vmem:[%s3461_s8 + $0x80] sm:$0xff] }
 0x16a   :  { %1266 = vmatprep.subr.mxu0 %v890_v63  ;;  %v880_v63 = vld [vmem:[%s3461_s8 + $0x48] sm:$0xff] }
 0x16b   :  { %1267 = vmatpush1.msra.mxu0 %v889_v0  ;;  %v879_v0 = vld [vmem:[%s3461_s8 + $0x40] sm:$0xff] }
 0x16c   :  { %1268 = vmatprep.subr.mxu0 %v882_v1  ;;  %v872_v1 = vld [vmem:[%s3461_s8 + $0x8] sm:$0xff] }
 0x16d   :  { %1269 = vmatpush1.msra.mxu0 %v881_v2  ;;  %v871_v2 = vld [vmem:[%s3461_s8] sm:$0xff] }
 0x16e   :  { %1270 = vmatprep.subr.mxu0 %v874_v3  ;;  %v1120_v3 = vld [vmem:[%s3461_s8 + $0x7c8] sm:$0xff] }
 0x16f   :  { %1271 = vmatpush1.msra.mxu0 %v873_v4  ;;  %v1119_v4 = vld [vmem:[%s3461_s8 + $0x7c0] sm:$0xff] }
 0x170   :  { %1272 = vmatprep.subr.mxu0 %v1122_v5  ;;  %v1112_v5 = vld [vmem:[%s3461_s8 + $0x788] sm:$0xff] }
 0x171   :  { %1273 = vmatpush2.msra.mxu0 %v1121_v6  ;;  %v1111_v6 = vld [vmem:[%s3461_s8 + $0x780] sm:$0xff] }
 0x172   :  { %1274 = vmatprep.subr.mxu0 %v1114_v7  ;;  %v1104_v7 = vld [vmem:[%s3461_s8 + $0x748] sm:$0xff] }
 0x173   :  { %1275 = vmatpush2.msra.mxu0 %v1113_v8  ;;  %v1103_v8 = vld [vmem:[%s3461_s8 + $0x740] sm:$0xff] }
 0x174   :  { %1276 = vmatprep.subr.mxu0 %v1106_v9  ;;  %v1096_v9 = vld [vmem:[%s3461_s8 + $0x708] sm:$0xff] }
 0x175   :  { %1277 = vmatpush2.msra.mxu0 %v1105_v10  ;;  %v1095_v10 = vld [vmem:[%s3461_s8 + $0x700] sm:$0xff] }
 0x176   :  { %1278 = vmatprep.subr.mxu0 %v1098_v11  ;;  %v1088_v11 = vld [vmem:[%s3461_s8 + $0x6c8] sm:$0xff] }
 0x177   :  { %1279 = vmatpush2.msra.mxu0 %v1097_v12  ;;  %v1087_v12 = vld [vmem:[%s3461_s8 + $0x6c0] sm:$0xff] }
 0x178   :  { %1280 = vmatprep.subr.mxu0 %v1090_v13  ;;  %v1080_v13 = vld [vmem:[%s3461_s8 + $0x688] sm:$0xff] }
 0x179   :  { %1281 = vmatpush2.msra.mxu0 %v1089_v14  ;;  %v1079_v14 = vld [vmem:[%s3461_s8 + $0x680] sm:$0xff] }
 0x17a   :  { %1282 = vmatprep.subr.mxu0 %v1082_v15  ;;  %v1072_v15 = vld [vmem:[%s3461_s8 + $0x648] sm:$0xff] }
 0x17b   :  { %1283 = vmatpush2.msra.mxu0 %v1081_v16  ;;  %v1071_v16 = vld [vmem:[%s3461_s8 + $0x640] sm:$0xff] }
 0x17c   :  { %1284 = vmatprep.subr.mxu0 %v1074_v17  ;;  %v1064_v17 = vld [vmem:[%s3461_s8 + $0x608] sm:$0xff] }
 0x17d   :  { %1285 = vmatpush2.msra.mxu0 %v1073_v18  ;;  %v1063_v18 = vld [vmem:[%s3461_s8 + $0x600] sm:$0xff] }
 0x17e   :  { %1286 = vmatprep.subr.mxu0 %v1066_v19  ;;  %v1056_v19 = vld [vmem:[%s3461_s8 + $0x5c8] sm:$0xff] }
 0x17f   :  { %1287 = vmatpush2.msra.mxu0 %v1065_v20  ;;  %v1055_v20 = vld [vmem:[%s3461_s8 + $0x5c0] sm:$0xff] }
 0x210   :  { %v1600_v21 = vpop.f32.mrf.mxu0 }
 0x212   :  { %v1601_v24 = vpop.f32.mrf.mxu0 }
 0x213   :  { %v1602_v25 = vadd.f32 %v1601_v24, %v1600_v21  ;;  %v1058_v21 = vld [vmem:[%s3461_s8 + $0x5d8] sm:$0xff] }
 0x214   :  { %1288 = vmatprep.subr.mxu0 %v1058_v21  ;;  %v1050_v24 = vld [vmem:[%s3461_s8 + $0x598] sm:$0xff]  ;;  %v1048_v21 = vld [vmem:[%s3461_s8 + $0x588] sm:$0xff] }
 0x215   :  { %v2640_v26 = vadd.f32 %v1602_v25, %v1560_v22  ;;  %v1057_v22 = vld [vmem:[%s3461_s8 + $0x5d0] sm:$0xff] }
 0x216   :  { %1289 = vmatpush2.msra.mxu0 %v1057_v22  ;;  %v1049_v25 = vld [vmem:[%s3461_s8 + $0x590] sm:$0xff]  ;;  %v1047_v22 = vld [vmem:[%s3461_s8 + $0x580] sm:$0xff] }
 0x217   :  { %v757_v27 = vmul.f32 0.5, %v2640_v26  ;;  %753 = vrot.lane.b32.xlu1 %v2640_v26, %s1658_s26  ;;  %751 = vst.msk [vmem:[#allocation2] sm:$0x3] %vm750_vm1, %v2640_v26  ;;  %1290 = vmatprep.subr.mxu0 %v1050_v24  ;;  %v1040_v24 = vld [vmem:[%s3461_s8 + $0x548] sm:$0xff] }
 0x218   :  { %1291 = vmatpush2.msra.mxu0 %v1049_v25  ;;  %v1039_v25 = vld [vmem:[%s3461_s8 + $0x540] sm:$0xff] }
 0x219   :  { %v758_v28 = vmul.f32 1.442695, %v757_v27  ;;  %v1042_v27 = vld [vmem:[%s3461_s8 + $0x558] sm:$0xff] }
 0x21a   :  { %1292 = vmatprep.subr.mxu0 %v1042_v27  ;;  %v1032_v27 = vld [vmem:[%s3461_s8 + $0x508] sm:$0xff] }
 0x21b   :  { %1610 = vpow2.f32 %v758_v28  ;;  %v1041_v28 = vld [vmem:[%s3461_s8 + $0x550] sm:$0xff] }
 0x21c   :  { %1293 = vmatpush2.msra.mxu0 %v1041_v28  ;;  %v1031_v28 = vld [vmem:[%s3461_s8 + $0x500] sm:$0xff] }
 0x21d   :  { %1294 = vmatprep.subr.mxu0 %v1034_v29  ;;  %v1024_v29 = vld [vmem:[%s3461_s8 + $0x4c8] sm:$0xff] }
 0x21e   :  { %1295 = vmatpush2.msra.mxu0 %v1033_v40  ;;  %v1023_v40 = vld [vmem:[%s3461_s8 + $0x4c0] sm:$0xff] }
 0x21f   :  { %1296 = vmatprep.subr.mxu0 %v1026_v48  ;;  %v1025_v48 = vld [vmem:[%s3461_s8 + $0x4d0] sm:$0xff] }
 0x220   :  { %1297 = vmatpush2.msra.mxu0 %v1025_v48  ;;  %v925_v48 = vld [vmem:[%s3461_s8 + $0x1b0] sm:$0xff] }
 0x228   :  { %v1611_v39 = vpop.eup %1610 }
 0x229   :  { %v765_v42 = vmul.f32 %v1611_v39, %v763_v36  ;;  %v976_v36 = vld [vmem:[%s3461_s8 + $0x348] sm:$0xff] }
 0x22a   :  { %v960_v39 = vld [vmem:[%s3461_s8 + $0x2c8] sm:$0xff] }
 0x22b   :  { %767 = vrot.lane.b32.xlu0 %v765_v42, %s1658_s26  ;;  %v952_v42 = vld [vmem:[%s3461_s8 + $0x288] sm:$0xff]  ;;  %s1544_s26 = sshll.u32 %s1661_s6, 4  ;;  %s1545_s26 = int_to_ptr.vmem [resolvable:$true] %s1544_s26 }
 0x289   :  { %v754_v30 = vpop.permute.xlu1 %753 }
 0x28a   :  { %756 = vst.msk [vmem:[#allocation4] sm:$0x3] %vm750_vm1, %v754_v30  ;;  %v1016_v30 = vld [vmem:[%s3461_s8 + $0x488] sm:$0xff] }
 0x29d   :  { %v768_v31 = vpop.permute.xlu0 %767 }
 0x29e   :  { %v770_v32 = vadd.f32 %v768_v31, %v2640_v26  ;;  %v975_v26 = vld [vmem:[%s3461_s8 + $0x340] sm:$0xff]  ;;  %v1018_v31 = vld [vmem:[%s3461_s8 + $0x498] sm:$0xff] }
 0x29f   :  { %1298 = vmatprep.subr.mxu0 %v1018_v31  ;;  %v918_v31 = vld [vmem:[%s3461_s8 + $0x178] sm:$0xff] }
 0x2a0   :  { %1563 = vmatmul.mubr.msk.f32.vlgmr.msra.gmra.mxu1 %vm787_vm2, %v770_v32  ;;  %v1015_v32 = vld [vmem:[%s3461_s8 + $0x480] sm:$0xff] }
 0x2a1   :  { %1170 = vmatpush1.msra.mxu1 %v991_v33  ;;  %v1017_v33 = vld [vmem:[%s3461_s8 + $0x490] sm:$0xff] }
 0x2a2   :  { %1171 = vmatprep.subr.mxu1 %v984_v34  ;;  %1299 = vmatpush2.msra.mxu0 %v1017_v33  ;;  %v1008_v34 = vld [vmem:[%s3461_s8 + $0x448] sm:$0xff]  ;;  %v917_v33 = vld [vmem:[%s3461_s8 + $0x170] sm:$0xff] }
 0x2a3   :  { %1172 = vmatpush1.msra.mxu1 %v983_v35  ;;  %v1010_v35 = vld [vmem:[%s3461_s8 + $0x458] sm:$0xff] }
 0x2a4   :  { %1173 = vmatprep.subr.mxu1 %v976_v36  ;;  %1300 = vmatprep.subr.mxu0 %v1010_v35  ;;  %v1007_v36 = vld [vmem:[%s3461_s8 + $0x440] sm:$0xff]  ;;  %v910_v35 = vld [vmem:[%s3461_s8 + $0x138] sm:$0xff] }
 0x2a5   :  { %1174 = vmatpush1.msra.mxu1 %v975_v26  ;;  %v1009_v26 = vld [vmem:[%s3461_s8 + $0x450] sm:$0xff] }
 0x2a6   :  { %1175 = vmatprep.subr.mxu1 %v968_v37  ;;  %1301 = vmatpush2.msra.mxu0 %v1009_v26  ;;  %v1000_v37 = vld [vmem:[%s3461_s8 + $0x408] sm:$0xff]  ;;  %v909_v26 = vld [vmem:[%s3461_s8 + $0x130] sm:$0xff] }
 0x2a7   :  { %1176 = vmatpush1.msra.mxu1 %v967_v38  ;;  %v1002_v38 = vld [vmem:[%s3461_s8 + $0x418] sm:$0xff] }
 0x2a8   :  { %1177 = vmatprep.subr.mxu1 %v960_v39  ;;  %1302 = vmatprep.subr.mxu0 %v1002_v38  ;;  %v999_v39 = vld [vmem:[%s3461_s8 + $0x400] sm:$0xff]  ;;  %v902_v38 = vld [vmem:[%s3461_s8 + $0xf8] sm:$0xff] }
 0x2a9   :  { %1178 = vmatpush1.msra.mxu1 %v959_v41  ;;  %v1001_v41 = vld [vmem:[%s3461_s8 + $0x410] sm:$0xff] }
 0x2aa   :  { %1179 = vmatprep.subr.mxu1 %v952_v42  ;;  %1303 = vmatpush2.msra.mxu0 %v1001_v41  ;;  %v996_v42 = vld [vmem:[%s3461_s8 + $0x3e8] sm:$0xff]  ;;  %v901_v41 = vld [vmem:[%s3461_s8 + $0xf0] sm:$0xff] }
 0x2ab   :  { %1180 = vmatpush1.msra.mxu1 %v951_v43  ;;  %v998_v43 = vld [vmem:[%s3461_s8 + $0x3f8] sm:$0xff] }
 0x2ac   :  { %1181 = vmatprep.subr.mxu1 %v944_v44  ;;  %1382 = vmatprep.subr.mxu0 %v998_v43  ;;  %v775_v44 = vld [vmem:[%s3460_s7] sm:$0x3]  ;;  %v894_v43 = vld [vmem:[%s3461_s8 + $0xb8] sm:$0xff] }
 0x2ad   :  { %1182 = vmatpush1.msra.mxu1 %v943_v45  ;;  %v780_v45 = vrot.slane %v775_v44, %v2618_v59 }
 0x2ae   :  { %1183 = vmatprep.subr.mxu1 %v936_v46  ;;  %v784_v46 = vrot.slane %v775_v44, %v2624_v61  ;;  %v891_v44 = vld [vmem:[%s3461_s8 + $0xa0] sm:$0xff] }
 0x2af   :  { %1184 = vmatpush1.msra.mxu1 %v935_v47 }
 0x2b0   :  { %1185 = vmatprep.subr.mxu1 %v928_v49 }
 0x2b1   :  { %1186 = vmatpush1.msra.mxu1 %v927_v50 }
 0x2b2   :  { %1187 = vmatprep.subr.mxu1 %v920_v51 }
 0x2b3   :  { %1188 = vmatpush1.msra.mxu1 %v919_v52 }
 0x2b4   :  { %1189 = vmatprep.subr.mxu1 %v912_v53 }
 0x2b5   :  { %1190 = vmatpush1.msra.mxu1 %v911_v54  ;;  %v995_v54 = vld [vmem:[%s3461_s8 + $0x3e0] sm:$0xff] }
 0x2b6   :  { %1191 = vmatprep.subr.mxu1 %v904_v55  ;;  %v997_v55 = vld [vmem:[%s3461_s8 + $0x3f0] sm:$0xff] }
 0x2b7   :  { %1192 = vmatpush1.msra.mxu1 %v903_v56  ;;  %v988_v56 = vld [vmem:[%s3461_s8 + $0x3a8] sm:$0xff] }
 0x2b8   :  { %1193 = vmatprep.subr.mxu1 %v896_v57  ;;  %v990_v57 = vld [vmem:[%s3461_s8 + $0x3b8] sm:$0xff] }
 0x2b9   :  { %1194 = vmatpush1.msra.mxu1 %v895_v58  ;;  %v987_v58 = vld [vmem:[%s3461_s8 + $0x3a0] sm:$0xff] }
 0x2ba   :  { %1195 = vmatprep.subr.mxu1 %v888_v60  ;;  %v989_v60 = vld [vmem:[%s3461_s8 + $0x3b0] sm:$0xff] }
 0x2bb   :  { %1196 = vmatpush1.msra.mxu1 %v887_v62  ;;  %v980_v62 = vld [vmem:[%s3461_s8 + $0x368] sm:$0xff] }
 0x2bc   :  { %1197 = vmatprep.subr.mxu1 %v880_v63  ;;  %v982_v63 = vld [vmem:[%s3461_s8 + $0x378] sm:$0xff] }
 0x2bd   :  { %1198 = vmatpush1.msra.mxu1 %v879_v0  ;;  %v979_v0 = vld [vmem:[%s3461_s8 + $0x360] sm:$0xff] }
 0x2be   :  { %1199 = vmatprep.subr.mxu1 %v872_v1  ;;  %v981_v1 = vld [vmem:[%s3461_s8 + $0x370] sm:$0xff] }
 0x2bf   :  { %1200 = vmatpush1.msra.mxu1 %v871_v2  ;;  %v972_v2 = vld [vmem:[%s3461_s8 + $0x328] sm:$0xff] }
 0x2c0   :  { %1201 = vmatprep.subr.mxu1 %v1120_v3  ;;  %v974_v3 = vld [vmem:[%s3461_s8 + $0x338] sm:$0xff] }
 0x2c1   :  { %1202 = vmatpush2.msra.mxu1 %v1119_v4  ;;  %v971_v4 = vld [vmem:[%s3461_s8 + $0x320] sm:$0xff] }
 0x2c2   :  { %1203 = vmatprep.subr.mxu1 %v1112_v5  ;;  %v973_v5 = vld [vmem:[%s3461_s8 + $0x330] sm:$0xff] }
 0x2c3   :  { %1204 = vmatpush2.msra.mxu1 %v1111_v6  ;;  %v964_v6 = vld [vmem:[%s3461_s8 + $0x2e8] sm:$0xff] }
 0x2c4   :  { %1205 = vmatprep.subr.mxu1 %v1104_v7  ;;  %v966_v7 = vld [vmem:[%s3461_s8 + $0x2f8] sm:$0xff] }
 0x2c5   :  { %1206 = vmatpush2.msra.mxu1 %v1103_v8  ;;  %v963_v8 = vld [vmem:[%s3461_s8 + $0x2e0] sm:$0xff] }
 0x2c6   :  { %1207 = vmatprep.subr.mxu1 %v1096_v9  ;;  %v965_v9 = vld [vmem:[%s3461_s8 + $0x2f0] sm:$0xff] }
 0x2c7   :  { %1208 = vmatpush2.msra.mxu1 %v1095_v10  ;;  %v956_v10 = vld [vmem:[%s3461_s8 + $0x2a8] sm:$0xff] }
 0x2c8   :  { %1209 = vmatprep.subr.mxu1 %v1088_v11  ;;  %v958_v11 = vld [vmem:[%s3461_s8 + $0x2b8] sm:$0xff] }
 0x2c9   :  { %1210 = vmatpush2.msra.mxu1 %v1087_v12  ;;  %v955_v12 = vld [vmem:[%s3461_s8 + $0x2a0] sm:$0xff] }
 0x2ca   :  { %1211 = vmatprep.subr.mxu1 %v1080_v13  ;;  %v957_v13 = vld [vmem:[%s3461_s8 + $0x2b0] sm:$0xff] }
 0x2cb   :  { %1212 = vmatpush2.msra.mxu1 %v1079_v14  ;;  %v948_v14 = vld [vmem:[%s3461_s8 + $0x268] sm:$0xff] }
 0x2cc   :  { %1213 = vmatprep.subr.mxu1 %v1072_v15  ;;  %v950_v15 = vld [vmem:[%s3461_s8 + $0x278] sm:$0xff] }
 0x2cd   :  { %1214 = vmatpush2.msra.mxu1 %v1071_v16  ;;  %v947_v16 = vld [vmem:[%s3461_s8 + $0x260] sm:$0xff] }
 0x2ce   :  { %1215 = vmatprep.subr.mxu1 %v1064_v17  ;;  %v949_v17 = vld [vmem:[%s3461_s8 + $0x270] sm:$0xff] }
 0x2cf   :  { %1216 = vmatpush2.msra.mxu1 %v1063_v18  ;;  %v940_v18 = vld [vmem:[%s3461_s8 + $0x228] sm:$0xff] }
 0x2d0   :  { %1217 = vmatprep.subr.mxu1 %v1056_v19  ;;  %v942_v19 = vld [vmem:[%s3461_s8 + $0x238] sm:$0xff] }
 0x2d1   :  { %1218 = vmatpush2.msra.mxu1 %v1055_v20  ;;  %v939_v20 = vld [vmem:[%s3461_s8 + $0x220] sm:$0xff] }
 0x2d2   :  { %1219 = vmatprep.subr.mxu1 %v1048_v21  ;;  %v941_v21 = vld [vmem:[%s3461_s8 + $0x230] sm:$0xff] }
 0x2d3   :  { %1220 = vmatpush2.msra.mxu1 %v1047_v22  ;;  %v932_v22 = vld [vmem:[%s3461_s8 + $0x1e8] sm:$0xff] }
 0x2d4   :  { %1221 = vmatprep.subr.mxu1 %v1040_v24  ;;  %v934_v24 = vld [vmem:[%s3461_s8 + $0x1f8] sm:$0xff] }
 0x2d5   :  { %1222 = vmatpush2.msra.mxu1 %v1039_v25  ;;  %v931_v25 = vld [vmem:[%s3461_s8 + $0x1e0] sm:$0xff] }
 0x2d6   :  { %1223 = vmatprep.subr.mxu1 %v1032_v27  ;;  %v933_v27 = vld [vmem:[%s3461_s8 + $0x1f0] sm:$0xff] }
 0x2d7   :  { %1224 = vmatpush2.msra.mxu1 %v1031_v28  ;;  %v924_v28 = vld [vmem:[%s3461_s8 + $0x1a8] sm:$0xff] }
 0x2d8   :  { %1225 = vmatprep.subr.mxu1 %v1024_v29  ;;  %v926_v29 = vld [vmem:[%s3461_s8 + $0x1b8] sm:$0xff] }
 0x2d9   :  { %1226 = vmatpush2.msra.mxu1 %v1023_v40  ;;  %v923_v40 = vld [vmem:[%s3461_s8 + $0x1a0] sm:$0xff] }
 0x2da   :  { %1227 = vmatprep.subr.mxu1 %v1016_v30  ;;  %v916_v30 = vld [vmem:[%s3461_s8 + $0x168] sm:$0xff] }
 0x2db   :  { %1228 = vmatpush2.msra.mxu1 %v1015_v32  ;;  %v915_v32 = vld [vmem:[%s3461_s8 + $0x160] sm:$0xff] }
 0x2dc   :  { %1229 = vmatprep.subr.mxu1 %v1008_v34  ;;  %v908_v34 = vld [vmem:[%s3461_s8 + $0x128] sm:$0xff] }
 0x2dd   :  { %1230 = vmatpush2.msra.mxu1 %v1007_v36  ;;  %v907_v36 = vld [vmem:[%s3461_s8 + $0x120] sm:$0xff] }
 0x2de   :  { %1231 = vmatprep.subr.mxu1 %v1000_v37  ;;  %v900_v37 = vld [vmem:[%s3461_s8 + $0xe8] sm:$0xff] }
 0x2df   :  { %1232 = vmatpush2.msra.mxu1 %v999_v39  ;;  %v899_v39 = vld [vmem:[%s3461_s8 + $0xe0] sm:$0xff] }
 0x2e0   :  { %1311 = vmatprep.subr.mxu1 %v996_v42  ;;  %v892_v42 = vld [vmem:[%s3461_s8 + $0xa8] sm:$0xff] }
 0x360   :  { %v864_v47 = vpop.f32.mrf.mxu1 }
 0x361   :  { %v865_v49 = vadd.f32 %v864_v47, %v780_v45  ;;  %v893_v45 = vld [vmem:[%s3461_s8 + $0xb0] sm:$0xff]  ;;  %v886_v47 = vld [vmem:[%s3461_s8 + $0x78] sm:$0xff] }
 0x362   :  { %v866_v50 = vpop.f32.mrf.mxu1 }
 0x363   :  { %v867_v51 = vadd.f32 %v866_v50, %v784_v46  ;;  %v3048_v53 = vmax.f32 %v865_v49, 0.0  ;;  %v884_v46 = vld [vmem:[%s3461_s8 + $0x68] sm:$0xff]  ;;  %v883_v49 = vld [vmem:[%s3461_s8 + $0x60] sm:$0xff]  ;;  %v885_v50 = vld [vmem:[%s3461_s8 + $0x70] sm:$0xff] }
 0x365   :  { %v870_v52 = vmax.f32 %v867_v51, 0.0  ;;  %v876_v51 = vld [vmem:[%s3461_s8 + $0x28] sm:$0xff] }
 0x367   :  { %1233 = vmatprep.mubr.f32.mxu1 %v870_v52  ;;  %1304 = vmatprep.mubr.f32.mxu0 %v870_v52 }
 0x368   :  { %1234 = vmatmul.mubr.f32.vlgmr.msra.gmra.mxu1 %v3048_v53  ;;  %1305 = vmatmul.mubr.f32.vlgmr.msra.gmra.mxu0 %v3048_v53 }
 0x369   :  { %1312 = vmatpush1.msra.mxu1 %v995_v54  ;;  %1383 = vmatpush1.msra.mxu0 %v997_v55  ;;  %v875_v54 = vld [vmem:[%s3461_s8 + $0x20] sm:$0xff]  ;;  %v877_v55 = vld [vmem:[%s3461_s8 + $0x30] sm:$0xff] }
 0x36a   :  { %1313 = vmatprep.subr.mxu1 %v988_v56  ;;  %1375 = vmatprep.mubr.f32.mxu1 %v870_v52  ;;  %v1124_v56 = vld [vmem:[%s3461_s8 + $0x7e8] sm:$0xff] }
 0x36b   :  { %1384 = vmatprep.subr.mxu0 %v990_v57  ;;  %1446 = vmatprep.mubr.f32.mxu0 %v870_v52  ;;  %v878_v52 = vld [vmem:[%s3461_s8 + $0x38] sm:$0xff] }
 0x36c   :  { %1314 = vmatpush1.msra.mxu1 %v987_v58  ;;  %1385 = vmatpush1.msra.mxu0 %v989_v60  ;;  %v1126_v57 = vld [vmem:[%s3461_s8 + $0x7f8] sm:$0xff]  ;;  %v1123_v58 = vld [vmem:[%s3461_s8 + $0x7e0] sm:$0xff]  ;;  %v1125_v60 = vld [vmem:[%s3461_s8 + $0x7f0] sm:$0xff] }
 0x36d   :  { %1315 = vmatprep.subr.mxu1 %v980_v62  ;;  %1386 = vmatprep.subr.mxu0 %v982_v63  ;;  %v1116_v62 = vld [vmem:[%s3461_s8 + $0x7a8] sm:$0xff]  ;;  %v1118_v63 = vld [vmem:[%s3461_s8 + $0x7b8] sm:$0xff] }
 0x36e   :  { %1316 = vmatpush1.msra.mxu1 %v979_v0  ;;  %1387 = vmatpush1.msra.mxu0 %v981_v1  ;;  %v1115_v0 = vld [vmem:[%s3461_s8 + $0x7a0] sm:$0xff]  ;;  %v1117_v1 = vld [vmem:[%s3461_s8 + $0x7b0] sm:$0xff] }
 0x36f   :  { %1317 = vmatprep.subr.mxu1 %v972_v2  ;;  %1388 = vmatprep.subr.mxu0 %v974_v3  ;;  %v1108_v2 = vld [vmem:[%s3461_s8 + $0x768] sm:$0xff]  ;;  %v1110_v3 = vld [vmem:[%s3461_s8 + $0x778] sm:$0xff] }
 0x370   :  { %1318 = vmatpush1.msra.mxu1 %v971_v4  ;;  %1389 = vmatpush1.msra.mxu0 %v973_v5  ;;  %v1107_v4 = vld [vmem:[%s3461_s8 + $0x760] sm:$0xff]  ;;  %v1109_v5 = vld [vmem:[%s3461_s8 + $0x770] sm:$0xff] }
 0x371   :  { %1319 = vmatprep.subr.mxu1 %v964_v6  ;;  %1390 = vmatprep.subr.mxu0 %v966_v7  ;;  %v1100_v6 = vld [vmem:[%s3461_s8 + $0x728] sm:$0xff]  ;;  %v1102_v7 = vld [vmem:[%s3461_s8 + $0x738] sm:$0xff] }
 0x372   :  { %1320 = vmatpush1.msra.mxu1 %v963_v8  ;;  %1391 = vmatpush1.msra.mxu0 %v965_v9  ;;  %v1099_v8 = vld [vmem:[%s3461_s8 + $0x720] sm:$0xff]  ;;  %v1101_v9 = vld [vmem:[%s3461_s8 + $0x730] sm:$0xff] }
 0x373   :  { %1321 = vmatprep.subr.mxu1 %v956_v10  ;;  %1392 = vmatprep.subr.mxu0 %v958_v11  ;;  %v1092_v10 = vld [vmem:[%s3461_s8 + $0x6e8] sm:$0xff]  ;;  %v1094_v11 = vld [vmem:[%s3461_s8 + $0x6f8] sm:$0xff] }
 0x374   :  { %1322 = vmatpush1.msra.mxu1 %v955_v12  ;;  %1393 = vmatpush1.msra.mxu0 %v957_v13  ;;  %v1091_v12 = vld [vmem:[%s3461_s8 + $0x6e0] sm:$0xff]  ;;  %v1093_v13 = vld [vmem:[%s3461_s8 + $0x6f0] sm:$0xff] }
 0x375   :  { %1323 = vmatprep.subr.mxu1 %v948_v14  ;;  %1394 = vmatprep.subr.mxu0 %v950_v15  ;;  %v1084_v14 = vld [vmem:[%s3461_s8 + $0x6a8] sm:$0xff]  ;;  %v1086_v15 = vld [vmem:[%s3461_s8 + $0x6b8] sm:$0xff] }
 0x376   :  { %1324 = vmatpush1.msra.mxu1 %v947_v16  ;;  %1395 = vmatpush1.msra.mxu0 %v949_v17  ;;  %v1083_v16 = vld [vmem:[%s3461_s8 + $0x6a0] sm:$0xff]  ;;  %v1085_v17 = vld [vmem:[%s3461_s8 + $0x6b0] sm:$0xff] }
 0x377   :  { %1325 = vmatprep.subr.mxu1 %v940_v18  ;;  %1396 = vmatprep.subr.mxu0 %v942_v19  ;;  %v1076_v18 = vld [vmem:[%s3461_s8 + $0x668] sm:$0xff]  ;;  %v1078_v19 = vld [vmem:[%s3461_s8 + $0x678] sm:$0xff] }
 0x378   :  { %1326 = vmatpush1.msra.mxu1 %v939_v20  ;;  %1397 = vmatpush1.msra.mxu0 %v941_v21  ;;  %v1075_v20 = vld [vmem:[%s3461_s8 + $0x660] sm:$0xff]  ;;  %v1077_v21 = vld [vmem:[%s3461_s8 + $0x670] sm:$0xff] }
 0x379   :  { %1327 = vmatprep.subr.mxu1 %v932_v22  ;;  %1398 = vmatprep.subr.mxu0 %v934_v24  ;;  %v1068_v22 = vld [vmem:[%s3461_s8 + $0x628] sm:$0xff]  ;;  %v1070_v24 = vld [vmem:[%s3461_s8 + $0x638] sm:$0xff] }
 0x37a   :  { %1328 = vmatpush1.msra.mxu1 %v931_v25  ;;  %1399 = vmatpush1.msra.mxu0 %v933_v27  ;;  %v1067_v25 = vld [vmem:[%s3461_s8 + $0x620] sm:$0xff]  ;;  %v1069_v27 = vld [vmem:[%s3461_s8 + $0x630] sm:$0xff] }
 0x37b   :  { %1329 = vmatprep.subr.mxu1 %v924_v28  ;;  %1400 = vmatprep.subr.mxu0 %v926_v29  ;;  %v1060_v28 = vld [vmem:[%s3461_s8 + $0x5e8] sm:$0xff]  ;;  %v1062_v29 = vld [vmem:[%s3461_s8 + $0x5f8] sm:$0xff] }
 0x37c   :  { %1330 = vmatpush1.msra.mxu1 %v923_v40  ;;  %1401 = vmatpush1.msra.mxu0 %v925_v48  ;;  %v1059_v40 = vld [vmem:[%s3461_s8 + $0x5e0] sm:$0xff]  ;;  %v1061_v48 = vld [vmem:[%s3461_s8 + $0x5f0] sm:$0xff] }
 0x37d   :  { %1331 = vmatprep.subr.mxu1 %v916_v30  ;;  %1402 = vmatprep.subr.mxu0 %v918_v31  ;;  %v1052_v30 = vld [vmem:[%s3461_s8 + $0x5a8] sm:$0xff]  ;;  %v1054_v31 = vld [vmem:[%s3461_s8 + $0x5b8] sm:$0xff] }
 0x37e   :  { %1332 = vmatpush1.msra.mxu1 %v915_v32  ;;  %1403 = vmatpush1.msra.mxu0 %v917_v33  ;;  %v1051_v32 = vld [vmem:[%s3461_s8 + $0x5a0] sm:$0xff]  ;;  %v1053_v33 = vld [vmem:[%s3461_s8 + $0x5b0] sm:$0xff] }
 0x37f   :  { %1333 = vmatprep.subr.mxu1 %v908_v34  ;;  %1404 = vmatprep.subr.mxu0 %v910_v35  ;;  %v1044_v34 = vld [vmem:[%s3461_s8 + $0x568] sm:$0xff]  ;;  %v1046_v35 = vld [vmem:[%s3461_s8 + $0x578] sm:$0xff] }
 0x380   :  { %1334 = vmatpush1.msra.mxu1 %v907_v36  ;;  %1405 = vmatpush1.msra.mxu0 %v909_v26  ;;  %v1043_v36 = vld [vmem:[%s3461_s8 + $0x560] sm:$0xff]  ;;  %v1045_v26 = vld [vmem:[%s3461_s8 + $0x570] sm:$0xff] }
 0x381   :  { %1335 = vmatprep.subr.mxu1 %v900_v37  ;;  %1406 = vmatprep.subr.mxu0 %v902_v38  ;;  %v1036_v37 = vld [vmem:[%s3461_s8 + $0x528] sm:$0xff]  ;;  %v1038_v38 = vld [vmem:[%s3461_s8 + $0x538] sm:$0xff] }
 0x382   :  { %1336 = vmatpush1.msra.mxu1 %v899_v39  ;;  %1407 = vmatpush1.msra.mxu0 %v901_v41  ;;  %v1035_v39 = vld [vmem:[%s3461_s8 + $0x520] sm:$0xff]  ;;  %v1037_v41 = vld [vmem:[%s3461_s8 + $0x530] sm:$0xff] }
 0x383   :  { %1337 = vmatprep.subr.mxu1 %v892_v42  ;;  %1408 = vmatprep.subr.mxu0 %v894_v43  ;;  %v1028_v42 = vld [vmem:[%s3461_s8 + $0x4e8] sm:$0xff]  ;;  %v1030_v43 = vld [vmem:[%s3461_s8 + $0x4f8] sm:$0xff] }
 0x384   :  { %1338 = vmatpush1.msra.mxu1 %v891_v44  ;;  %1409 = vmatpush1.msra.mxu0 %v893_v45  ;;  %v1027_v44 = vld [vmem:[%s3461_s8 + $0x4e0] sm:$0xff]  ;;  %v1029_v45 = vld [vmem:[%s3461_s8 + $0x4f0] sm:$0xff] }
 0x385   :  { %1339 = vmatprep.subr.mxu1 %v884_v46  ;;  %1410 = vmatprep.subr.mxu0 %v886_v47  ;;  %v1020_v46 = vld [vmem:[%s3461_s8 + $0x4a8] sm:$0xff]  ;;  %v1022_v47 = vld [vmem:[%s3461_s8 + $0x4b8] sm:$0xff] }
 0x386   :  { %1340 = vmatpush1.msra.mxu1 %v883_v49  ;;  %1411 = vmatpush1.msra.mxu0 %v885_v50  ;;  %v1019_v49 = vld [vmem:[%s3461_s8 + $0x4a0] sm:$0xff]  ;;  %v1021_v50 = vld [vmem:[%s3461_s8 + $0x4b0] sm:$0xff] }
 0x387   :  { %1341 = vmatprep.subr.mxu1 %v876_v51  ;;  %1412 = vmatprep.subr.mxu0 %v878_v52  ;;  %v1012_v51 = vld [vmem:[%s3461_s8 + $0x468] sm:$0xff]  ;;  %v1014_v52 = vld [vmem:[%s3461_s8 + $0x478] sm:$0xff] }
 0x388   :  { %1342 = vmatpush1.msra.mxu1 %v875_v54  ;;  %1413 = vmatpush1.msra.mxu0 %v877_v55  ;;  %v1011_v54 = vld [vmem:[%s3461_s8 + $0x460] sm:$0xff]  ;;  %v1013_v55 = vld [vmem:[%s3461_s8 + $0x470] sm:$0xff] }
 0x389   :  { %1343 = vmatprep.subr.mxu1 %v1124_v56  ;;  %1414 = vmatprep.subr.mxu0 %v1126_v57  ;;  %v1004_v56 = vld [vmem:[%s3461_s8 + $0x428] sm:$0xff]  ;;  %v1006_v57 = vld [vmem:[%s3461_s8 + $0x438] sm:$0xff] }
 0x38a   :  { %1344 = vmatpush2.msra.mxu1 %v1123_v58  ;;  %1415 = vmatpush2.msra.mxu0 %v1125_v60  ;;  %v1003_v58 = vld [vmem:[%s3461_s8 + $0x420] sm:$0xff]  ;;  %v1005_v60 = vld [vmem:[%s3461_s8 + $0x430] sm:$0xff] }
 0x38b   :  { %1345 = vmatprep.subr.mxu1 %v1116_v62  ;;  %1416 = vmatprep.subr.mxu0 %v1118_v63 }
 0x38c   :  { %1346 = vmatpush2.msra.mxu1 %v1115_v0  ;;  %1417 = vmatpush2.msra.mxu0 %v1117_v1 }
 0x38d   :  { %1347 = vmatprep.subr.mxu1 %v1108_v2  ;;  %1418 = vmatprep.subr.mxu0 %v1110_v3 }
 0x38e   :  { %1348 = vmatpush2.msra.mxu1 %v1107_v4  ;;  %1419 = vmatpush2.msra.mxu0 %v1109_v5 }
 0x38f   :  { %1349 = vmatprep.subr.mxu1 %v1100_v6  ;;  %1420 = vmatprep.subr.mxu0 %v1102_v7 }
 0x390   :  { %1350 = vmatpush2.msra.mxu1 %v1099_v8  ;;  %1421 = vmatpush2.msra.mxu0 %v1101_v9 }
 0x391   :  { %1351 = vmatprep.subr.mxu1 %v1092_v10  ;;  %1422 = vmatprep.subr.mxu0 %v1094_v11 }
 0x392   :  { %1352 = vmatpush2.msra.mxu1 %v1091_v12  ;;  %1423 = vmatpush2.msra.mxu0 %v1093_v13 }
 0x393   :  { %1353 = vmatprep.subr.mxu1 %v1084_v14  ;;  %1424 = vmatprep.subr.mxu0 %v1086_v15 }
 0x394   :  { %1354 = vmatpush2.msra.mxu1 %v1083_v16  ;;  %1425 = vmatpush2.msra.mxu0 %v1085_v17 }
 0x395   :  { %1355 = vmatprep.subr.mxu1 %v1076_v18  ;;  %1426 = vmatprep.subr.mxu0 %v1078_v19 }
 0x396   :  { %1356 = vmatpush2.msra.mxu1 %v1075_v20  ;;  %1427 = vmatpush2.msra.mxu0 %v1077_v21 }
 0x397   :  { %1357 = vmatprep.subr.mxu1 %v1068_v22  ;;  %1428 = vmatprep.subr.mxu0 %v1070_v24 }
 0x398   :  { %1358 = vmatpush2.msra.mxu1 %v1067_v25  ;;  %1429 = vmatpush2.msra.mxu0 %v1069_v27 }
 0x399   :  { %1359 = vmatprep.subr.mxu1 %v1060_v28  ;;  %1430 = vmatprep.subr.mxu0 %v1062_v29 }
 0x39a   :  { %1360 = vmatpush2.msra.mxu1 %v1059_v40  ;;  %1431 = vmatpush2.msra.mxu0 %v1061_v48 }
 0x39b   :  { %1361 = vmatprep.subr.mxu1 %v1052_v30  ;;  %1432 = vmatprep.subr.mxu0 %v1054_v31 }
 0x39c   :  { %1362 = vmatpush2.msra.mxu1 %v1051_v32  ;;  %1433 = vmatpush2.msra.mxu0 %v1053_v33 }
 0x39d   :  { %1363 = vmatprep.subr.mxu1 %v1044_v34  ;;  %1434 = vmatprep.subr.mxu0 %v1046_v35 }
 0x39e   :  { %1364 = vmatpush2.msra.mxu1 %v1043_v36  ;;  %1435 = vmatpush2.msra.mxu0 %v1045_v26 }
 0x39f   :  { %1365 = vmatprep.subr.mxu1 %v1036_v37  ;;  %1436 = vmatprep.subr.mxu0 %v1038_v38 }
 0x3a0   :  { %1366 = vmatpush2.msra.mxu1 %v1035_v39  ;;  %1437 = vmatpush2.msra.mxu0 %v1037_v41 }
 0x3a1   :  { %1367 = vmatprep.subr.mxu1 %v1028_v42  ;;  %1438 = vmatprep.subr.mxu0 %v1030_v43 }
 0x3a2   :  { %1368 = vmatpush2.msra.mxu1 %v1027_v44  ;;  %1439 = vmatpush2.msra.mxu0 %v1029_v45 }
 0x3a3   :  { %1369 = vmatprep.subr.mxu1 %v1020_v46  ;;  %1440 = vmatprep.subr.mxu0 %v1022_v47 }
 0x3a4   :  { %1370 = vmatpush2.msra.mxu1 %v1019_v49  ;;  %1441 = vmatpush2.msra.mxu0 %v1021_v50 }
 0x3a5   :  { %1371 = vmatprep.subr.mxu1 %v1012_v51  ;;  %1442 = vmatprep.subr.mxu0 %v1014_v52 }
 0x3a6   :  { %1372 = vmatpush2.msra.mxu1 %v1011_v54  ;;  %1443 = vmatpush2.msra.mxu0 %v1013_v55 }
 0x3a7   :  { %1373 = vmatprep.subr.mxu1 %v1004_v56  ;;  %1444 = vmatprep.subr.mxu0 %v1006_v57 }
 0x3a8   :  { %1374 = vmatpush2.msra.mxu1 %v1003_v58  ;;  %1445 = vmatpush2.msra.mxu0 %v1005_v60 }
 0x3a9   :  { %1376 = vmatmul.mubr.f32.vlgmr.msra.gmra.mxu1 %v3048_v53  ;;  %1447 = vmatmul.mubr.f32.vlgmr.msra.gmra.mxu0 %v3048_v53 }
 0x3aa   :  { %1623 = shalt.err (!%p1620_p4)
}
 0x3ab   :  { %1537 = dma.vmem_to_hbm [thread:$0]  %s1535_s15, 32, %s3463_s10, [#allocation3]  }
 0x3ac   :  { %s1632_s1 = scalar_lea.vmem %s1545_s26, 32  ;;  %p1637_p6 = scmp.lt.s32.totalorder %s1545_s26, %s1545_s26 }
 0x3ad   :  { %p1633_p5 = scmp.ne.s32.totalorder %s1545_s26, %s1632_s1  ;;  %p1638_p7 = scmp.lt.s32.totalorder %s1632_s1, %s1632_s1 }
 0x3af   :  { %p1639_p8 = por %p1638_p7, %p1637_p6 }
 0x3b1   :  { %p1640_p9 = pnand %p1639_p8, %p1633_p5 }
 0x3b3   :  { %1643 = shalt.err (!%p1640_p9)
}
 0x3b4   :  { %1547 = dma.vmem_to_hbm [thread:$0]  %s1545_s26, 32, %s3464_s11, [#allocation5]   ;;  %v1143_v53 = vsub.s32 3, %v1980_v23  ;;  %v1139_v0 = vsub.s32 2, %v1980_v23  ;;  %v1127_v1 = vld [vmem:[%s3462_s9] sm:$0xff]  ;;  %v1147_v12 = vsub.s32 4, %v1980_v23 }
 0x3b5   :  { %v1136_v2 = vrot.slane %v1127_v1, %v2624_v61  ;;  %v1132_v6 = vrot.slane %v1127_v1, %v2618_v59  ;;  %v1662_v9 = vmov 1966171168   ;;  %v1155_v13 = vsub.s32 6, %v1980_v23 }
 0x3b6   :  { %v1144_v3 = vrot.slane %v1127_v1, %v1143_v53  ;;  %v1140_v7 = vrot.slane %v1127_v1, %v1139_v0  ;;  %v1482_v10 = vunpack.c.l.s4 %v1662_v9  ;;  %v1151_v16 = vsub.s32 5, %v1980_v23 }
 0x3b7   :  { %v1159_v61 = vsub.s32 7, %v1980_v23  ;;  %v1148_v20 = vrot.slane %v1127_v1, %v1147_v12  ;;  %v1156_v59 = vrot.slane %v1127_v1, %v1155_v13 }
 0x3b8   :  { %v1483_v18 = vunpack.c.0.s8 %v1482_v10  ;;  %v1152_v24 = vrot.slane %v1127_v1, %v1151_v16 }
 0x3b9   :  { %v1160_v25 = vrot.slane %v1127_v1, %v1159_v61 }
 0x3ba   :  { %v1486_v28 = vsub.s32 %v1483_v18, %v1980_v23 }
 0x428   :  { %v1235_v62 = vpop.f32.mrf.mxu1  ;;  %v1306_v63 = vpop.f32.mrf.mxu0 }
 0x429   :  { %v1236_v14 = vadd.f32 %v1235_v62, %v1132_v6  ;;  %v1307_v15 = vadd.f32 %v1306_v63, %v1140_v7 }
 0x42a   :  { %v1237_v4 = vpop.f32.mrf.mxu1  ;;  %v1308_v5 = vpop.f32.mrf.mxu0 }
 0x42b   :  { %v1238_v8 = vadd.f32 %v1237_v4, %v1136_v2  ;;  %v1309_v11 = vadd.f32 %v1308_v5, %v1144_v3  ;;  %v1453_v21 = vmax.f32 %v1236_v14, 0.0  ;;  %v1455_v22 = vmax.f32 %v1307_v15, 0.0 }
 0x42d   :  { %v1454_v17 = vmax.f32 %v1238_v8, 0.0  ;;  %v1456_v19 = vmax.f32 %v1309_v11, 0.0 }
 0x42f   :  { %v1564_v27 = vpack.c.bf16 %v1454_v17, %v1453_v21  ;;  %v1565_v29 = vpack.c.bf16 %v1456_v19, %v1455_v22 }
 0x431   :  { %v1487_v36 = vrot.slane %v1564_v27, %v1486_v28  ;;  %v1494_v26 = vrot.slane %v1565_v29, %v1486_v28 }
 0x433   :  { %v1509_v44 = vcombine.low %v1487_v36, %v1494_v26 }
 0x435   :  { %v1517_v47 = vrot.slane %v1509_v44, %v1486_v28 }
 0x469   :  { %v1377_v40 = vpop.f32.mrf.mxu1  ;;  %v1448_v48 = vpop.f32.mrf.mxu0 }
 0x46a   :  { %v1378_v30 = vadd.f32 %v1377_v40, %v1148_v20  ;;  %v1449_v31 = vadd.f32 %v1448_v48, %v1156_v59 }
 0x46b   :  { %v1379_v32 = vpop.f32.mrf.mxu1  ;;  %v1450_v33 = vpop.f32.mrf.mxu0 }
 0x46c   :  { %v1380_v34 = vadd.f32 %v1379_v32, %v1152_v24  ;;  %v1451_v35 = vadd.f32 %v1450_v33, %v1160_v25  ;;  %v1457_v37 = vmax.f32 %v1378_v30, 0.0  ;;  %v1459_v38 = vmax.f32 %v1449_v31, 0.0 }
 0x46e   :  { %v1458_v39 = vmax.f32 %v1380_v34, 0.0  ;;  %v1460_v41 = vmax.f32 %v1451_v35, 0.0 }
 0x470   :  { %v1566_v42 = vpack.c.bf16 %v1458_v39, %v1457_v37  ;;  %v1567_v43 = vpack.c.bf16 %v1460_v41, %v1459_v38 }
 0x472   :  { %v1501_v45 = vrot.slane %v1566_v42, %v1486_v28  ;;  %v1508_v23 = vrot.slane %v1567_v43, %v1486_v28 }
 0x474   :  { %v1510_v46 = vcombine.low %v1501_v45, %v1508_v23 }
 0x476   :  { %v1524_v49 = vrot.slane %v1510_v46, %v1486_v28 }
 0x478   :  { %v1525_v50 = vcombine.low %v1517_v47, %v1524_v49 }
 0x47a   :  { %1527 = vst [vmem:[%s3465_s12] sm:$0xff] %v1525_v50 }
 0x47b   :  { %1652 = dma.done.wait [#allocation3], 32  }
 0x47c   :  { %1653 = vsyncadd [#allocation3], 4294967264 }
 0x47d   :  { %1654 = dma.done.wait [#allocation5], 32  }
 0x47e   :  { %1655 = vsyncadd [#allocation5], 4294967264 }
 0x47f   :  { %1558 = vsyncpa [#allocation3], 1 }
 0x480   :  { %1559 = vsyncpa [#allocation5], 1 }

// kernel: tile.33
= control target key start
LH: loop header
LB: loop body
LE: loop exit
PB: predicated region body
PF: predicated region fallthrough
CT: control target
= control target key end

     0   :  { %s22_s0 = inlined_call_operand.vmem [shape: f32[64], index: 0, kind: input, shape index: {}]   ;;  %s23_s1 = inlined_call_operand.vmem [shape: f32[4,64], index: 1, kind: output, shape index: {}]  }
   0x1   :  { %v4_v0 = vld [vmem:[%s22_s0] ss:$0 sm:$0xff] }
   0x2   :  { %5 = vst [vmem:[%s23_s1] sm:$0xf] %v4_v0 }

// kernel: tile.34
= control target key start
LH: loop header
LB: loop body
LE: loop exit
PB: predicated region body
PF: predicated region fallthrough
CT: control target
= control target key end

     0   :  { %s7_s8 = smov 3  ;;  %vm9_vm0 = vcmask 523264   ;;  %s34_s9 = smov 64   ;;  %vm16_vm1 = vcmask 1048064   ;;  %s54_s0 = inlined_call_operand.vmem [shape: f32[4,64], index: 0, kind: input, shape index: {}]   ;;  %s55_s1 = inlined_call_operand.vmem [shape: f32[1,256], index: 1, kind: output, shape index: {}]  }
   0x1   :  { %v5_v0 = vld [vmem:[%s54_s0] sm:$0xf]  ;;  %s12_s0 = smov 3 }
   0x2   :  { %6 = vst [vmem:[#allocation1] sm:$0xf] %v5_v0 }
   0x9   :  { %v13_v1 = vld [vmem:[#allocation1 + $0x1] ss:$2 sm:%s12_s0]   ;;  %v8_v2 = vld [vmem:[#allocation1] ss:$2 sm:%s7_s8]  }
   0xa   :  { %14 = vrot.lane.b32.xlu0 %v13_v1, %s34_s9  ;;  %10 = vst.msk [vmem:[#allocation0] ss:$8 sm:$0x3] %vm9_vm0, %v8_v2  }
  0x7c   :  { %v15_v3 = vpop.permute.xlu0 %14  }
  0x7d   :  { %17 = vst.msk [vmem:[#allocation0] ss:$8 sm:$0x3] %vm16_vm1, %v15_v3  }
  0x84   :  { %v22_v4 = vld [vmem:[#allocation0] sm:$0x1]  ;;  %v27_v5 = vld [vmem:[#allocation0 + $0x8] sm:$0x1] }
  0x85   :  { %25 = vst [vmem:[%s55_s1] sm:$0x1] %v22_v4  ;;  %32 = vst [vmem:[%s55_s1 + $0x1] sm:$0x1] %v27_v5 }

// kernel: beta_vae_h_forward.14
= control target key start
LH: loop header
LB: loop body
LE: loop exit
PB: predicated region body
PF: predicated region fallthrough
CT: control target
= control target key end

     0   :  { %v55_v41 = vlaneseq  ;;  %s708_s1 = inlined_call_operand.vmem [shape: bf16[256,256], index: 1, kind: input, shape index: {}]   ;;  %s709_s0 = inlined_call_operand.vmem [shape: bf16[50,256], index: 0, kind: input, shape index: {}]   ;;  %s710_s2 = inlined_call_operand.vmem [shape: f32[1,256], index: 2, kind: input, shape index: {}]   ;;  %s711_s3 = inlined_call_operand.vmem [shape: bf16[50,256], index: 3, kind: output, shape index: {}]  }
   0x1   :  { %v488_v0 = vld [vmem:[%s708_s1 + $0x74] ss:$8 sps:$4 sm:$0xff]   ;;  %v490_v1 = vld [vmem:[%s708_s1 + $0x70] ss:$8 sps:$4 sm:$0xff]   ;;  %v491_v2 = vld [vmem:[%s708_s1 + $0x64] ss:$8 sps:$4 sm:$0xff]  }
   0x2   :  { %262 = vmatprep.subr.bf16.mxu0 %v488_v0  ;;  %456 = vmatprep.subr.bf16.mxu1 %v488_v0  ;;  %v493_v3 = vld [vmem:[%s708_s1 + $0x60] ss:$8 sps:$4 sm:$0xff]   ;;  %v494_v4 = vld [vmem:[%s708_s1 + $0x54] ss:$8 sps:$4 sm:$0xff]   ;;  %v496_v5 = vld [vmem:[%s708_s1 + $0x50] ss:$8 sps:$4 sm:$0xff]  }
   0x3   :  { %263 = vmatpush1.bf16.msra.mxu0 %v490_v1  ;;  %472 = vmatpush1.bf16.msra.mxu1 %v490_v1  ;;  %v497_v6 = vld [vmem:[%s708_s1 + $0x44] ss:$8 sps:$4 sm:$0xff]   ;;  %v499_v7 = vld [vmem:[%s708_s1 + $0x40] ss:$8 sps:$4 sm:$0xff]   ;;  %v500_v8 = vld [vmem:[%s708_s1 + $0x34] ss:$8 sps:$4 sm:$0xff]  }
   0x4   :  { %264 = vmatprep.subr.bf16.mxu0 %v491_v2  ;;  %457 = vmatprep.subr.bf16.mxu1 %v491_v2  ;;  %v502_v9 = vld [vmem:[%s708_s1 + $0x30] ss:$8 sps:$4 sm:$0xff]   ;;  %v503_v10 = vld [vmem:[%s708_s1 + $0x24] ss:$8 sps:$4 sm:$0xff]   ;;  %v505_v11 = vld [vmem:[%s708_s1 + $0x20] ss:$8 sps:$4 sm:$0xff]  }
   0x5   :  { %v506_v12 = vld [vmem:[%s708_s1 + $0x14] ss:$8 sps:$4 sm:$0xff]   ;;  %v538_v13 = vld [vmem:[%s709_s0 + $0x4] ss:$8 sps:$4 sm:$0xff]   ;;  %v508_v14 = vld [vmem:[%s708_s1 + $0x10] ss:$8 sps:$4 sm:$0xff]  }
   0x6   :  { %v541_v15 = vld [vmem:[%s709_s0 + $0x24] ss:$8 sps:$4 sm:$0xff]   ;;  %294 = vmatprep.mubr.bf16.mxu0 %v538_v13  ;;  %v511_v17 = vld [vmem:[%s708_s1] ss:$8 sps:$4 sm:$0xff]   ;;  %v512_v18 = vld [vmem:[%s708_s1 + $0xf4] ss:$8 sps:$4 sm:$0xff]  }
   0x7   :  { %265 = vmatpush1.bf16.msra.mxu0 %v493_v3  ;;  %473 = vmatpush1.bf16.msra.mxu1 %v493_v3  ;;  %v509_v16 = vld [vmem:[%s708_s1 + $0x4] ss:$8 sps:$4 sm:$0xff]   ;;  %v514_v19 = vld [vmem:[%s708_s1 + $0xf0] ss:$8 sps:$4 sm:$0xff]   ;;  %v517_v21 = vld [vmem:[%s708_s1 + $0xe0] ss:$8 sps:$4 sm:$0xff]  }
   0x8   :  { %266 = vmatprep.subr.bf16.mxu0 %v494_v4  ;;  %458 = vmatprep.subr.bf16.mxu1 %v494_v4  ;;  %v515_v20 = vld [vmem:[%s708_s1 + $0xe4] ss:$8 sps:$4 sm:$0xff]   ;;  %v518_v22 = vld [vmem:[%s708_s1 + $0xd4] ss:$8 sps:$4 sm:$0xff]   ;;  %v520_v23 = vld [vmem:[%s708_s1 + $0xd0] ss:$8 sps:$4 sm:$0xff]  }
   0x9   :  { %314 = vmatprep.mubr.bf16.mxu1 %v541_v15  ;;  %v521_v24 = vld [vmem:[%s708_s1 + $0xc4] ss:$8 sps:$4 sm:$0xff]   ;;  %v523_v25 = vld [vmem:[%s708_s1 + $0xc0] ss:$8 sps:$4 sm:$0xff]   ;;  %v524_v26 = vld [vmem:[%s708_s1 + $0xb4] ss:$8 sps:$4 sm:$0xff]  }
   0xa   :  { %v526_v27 = vld [vmem:[%s708_s1 + $0xb0] ss:$8 sps:$4 sm:$0xff]   ;;  %v527_v28 = vld [vmem:[%s708_s1 + $0xa4] ss:$8 sps:$4 sm:$0xff]   ;;  %v529_v29 = vld [vmem:[%s708_s1 + $0xa0] ss:$8 sps:$4 sm:$0xff]  }
   0xb   :  { %267 = vmatpush1.bf16.msra.mxu0 %v496_v5  ;;  %474 = vmatpush1.bf16.msra.mxu1 %v496_v5  ;;  %v530_v30 = vld [vmem:[%s708_s1 + $0x94] ss:$8 sps:$4 sm:$0xff]   ;;  %v532_v31 = vld [vmem:[%s708_s1 + $0x90] ss:$8 sps:$4 sm:$0xff]   ;;  %v533_v32 = vld [vmem:[%s708_s1 + $0x84] ss:$8 sps:$4 sm:$0xff]  }
   0xc   :  { %268 = vmatprep.subr.bf16.mxu0 %v497_v6  ;;  %459 = vmatprep.subr.bf16.mxu1 %v497_v6  ;;  %v535_v33 = vld [vmem:[%s708_s1 + $0x80] ss:$8 sps:$4 sm:$0xff]   ;;  %v20_v34 = vld [vmem:[%s709_s0 + $0x30] sm:$0x11]  ;;  %v56_v42 = vshrl.u32 %v55_v41, 7 }
   0xd   :  { %v536_v35 = vld [vmem:[%s709_s0] ss:$8 sps:$4 sm:$0xff]   ;;  %v542_v37 = vld [vmem:[%s709_s0 + $0x14] ss:$8 sps:$4 sm:$0xff]   ;;  %v409_v38 = vcombine.high %v20_v34, %v20_v34  ;;  %v545_v39 = vld [vmem:[%s709_s0 + $0x10] ss:$8 sps:$4 sm:$0xff]   ;;  %v408_v40 = vcombine.low %v20_v34, %v20_v34 }
   0xe   :  { %v539_v36 = vld [vmem:[%s709_s0 + $0x20] ss:$8 sps:$4 sm:$0xff]   ;;  %v57_v43 = vsub.s32 0, %v56_v42  ;;  %v61_v45 = vsub.s32 1, %v56_v42 }
   0xf   :  { %269 = vmatpush1.bf16.msra.mxu0 %v499_v7  ;;  %475 = vmatpush1.bf16.msra.mxu1 %v499_v7  ;;  %v53_v44 = vld [vmem:[%s710_s2] sm:$0x3] }
  0x10   :  { %270 = vmatprep.subr.bf16.mxu0 %v500_v8  ;;  %460 = vmatprep.subr.bf16.mxu1 %v500_v8  ;;  %v58_v46 = vrot.slane %v53_v44, %v57_v43  ;;  %v62_v47 = vrot.slane %v53_v44, %v61_v45 }
  0x13   :  { %271 = vmatpush1.bf16.msra.mxu0 %v502_v9  ;;  %476 = vmatpush1.bf16.msra.mxu1 %v502_v9 }
  0x14   :  { %272 = vmatprep.subr.bf16.mxu0 %v503_v10  ;;  %461 = vmatprep.subr.bf16.mxu1 %v503_v10 }
  0x17   :  { %273 = vmatpush1.bf16.msra.mxu0 %v505_v11  ;;  %477 = vmatpush1.bf16.msra.mxu1 %v505_v11 }
  0x18   :  { %274 = vmatprep.subr.bf16.mxu0 %v506_v12  ;;  %462 = vmatprep.subr.bf16.mxu1 %v506_v12 }
  0x1b   :  { %275 = vmatpush1.bf16.msra.mxu0 %v508_v14  ;;  %478 = vmatpush1.bf16.msra.mxu1 %v508_v14 }
  0x1c   :  { %276 = vmatprep.subr.bf16.mxu0 %v509_v16  ;;  %463 = vmatprep.subr.bf16.mxu1 %v509_v16 }
  0x1f   :  { %277 = vmatpush1.bf16.msra.mxu0 %v511_v17  ;;  %479 = vmatpush1.bf16.msra.mxu1 %v511_v17 }
  0x20   :  { %278 = vmatprep.subr.bf16.mxu0 %v512_v18  ;;  %464 = vmatprep.subr.bf16.mxu1 %v512_v18 }
  0x23   :  { %279 = vmatpush2.bf16.msra.mxu0 %v514_v19  ;;  %480 = vmatpush2.bf16.msra.mxu1 %v514_v19 }
  0x24   :  { %280 = vmatprep.subr.bf16.mxu0 %v515_v20  ;;  %465 = vmatprep.subr.bf16.mxu1 %v515_v20 }
  0x27   :  { %281 = vmatpush2.bf16.msra.mxu0 %v517_v21  ;;  %481 = vmatpush2.bf16.msra.mxu1 %v517_v21 }
  0x28   :  { %282 = vmatprep.subr.bf16.mxu0 %v518_v22  ;;  %466 = vmatprep.subr.bf16.mxu1 %v518_v22 }
  0x2b   :  { %283 = vmatpush2.bf16.msra.mxu0 %v520_v23  ;;  %482 = vmatpush2.bf16.msra.mxu1 %v520_v23 }
  0x2c   :  { %284 = vmatprep.subr.bf16.mxu0 %v521_v24  ;;  %467 = vmatprep.subr.bf16.mxu1 %v521_v24 }
  0x2f   :  { %285 = vmatpush2.bf16.msra.mxu0 %v523_v25  ;;  %483 = vmatpush2.bf16.msra.mxu1 %v523_v25 }
  0x30   :  { %286 = vmatprep.subr.bf16.mxu0 %v524_v26  ;;  %468 = vmatprep.subr.bf16.mxu1 %v524_v26 }
  0x33   :  { %287 = vmatpush2.bf16.msra.mxu0 %v526_v27  ;;  %484 = vmatpush2.bf16.msra.mxu1 %v526_v27 }
  0x34   :  { %288 = vmatprep.subr.bf16.mxu0 %v527_v28  ;;  %469 = vmatprep.subr.bf16.mxu1 %v527_v28 }
  0x37   :  { %289 = vmatpush2.bf16.msra.mxu0 %v529_v29  ;;  %485 = vmatpush2.bf16.msra.mxu1 %v529_v29 }
  0x38   :  { %290 = vmatprep.subr.bf16.mxu0 %v530_v30  ;;  %470 = vmatprep.subr.bf16.mxu1 %v530_v30 }
  0x3b   :  { %291 = vmatpush2.bf16.msra.mxu0 %v532_v31  ;;  %486 = vmatpush2.bf16.msra.mxu1 %v532_v31 }
  0x3c   :  { %292 = vmatprep.subr.bf16.mxu0 %v533_v32  ;;  %471 = vmatprep.subr.bf16.mxu1 %v533_v32 }
  0x3f   :  { %293 = vmatpush2.bf16.msra.mxu0 %v535_v33  ;;  %487 = vmatpush2.bf16.msra.mxu1 %v535_v33 }
  0x42   :  { %295 = vmatmul.mubr.bf16.vlgmr.msra.gmra.mxu0 %v536_v35  ;;  %315 = vmatmul.mubr.bf16.vlgmr.msra.gmra.mxu1 %v539_v36 }
  0x43   :  { %304 = vmatprep.mubr.bf16.mxu0 %v542_v37  ;;  %324 = vmatprep.mubr.bf16.mxu1 %v409_v38 }
  0x4a   :  { %305 = vmatmul.mubr.bf16.gmra.mxu0 %v545_v39  ;;  %325 = vmatmul.mubr.bf16.gmra.mxu1 %v408_v40 }
 0x102   :  { %v296_v48 = vpop.f32.mrf.mxu0  ;;  %v316_v49 = vpop.f32.mrf.mxu1 }
 0x103   :  { %v297_v50 = vadd.f32 %v296_v48, %v58_v46  ;;  %v317_v51 = vadd.f32 %v316_v49, %v58_v46 }
 0x104   :  { %v298_v52 = vpop.f32.mrf.mxu0  ;;  %v318_v53 = vpop.f32.mrf.mxu1 }
 0x105   :  { %v341_v54 = vmax.f32 %v317_v51, 0.0  ;;  %v299_v55 = vadd.f32 %v298_v52, %v62_v47  ;;  %v319_v56 = vadd.f32 %v318_v53, %v62_v47  ;;  %v333_v59 = vmax.f32 %v297_v50, 0.0 }
 0x106   :  { %v300_v57 = vpop.f32.mrf.mxu0  ;;  %v320_v58 = vpop.f32.mrf.mxu1 }
 0x107   :  { %v334_v60 = vmax.f32 %v299_v55, 0.0  ;;  %v342_v61 = vmax.f32 %v319_v56, 0.0  ;;  %v301_v62 = vadd.f32 %v300_v57, %v58_v46  ;;  %v321_v63 = vadd.f32 %v320_v58, %v58_v46 }
 0x108   :  { %v302_v0 = vpop.f32.mrf.mxu0  ;;  %v322_v1 = vpop.f32.mrf.mxu1 }
 0x109   :  { %v449_v2 = vpack.c.bf16 %v334_v60, %v333_v59  ;;  %v453_v3 = vpack.c.bf16 %v342_v61, %v341_v54  ;;  %v303_v4 = vadd.f32 %v302_v0, %v62_v47  ;;  %v323_v5 = vadd.f32 %v322_v1, %v62_v47 }
 0x10a   :  { %v306_v6 = vpop.f32.mrf.mxu0  ;;  %v326_v7 = vpop.f32.mrf.mxu1  ;;  %v335_v10 = vmax.f32 %v301_v62, 0.0  ;;  %v343_v11 = vmax.f32 %v321_v63, 0.0 }
 0x10b   :  { %391 = vst [vmem:[%s711_s3] sm:$0xff] %v449_v2  ;;  %395 = vst [vmem:[%s711_s3 + $0x20] sm:$0xff] %v453_v3  ;;  %v307_v8 = vadd.f32 %v306_v6, %v58_v46  ;;  %v327_v9 = vadd.f32 %v326_v7, %v58_v46  ;;  %v336_v12 = vmax.f32 %v303_v4, 0.0  ;;  %v344_v13 = vmax.f32 %v323_v5, 0.0 }
 0x10c   :  { %v308_v14 = vpop.f32.mrf.mxu0  ;;  %v328_v15 = vpop.f32.mrf.mxu1 }
 0x10d   :  { %v345_v16 = vmax.f32 %v327_v9, 0.0  ;;  %v309_v17 = vadd.f32 %v308_v14, %v62_v47  ;;  %v329_v18 = vadd.f32 %v328_v15, %v62_v47  ;;  %v450_v19 = vpack.c.bf16 %v336_v12, %v335_v10 }
 0x10e   :  { %v454_v20 = vpack.c.bf16 %v344_v13, %v343_v11  ;;  %v310_v21 = vpop.f32.mrf.mxu0  ;;  %v330_v22 = vpop.f32.mrf.mxu1  ;;  %v337_v23 = vmax.f32 %v307_v8, 0.0 }
 0x10f   :  { %v338_v24 = vmax.f32 %v309_v17, 0.0  ;;  %v346_v25 = vmax.f32 %v329_v18, 0.0  ;;  %v311_v26 = vadd.f32 %v310_v21, %v58_v46  ;;  %392 = vst [vmem:[%s711_s3 + $0x8] sm:$0xff] %v450_v19 }
 0x110   :  { %396 = vst [vmem:[%s711_s3 + $0x28] sm:$0xff] %v454_v20  ;;  %v312_v27 = vpop.f32.mrf.mxu0  ;;  %v331_v28 = vpop.f32.mrf.mxu1 }
 0x111   :  { %v451_v29 = vpack.c.bf16 %v338_v24, %v337_v23  ;;  %v455_v30 = vpack.c.bf16 %v346_v25, %v345_v16  ;;  %v313_v31 = vadd.f32 %v312_v27, %v62_v47  ;;  %v339_v32 = vmax.f32 %v311_v26, 0.0 }
 0x113   :  { %393 = vst [vmem:[%s711_s3 + $0x10] sm:$0xff] %v451_v29  ;;  %397 = vst [vmem:[%s711_s3 + $0x30] sm:$0x11] %v455_v30  ;;  %v340_v33 = vmax.f32 %v313_v31, 0.0 }
 0x115   :  { %v452_v34 = vpack.c.bf16 %v340_v33, %v339_v32 }
 0x117   :  { %394 = vst [vmem:[%s711_s3 + $0x18] sm:$0xff] %v452_v34 }

// kernel: tile.38
= control target key start
LH: loop header
LB: loop body
LE: loop exit
PB: predicated region body
PF: predicated region fallthrough
CT: control target
= control target key end

     0   :  { %s22_s0 = inlined_call_operand.vmem [shape: f32[32], index: 0, kind: input, shape index: {}]   ;;  %s23_s1 = inlined_call_operand.vmem [shape: f32[4,32], index: 1, kind: output, shape index: {}]  }
   0x1   :  { %v4_v0 = vld [vmem:[%s22_s0] ss:$0 sm:$0xff] }
   0x2   :  { %5 = vst [vmem:[%s23_s1] sm:$0xf] %v4_v0 }

// kernel: tile.39
= control target key start
LH: loop header
LB: loop body
LE: loop exit
PB: predicated region body
PF: predicated region fallthrough
CT: control target
= control target key end

     0   :  { %vm8_vm0 = vcmask 261120   ;;  %s40_s8 = smov 32   ;;  %s41_s9 = smov 64   ;;  %vm14_vm1 = vcmask 1048320   ;;  %vm20_vm2 = vcmask 785920   ;;  %vm26_vm3 = vcmask 523520   ;;  %s58_s0 = inlined_call_operand.vmem [shape: f32[4,32], index: 0, kind: input, shape index: {}]   ;;  %s59_s1 = inlined_call_operand.vmem [shape: f32[1,128], index: 1, kind: output, shape index: {}]  }
   0x1   :  { %v5_v0 = vld [vmem:[%s58_s0] sm:$0xf]  ;;  %s39_s0 = smov 96  }
   0x2   :  { %6 = vst [vmem:[#allocation1] sm:$0xf] %v5_v0 }
   0x9   :  { %v11_v1 = vld [vmem:[#allocation1 + $0x3] sm:$0x1]   ;;  %v23_v2 = vld [vmem:[#allocation1 + $0x1] sm:$0x1]   ;;  %v7_v3 = vld [vmem:[#allocation1] sm:$0x1]  }
   0xa   :  { %12 = vrot.lane.b32.xlu0 %v11_v1, %s39_s0  ;;  %24 = vrot.lane.b32.xlu1 %v23_v2, %s40_s8  ;;  %v17_v4 = vld [vmem:[#allocation1 + $0x2] sm:$0x1]   ;;  %9 = vst.msk [vmem:[#allocation0] sm:$0x1] %vm8_vm0, %v7_v3  }
   0xe   :  { %18 = vrot.lane.b32.xlu0 %v17_v4, %s41_s9 }
  0x7c   :  { %v13_v5 = vpop.permute.xlu0 %12   ;;  %v25_v6 = vpop.permute.xlu1 %24  }
  0x7d   :  { %15 = vst.msk [vmem:[#allocation0] sm:$0x1] %vm14_vm1, %v13_v5  }
  0x80   :  { %v19_v7 = vpop.permute.xlu0 %18  }
  0x81   :  { %21 = vst.msk [vmem:[#allocation0] sm:$0x1] %vm20_vm2, %v19_v7  }
  0x82   :  { %27 = vst.msk [vmem:[#allocation0] sm:$0x1] %vm26_vm3, %v25_v6  }
  0x89   :  { %v32_v8 = vld [vmem:[#allocation0] sm:$0x1] }
  0x8a   :  { %35 = vst [vmem:[%s59_s1] sm:$0x1] %v32_v8 }

// kernel: beta_vae_h_forward.15
= control target key start
LH: loop header
LB: loop body
LE: loop exit
PB: predicated region body
PF: predicated region fallthrough
CT: control target
= control target key end

     0   :  { %s1005_s1 = inlined_call_operand.vmem [shape: bf16[256,128], index: 1, kind: input, shape index: {}]   ;;  %s1006_s0 = inlined_call_operand.vmem [shape: bf16[162,256], index: 0, kind: input, shape index: {}]   ;;  %s1007_s2 = inlined_call_operand.vmem [shape: f32[1,128], index: 2, kind: input, shape index: {}]   ;;  %s1008_s3 = inlined_call_operand.vmem [shape: bf16[162,128], index: 3, kind: output, shape index: {}]  }
   0x1   :  { %v767_v0 = vld [vmem:[%s1005_s1 + $0x78] sm:$0xff]   ;;  %v769_v2 = vld [vmem:[%s1005_s1 + $0x70] sm:$0xff]   ;;  %v771_v4 = vld [vmem:[%s1005_s1 + $0x68] sm:$0xff]  }
   0x2   :  { %v768_v1 = vld [vmem:[%s1005_s1 + $0x38] sm:$0xff]   ;;  %669 = vmatprep.subr.bf16.mxu0 %v767_v0  ;;  %751 = vmatprep.subr.bf16.mxu1 %v767_v0  ;;  %v770_v3 = vld [vmem:[%s1005_s1 + $0x30] sm:$0xff]   ;;  %v772_v5 = vld [vmem:[%s1005_s1 + $0x28] sm:$0xff]  }
   0x3   :  { %670 = vmatpush3.bf16.msra.mxu0 %v768_v1  ;;  %759 = vmatpush3.bf16.msra.mxu1 %v768_v1  ;;  %v773_v6 = vld [vmem:[%s1005_s1 + $0x60] sm:$0xff]   ;;  %v775_v8 = vld [vmem:[%s1005_s1 + $0x58] sm:$0xff]   ;;  %v777_v10 = vld [vmem:[%s1005_s1 + $0x50] sm:$0xff]  }
   0x4   :  { %671 = vmatprep.subr.bf16.mxu0 %v769_v2  ;;  %752 = vmatprep.subr.bf16.mxu1 %v769_v2  ;;  %v774_v7 = vld [vmem:[%s1005_s1 + $0x20] sm:$0xff]   ;;  %v776_v9 = vld [vmem:[%s1005_s1 + $0x18] sm:$0xff]   ;;  %v778_v13 = vld [vmem:[%s1005_s1 + $0x10] sm:$0xff]  }
   0x5   :  { %v785_v11 = vld [vmem:[%s1006_s0 + $0x4] ss:$8 sps:$4 sm:$0xff]   ;;  %v783_v18 = vld [vmem:[%s1006_s0] ss:$8 sps:$4 sm:$0xff]   ;;  %v789_v20 = vld [vmem:[%s1006_s0 + $0x14] ss:$8 sps:$4 sm:$0xff]  }
   0x6   :  { %v788_v12 = vld [vmem:[%s1006_s0 + $0x64] ss:$8 sps:$4 sm:$0xff]   ;;  %310 = vmatprep.mubr.bf16.mxu0 %v785_v11  ;;  %v786_v19 = vld [vmem:[%s1006_s0 + $0x60] ss:$8 sps:$4 sm:$0xff]   ;;  %v792_v21 = vld [vmem:[%s1006_s0 + $0x74] ss:$8 sps:$4 sm:$0xff]  }
   0x7   :  { %672 = vmatpush3.bf16.msra.mxu0 %v770_v3  ;;  %760 = vmatpush3.bf16.msra.mxu1 %v770_v3  ;;  %v779_v14 = vld [vmem:[%s1005_s1 + $0x48] sm:$0xff]   ;;  %v781_v16 = vld [vmem:[%s1005_s1 + $0x40] sm:$0xff]   ;;  %v791_v22 = vld [vmem:[%s1006_s0 + $0x10] ss:$8 sps:$4 sm:$0xff]  }
   0x8   :  { %673 = vmatprep.subr.bf16.mxu0 %v771_v4  ;;  %753 = vmatprep.subr.bf16.mxu1 %v771_v4  ;;  %v780_v15 = vld [vmem:[%s1005_s1 + $0x8] sm:$0xff]   ;;  %v782_v17 = vld [vmem:[%s1005_s1] sm:$0xff]   ;;  %v794_v23 = vld [vmem:[%s1006_s0 + $0x70] ss:$8 sps:$4 sm:$0xff]  }
   0x9   :  { %358 = vmatprep.mubr.bf16.mxu1 %v788_v12  ;;  %v795_v24 = vld [vmem:[%s1006_s0 + $0x24] ss:$8 sps:$4 sm:$0xff]   ;;  %v797_v26 = vld [vmem:[%s1006_s0 + $0x20] ss:$8 sps:$4 sm:$0xff]   ;;  %v801_v28 = vld [vmem:[%s1006_s0 + $0x34] ss:$8 sps:$4 sm:$0xff]  }
   0xa   :  { %v798_v25 = vld [vmem:[%s1006_s0 + $0x84] ss:$8 sps:$4 sm:$0xff]   ;;  %v800_v27 = vld [vmem:[%s1006_s0 + $0x80] ss:$8 sps:$4 sm:$0xff]   ;;  %v804_v29 = vld [vmem:[%s1006_s0 + $0x94] ss:$8 sps:$4 sm:$0xff]  }
   0xb   :  { %674 = vmatpush3.bf16.msra.mxu0 %v772_v5  ;;  %761 = vmatpush3.bf16.msra.mxu1 %v772_v5  ;;  %v35_v30 = vld [vmem:[%s1006_s0 + $0xa0] sm:$0x11]  ;;  %v803_v31 = vld [vmem:[%s1006_s0 + $0x30] ss:$8 sps:$4 sm:$0xff]   ;;  %v812_v37 = vld [vmem:[%s1006_s0 + $0x54] ss:$8 sps:$4 sm:$0xff]  }
   0xc   :  { %675 = vmatprep.subr.bf16.mxu0 %v773_v6  ;;  %754 = vmatprep.subr.bf16.mxu1 %v773_v6  ;;  %v806_v32 = vld [vmem:[%s1006_s0 + $0x90] ss:$8 sps:$4 sm:$0xff]   ;;  %v807_v33 = vld [vmem:[%s1006_s0 + $0x44] ss:$8 sps:$4 sm:$0xff]   ;;  %v551_v34 = vcombine.high %v35_v30, %v35_v30  ;;  %v809_v35 = vld [vmem:[%s1006_s0 + $0x40] ss:$8 sps:$4 sm:$0xff]   ;;  %v550_v36 = vcombine.low %v35_v30, %v35_v30 }
   0xd   :  { %v814_v38 = vld [vmem:[%s1006_s0 + $0x50] ss:$8 sps:$4 sm:$0xff]   ;;  %v949_v43 = vld [vmem:[%s1007_s2] ss:$0 sm:$0xff] }
   0xf   :  { %676 = vmatpush3.bf16.msra.mxu0 %v774_v7  ;;  %762 = vmatpush3.bf16.msra.mxu1 %v774_v7 }
  0x10   :  { %677 = vmatprep.subr.bf16.mxu0 %v775_v8  ;;  %755 = vmatprep.subr.bf16.mxu1 %v775_v8 }
  0x13   :  { %678 = vmatpush3.bf16.msra.mxu0 %v776_v9  ;;  %763 = vmatpush3.bf16.msra.mxu1 %v776_v9 }
  0x14   :  { %679 = vmatprep.subr.bf16.mxu0 %v777_v10  ;;  %756 = vmatprep.subr.bf16.mxu1 %v777_v10 }
  0x17   :  { %680 = vmatpush3.bf16.msra.mxu0 %v778_v13  ;;  %764 = vmatpush3.bf16.msra.mxu1 %v778_v13 }
  0x18   :  { %681 = vmatprep.subr.bf16.mxu0 %v779_v14  ;;  %757 = vmatprep.subr.bf16.mxu1 %v779_v14 }
  0x1b   :  { %682 = vmatpush3.bf16.msra.mxu0 %v780_v15  ;;  %765 = vmatpush3.bf16.msra.mxu1 %v780_v15 }
  0x1c   :  { %683 = vmatprep.subr.bf16.mxu0 %v781_v16  ;;  %758 = vmatprep.subr.bf16.mxu1 %v781_v16 }
  0x1f   :  { %684 = vmatpush3.bf16.msra.mxu0 %v782_v17  ;;  %766 = vmatpush3.bf16.msra.mxu1 %v782_v17 }
  0x22   :  { %311 = vmatmul.mubr.bf16.vlgmr.msra.gmra.mxu0 %v783_v18  ;;  %359 = vmatmul.mubr.bf16.vlgmr.msra.gmra.mxu1 %v786_v19 }
  0x23   :  { %318 = vmatprep.mubr.bf16.mxu0 %v789_v20  ;;  %366 = vmatprep.mubr.bf16.mxu1 %v792_v21 }
  0x2a   :  { %319 = vmatmul.mubr.bf16.gmra.mxu0 %v791_v22  ;;  %367 = vmatmul.mubr.bf16.gmra.mxu1 %v794_v23 }
  0x2b   :  { %326 = vmatprep.mubr.bf16.mxu0 %v795_v24  ;;  %374 = vmatprep.mubr.bf16.mxu1 %v798_v25 }
  0x32   :  { %327 = vmatmul.mubr.bf16.gmra.mxu0 %v797_v26  ;;  %375 = vmatmul.mubr.bf16.gmra.mxu1 %v800_v27 }
  0x33   :  { %334 = vmatprep.mubr.bf16.mxu0 %v801_v28  ;;  %382 = vmatprep.mubr.bf16.mxu1 %v804_v29 }
  0x3a   :  { %335 = vmatmul.mubr.bf16.gmra.mxu0 %v803_v31  ;;  %383 = vmatmul.mubr.bf16.gmra.mxu1 %v806_v32 }
  0x3b   :  { %342 = vmatprep.mubr.bf16.mxu0 %v807_v33  ;;  %390 = vmatprep.mubr.bf16.mxu1 %v551_v34 }
  0x42   :  { %343 = vmatmul.mubr.bf16.gmra.mxu0 %v809_v35  ;;  %391 = vmatmul.mubr.bf16.gmra.mxu1 %v550_v36 }
  0x43   :  { %350 = vmatprep.mubr.bf16.mxu0 %v812_v37 }
  0x4a   :  { %351 = vmatmul.mubr.bf16.gmra.mxu0 %v814_v38 }
  0xe2   :  { %v685_v39 = vpop.f32.mrf.mxu0  ;;  %v721_v40 = vpop.f32.mrf.mxu1 }
  0xe4   :  { %v686_v41 = vpop.f32.mrf.mxu0  ;;  %v722_v42 = vpop.f32.mrf.mxu1 }
  0xe5   :  { %v687_v44 = vadd.f32 %v686_v41, %v685_v39  ;;  %v723_v45 = vadd.f32 %v722_v42, %v721_v40 }
  0xe6   :  { %v688_v46 = vpop.f32.mrf.mxu0  ;;  %v724_v47 = vpop.f32.mrf.mxu1 }
  0xe7   :  { %v361_v48 = vadd.f32 %v723_v45, %v949_v43  ;;  %v313_v49 = vadd.f32 %v687_v44, %v949_v43 }
  0xe8   :  { %v689_v50 = vpop.f32.mrf.mxu0  ;;  %v725_v51 = vpop.f32.mrf.mxu1 }
  0xe9   :  { %v690_v52 = vadd.f32 %v689_v50, %v688_v46  ;;  %v726_v53 = vadd.f32 %v725_v51, %v724_v47  ;;  %v410_v57 = vmax.f32 %v361_v48, 0.0  ;;  %v398_v59 = vmax.f32 %v313_v49, 0.0 }
  0xea   :  { %v691_v54 = vpop.f32.mrf.mxu0  ;;  %v727_v55 = vpop.f32.mrf.mxu1 }
  0xeb   :  { %v316_v56 = vadd.f32 %v690_v52, %v949_v43  ;;  %v364_v58 = vadd.f32 %v726_v53, %v949_v43 }
  0xec   :  { %v692_v60 = vpop.f32.mrf.mxu0  ;;  %v728_v61 = vpop.f32.mrf.mxu1 }
  0xed   :  { %v399_v62 = vmax.f32 %v316_v56, 0.0  ;;  %v693_v63 = vadd.f32 %v692_v60, %v691_v54  ;;  %v411_v0 = vmax.f32 %v364_v58, 0.0  ;;  %v729_v1 = vadd.f32 %v728_v61, %v727_v55 }
  0xee   :  { %v694_v2 = vpop.f32.mrf.mxu0  ;;  %v730_v3 = vpop.f32.mrf.mxu1 }
  0xef   :  { %v613_v4 = vpack.c.bf16 %v399_v62, %v398_v59  ;;  %v643_v5 = vpack.c.bf16 %v411_v0, %v410_v57  ;;  %v369_v6 = vadd.f32 %v729_v1, %v949_v43  ;;  %v321_v7 = vadd.f32 %v693_v63, %v949_v43 }
  0xf0   :  { %v695_v8 = vpop.f32.mrf.mxu0  ;;  %v731_v9 = vpop.f32.mrf.mxu1 }
  0xf1   :  { %614 = vst [vmem:[%s1008_s3] sm:$0xff] %v613_v4   ;;  %665 = vst [vmem:[%s1008_s3 + $0x30] sm:$0xff] %v643_v5   ;;  %v696_v10 = vadd.f32 %v695_v8, %v694_v2  ;;  %v732_v11 = vadd.f32 %v731_v9, %v730_v3  ;;  %v412_v15 = vmax.f32 %v369_v6, 0.0  ;;  %v400_v17 = vmax.f32 %v321_v7, 0.0 }
  0xf2   :  { %v697_v12 = vpop.f32.mrf.mxu0  ;;  %v733_v13 = vpop.f32.mrf.mxu1 }
  0xf3   :  { %v324_v14 = vadd.f32 %v696_v10, %v949_v43  ;;  %v372_v16 = vadd.f32 %v732_v11, %v949_v43 }
  0xf4   :  { %v698_v18 = vpop.f32.mrf.mxu0  ;;  %v734_v19 = vpop.f32.mrf.mxu1 }
  0xf5   :  { %v401_v20 = vmax.f32 %v324_v14, 0.0  ;;  %v699_v21 = vadd.f32 %v698_v18, %v697_v12  ;;  %v413_v22 = vmax.f32 %v372_v16, 0.0  ;;  %v735_v23 = vadd.f32 %v734_v19, %v733_v13 }
  0xf6   :  { %v700_v24 = vpop.f32.mrf.mxu0  ;;  %v736_v25 = vpop.f32.mrf.mxu1 }
  0xf7   :  { %v618_v26 = vpack.c.bf16 %v401_v20, %v400_v17  ;;  %v648_v27 = vpack.c.bf16 %v413_v22, %v412_v15  ;;  %v377_v28 = vadd.f32 %v735_v23, %v949_v43  ;;  %v329_v29 = vadd.f32 %v699_v21, %v949_v43 }
  0xf8   :  { %v701_v30 = vpop.f32.mrf.mxu0  ;;  %v737_v31 = vpop.f32.mrf.mxu1 }
  0xf9   :  { %660 = vst [vmem:[%s1008_s3 + $0x8] sm:$0xff] %v618_v26   ;;  %666 = vst [vmem:[%s1008_s3 + $0x38] sm:$0xff] %v648_v27   ;;  %v702_v32 = vadd.f32 %v701_v30, %v700_v24  ;;  %v738_v33 = vadd.f32 %v737_v31, %v736_v25  ;;  %v414_v37 = vmax.f32 %v377_v28, 0.0  ;;  %v402_v39 = vmax.f32 %v329_v29, 0.0 }
  0xfa   :  { %v703_v34 = vpop.f32.mrf.mxu0  ;;  %v739_v35 = vpop.f32.mrf.mxu1 }
  0xfb   :  { %v332_v36 = vadd.f32 %v702_v32, %v949_v43  ;;  %v380_v38 = vadd.f32 %v738_v33, %v949_v43 }
  0xfc   :  { %v704_v40 = vpop.f32.mrf.mxu0  ;;  %v740_v41 = vpop.f32.mrf.mxu1 }
  0xfd   :  { %v403_v42 = vmax.f32 %v332_v36, 0.0  ;;  %v705_v44 = vadd.f32 %v704_v40, %v703_v34  ;;  %v415_v45 = vmax.f32 %v380_v38, 0.0  ;;  %v741_v46 = vadd.f32 %v740_v41, %v739_v35 }
  0xfe   :  { %v706_v47 = vpop.f32.mrf.mxu0  ;;  %v742_v48 = vpop.f32.mrf.mxu1 }
  0xff   :  { %v623_v49 = vpack.c.bf16 %v403_v42, %v402_v39  ;;  %v653_v50 = vpack.c.bf16 %v415_v45, %v414_v37  ;;  %v385_v51 = vadd.f32 %v741_v46, %v949_v43  ;;  %v337_v52 = vadd.f32 %v705_v44, %v949_v43 }
 0x100   :  { %v707_v53 = vpop.f32.mrf.mxu0  ;;  %v743_v54 = vpop.f32.mrf.mxu1 }
 0x101   :  { %661 = vst [vmem:[%s1008_s3 + $0x10] sm:$0xff] %v623_v49   ;;  %667 = vst [vmem:[%s1008_s3 + $0x40] sm:$0xff] %v653_v50   ;;  %v708_v55 = vadd.f32 %v707_v53, %v706_v47  ;;  %v744_v56 = vadd.f32 %v743_v54, %v742_v48  ;;  %v416_v60 = vmax.f32 %v385_v51, 0.0  ;;  %v404_v62 = vmax.f32 %v337_v52, 0.0 }
 0x102   :  { %v709_v57 = vpop.f32.mrf.mxu0  ;;  %v745_v58 = vpop.f32.mrf.mxu1 }
 0x103   :  { %v340_v59 = vadd.f32 %v708_v55, %v949_v43  ;;  %v388_v61 = vadd.f32 %v744_v56, %v949_v43 }
 0x104   :  { %v710_v63 = vpop.f32.mrf.mxu0  ;;  %v746_v0 = vpop.f32.mrf.mxu1 }
 0x105   :  { %v405_v1 = vmax.f32 %v340_v59, 0.0  ;;  %v711_v2 = vadd.f32 %v710_v63, %v709_v57  ;;  %v417_v3 = vmax.f32 %v388_v61, 0.0  ;;  %v747_v4 = vadd.f32 %v746_v0, %v745_v58 }
 0x106   :  { %v712_v5 = vpop.f32.mrf.mxu0  ;;  %v748_v6 = vpop.f32.mrf.mxu1 }
 0x107   :  { %v628_v7 = vpack.c.bf16 %v405_v1, %v404_v62  ;;  %v658_v8 = vpack.c.bf16 %v417_v3, %v416_v60  ;;  %v393_v9 = vadd.f32 %v747_v4, %v949_v43  ;;  %v345_v12 = vadd.f32 %v711_v2, %v949_v43 }
 0x108   :  { %v713_v10 = vpop.f32.mrf.mxu0  ;;  %v749_v11 = vpop.f32.mrf.mxu1 }
 0x109   :  { %662 = vst [vmem:[%s1008_s3 + $0x18] sm:$0xff] %v628_v7   ;;  %668 = vst [vmem:[%s1008_s3 + $0x48] sm:$0xff] %v658_v8   ;;  %v714_v13 = vadd.f32 %v713_v10, %v712_v5  ;;  %v418_v14 = vmax.f32 %v393_v9, 0.0  ;;  %v406_v19 = vmax.f32 %v345_v12, 0.0 }
 0x10a   :  { %v715_v15 = vpop.f32.mrf.mxu0 }
 0x10b   :  { %v348_v16 = vadd.f32 %v714_v13, %v949_v43  ;;  %v609_v17 = vpack.c.bf16 %v418_v14, %v418_v14 }
 0x10c   :  { %v716_v18 = vpop.f32.mrf.mxu0 }
 0x10d   :  { %v407_v20 = vmax.f32 %v348_v16, 0.0  ;;  %524 = vst [vmem:[%s1008_s3 + $0x50] sm:$0x1] %v609_v17  ;;  %v717_v21 = vadd.f32 %v716_v18, %v715_v15 }
 0x10e   :  { %v718_v22 = vpop.f32.mrf.mxu0 }
 0x10f   :  { %v633_v23 = vpack.c.bf16 %v407_v20, %v406_v19  ;;  %v353_v25 = vadd.f32 %v717_v21, %v949_v43 }
 0x110   :  { %v719_v24 = vpop.f32.mrf.mxu0 }
 0x111   :  { %663 = vst [vmem:[%s1008_s3 + $0x20] sm:$0xff] %v633_v23   ;;  %v720_v26 = vadd.f32 %v719_v24, %v718_v22  ;;  %v408_v28 = vmax.f32 %v353_v25, 0.0 }
 0x113   :  { %v356_v27 = vadd.f32 %v720_v26, %v949_v43 }
 0x115   :  { %v409_v29 = vmax.f32 %v356_v27, 0.0 }
 0x117   :  { %v638_v30 = vpack.c.bf16 %v409_v29, %v408_v28 }
 0x119   :  { %664 = vst [vmem:[%s1008_s3 + $0x28] sm:$0xff] %v638_v30  }

// kernel: beta_vae_h_forward.16
= control target key start
LH: loop header
LB: loop body
LE: loop exit
PB: predicated region body
PF: predicated region fallthrough
CT: control target
= control target key end

     0   :  { %v1829_v0 = vmov 0.0   ;;  %vm1830_vm0 = vmmov 0   ;;  %s2265_s1 = inlined_call_operand.vmem [shape: bf16[128,128], index: 1, kind: input, shape index: {}]   ;;  %s2266_s0 = inlined_call_operand.vmem [shape: bf16[578,128], index: 0, kind: input, shape index: {}]   ;;  %s2267_s2 = inlined_call_operand.vmem [shape: f32[1,128], index: 2, kind: input, shape index: {}]   ;;  %s2268_s3 = inlined_call_operand.vmem [shape: bf16[578,128], index: 3, kind: output, shape index: {}]  }
   0x1   :  { %1602 = vmatprep.subr.bf16.mxu0 %v1829_v0  ;;  %v1784_v1 = vld [vmem:[%s2265_s1 + $0x38] sm:$0xff]   ;;  %1766 = vmatprep.subr.bf16.mxu1 %v1829_v0  ;;  %v1785_v2 = vld [vmem:[%s2265_s1 + $0x30] sm:$0xff]   ;;  %v1786_v3 = vld [vmem:[%s2265_s1 + $0x28] sm:$0xff]  }
   0x2   :  { %1618 = vmatprep.mubr.msk.bf16.mxu0 %vm1830_vm0, %v1829_v0  ;;  %1694 = vmatprep.mubr.msk.bf16.mxu1 %vm1830_vm0, %v1829_v0  ;;  %v1787_v4 = vld [vmem:[%s2265_s1 + $0x20] sm:$0xff]   ;;  %v1788_v5 = vld [vmem:[%s2265_s1 + $0x18] sm:$0xff]   ;;  %v1789_v6 = vld [vmem:[%s2265_s1 + $0x10] sm:$0xff]  }
   0x3   :  { %1603 = vmatpush3.bf16.msra.mxu0 %v1784_v1  ;;  %1774 = vmatpush3.bf16.msra.mxu1 %v1784_v1  ;;  %v1790_v7 = vld [vmem:[%s2265_s1 + $0x8] sm:$0xff]   ;;  %v1791_v8 = vld [vmem:[%s2265_s1] sm:$0xff]   ;;  %v1793_v10 = vld [vmem:[%s2266_s0 + $0x98] sm:$0xff]  }
   0x4   :  { %1604 = vmatprep.subr.bf16.mxu0 %v1829_v0  ;;  %1767 = vmatprep.subr.bf16.mxu1 %v1829_v0  ;;  %v1792_v9 = vld [vmem:[%s2266_s0] sm:$0xff]   ;;  %v1794_v11 = vld [vmem:[%s2266_s0 + $0x8] sm:$0xff]   ;;  %v1796_v13 = vld [vmem:[%s2266_s0 + $0x10] sm:$0xff]  }
   0x5   :  { %v1795_v12 = vld [vmem:[%s2266_s0 + $0xa0] sm:$0xff]   ;;  %v1797_v14 = vld [vmem:[%s2266_s0 + $0xa8] sm:$0xff]   ;;  %v1798_v15 = vld [vmem:[%s2266_s0 + $0x18] sm:$0xff]  }
   0x6   :  { %v1799_v16 = vld [vmem:[%s2266_s0 + $0xb0] sm:$0xff]   ;;  %v1800_v17 = vld [vmem:[%s2266_s0 + $0x20] sm:$0xff]   ;;  %v1801_v18 = vld [vmem:[%s2266_s0 + $0xb8] sm:$0xff]  }
   0x7   :  { %1605 = vmatpush3.bf16.msra.mxu0 %v1785_v2  ;;  %1775 = vmatpush3.bf16.msra.mxu1 %v1785_v2  ;;  %v1802_v19 = vld [vmem:[%s2266_s0 + $0x28] sm:$0xff]   ;;  %v1803_v20 = vld [vmem:[%s2266_s0 + $0xc0] sm:$0xff]   ;;  %v1804_v21 = vld [vmem:[%s2266_s0 + $0x30] sm:$0xff]  }
   0x8   :  { %1606 = vmatprep.subr.bf16.mxu0 %v1829_v0  ;;  %1768 = vmatprep.subr.bf16.mxu1 %v1829_v0  ;;  %v1805_v22 = vld [vmem:[%s2266_s0 + $0xc8] sm:$0xff]   ;;  %v1806_v23 = vld [vmem:[%s2266_s0 + $0x38] sm:$0xff]   ;;  %v1807_v24 = vld [vmem:[%s2266_s0 + $0xd0] sm:$0xff]  }
   0x9   :  { %v1808_v25 = vld [vmem:[%s2266_s0 + $0x40] sm:$0xff]   ;;  %v1809_v26 = vld [vmem:[%s2266_s0 + $0xd8] sm:$0xff]   ;;  %v1810_v27 = vld [vmem:[%s2266_s0 + $0x48] sm:$0xff]  }
   0xa   :  { %v1811_v28 = vld [vmem:[%s2266_s0 + $0xe0] sm:$0xff]   ;;  %v1812_v29 = vld [vmem:[%s2266_s0 + $0x50] sm:$0xff]   ;;  %v1813_v30 = vld [vmem:[%s2266_s0 + $0xe8] sm:$0xff]  }
   0xb   :  { %1607 = vmatpush3.bf16.msra.mxu0 %v1786_v3  ;;  %1776 = vmatpush3.bf16.msra.mxu1 %v1786_v3  ;;  %v1814_v31 = vld [vmem:[%s2266_s0 + $0x58] sm:$0xff]   ;;  %v1815_v32 = vld [vmem:[%s2266_s0 + $0xf0] sm:$0xff]   ;;  %v1816_v33 = vld [vmem:[%s2266_s0 + $0x60] sm:$0xff]  }
   0xc   :  { %1608 = vmatprep.subr.bf16.mxu0 %v1829_v0  ;;  %1769 = vmatprep.subr.bf16.mxu1 %v1829_v0  ;;  %v1817_v34 = vld [vmem:[%s2266_s0 + $0xf8] sm:$0xff]   ;;  %v1818_v35 = vld [vmem:[%s2266_s0 + $0x68] sm:$0xff]   ;;  %v1819_v36 = vld [vmem:[%s2266_s0 + $0x100] sm:$0xff]  }
   0xd   :  { %v1820_v37 = vld [vmem:[%s2266_s0 + $0x70] sm:$0xff]   ;;  %v1821_v38 = vld [vmem:[%s2266_s0 + $0x108] sm:$0xff]   ;;  %v1822_v39 = vld [vmem:[%s2266_s0 + $0x78] sm:$0xff]  }
   0xe   :  { %v1823_v40 = vld [vmem:[%s2266_s0 + $0x110] sm:$0xff]   ;;  %v1824_v41 = vld [vmem:[%s2266_s0 + $0x80] sm:$0xff]   ;;  %v1825_v42 = vld [vmem:[%s2266_s0 + $0x118] sm:$0xff]  }
   0xf   :  { %1609 = vmatpush3.bf16.msra.mxu0 %v1787_v4  ;;  %1777 = vmatpush3.bf16.msra.mxu1 %v1787_v4  ;;  %v1826_v43 = vld [vmem:[%s2266_s0 + $0x88] sm:$0xff]   ;;  %v1827_v44 = vld [vmem:[%s2266_s0 + $0x120] ss:$0 sps:$4 sm:$0x11]   ;;  %v1828_v45 = vld [vmem:[%s2266_s0 + $0x90] sm:$0xff]  }
  0x10   :  { %1610 = vmatprep.subr.bf16.mxu0 %v1829_v0  ;;  %1770 = vmatprep.subr.bf16.mxu1 %v1829_v0  ;;  %v2079_v46 = vld [vmem:[%s2267_s2] ss:$0 sm:$0xff] }
  0x13   :  { %1611 = vmatpush3.bf16.msra.mxu0 %v1788_v5  ;;  %1778 = vmatpush3.bf16.msra.mxu1 %v1788_v5 }
  0x14   :  { %1612 = vmatprep.subr.bf16.mxu0 %v1829_v0  ;;  %1771 = vmatprep.subr.bf16.mxu1 %v1829_v0 }
  0x17   :  { %1613 = vmatpush3.bf16.msra.mxu0 %v1789_v6  ;;  %1779 = vmatpush3.bf16.msra.mxu1 %v1789_v6 }
  0x18   :  { %1614 = vmatprep.subr.bf16.mxu0 %v1829_v0  ;;  %1772 = vmatprep.subr.bf16.mxu1 %v1829_v0 }
  0x1b   :  { %1615 = vmatpush3.bf16.msra.mxu0 %v1790_v7  ;;  %1780 = vmatpush3.bf16.msra.mxu1 %v1790_v7 }
  0x1c   :  { %1616 = vmatprep.subr.bf16.mxu0 %v1829_v0  ;;  %1773 = vmatprep.subr.bf16.mxu1 %v1829_v0 }
  0x1f   :  { %1617 = vmatpush3.bf16.msra.mxu0 %v1791_v8  ;;  %1781 = vmatpush3.bf16.msra.mxu1 %v1791_v8 }
  0x22   :  { %1619 = vmatmul.mubr.bf16.vlgmr.msra.gmra.mxu0 %v1792_v9  ;;  %1695 = vmatmul.mubr.bf16.vlgmr.msra.gmra.mxu1 %v1793_v10 }
  0x23   :  { %1622 = vmatprep.mubr.msk.bf16.mxu0 %vm1830_vm0, %v1829_v0  ;;  %1698 = vmatprep.mubr.msk.bf16.mxu1 %vm1830_vm0, %v1829_v0 }
  0x2a   :  { %1623 = vmatmul.mubr.bf16.gmra.mxu0 %v1794_v11  ;;  %1699 = vmatmul.mubr.bf16.gmra.mxu1 %v1795_v12 }
  0x2b   :  { %1626 = vmatprep.mubr.msk.bf16.mxu0 %vm1830_vm0, %v1829_v0  ;;  %1702 = vmatprep.mubr.msk.bf16.mxu1 %vm1830_vm0, %v1829_v0 }
  0x32   :  { %1627 = vmatmul.mubr.bf16.gmra.mxu0 %v1796_v13  ;;  %1703 = vmatmul.mubr.bf16.gmra.mxu1 %v1797_v14 }
  0x33   :  { %1630 = vmatprep.mubr.msk.bf16.mxu0 %vm1830_vm0, %v1829_v0  ;;  %1706 = vmatprep.mubr.msk.bf16.mxu1 %vm1830_vm0, %v1829_v0 }
  0x3a   :  { %1631 = vmatmul.mubr.bf16.gmra.mxu0 %v1798_v15  ;;  %1707 = vmatmul.mubr.bf16.gmra.mxu1 %v1799_v16 }
  0x3b   :  { %1634 = vmatprep.mubr.msk.bf16.mxu0 %vm1830_vm0, %v1829_v0  ;;  %1710 = vmatprep.mubr.msk.bf16.mxu1 %vm1830_vm0, %v1829_v0 }
  0x42   :  { %1635 = vmatmul.mubr.bf16.gmra.mxu0 %v1800_v17  ;;  %1711 = vmatmul.mubr.bf16.gmra.mxu1 %v1801_v18 }
  0x43   :  { %1638 = vmatprep.mubr.msk.bf16.mxu0 %vm1830_vm0, %v1829_v0  ;;  %1714 = vmatprep.mubr.msk.bf16.mxu1 %vm1830_vm0, %v1829_v0 }
  0x4a   :  { %1639 = vmatmul.mubr.bf16.gmra.mxu0 %v1802_v19  ;;  %1715 = vmatmul.mubr.bf16.gmra.mxu1 %v1803_v20 }
  0x4b   :  { %1642 = vmatprep.mubr.msk.bf16.mxu0 %vm1830_vm0, %v1829_v0  ;;  %1718 = vmatprep.mubr.msk.bf16.mxu1 %vm1830_vm0, %v1829_v0 }
  0x52   :  { %1643 = vmatmul.mubr.bf16.gmra.mxu0 %v1804_v21  ;;  %1719 = vmatmul.mubr.bf16.gmra.mxu1 %v1805_v22 }
  0x53   :  { %1646 = vmatprep.mubr.msk.bf16.mxu0 %vm1830_vm0, %v1829_v0  ;;  %1722 = vmatprep.mubr.msk.bf16.mxu1 %vm1830_vm0, %v1829_v0 }
  0x5a   :  { %1647 = vmatmul.mubr.bf16.gmra.mxu0 %v1806_v23  ;;  %1723 = vmatmul.mubr.bf16.gmra.mxu1 %v1807_v24 }
  0x5b   :  { %1650 = vmatprep.mubr.msk.bf16.mxu0 %vm1830_vm0, %v1829_v0  ;;  %1726 = vmatprep.mubr.msk.bf16.mxu1 %vm1830_vm0, %v1829_v0 }
  0x62   :  { %1651 = vmatmul.mubr.bf16.gmra.mxu0 %v1808_v25  ;;  %1727 = vmatmul.mubr.bf16.gmra.mxu1 %v1809_v26 }
  0x63   :  { %1654 = vmatprep.mubr.msk.bf16.mxu0 %vm1830_vm0, %v1829_v0  ;;  %1730 = vmatprep.mubr.msk.bf16.mxu1 %vm1830_vm0, %v1829_v0 }
  0x6a   :  { %1655 = vmatmul.mubr.bf16.gmra.mxu0 %v1810_v27  ;;  %1731 = vmatmul.mubr.bf16.gmra.mxu1 %v1811_v28 }
  0x6b   :  { %1658 = vmatprep.mubr.msk.bf16.mxu0 %vm1830_vm0, %v1829_v0  ;;  %1734 = vmatprep.mubr.msk.bf16.mxu1 %vm1830_vm0, %v1829_v0 }
  0x72   :  { %1659 = vmatmul.mubr.bf16.gmra.mxu0 %v1812_v29  ;;  %1735 = vmatmul.mubr.bf16.gmra.mxu1 %v1813_v30 }
  0x73   :  { %1662 = vmatprep.mubr.msk.bf16.mxu0 %vm1830_vm0, %v1829_v0  ;;  %1738 = vmatprep.mubr.msk.bf16.mxu1 %vm1830_vm0, %v1829_v0 }
  0x7a   :  { %1663 = vmatmul.mubr.bf16.gmra.mxu0 %v1814_v31  ;;  %1739 = vmatmul.mubr.bf16.gmra.mxu1 %v1815_v32 }
  0x7b   :  { %1666 = vmatprep.mubr.msk.bf16.mxu0 %vm1830_vm0, %v1829_v0  ;;  %1742 = vmatprep.mubr.msk.bf16.mxu1 %vm1830_vm0, %v1829_v0 }
  0x82   :  { %1667 = vmatmul.mubr.bf16.gmra.mxu0 %v1816_v33  ;;  %1743 = vmatmul.mubr.bf16.gmra.mxu1 %v1817_v34 }
  0x83   :  { %1670 = vmatprep.mubr.msk.bf16.mxu0 %vm1830_vm0, %v1829_v0  ;;  %1746 = vmatprep.mubr.msk.bf16.mxu1 %vm1830_vm0, %v1829_v0 }
  0x8a   :  { %1671 = vmatmul.mubr.bf16.gmra.mxu0 %v1818_v35  ;;  %1747 = vmatmul.mubr.bf16.gmra.mxu1 %v1819_v36 }
  0x8b   :  { %1674 = vmatprep.mubr.msk.bf16.mxu0 %vm1830_vm0, %v1829_v0  ;;  %1750 = vmatprep.mubr.msk.bf16.mxu1 %vm1830_vm0, %v1829_v0 }
  0x92   :  { %1675 = vmatmul.mubr.bf16.gmra.mxu0 %v1820_v37  ;;  %1751 = vmatmul.mubr.bf16.gmra.mxu1 %v1821_v38 }
  0x93   :  { %1678 = vmatprep.mubr.msk.bf16.mxu0 %vm1830_vm0, %v1829_v0  ;;  %1754 = vmatprep.mubr.msk.bf16.mxu1 %vm1830_vm0, %v1829_v0 }
  0x9a   :  { %1679 = vmatmul.mubr.bf16.gmra.mxu0 %v1822_v39  ;;  %1755 = vmatmul.mubr.bf16.gmra.mxu1 %v1823_v40 }
  0x9b   :  { %1682 = vmatprep.mubr.msk.bf16.mxu0 %vm1830_vm0, %v1829_v0  ;;  %1758 = vmatprep.mubr.msk.bf16.mxu1 %vm1830_vm0, %v1829_v0 }
  0xa2   :  { %1683 = vmatmul.mubr.bf16.gmra.mxu0 %v1824_v41  ;;  %1759 = vmatmul.mubr.bf16.gmra.mxu1 %v1825_v42 }
  0xa3   :  { %1686 = vmatprep.mubr.msk.bf16.mxu0 %vm1830_vm0, %v1829_v0  ;;  %1762 = vmatprep.mubr.msk.bf16.mxu1 %vm1830_vm0, %v1829_v0 }
  0xaa   :  { %1687 = vmatmul.mubr.bf16.gmra.mxu0 %v1826_v43  ;;  %1763 = vmatmul.mubr.bf16.gmra.mxu1 %v1827_v44 }
  0xab   :  { %1690 = vmatprep.mubr.msk.bf16.mxu0 %vm1830_vm0, %v1829_v0 }
  0xb2   :  { %1691 = vmatmul.mubr.bf16.gmra.mxu0 %v1828_v45 }
  0xe2   :  { %v413_v47 = vpop.f32.mrf.mxu0  ;;  %v565_v48 = vpop.f32.mrf.mxu1 }
  0xe3   :  { %v566_v49 = vadd.f32 %v2079_v46, %v565_v48  ;;  %v414_v52 = vadd.f32 %v2079_v46, %v413_v47 }
  0xe4   :  { %v1620_v50 = vpop.f32.mrf.mxu0  ;;  %v1696_v51 = vpop.f32.mrf.mxu1 }
  0xe5   :  { %v745_v56 = vmax.f32 %v566_v49, 0.0  ;;  %v707_v60 = vmax.f32 %v414_v52, 0.0 }
  0xe6   :  { %v416_v53 = vpop.f32.mrf.mxu0  ;;  %v568_v54 = vpop.f32.mrf.mxu1 }
  0xe7   :  { %v417_v55 = vadd.f32 %v2079_v46, %v416_v53  ;;  %v569_v57 = vadd.f32 %v2079_v46, %v568_v54 }
  0xe8   :  { %v1621_v58 = vpop.f32.mrf.mxu0  ;;  %v1697_v59 = vpop.f32.mrf.mxu1 }
  0xe9   :  { %v708_v61 = vmax.f32 %v417_v55, 0.0  ;;  %v746_v62 = vmax.f32 %v569_v57, 0.0 }
  0xea   :  { %v421_v63 = vpop.f32.mrf.mxu0  ;;  %v573_v0 = vpop.f32.mrf.mxu1 }
  0xeb   :  { %v1345_v1 = vpack.c.bf16 %v708_v61, %v707_v60  ;;  %v1440_v2 = vpack.c.bf16 %v746_v62, %v745_v56  ;;  %v574_v3 = vadd.f32 %v2079_v46, %v573_v0  ;;  %v422_v6 = vadd.f32 %v2079_v46, %v421_v63 }
  0xec   :  { %v1624_v4 = vpop.f32.mrf.mxu0  ;;  %v1700_v5 = vpop.f32.mrf.mxu1 }
  0xed   :  { %1346 = vst [vmem:[%s2268_s3] sm:$0xff] %v1345_v1   ;;  %1540 = vst [vmem:[%s2268_s3 + $0x98] sm:$0xff] %v1440_v2   ;;  %v747_v10 = vmax.f32 %v574_v3, 0.0  ;;  %v709_v14 = vmax.f32 %v422_v6, 0.0 }
  0xee   :  { %v424_v7 = vpop.f32.mrf.mxu0  ;;  %v576_v8 = vpop.f32.mrf.mxu1 }
  0xef   :  { %v425_v9 = vadd.f32 %v2079_v46, %v424_v7  ;;  %v577_v11 = vadd.f32 %v2079_v46, %v576_v8 }
  0xf0   :  { %v1625_v12 = vpop.f32.mrf.mxu0  ;;  %v1701_v13 = vpop.f32.mrf.mxu1 }
  0xf1   :  { %v710_v15 = vmax.f32 %v425_v9, 0.0  ;;  %v748_v16 = vmax.f32 %v577_v11, 0.0 }
  0xf2   :  { %v429_v17 = vpop.f32.mrf.mxu0  ;;  %v581_v18 = vpop.f32.mrf.mxu1 }
  0xf3   :  { %v1350_v19 = vpack.c.bf16 %v710_v15, %v709_v14  ;;  %v1445_v20 = vpack.c.bf16 %v748_v16, %v747_v10  ;;  %v582_v21 = vadd.f32 %v2079_v46, %v581_v18  ;;  %v430_v24 = vadd.f32 %v2079_v46, %v429_v17 }
  0xf4   :  { %v1628_v22 = vpop.f32.mrf.mxu0  ;;  %v1704_v23 = vpop.f32.mrf.mxu1 }
  0xf5   :  { %1522 = vst [vmem:[%s2268_s3 + $0x8] sm:$0xff] %v1350_v19   ;;  %1541 = vst [vmem:[%s2268_s3 + $0xa0] sm:$0xff] %v1445_v20   ;;  %v749_v28 = vmax.f32 %v582_v21, 0.0  ;;  %v711_v32 = vmax.f32 %v430_v24, 0.0 }
  0xf6   :  { %v432_v25 = vpop.f32.mrf.mxu0  ;;  %v584_v26 = vpop.f32.mrf.mxu1 }
  0xf7   :  { %v433_v27 = vadd.f32 %v2079_v46, %v432_v25  ;;  %v585_v29 = vadd.f32 %v2079_v46, %v584_v26 }
  0xf8   :  { %v1629_v30 = vpop.f32.mrf.mxu0  ;;  %v1705_v31 = vpop.f32.mrf.mxu1 }
  0xf9   :  { %v712_v33 = vmax.f32 %v433_v27, 0.0  ;;  %v750_v34 = vmax.f32 %v585_v29, 0.0 }
  0xfa   :  { %v437_v35 = vpop.f32.mrf.mxu0  ;;  %v589_v36 = vpop.f32.mrf.mxu1 }
  0xfb   :  { %v1355_v37 = vpack.c.bf16 %v712_v33, %v711_v32  ;;  %v1450_v38 = vpack.c.bf16 %v750_v34, %v749_v28  ;;  %v590_v39 = vadd.f32 %v2079_v46, %v589_v36  ;;  %v438_v42 = vadd.f32 %v2079_v46, %v437_v35 }
  0xfc   :  { %v1632_v40 = vpop.f32.mrf.mxu0  ;;  %v1708_v41 = vpop.f32.mrf.mxu1 }
  0xfd   :  { %1523 = vst [vmem:[%s2268_s3 + $0x10] sm:$0xff] %v1355_v37   ;;  %1542 = vst [vmem:[%s2268_s3 + $0xa8] sm:$0xff] %v1450_v38   ;;  %v751_v47 = vmax.f32 %v590_v39, 0.0  ;;  %v713_v51 = vmax.f32 %v438_v42, 0.0 }
  0xfe   :  { %v440_v43 = vpop.f32.mrf.mxu0  ;;  %v592_v44 = vpop.f32.mrf.mxu1 }
  0xff   :  { %v441_v45 = vadd.f32 %v2079_v46, %v440_v43  ;;  %v593_v48 = vadd.f32 %v2079_v46, %v592_v44 }
 0x100   :  { %v1633_v49 = vpop.f32.mrf.mxu0  ;;  %v1709_v50 = vpop.f32.mrf.mxu1 }
 0x101   :  { %v714_v52 = vmax.f32 %v441_v45, 0.0  ;;  %v752_v53 = vmax.f32 %v593_v48, 0.0 }
 0x102   :  { %v445_v54 = vpop.f32.mrf.mxu0  ;;  %v597_v55 = vpop.f32.mrf.mxu1 }
 0x103   :  { %v1360_v56 = vpack.c.bf16 %v714_v52, %v713_v51  ;;  %v1455_v57 = vpack.c.bf16 %v752_v53, %v751_v47  ;;  %v598_v58 = vadd.f32 %v2079_v46, %v597_v55  ;;  %v446_v61 = vadd.f32 %v2079_v46, %v445_v54 }
 0x104   :  { %v1636_v59 = vpop.f32.mrf.mxu0  ;;  %v1712_v60 = vpop.f32.mrf.mxu1 }
 0x105   :  { %1524 = vst [vmem:[%s2268_s3 + $0x18] sm:$0xff] %v1360_v56   ;;  %1543 = vst [vmem:[%s2268_s3 + $0xb0] sm:$0xff] %v1455_v57   ;;  %v753_v1 = vmax.f32 %v598_v58, 0.0  ;;  %v715_v5 = vmax.f32 %v446_v61, 0.0 }
 0x106   :  { %v448_v62 = vpop.f32.mrf.mxu0  ;;  %v600_v63 = vpop.f32.mrf.mxu1 }
 0x107   :  { %v449_v0 = vadd.f32 %v2079_v46, %v448_v62  ;;  %v601_v2 = vadd.f32 %v2079_v46, %v600_v63 }
 0x108   :  { %v1637_v3 = vpop.f32.mrf.mxu0  ;;  %v1713_v4 = vpop.f32.mrf.mxu1 }
 0x109   :  { %v716_v6 = vmax.f32 %v449_v0, 0.0  ;;  %v754_v7 = vmax.f32 %v601_v2, 0.0 }
 0x10a   :  { %v453_v8 = vpop.f32.mrf.mxu0  ;;  %v605_v9 = vpop.f32.mrf.mxu1 }
 0x10b   :  { %v1365_v10 = vpack.c.bf16 %v716_v6, %v715_v5  ;;  %v1460_v11 = vpack.c.bf16 %v754_v7, %v753_v1  ;;  %v606_v12 = vadd.f32 %v2079_v46, %v605_v9  ;;  %v454_v15 = vadd.f32 %v2079_v46, %v453_v8 }
 0x10c   :  { %v1640_v13 = vpop.f32.mrf.mxu0  ;;  %v1716_v14 = vpop.f32.mrf.mxu1 }
 0x10d   :  { %1525 = vst [vmem:[%s2268_s3 + $0x20] sm:$0xff] %v1365_v10   ;;  %1544 = vst [vmem:[%s2268_s3 + $0xb8] sm:$0xff] %v1460_v11   ;;  %v755_v19 = vmax.f32 %v606_v12, 0.0  ;;  %v717_v23 = vmax.f32 %v454_v15, 0.0 }
 0x10e   :  { %v456_v16 = vpop.f32.mrf.mxu0  ;;  %v608_v17 = vpop.f32.mrf.mxu1 }
 0x10f   :  { %v457_v18 = vadd.f32 %v2079_v46, %v456_v16  ;;  %v609_v20 = vadd.f32 %v2079_v46, %v608_v17 }
 0x110   :  { %v1641_v21 = vpop.f32.mrf.mxu0  ;;  %v1717_v22 = vpop.f32.mrf.mxu1 }
 0x111   :  { %v718_v24 = vmax.f32 %v457_v18, 0.0  ;;  %v756_v25 = vmax.f32 %v609_v20, 0.0 }
 0x112   :  { %v461_v26 = vpop.f32.mrf.mxu0  ;;  %v613_v27 = vpop.f32.mrf.mxu1 }
 0x113   :  { %v1370_v28 = vpack.c.bf16 %v718_v24, %v717_v23  ;;  %v1465_v29 = vpack.c.bf16 %v756_v25, %v755_v19  ;;  %v614_v30 = vadd.f32 %v2079_v46, %v613_v27  ;;  %v462_v33 = vadd.f32 %v2079_v46, %v461_v26 }
 0x114   :  { %v1644_v31 = vpop.f32.mrf.mxu0  ;;  %v1720_v32 = vpop.f32.mrf.mxu1 }
 0x115   :  { %1526 = vst [vmem:[%s2268_s3 + $0x28] sm:$0xff] %v1370_v28   ;;  %1545 = vst [vmem:[%s2268_s3 + $0xc0] sm:$0xff] %v1465_v29   ;;  %v757_v37 = vmax.f32 %v614_v30, 0.0  ;;  %v719_v41 = vmax.f32 %v462_v33, 0.0 }
 0x116   :  { %v464_v34 = vpop.f32.mrf.mxu0  ;;  %v616_v35 = vpop.f32.mrf.mxu1 }
 0x117   :  { %v465_v36 = vadd.f32 %v2079_v46, %v464_v34  ;;  %v617_v38 = vadd.f32 %v2079_v46, %v616_v35 }
 0x118   :  { %v1645_v39 = vpop.f32.mrf.mxu0  ;;  %v1721_v40 = vpop.f32.mrf.mxu1 }
 0x119   :  { %v720_v42 = vmax.f32 %v465_v36, 0.0  ;;  %v758_v43 = vmax.f32 %v617_v38, 0.0 }
 0x11a   :  { %v469_v44 = vpop.f32.mrf.mxu0  ;;  %v621_v45 = vpop.f32.mrf.mxu1 }
 0x11b   :  { %v1375_v47 = vpack.c.bf16 %v720_v42, %v719_v41  ;;  %v1470_v48 = vpack.c.bf16 %v758_v43, %v757_v37  ;;  %v622_v49 = vadd.f32 %v2079_v46, %v621_v45  ;;  %v470_v52 = vadd.f32 %v2079_v46, %v469_v44 }
 0x11c   :  { %v1648_v50 = vpop.f32.mrf.mxu0  ;;  %v1724_v51 = vpop.f32.mrf.mxu1 }
 0x11d   :  { %1527 = vst [vmem:[%s2268_s3 + $0x30] sm:$0xff] %v1375_v47   ;;  %1546 = vst [vmem:[%s2268_s3 + $0xc8] sm:$0xff] %v1470_v48   ;;  %v759_v56 = vmax.f32 %v622_v49, 0.0  ;;  %v721_v60 = vmax.f32 %v470_v52, 0.0 }
 0x11e   :  { %v472_v53 = vpop.f32.mrf.mxu0  ;;  %v624_v54 = vpop.f32.mrf.mxu1 }
 0x11f   :  { %v473_v55 = vadd.f32 %v2079_v46, %v472_v53  ;;  %v625_v57 = vadd.f32 %v2079_v46, %v624_v54 }
 0x120   :  { %v1649_v58 = vpop.f32.mrf.mxu0  ;;  %v1725_v59 = vpop.f32.mrf.mxu1 }
 0x121   :  { %v722_v61 = vmax.f32 %v473_v55, 0.0  ;;  %v760_v62 = vmax.f32 %v625_v57, 0.0 }
 0x122   :  { %v477_v63 = vpop.f32.mrf.mxu0  ;;  %v629_v0 = vpop.f32.mrf.mxu1 }
 0x123   :  { %v1380_v1 = vpack.c.bf16 %v722_v61, %v721_v60  ;;  %v1475_v2 = vpack.c.bf16 %v760_v62, %v759_v56  ;;  %v630_v3 = vadd.f32 %v2079_v46, %v629_v0  ;;  %v478_v6 = vadd.f32 %v2079_v46, %v477_v63 }
 0x124   :  { %v1652_v4 = vpop.f32.mrf.mxu0  ;;  %v1728_v5 = vpop.f32.mrf.mxu1 }
 0x125   :  { %1528 = vst [vmem:[%s2268_s3 + $0x38] sm:$0xff] %v1380_v1   ;;  %1547 = vst [vmem:[%s2268_s3 + $0xd0] sm:$0xff] %v1475_v2   ;;  %v761_v10 = vmax.f32 %v630_v3, 0.0  ;;  %v723_v14 = vmax.f32 %v478_v6, 0.0 }
 0x126   :  { %v480_v7 = vpop.f32.mrf.mxu0  ;;  %v632_v8 = vpop.f32.mrf.mxu1 }
 0x127   :  { %v481_v9 = vadd.f32 %v2079_v46, %v480_v7  ;;  %v633_v11 = vadd.f32 %v2079_v46, %v632_v8 }
 0x128   :  { %v1653_v12 = vpop.f32.mrf.mxu0  ;;  %v1729_v13 = vpop.f32.mrf.mxu1 }
 0x129   :  { %v724_v15 = vmax.f32 %v481_v9, 0.0  ;;  %v762_v16 = vmax.f32 %v633_v11, 0.0 }
 0x12a   :  { %v485_v17 = vpop.f32.mrf.mxu0  ;;  %v637_v18 = vpop.f32.mrf.mxu1 }
 0x12b   :  { %v1385_v19 = vpack.c.bf16 %v724_v15, %v723_v14  ;;  %v1480_v20 = vpack.c.bf16 %v762_v16, %v761_v10  ;;  %v638_v21 = vadd.f32 %v2079_v46, %v637_v18  ;;  %v486_v24 = vadd.f32 %v2079_v46, %v485_v17 }
 0x12c   :  { %v1656_v22 = vpop.f32.mrf.mxu0  ;;  %v1732_v23 = vpop.f32.mrf.mxu1 }
 0x12d   :  { %1529 = vst [vmem:[%s2268_s3 + $0x40] sm:$0xff] %v1385_v19   ;;  %1548 = vst [vmem:[%s2268_s3 + $0xd8] sm:$0xff] %v1480_v20   ;;  %v763_v28 = vmax.f32 %v638_v21, 0.0  ;;  %v725_v32 = vmax.f32 %v486_v24, 0.0 }
 0x12e   :  { %v488_v25 = vpop.f32.mrf.mxu0  ;;  %v640_v26 = vpop.f32.mrf.mxu1 }
 0x12f   :  { %v489_v27 = vadd.f32 %v2079_v46, %v488_v25  ;;  %v641_v29 = vadd.f32 %v2079_v46, %v640_v26 }
 0x130   :  { %v1657_v30 = vpop.f32.mrf.mxu0  ;;  %v1733_v31 = vpop.f32.mrf.mxu1 }
 0x131   :  { %v726_v33 = vmax.f32 %v489_v27, 0.0  ;;  %v764_v34 = vmax.f32 %v641_v29, 0.0 }
 0x132   :  { %v493_v35 = vpop.f32.mrf.mxu0  ;;  %v645_v36 = vpop.f32.mrf.mxu1 }
 0x133   :  { %v1390_v37 = vpack.c.bf16 %v726_v33, %v725_v32  ;;  %v1485_v38 = vpack.c.bf16 %v764_v34, %v763_v28  ;;  %v646_v39 = vadd.f32 %v2079_v46, %v645_v36  ;;  %v494_v42 = vadd.f32 %v2079_v46, %v493_v35 }
 0x134   :  { %v1660_v40 = vpop.f32.mrf.mxu0  ;;  %v1736_v41 = vpop.f32.mrf.mxu1 }
 0x135   :  { %1530 = vst [vmem:[%s2268_s3 + $0x48] sm:$0xff] %v1390_v37   ;;  %1549 = vst [vmem:[%s2268_s3 + $0xe0] sm:$0xff] %v1485_v38   ;;  %v765_v47 = vmax.f32 %v646_v39, 0.0  ;;  %v727_v51 = vmax.f32 %v494_v42, 0.0 }
 0x136   :  { %v496_v43 = vpop.f32.mrf.mxu0  ;;  %v648_v44 = vpop.f32.mrf.mxu1 }
 0x137   :  { %v497_v45 = vadd.f32 %v2079_v46, %v496_v43  ;;  %v649_v48 = vadd.f32 %v2079_v46, %v648_v44 }
 0x138   :  { %v1661_v49 = vpop.f32.mrf.mxu0  ;;  %v1737_v50 = vpop.f32.mrf.mxu1 }
 0x139   :  { %v728_v52 = vmax.f32 %v497_v45, 0.0  ;;  %v766_v53 = vmax.f32 %v649_v48, 0.0 }
 0x13a   :  { %v501_v54 = vpop.f32.mrf.mxu0  ;;  %v653_v55 = vpop.f32.mrf.mxu1 }
 0x13b   :  { %v1395_v56 = vpack.c.bf16 %v728_v52, %v727_v51  ;;  %v1490_v57 = vpack.c.bf16 %v766_v53, %v765_v47  ;;  %v654_v58 = vadd.f32 %v2079_v46, %v653_v55  ;;  %v502_v61 = vadd.f32 %v2079_v46, %v501_v54 }
 0x13c   :  { %v1664_v59 = vpop.f32.mrf.mxu0  ;;  %v1740_v60 = vpop.f32.mrf.mxu1 }
 0x13d   :  { %1531 = vst [vmem:[%s2268_s3 + $0x50] sm:$0xff] %v1395_v56   ;;  %1550 = vst [vmem:[%s2268_s3 + $0xe8] sm:$0xff] %v1490_v57   ;;  %v767_v1 = vmax.f32 %v654_v58, 0.0  ;;  %v729_v5 = vmax.f32 %v502_v61, 0.0 }
 0x13e   :  { %v504_v62 = vpop.f32.mrf.mxu0  ;;  %v656_v63 = vpop.f32.mrf.mxu1 }
 0x13f   :  { %v505_v0 = vadd.f32 %v2079_v46, %v504_v62  ;;  %v657_v2 = vadd.f32 %v2079_v46, %v656_v63 }
 0x140   :  { %v1665_v3 = vpop.f32.mrf.mxu0  ;;  %v1741_v4 = vpop.f32.mrf.mxu1 }
 0x141   :  { %v730_v6 = vmax.f32 %v505_v0, 0.0  ;;  %v768_v7 = vmax.f32 %v657_v2, 0.0 }
 0x142   :  { %v509_v8 = vpop.f32.mrf.mxu0  ;;  %v661_v9 = vpop.f32.mrf.mxu1 }
 0x143   :  { %v1400_v10 = vpack.c.bf16 %v730_v6, %v729_v5  ;;  %v1495_v11 = vpack.c.bf16 %v768_v7, %v767_v1  ;;  %v662_v12 = vadd.f32 %v2079_v46, %v661_v9  ;;  %v510_v15 = vadd.f32 %v2079_v46, %v509_v8 }
 0x144   :  { %v1668_v13 = vpop.f32.mrf.mxu0  ;;  %v1744_v14 = vpop.f32.mrf.mxu1 }
 0x145   :  { %1532 = vst [vmem:[%s2268_s3 + $0x58] sm:$0xff] %v1400_v10   ;;  %1551 = vst [vmem:[%s2268_s3 + $0xf0] sm:$0xff] %v1495_v11   ;;  %v769_v19 = vmax.f32 %v662_v12, 0.0  ;;  %v731_v23 = vmax.f32 %v510_v15, 0.0 }
 0x146   :  { %v512_v16 = vpop.f32.mrf.mxu0  ;;  %v664_v17 = vpop.f32.mrf.mxu1 }
 0x147   :  { %v513_v18 = vadd.f32 %v2079_v46, %v512_v16  ;;  %v665_v20 = vadd.f32 %v2079_v46, %v664_v17 }
 0x148   :  { %v1669_v21 = vpop.f32.mrf.mxu0  ;;  %v1745_v22 = vpop.f32.mrf.mxu1 }
 0x149   :  { %v732_v24 = vmax.f32 %v513_v18, 0.0  ;;  %v770_v25 = vmax.f32 %v665_v20, 0.0 }
 0x14a   :  { %v517_v26 = vpop.f32.mrf.mxu0  ;;  %v669_v27 = vpop.f32.mrf.mxu1 }
 0x14b   :  { %v1405_v28 = vpack.c.bf16 %v732_v24, %v731_v23  ;;  %v1500_v29 = vpack.c.bf16 %v770_v25, %v769_v19  ;;  %v670_v30 = vadd.f32 %v2079_v46, %v669_v27  ;;  %v518_v33 = vadd.f32 %v2079_v46, %v517_v26 }
 0x14c   :  { %v1672_v31 = vpop.f32.mrf.mxu0  ;;  %v1748_v32 = vpop.f32.mrf.mxu1 }
 0x14d   :  { %1533 = vst [vmem:[%s2268_s3 + $0x60] sm:$0xff] %v1405_v28   ;;  %1552 = vst [vmem:[%s2268_s3 + $0xf8] sm:$0xff] %v1500_v29   ;;  %v771_v37 = vmax.f32 %v670_v30, 0.0  ;;  %v733_v41 = vmax.f32 %v518_v33, 0.0 }
 0x14e   :  { %v520_v34 = vpop.f32.mrf.mxu0  ;;  %v672_v35 = vpop.f32.mrf.mxu1 }
 0x14f   :  { %v521_v36 = vadd.f32 %v2079_v46, %v520_v34  ;;  %v673_v38 = vadd.f32 %v2079_v46, %v672_v35 }
 0x150   :  { %v1673_v39 = vpop.f32.mrf.mxu0  ;;  %v1749_v40 = vpop.f32.mrf.mxu1 }
 0x151   :  { %v734_v42 = vmax.f32 %v521_v36, 0.0  ;;  %v772_v43 = vmax.f32 %v673_v38, 0.0 }
 0x152   :  { %v525_v44 = vpop.f32.mrf.mxu0  ;;  %v677_v45 = vpop.f32.mrf.mxu1 }
 0x153   :  { %v1410_v47 = vpack.c.bf16 %v734_v42, %v733_v41  ;;  %v1505_v48 = vpack.c.bf16 %v772_v43, %v771_v37  ;;  %v678_v49 = vadd.f32 %v2079_v46, %v677_v45  ;;  %v526_v52 = vadd.f32 %v2079_v46, %v525_v44 }
 0x154   :  { %v1676_v50 = vpop.f32.mrf.mxu0  ;;  %v1752_v51 = vpop.f32.mrf.mxu1 }
 0x155   :  { %1534 = vst [vmem:[%s2268_s3 + $0x68] sm:$0xff] %v1410_v47   ;;  %1553 = vst [vmem:[%s2268_s3 + $0x100] sm:$0xff] %v1505_v48   ;;  %v773_v56 = vmax.f32 %v678_v49, 0.0  ;;  %v735_v60 = vmax.f32 %v526_v52, 0.0 }
 0x156   :  { %v528_v53 = vpop.f32.mrf.mxu0  ;;  %v680_v54 = vpop.f32.mrf.mxu1 }
 0x157   :  { %v529_v55 = vadd.f32 %v2079_v46, %v528_v53  ;;  %v681_v57 = vadd.f32 %v2079_v46, %v680_v54 }
 0x158   :  { %v1677_v58 = vpop.f32.mrf.mxu0  ;;  %v1753_v59 = vpop.f32.mrf.mxu1 }
 0x159   :  { %v736_v61 = vmax.f32 %v529_v55, 0.0  ;;  %v774_v62 = vmax.f32 %v681_v57, 0.0 }
 0x15a   :  { %v533_v63 = vpop.f32.mrf.mxu0  ;;  %v685_v0 = vpop.f32.mrf.mxu1 }
 0x15b   :  { %v1415_v1 = vpack.c.bf16 %v736_v61, %v735_v60  ;;  %v1510_v2 = vpack.c.bf16 %v774_v62, %v773_v56  ;;  %v686_v3 = vadd.f32 %v2079_v46, %v685_v0  ;;  %v534_v6 = vadd.f32 %v2079_v46, %v533_v63 }
 0x15c   :  { %v1680_v4 = vpop.f32.mrf.mxu0  ;;  %v1756_v5 = vpop.f32.mrf.mxu1 }
 0x15d   :  { %1535 = vst [vmem:[%s2268_s3 + $0x70] sm:$0xff] %v1415_v1   ;;  %1554 = vst [vmem:[%s2268_s3 + $0x108] sm:$0xff] %v1510_v2   ;;  %v775_v10 = vmax.f32 %v686_v3, 0.0  ;;  %v737_v14 = vmax.f32 %v534_v6, 0.0 }
 0x15e   :  { %v536_v7 = vpop.f32.mrf.mxu0  ;;  %v688_v8 = vpop.f32.mrf.mxu1 }
 0x15f   :  { %v537_v9 = vadd.f32 %v2079_v46, %v536_v7  ;;  %v689_v11 = vadd.f32 %v2079_v46, %v688_v8 }
 0x160   :  { %v1681_v12 = vpop.f32.mrf.mxu0  ;;  %v1757_v13 = vpop.f32.mrf.mxu1 }
 0x161   :  { %v738_v15 = vmax.f32 %v537_v9, 0.0  ;;  %v776_v16 = vmax.f32 %v689_v11, 0.0 }
 0x162   :  { %v541_v17 = vpop.f32.mrf.mxu0  ;;  %v693_v18 = vpop.f32.mrf.mxu1 }
 0x163   :  { %v1420_v19 = vpack.c.bf16 %v738_v15, %v737_v14  ;;  %v1515_v20 = vpack.c.bf16 %v776_v16, %v775_v10  ;;  %v694_v21 = vadd.f32 %v2079_v46, %v693_v18  ;;  %v542_v24 = vadd.f32 %v2079_v46, %v541_v17 }
 0x164   :  { %v1684_v22 = vpop.f32.mrf.mxu0  ;;  %v1760_v23 = vpop.f32.mrf.mxu1 }
 0x165   :  { %1536 = vst [vmem:[%s2268_s3 + $0x78] sm:$0xff] %v1420_v19   ;;  %1555 = vst [vmem:[%s2268_s3 + $0x110] sm:$0xff] %v1515_v20   ;;  %v777_v28 = vmax.f32 %v694_v21, 0.0  ;;  %v739_v32 = vmax.f32 %v542_v24, 0.0 }
 0x166   :  { %v544_v25 = vpop.f32.mrf.mxu0  ;;  %v696_v26 = vpop.f32.mrf.mxu1 }
 0x167   :  { %v545_v27 = vadd.f32 %v2079_v46, %v544_v25  ;;  %v697_v29 = vadd.f32 %v2079_v46, %v696_v26 }
 0x168   :  { %v1685_v30 = vpop.f32.mrf.mxu0  ;;  %v1761_v31 = vpop.f32.mrf.mxu1 }
 0x169   :  { %v740_v33 = vmax.f32 %v545_v27, 0.0  ;;  %v778_v34 = vmax.f32 %v697_v29, 0.0 }
 0x16a   :  { %v549_v35 = vpop.f32.mrf.mxu0  ;;  %v701_v36 = vpop.f32.mrf.mxu1 }
 0x16b   :  { %v1425_v37 = vpack.c.bf16 %v740_v33, %v739_v32  ;;  %v1520_v38 = vpack.c.bf16 %v778_v34, %v777_v28  ;;  %v702_v39 = vadd.f32 %v2079_v46, %v701_v36  ;;  %v550_v42 = vadd.f32 %v2079_v46, %v549_v35 }
 0x16c   :  { %v1688_v40 = vpop.f32.mrf.mxu0  ;;  %v1764_v41 = vpop.f32.mrf.mxu1 }
 0x16d   :  { %1537 = vst [vmem:[%s2268_s3 + $0x80] sm:$0xff] %v1425_v37   ;;  %1556 = vst [vmem:[%s2268_s3 + $0x118] sm:$0xff] %v1520_v38   ;;  %v779_v43 = vmax.f32 %v702_v39, 0.0  ;;  %v741_v51 = vmax.f32 %v550_v42, 0.0 }
 0x16e   :  { %v552_v44 = vpop.f32.mrf.mxu0  ;;  %v704_v45 = vpop.f32.mrf.mxu1 }
 0x16f   :  { %v553_v47 = vadd.f32 %v2079_v46, %v552_v44  ;;  %v1341_v48 = vpack.c.bf16 %v779_v43, %v779_v43 }
 0x170   :  { %v1689_v49 = vpop.f32.mrf.mxu0  ;;  %v1765_v50 = vpop.f32.mrf.mxu1 }
 0x171   :  { %v742_v52 = vmax.f32 %v553_v47, 0.0  ;;  %1145 = vst [vmem:[%s2268_s3 + $0x120] sm:$0x1] %v1341_v48 }
 0x172   :  { %v557_v53 = vpop.f32.mrf.mxu0 }
 0x173   :  { %v1430_v54 = vpack.c.bf16 %v742_v52, %v741_v51  ;;  %v558_v56 = vadd.f32 %v2079_v46, %v557_v53 }
 0x174   :  { %v1692_v55 = vpop.f32.mrf.mxu0 }
 0x175   :  { %1538 = vst [vmem:[%s2268_s3 + $0x88] sm:$0xff] %v1430_v54   ;;  %v743_v60 = vmax.f32 %v558_v56, 0.0 }
 0x176   :  { %v560_v57 = vpop.f32.mrf.mxu0 }
 0x177   :  { %v561_v58 = vadd.f32 %v2079_v46, %v560_v57 }
 0x178   :  { %v1693_v59 = vpop.f32.mrf.mxu0 }
 0x179   :  { %v744_v61 = vmax.f32 %v561_v58, 0.0 }
 0x17b   :  { %v1435_v62 = vpack.c.bf16 %v744_v61, %v743_v60 }
 0x17d   :  { %1539 = vst [vmem:[%s2268_s3 + $0x90] sm:$0xff] %v1435_v62  }

// kernel: tile.48
= control target key start
LH: loop header
LB: loop body
LE: loop exit
PB: predicated region body
PF: predicated region fallthrough
CT: control target
= control target key end

     0   :  { %s22_s0 = inlined_call_operand.vmem [shape: f32[3], index: 0, kind: input, shape index: {}]   ;;  %s23_s1 = inlined_call_operand.vmem [shape: f32[4,3], index: 1, kind: output, shape index: {}]  }
   0x1   :  { %v4_v0 = vld [vmem:[%s22_s0] ss:$0 sm:$0xff] }
   0x2   :  { %5 = vst [vmem:[%s23_s1] sm:$0xf] %v4_v0 }

// kernel: tile.49
= control target key start
LH: loop header
LB: loop body
LE: loop exit
PB: predicated region body
PF: predicated region fallthrough
CT: control target
= control target key end

     0   :  { %vm8_vm0 = vcmask 23552   ;;  %s40_s8 = smov 3   ;;  %s41_s9 = smov 6   ;;  %vm14_vm1 = vcmask 97352   ;;  %vm20_vm2 = vcmask 72752   ;;  %vm26_vm3 = vcmask 48152   ;;  %s58_s0 = inlined_call_operand.vmem [shape: f32[4,3], index: 0, kind: input, shape index: {}]   ;;  %s59_s1 = inlined_call_operand.vmem [shape: f32[12], index: 1, kind: output, shape index: {}]  }
   0x1   :  { %v5_v0 = vld [vmem:[%s58_s0] sm:$0xf]  ;;  %s39_s0 = smov 9  }
   0x2   :  { %6 = vst [vmem:[#allocation1] sm:$0xf] %v5_v0 }
   0x9   :  { %v11_v1 = vld [vmem:[#allocation1 + $0x3] sm:$0x1]   ;;  %v23_v2 = vld [vmem:[#allocation1 + $0x1] sm:$0x1]   ;;  %v7_v3 = vld [vmem:[#allocation1] sm:$0x1]  }
   0xa   :  { %12 = vrot.lane.b32.xlu0 %v11_v1, %s39_s0  ;;  %24 = vrot.lane.b32.xlu1 %v23_v2, %s40_s8  ;;  %v17_v4 = vld [vmem:[#allocation1 + $0x2] sm:$0x1]   ;;  %9 = vst.msk [vmem:[#allocation0] sm:$0x1] %vm8_vm0, %v7_v3  }
   0xe   :  { %18 = vrot.lane.b32.xlu0 %v17_v4, %s41_s9 }
  0x7c   :  { %v13_v5 = vpop.permute.xlu0 %12   ;;  %v25_v6 = vpop.permute.xlu1 %24  }
  0x7d   :  { %15 = vst.msk [vmem:[#allocation0] sm:$0x1] %vm14_vm1, %v13_v5  }
  0x80   :  { %v19_v7 = vpop.permute.xlu0 %18  }
  0x81   :  { %21 = vst.msk [vmem:[#allocation0] sm:$0x1] %vm20_vm2, %v19_v7  }
  0x82   :  { %27 = vst.msk [vmem:[#allocation0] sm:$0x1] %vm26_vm3, %v25_v6  }
  0x89   :  { %v32_v8 = vld [vmem:[#allocation0] sm:$0x1] }
  0x8a   :  { %35 = vst [vmem:[%s59_s1] sm:$0x1] %v32_v8 }

// kernel: beta_vae_h_forward.17
= control target key start
LH: loop header
LB: loop body
LE: loop exit
PB: predicated region body
PF: predicated region fallthrough
CT: control target
= control target key end

     0   :  { %v3604_v0 = vmov 0.0   ;;  %vm3605_vm0 = vmmov 0   ;;  %s5458_s1 = inlined_call_operand.vmem [shape: bf16[128,128], index: 1, kind: input, shape index: {}]   ;;  %s5459_s0 = inlined_call_operand.vmem [shape: bf16[2178,128], index: 0, kind: input, shape index: {}]   ;;  %s5460_s2 = inlined_call_operand.vmem [shape: f32[1,128], index: 2, kind: input, shape index: {}]   ;;  %s5461_s3 = inlined_call_operand.vmem [shape: f32[2178,128], index: 3, kind: output, shape index: {}]  }
   0x1   :  { %2875 = vmatprep.subr.bf16.mxu0 %v3604_v0  ;;  %v3457_v1 = vld [vmem:[%s5458_s1 + $0x38] sm:$0xff]   ;;  %3439 = vmatprep.subr.bf16.mxu1 %v3604_v0  ;;  %v3458_v2 = vld [vmem:[%s5458_s1 + $0x30] sm:$0xff]   ;;  %v3459_v3 = vld [vmem:[%s5458_s1 + $0x28] sm:$0xff]  }
   0x2   :  { %2891 = vmatprep.mubr.msk.bf16.mxu0 %vm3605_vm0, %v3604_v0  ;;  %3167 = vmatprep.mubr.msk.bf16.mxu1 %vm3605_vm0, %v3604_v0  ;;  %v3460_v4 = vld [vmem:[%s5458_s1 + $0x20] sm:$0xff]   ;;  %v3461_v5 = vld [vmem:[%s5458_s1 + $0x18] sm:$0xff]   ;;  %v3462_v6 = vld [vmem:[%s5458_s1 + $0x10] sm:$0xff]  }
   0x3   :  { %2876 = vmatpush3.bf16.msra.mxu0 %v3457_v1  ;;  %3447 = vmatpush3.bf16.msra.mxu1 %v3457_v1  ;;  %v3463_v7 = vld [vmem:[%s5458_s1 + $0x8] sm:$0xff]   ;;  %v3464_v8 = vld [vmem:[%s5458_s1] sm:$0xff]   ;;  %v3468_v12 = vld [vmem:[%s5459_s0 + $0x230] sm:$0xff]  }
   0x4   :  { %2877 = vmatprep.subr.bf16.mxu0 %v3604_v0  ;;  %3440 = vmatprep.subr.bf16.mxu1 %v3604_v0  ;;  %v3465_v9 = vld [vmem:[%s5459_s0] sm:$0xff]   ;;  %v3466_v10 = vld [vmem:[%s5459_s0 + $0x228] sm:$0xff]   ;;  %v3469_v13 = vld [vmem:[%s5459_s0 + $0x10] sm:$0xff]  }
   0x5   :  { %v3467_v11 = vld [vmem:[%s5459_s0 + $0x8] sm:$0xff]   ;;  %v3470_v14 = vld [vmem:[%s5459_s0 + $0x238] sm:$0xff]   ;;  %v3472_v16 = vld [vmem:[%s5459_s0 + $0x240] sm:$0xff]  }
   0x6   :  { %v3471_v15 = vld [vmem:[%s5459_s0 + $0x18] sm:$0xff]   ;;  %v3473_v17 = vld [vmem:[%s5459_s0 + $0x20] sm:$0xff]   ;;  %v3474_v18 = vld [vmem:[%s5459_s0 + $0x248] sm:$0xff]  }
   0x7   :  { %2878 = vmatpush3.bf16.msra.mxu0 %v3458_v2  ;;  %3448 = vmatpush3.bf16.msra.mxu1 %v3458_v2  ;;  %v3475_v19 = vld [vmem:[%s5459_s0 + $0x28] sm:$0xff]   ;;  %v3476_v20 = vld [vmem:[%s5459_s0 + $0x250] sm:$0xff]   ;;  %v3478_v22 = vld [vmem:[%s5459_s0 + $0x258] sm:$0xff]  }
   0x8   :  { %2879 = vmatprep.subr.bf16.mxu0 %v3604_v0  ;;  %3441 = vmatprep.subr.bf16.mxu1 %v3604_v0  ;;  %v3477_v21 = vld [vmem:[%s5459_s0 + $0x30] sm:$0xff]   ;;  %v3479_v23 = vld [vmem:[%s5459_s0 + $0x38] sm:$0xff]   ;;  %v3480_v24 = vld [vmem:[%s5459_s0 + $0x260] sm:$0xff]  }
   0x9   :  { %v3481_v25 = vld [vmem:[%s5459_s0 + $0x40] sm:$0xff]   ;;  %v3482_v26 = vld [vmem:[%s5459_s0 + $0x268] sm:$0xff]   ;;  %v3484_v28 = vld [vmem:[%s5459_s0 + $0x270] sm:$0xff]  }
   0xa   :  { %v3483_v27 = vld [vmem:[%s5459_s0 + $0x48] sm:$0xff]   ;;  %v3485_v29 = vld [vmem:[%s5459_s0 + $0x50] sm:$0xff]   ;;  %v3486_v30 = vld [vmem:[%s5459_s0 + $0x278] sm:$0xff]  }
   0xb   :  { %2880 = vmatpush3.bf16.msra.mxu0 %v3459_v3  ;;  %3449 = vmatpush3.bf16.msra.mxu1 %v3459_v3  ;;  %v3487_v31 = vld [vmem:[%s5459_s0 + $0x58] sm:$0xff]   ;;  %v3488_v32 = vld [vmem:[%s5459_s0 + $0x280] sm:$0xff]   ;;  %v3490_v34 = vld [vmem:[%s5459_s0 + $0x288] sm:$0xff]  }
   0xc   :  { %2881 = vmatprep.subr.bf16.mxu0 %v3604_v0  ;;  %3442 = vmatprep.subr.bf16.mxu1 %v3604_v0  ;;  %v3489_v33 = vld [vmem:[%s5459_s0 + $0x60] sm:$0xff]   ;;  %v3491_v35 = vld [vmem:[%s5459_s0 + $0x68] sm:$0xff]   ;;  %v3492_v36 = vld [vmem:[%s5459_s0 + $0x290] sm:$0xff]  }
   0xd   :  { %v3493_v37 = vld [vmem:[%s5459_s0 + $0x70] sm:$0xff]   ;;  %v3494_v38 = vld [vmem:[%s5459_s0 + $0x298] sm:$0xff]   ;;  %v3496_v40 = vld [vmem:[%s5459_s0 + $0x2a0] sm:$0xff]  }
   0xe   :  { %v3495_v39 = vld [vmem:[%s5459_s0 + $0x78] sm:$0xff]   ;;  %v3497_v41 = vld [vmem:[%s5459_s0 + $0x80] sm:$0xff]   ;;  %v3498_v42 = vld [vmem:[%s5459_s0 + $0x2a8] sm:$0xff]  }
   0xf   :  { %2882 = vmatpush3.bf16.msra.mxu0 %v3460_v4  ;;  %3450 = vmatpush3.bf16.msra.mxu1 %v3460_v4  ;;  %v3499_v43 = vld [vmem:[%s5459_s0 + $0x88] sm:$0xff]   ;;  %v3500_v44 = vld [vmem:[%s5459_s0 + $0x2b0] sm:$0xff]   ;;  %v3502_v46 = vld [vmem:[%s5459_s0 + $0x2b8] sm:$0xff]  }
  0x10   :  { %2883 = vmatprep.subr.bf16.mxu0 %v3604_v0  ;;  %3443 = vmatprep.subr.bf16.mxu1 %v3604_v0  ;;  %v3501_v45 = vld [vmem:[%s5459_s0 + $0x90] sm:$0xff]   ;;  %v3503_v47 = vld [vmem:[%s5459_s0 + $0x98] sm:$0xff]   ;;  %v3504_v48 = vld [vmem:[%s5459_s0 + $0x2c0] sm:$0xff]  }
  0x11   :  { %v3505_v49 = vld [vmem:[%s5459_s0 + $0xa0] sm:$0xff]   ;;  %v3506_v50 = vld [vmem:[%s5459_s0 + $0x2c8] sm:$0xff]   ;;  %v3508_v52 = vld [vmem:[%s5459_s0 + $0x2d0] sm:$0xff]  }
  0x12   :  { %v3507_v51 = vld [vmem:[%s5459_s0 + $0xa8] sm:$0xff]   ;;  %v3509_v53 = vld [vmem:[%s5459_s0 + $0xb0] sm:$0xff]   ;;  %v3510_v54 = vld [vmem:[%s5459_s0 + $0x2d8] sm:$0xff]  }
  0x13   :  { %2884 = vmatpush3.bf16.msra.mxu0 %v3461_v5  ;;  %3451 = vmatpush3.bf16.msra.mxu1 %v3461_v5  ;;  %v3511_v55 = vld [vmem:[%s5459_s0 + $0xb8] sm:$0xff]   ;;  %v3512_v56 = vld [vmem:[%s5459_s0 + $0x2e0] sm:$0xff]   ;;  %v3514_v58 = vld [vmem:[%s5459_s0 + $0x2e8] sm:$0xff]  }
  0x14   :  { %2885 = vmatprep.subr.bf16.mxu0 %v3604_v0  ;;  %3444 = vmatprep.subr.bf16.mxu1 %v3604_v0  ;;  %v3513_v57 = vld [vmem:[%s5459_s0 + $0xc0] sm:$0xff]   ;;  %v3515_v5 = vld [vmem:[%s5459_s0 + $0xc8] sm:$0xff]  }
  0x15   :  { %v3919_v59 = vld [vmem:[%s5460_s2] ss:$0 sm:$0xff] }
  0x17   :  { %2886 = vmatpush3.bf16.msra.mxu0 %v3462_v6  ;;  %3452 = vmatpush3.bf16.msra.mxu1 %v3462_v6  ;;  %v3516_v6 = vld [vmem:[%s5459_s0 + $0x2f0] sm:$0xff]  }
  0x18   :  { %2887 = vmatprep.subr.bf16.mxu0 %v3604_v0  ;;  %3445 = vmatprep.subr.bf16.mxu1 %v3604_v0 }
  0x1b   :  { %2888 = vmatpush3.bf16.msra.mxu0 %v3463_v7  ;;  %3453 = vmatpush3.bf16.msra.mxu1 %v3463_v7 }
  0x1c   :  { %2889 = vmatprep.subr.bf16.mxu0 %v3604_v0  ;;  %3446 = vmatprep.subr.bf16.mxu1 %v3604_v0 }
  0x1f   :  { %2890 = vmatpush3.bf16.msra.mxu0 %v3464_v8  ;;  %3454 = vmatpush3.bf16.msra.mxu1 %v3464_v8 }
  0x22   :  { %2892 = vmatmul.mubr.bf16.vlgmr.msra.gmra.mxu0 %v3465_v9  ;;  %3168 = vmatmul.mubr.bf16.vlgmr.msra.gmra.mxu1 %v3466_v10 }
  0x23   :  { %2895 = vmatprep.mubr.msk.bf16.mxu0 %vm3605_vm0, %v3604_v0  ;;  %3171 = vmatprep.mubr.msk.bf16.mxu1 %vm3605_vm0, %v3604_v0 }
  0x2a   :  { %2896 = vmatmul.mubr.bf16.gmra.mxu0 %v3467_v11  ;;  %3172 = vmatmul.mubr.bf16.gmra.mxu1 %v3468_v12 }
  0x2b   :  { %2899 = vmatprep.mubr.msk.bf16.mxu0 %vm3605_vm0, %v3604_v0  ;;  %3175 = vmatprep.mubr.msk.bf16.mxu1 %vm3605_vm0, %v3604_v0 }
  0x32   :  { %2900 = vmatmul.mubr.bf16.gmra.mxu0 %v3469_v13  ;;  %3176 = vmatmul.mubr.bf16.gmra.mxu1 %v3470_v14 }
  0x33   :  { %2903 = vmatprep.mubr.msk.bf16.mxu0 %vm3605_vm0, %v3604_v0  ;;  %3179 = vmatprep.mubr.msk.bf16.mxu1 %vm3605_vm0, %v3604_v0 }
  0x3a   :  { %2904 = vmatmul.mubr.bf16.gmra.mxu0 %v3471_v15  ;;  %3180 = vmatmul.mubr.bf16.gmra.mxu1 %v3472_v16 }
  0x3b   :  { %2907 = vmatprep.mubr.msk.bf16.mxu0 %vm3605_vm0, %v3604_v0  ;;  %3183 = vmatprep.mubr.msk.bf16.mxu1 %vm3605_vm0, %v3604_v0 }
  0x42   :  { %2908 = vmatmul.mubr.bf16.gmra.mxu0 %v3473_v17  ;;  %3184 = vmatmul.mubr.bf16.gmra.mxu1 %v3474_v18 }
  0x43   :  { %2911 = vmatprep.mubr.msk.bf16.mxu0 %vm3605_vm0, %v3604_v0  ;;  %3187 = vmatprep.mubr.msk.bf16.mxu1 %vm3605_vm0, %v3604_v0 }
  0x4a   :  { %2912 = vmatmul.mubr.bf16.gmra.mxu0 %v3475_v19  ;;  %3188 = vmatmul.mubr.bf16.gmra.mxu1 %v3476_v20  ;;  %v3517_v19 = vld [vmem:[%s5459_s0 + $0xd0] sm:$0xff]   ;;  %v3518_v20 = vld [vmem:[%s5459_s0 + $0x2f8] sm:$0xff]  }
  0x4b   :  { %2915 = vmatprep.mubr.msk.bf16.mxu0 %vm3605_vm0, %v3604_v0  ;;  %3191 = vmatprep.mubr.msk.bf16.mxu1 %vm3605_vm0, %v3604_v0 }
  0x52   :  { %2916 = vmatmul.mubr.bf16.gmra.mxu0 %v3477_v21  ;;  %3192 = vmatmul.mubr.bf16.gmra.mxu1 %v3478_v22 }
  0x53   :  { %2919 = vmatprep.mubr.msk.bf16.mxu0 %vm3605_vm0, %v3604_v0  ;;  %3195 = vmatprep.mubr.msk.bf16.mxu1 %vm3605_vm0, %v3604_v0 }
  0x5a   :  { %2920 = vmatmul.mubr.bf16.gmra.mxu0 %v3479_v23  ;;  %3196 = vmatmul.mubr.bf16.gmra.mxu1 %v3480_v24 }
  0x5b   :  { %2923 = vmatprep.mubr.msk.bf16.mxu0 %vm3605_vm0, %v3604_v0  ;;  %3199 = vmatprep.mubr.msk.bf16.mxu1 %vm3605_vm0, %v3604_v0 }
  0x62   :  { %2924 = vmatmul.mubr.bf16.gmra.mxu0 %v3481_v25  ;;  %3200 = vmatmul.mubr.bf16.gmra.mxu1 %v3482_v26 }
  0x63   :  { %2927 = vmatprep.mubr.msk.bf16.mxu0 %vm3605_vm0, %v3604_v0  ;;  %3203 = vmatprep.mubr.msk.bf16.mxu1 %vm3605_vm0, %v3604_v0 }
  0x6a   :  { %2928 = vmatmul.mubr.bf16.gmra.mxu0 %v3483_v27  ;;  %3204 = vmatmul.mubr.bf16.gmra.mxu1 %v3484_v28 }
  0x6b   :  { %2931 = vmatprep.mubr.msk.bf16.mxu0 %vm3605_vm0, %v3604_v0  ;;  %3207 = vmatprep.mubr.msk.bf16.mxu1 %vm3605_vm0, %v3604_v0 }
  0x72   :  { %2932 = vmatmul.mubr.bf16.gmra.mxu0 %v3485_v29  ;;  %3208 = vmatmul.mubr.bf16.gmra.mxu1 %v3486_v30 }
  0x73   :  { %2935 = vmatprep.mubr.msk.bf16.mxu0 %vm3605_vm0, %v3604_v0  ;;  %3211 = vmatprep.mubr.msk.bf16.mxu1 %vm3605_vm0, %v3604_v0 }
  0x7a   :  { %2936 = vmatmul.mubr.bf16.gmra.mxu0 %v3487_v31  ;;  %3212 = vmatmul.mubr.bf16.gmra.mxu1 %v3488_v32 }
  0x7b   :  { %2939 = vmatprep.mubr.msk.bf16.mxu0 %vm3605_vm0, %v3604_v0  ;;  %3215 = vmatprep.mubr.msk.bf16.mxu1 %vm3605_vm0, %v3604_v0 }
  0x82   :  { %2940 = vmatmul.mubr.bf16.gmra.mxu0 %v3489_v33  ;;  %3216 = vmatmul.mubr.bf16.gmra.mxu1 %v3490_v34  ;;  %v3519_v33 = vld [vmem:[%s5459_s0 + $0xd8] sm:$0xff]   ;;  %v3520_v34 = vld [vmem:[%s5459_s0 + $0x300] sm:$0xff]  }
  0x83   :  { %2943 = vmatprep.mubr.msk.bf16.mxu0 %vm3605_vm0, %v3604_v0  ;;  %3219 = vmatprep.mubr.msk.bf16.mxu1 %vm3605_vm0, %v3604_v0 }
  0x8a   :  { %2944 = vmatmul.mubr.bf16.gmra.mxu0 %v3491_v35  ;;  %3220 = vmatmul.mubr.bf16.gmra.mxu1 %v3492_v36 }
  0x8b   :  { %2947 = vmatprep.mubr.msk.bf16.mxu0 %vm3605_vm0, %v3604_v0  ;;  %3223 = vmatprep.mubr.msk.bf16.mxu1 %vm3605_vm0, %v3604_v0 }
  0x92   :  { %2948 = vmatmul.mubr.bf16.gmra.mxu0 %v3493_v37  ;;  %3224 = vmatmul.mubr.bf16.gmra.mxu1 %v3494_v38 }
  0x93   :  { %2951 = vmatprep.mubr.msk.bf16.mxu0 %vm3605_vm0, %v3604_v0  ;;  %3227 = vmatprep.mubr.msk.bf16.mxu1 %vm3605_vm0, %v3604_v0 }
  0x9a   :  { %2952 = vmatmul.mubr.bf16.gmra.mxu0 %v3495_v39  ;;  %3228 = vmatmul.mubr.bf16.gmra.mxu1 %v3496_v40 }
  0x9b   :  { %2955 = vmatprep.mubr.msk.bf16.mxu0 %vm3605_vm0, %v3604_v0  ;;  %3231 = vmatprep.mubr.msk.bf16.mxu1 %vm3605_vm0, %v3604_v0 }
  0xa2   :  { %2956 = vmatmul.mubr.bf16.gmra.mxu0 %v3497_v41  ;;  %3232 = vmatmul.mubr.bf16.gmra.mxu1 %v3498_v42 }
  0xa3   :  { %2959 = vmatprep.mubr.msk.bf16.mxu0 %vm3605_vm0, %v3604_v0  ;;  %3235 = vmatprep.mubr.msk.bf16.mxu1 %vm3605_vm0, %v3604_v0 }
  0xaa   :  { %2960 = vmatmul.mubr.bf16.gmra.mxu0 %v3499_v43  ;;  %3236 = vmatmul.mubr.bf16.gmra.mxu1 %v3500_v44 }
  0xab   :  { %2963 = vmatprep.mubr.msk.bf16.mxu0 %vm3605_vm0, %v3604_v0  ;;  %3239 = vmatprep.mubr.msk.bf16.mxu1 %vm3605_vm0, %v3604_v0 }
  0xb2   :  { %2964 = vmatmul.mubr.bf16.gmra.mxu0 %v3501_v45  ;;  %3240 = vmatmul.mubr.bf16.gmra.mxu1 %v3502_v46 }
  0xb3   :  { %2967 = vmatprep.mubr.msk.bf16.mxu0 %vm3605_vm0, %v3604_v0  ;;  %3243 = vmatprep.mubr.msk.bf16.mxu1 %vm3605_vm0, %v3604_v0 }
  0xba   :  { %2968 = vmatmul.mubr.bf16.gmra.mxu0 %v3503_v47  ;;  %3244 = vmatmul.mubr.bf16.gmra.mxu1 %v3504_v48  ;;  %v3521_v47 = vld [vmem:[%s5459_s0 + $0xe0] sm:$0xff]   ;;  %v3522_v48 = vld [vmem:[%s5459_s0 + $0x308] sm:$0xff]  }
  0xbb   :  { %2971 = vmatprep.mubr.msk.bf16.mxu0 %vm3605_vm0, %v3604_v0  ;;  %3247 = vmatprep.mubr.msk.bf16.mxu1 %vm3605_vm0, %v3604_v0 }
  0xc2   :  { %2972 = vmatmul.mubr.bf16.gmra.mxu0 %v3505_v49  ;;  %3248 = vmatmul.mubr.bf16.gmra.mxu1 %v3506_v50 }
  0xc3   :  { %2975 = vmatprep.mubr.msk.bf16.mxu0 %vm3605_vm0, %v3604_v0  ;;  %3251 = vmatprep.mubr.msk.bf16.mxu1 %vm3605_vm0, %v3604_v0 }
  0xca   :  { %2976 = vmatmul.mubr.bf16.gmra.mxu0 %v3507_v51  ;;  %3252 = vmatmul.mubr.bf16.gmra.mxu1 %v3508_v52 }
  0xcb   :  { %2979 = vmatprep.mubr.msk.bf16.mxu0 %vm3605_vm0, %v3604_v0  ;;  %3255 = vmatprep.mubr.msk.bf16.mxu1 %vm3605_vm0, %v3604_v0 }
  0xd2   :  { %2980 = vmatmul.mubr.bf16.gmra.mxu0 %v3509_v53  ;;  %3256 = vmatmul.mubr.bf16.gmra.mxu1 %v3510_v54 }
  0xd3   :  { %2983 = vmatprep.mubr.msk.bf16.mxu0 %vm3605_vm0, %v3604_v0  ;;  %3259 = vmatprep.mubr.msk.bf16.mxu1 %vm3605_vm0, %v3604_v0 }
  0xda   :  { %2984 = vmatmul.mubr.bf16.gmra.mxu0 %v3511_v55  ;;  %3260 = vmatmul.mubr.bf16.gmra.mxu1 %v3512_v56 }
  0xdb   :  { %2987 = vmatprep.mubr.msk.bf16.mxu0 %vm3605_vm0, %v3604_v0  ;;  %3263 = vmatprep.mubr.msk.bf16.mxu1 %vm3605_vm0, %v3604_v0 }
  0xe2   :  { %v1213_v60 = vpop.f32.mrf.mxu0  ;;  %2988 = vmatmul.mubr.bf16.gmra.mxu0 %v3513_v57  ;;  %v1765_v61 = vpop.f32.mrf.mxu1  ;;  %3264 = vmatmul.mubr.bf16.gmra.mxu1 %v3514_v58 }
  0xe3   :  { %v1214_v62 = vadd.f32 %v3919_v59, %v1213_v60  ;;  %v1766_v63 = vadd.f32 %v3919_v59, %v1765_v61  ;;  %2991 = vmatprep.mubr.msk.bf16.mxu0 %vm3605_vm0, %v3604_v0  ;;  %3267 = vmatprep.mubr.msk.bf16.mxu1 %vm3605_vm0, %v3604_v0 }
  0xe4   :  { %v2893_v1 = vpop.f32.mrf.mxu0  ;;  %v3169_v2 = vpop.f32.mrf.mxu1 }
  0xe5   :  { %2307 = vst [vmem:[%s5461_s3] sm:$0xff] %v1214_v62  ;;  %2445 = vst [vmem:[%s5461_s3 + $0x450] sm:$0xff] %v1766_v63  ;;  %v3523_v62 = vld [vmem:[%s5459_s0 + $0xe8] sm:$0xff]   ;;  %v3524_v63 = vld [vmem:[%s5459_s0 + $0x310] sm:$0xff]  }
  0xe6   :  { %v1216_v3 = vpop.f32.mrf.mxu0  ;;  %v1768_v4 = vpop.f32.mrf.mxu1 }
  0xe7   :  { %v1217_v7 = vadd.f32 %v3919_v59, %v1216_v3  ;;  %v1769_v8 = vadd.f32 %v3919_v59, %v1768_v4 }
  0xe8   :  { %v2894_v9 = vpop.f32.mrf.mxu0  ;;  %v3170_v10 = vpop.f32.mrf.mxu1 }
  0xe9   :  { %2308 = vst [vmem:[%s5461_s3 + $0x8] sm:$0xff] %v1217_v7  ;;  %2446 = vst [vmem:[%s5461_s3 + $0x458] sm:$0xff] %v1769_v8 }
  0xea   :  { %v1221_v11 = vpop.f32.mrf.mxu0  ;;  %2992 = vmatmul.mubr.bf16.gmra.mxu0 %v3515_v5  ;;  %v1773_v12 = vpop.f32.mrf.mxu1  ;;  %3268 = vmatmul.mubr.bf16.gmra.mxu1 %v3516_v6 }
  0xeb   :  { %v1222_v13 = vadd.f32 %v3919_v59, %v1221_v11  ;;  %v1774_v14 = vadd.f32 %v3919_v59, %v1773_v12  ;;  %2995 = vmatprep.mubr.msk.bf16.mxu0 %vm3605_vm0, %v3604_v0  ;;  %3271 = vmatprep.mubr.msk.bf16.mxu1 %vm3605_vm0, %v3604_v0 }
  0xec   :  { %v2897_v15 = vpop.f32.mrf.mxu0  ;;  %v3173_v16 = vpop.f32.mrf.mxu1 }
  0xed   :  { %2309 = vst [vmem:[%s5461_s3 + $0x10] sm:$0xff] %v1222_v13  ;;  %2447 = vst [vmem:[%s5461_s3 + $0x460] sm:$0xff] %v1774_v14  ;;  %v3525_v13 = vld [vmem:[%s5459_s0 + $0xf0] sm:$0xff]   ;;  %v3526_v14 = vld [vmem:[%s5459_s0 + $0x318] sm:$0xff]  }
  0xee   :  { %v1224_v17 = vpop.f32.mrf.mxu0  ;;  %v1776_v18 = vpop.f32.mrf.mxu1 }
  0xef   :  { %v1225_v21 = vadd.f32 %v3919_v59, %v1224_v17  ;;  %v1777_v22 = vadd.f32 %v3919_v59, %v1776_v18 }
  0xf0   :  { %v2898_v23 = vpop.f32.mrf.mxu0  ;;  %v3174_v24 = vpop.f32.mrf.mxu1 }
  0xf1   :  { %2310 = vst [vmem:[%s5461_s3 + $0x18] sm:$0xff] %v1225_v21  ;;  %2448 = vst [vmem:[%s5461_s3 + $0x468] sm:$0xff] %v1777_v22 }
  0xf2   :  { %v1229_v25 = vpop.f32.mrf.mxu0  ;;  %2996 = vmatmul.mubr.bf16.gmra.mxu0 %v3517_v19  ;;  %v1781_v26 = vpop.f32.mrf.mxu1  ;;  %3272 = vmatmul.mubr.bf16.gmra.mxu1 %v3518_v20 }
  0xf3   :  { %v1230_v27 = vadd.f32 %v3919_v59, %v1229_v25  ;;  %v1782_v28 = vadd.f32 %v3919_v59, %v1781_v26  ;;  %2999 = vmatprep.mubr.msk.bf16.mxu0 %vm3605_vm0, %v3604_v0  ;;  %3275 = vmatprep.mubr.msk.bf16.mxu1 %vm3605_vm0, %v3604_v0 }
  0xf4   :  { %v2901_v29 = vpop.f32.mrf.mxu0  ;;  %v3177_v30 = vpop.f32.mrf.mxu1 }
  0xf5   :  { %2311 = vst [vmem:[%s5461_s3 + $0x20] sm:$0xff] %v1230_v27  ;;  %2449 = vst [vmem:[%s5461_s3 + $0x470] sm:$0xff] %v1782_v28  ;;  %v3527_v27 = vld [vmem:[%s5459_s0 + $0xf8] sm:$0xff]   ;;  %v3528_v28 = vld [vmem:[%s5459_s0 + $0x320] sm:$0xff]  }
  0xf6   :  { %v1232_v31 = vpop.f32.mrf.mxu0  ;;  %v1784_v32 = vpop.f32.mrf.mxu1 }
  0xf7   :  { %v1233_v35 = vadd.f32 %v3919_v59, %v1232_v31  ;;  %v1785_v36 = vadd.f32 %v3919_v59, %v1784_v32 }
  0xf8   :  { %v2902_v37 = vpop.f32.mrf.mxu0  ;;  %v3178_v38 = vpop.f32.mrf.mxu1 }
  0xf9   :  { %2312 = vst [vmem:[%s5461_s3 + $0x28] sm:$0xff] %v1233_v35  ;;  %2450 = vst [vmem:[%s5461_s3 + $0x478] sm:$0xff] %v1785_v36 }
  0xfa   :  { %v1237_v39 = vpop.f32.mrf.mxu0  ;;  %3000 = vmatmul.mubr.bf16.gmra.mxu0 %v3519_v33  ;;  %v1789_v40 = vpop.f32.mrf.mxu1  ;;  %3276 = vmatmul.mubr.bf16.gmra.mxu1 %v3520_v34 }
  0xfb   :  { %v1238_v41 = vadd.f32 %v3919_v59, %v1237_v39  ;;  %v1790_v42 = vadd.f32 %v3919_v59, %v1789_v40  ;;  %3003 = vmatprep.mubr.msk.bf16.mxu0 %vm3605_vm0, %v3604_v0  ;;  %3279 = vmatprep.mubr.msk.bf16.mxu1 %vm3605_vm0, %v3604_v0 }
  0xfc   :  { %v2905_v43 = vpop.f32.mrf.mxu0  ;;  %v3181_v44 = vpop.f32.mrf.mxu1 }
  0xfd   :  { %2313 = vst [vmem:[%s5461_s3 + $0x30] sm:$0xff] %v1238_v41  ;;  %2451 = vst [vmem:[%s5461_s3 + $0x480] sm:$0xff] %v1790_v42  ;;  %v3529_v41 = vld [vmem:[%s5459_s0 + $0x100] sm:$0xff]   ;;  %v3530_v42 = vld [vmem:[%s5459_s0 + $0x328] sm:$0xff]  }
  0xfe   :  { %v1240_v45 = vpop.f32.mrf.mxu0  ;;  %v1792_v46 = vpop.f32.mrf.mxu1 }
  0xff   :  { %v1241_v49 = vadd.f32 %v3919_v59, %v1240_v45  ;;  %v1793_v50 = vadd.f32 %v3919_v59, %v1792_v46 }
 0x100   :  { %v2906_v51 = vpop.f32.mrf.mxu0  ;;  %v3182_v52 = vpop.f32.mrf.mxu1 }
 0x101   :  { %2314 = vst [vmem:[%s5461_s3 + $0x38] sm:$0xff] %v1241_v49  ;;  %2452 = vst [vmem:[%s5461_s3 + $0x488] sm:$0xff] %v1793_v50 }
 0x102   :  { %v1245_v53 = vpop.f32.mrf.mxu0  ;;  %3004 = vmatmul.mubr.bf16.gmra.mxu0 %v3521_v47  ;;  %v1797_v54 = vpop.f32.mrf.mxu1  ;;  %3280 = vmatmul.mubr.bf16.gmra.mxu1 %v3522_v48 }
 0x103   :  { %v1246_v55 = vadd.f32 %v3919_v59, %v1245_v53  ;;  %v1798_v56 = vadd.f32 %v3919_v59, %v1797_v54  ;;  %3007 = vmatprep.mubr.msk.bf16.mxu0 %vm3605_vm0, %v3604_v0  ;;  %3283 = vmatprep.mubr.msk.bf16.mxu1 %vm3605_vm0, %v3604_v0 }
 0x104   :  { %v2909_v57 = vpop.f32.mrf.mxu0  ;;  %v3185_v58 = vpop.f32.mrf.mxu1 }
 0x105   :  { %2315 = vst [vmem:[%s5461_s3 + $0x40] sm:$0xff] %v1246_v55  ;;  %2453 = vst [vmem:[%s5461_s3 + $0x490] sm:$0xff] %v1798_v56  ;;  %v3531_v55 = vld [vmem:[%s5459_s0 + $0x108] sm:$0xff]   ;;  %v3532_v56 = vld [vmem:[%s5459_s0 + $0x330] sm:$0xff]  }
 0x106   :  { %v1248_v60 = vpop.f32.mrf.mxu0  ;;  %v1800_v61 = vpop.f32.mrf.mxu1 }
 0x107   :  { %v1249_v1 = vadd.f32 %v3919_v59, %v1248_v60  ;;  %v1801_v2 = vadd.f32 %v3919_v59, %v1800_v61 }
 0x108   :  { %v2910_v3 = vpop.f32.mrf.mxu0  ;;  %v3186_v4 = vpop.f32.mrf.mxu1 }
 0x109   :  { %2316 = vst [vmem:[%s5461_s3 + $0x48] sm:$0xff] %v1249_v1  ;;  %2454 = vst [vmem:[%s5461_s3 + $0x498] sm:$0xff] %v1801_v2 }
 0x10a   :  { %v1253_v5 = vpop.f32.mrf.mxu0  ;;  %3008 = vmatmul.mubr.bf16.gmra.mxu0 %v3523_v62  ;;  %v1805_v6 = vpop.f32.mrf.mxu1  ;;  %3284 = vmatmul.mubr.bf16.gmra.mxu1 %v3524_v63 }
 0x10b   :  { %v1254_v7 = vadd.f32 %v3919_v59, %v1253_v5  ;;  %v1806_v8 = vadd.f32 %v3919_v59, %v1805_v6  ;;  %3011 = vmatprep.mubr.msk.bf16.mxu0 %vm3605_vm0, %v3604_v0  ;;  %3287 = vmatprep.mubr.msk.bf16.mxu1 %vm3605_vm0, %v3604_v0 }
 0x10c   :  { %v2913_v9 = vpop.f32.mrf.mxu0  ;;  %v3189_v10 = vpop.f32.mrf.mxu1 }
 0x10d   :  { %2317 = vst [vmem:[%s5461_s3 + $0x50] sm:$0xff] %v1254_v7  ;;  %2455 = vst [vmem:[%s5461_s3 + $0x4a0] sm:$0xff] %v1806_v8  ;;  %v3533_v7 = vld [vmem:[%s5459_s0 + $0x110] sm:$0xff]   ;;  %v3534_v8 = vld [vmem:[%s5459_s0 + $0x338] sm:$0xff]  }
 0x10e   :  { %v1256_v11 = vpop.f32.mrf.mxu0  ;;  %v1808_v12 = vpop.f32.mrf.mxu1 }
 0x10f   :  { %v1257_v15 = vadd.f32 %v3919_v59, %v1256_v11  ;;  %v1809_v16 = vadd.f32 %v3919_v59, %v1808_v12 }
 0x110   :  { %v2914_v17 = vpop.f32.mrf.mxu0  ;;  %v3190_v18 = vpop.f32.mrf.mxu1 }
 0x111   :  { %2318 = vst [vmem:[%s5461_s3 + $0x58] sm:$0xff] %v1257_v15  ;;  %2456 = vst [vmem:[%s5461_s3 + $0x4a8] sm:$0xff] %v1809_v16 }
 0x112   :  { %v1261_v19 = vpop.f32.mrf.mxu0  ;;  %3012 = vmatmul.mubr.bf16.gmra.mxu0 %v3525_v13  ;;  %v1813_v20 = vpop.f32.mrf.mxu1  ;;  %3288 = vmatmul.mubr.bf16.gmra.mxu1 %v3526_v14 }
 0x113   :  { %v1262_v21 = vadd.f32 %v3919_v59, %v1261_v19  ;;  %v1814_v22 = vadd.f32 %v3919_v59, %v1813_v20  ;;  %3015 = vmatprep.mubr.msk.bf16.mxu0 %vm3605_vm0, %v3604_v0  ;;  %3291 = vmatprep.mubr.msk.bf16.mxu1 %vm3605_vm0, %v3604_v0 }
 0x114   :  { %v2917_v23 = vpop.f32.mrf.mxu0  ;;  %v3193_v24 = vpop.f32.mrf.mxu1 }
 0x115   :  { %2319 = vst [vmem:[%s5461_s3 + $0x60] sm:$0xff] %v1262_v21  ;;  %2457 = vst [vmem:[%s5461_s3 + $0x4b0] sm:$0xff] %v1814_v22  ;;  %v3535_v21 = vld [vmem:[%s5459_s0 + $0x118] sm:$0xff]   ;;  %v3536_v22 = vld [vmem:[%s5459_s0 + $0x340] sm:$0xff]  }
 0x116   :  { %v1264_v25 = vpop.f32.mrf.mxu0  ;;  %v1816_v26 = vpop.f32.mrf.mxu1 }
 0x117   :  { %v1265_v29 = vadd.f32 %v3919_v59, %v1264_v25  ;;  %v1817_v30 = vadd.f32 %v3919_v59, %v1816_v26 }
 0x118   :  { %v2918_v31 = vpop.f32.mrf.mxu0  ;;  %v3194_v32 = vpop.f32.mrf.mxu1 }
 0x119   :  { %2320 = vst [vmem:[%s5461_s3 + $0x68] sm:$0xff] %v1265_v29  ;;  %2458 = vst [vmem:[%s5461_s3 + $0x4b8] sm:$0xff] %v1817_v30 }
 0x11a   :  { %v1269_v33 = vpop.f32.mrf.mxu0  ;;  %3016 = vmatmul.mubr.bf16.gmra.mxu0 %v3527_v27  ;;  %v1821_v34 = vpop.f32.mrf.mxu1  ;;  %3292 = vmatmul.mubr.bf16.gmra.mxu1 %v3528_v28 }
 0x11b   :  { %v1270_v35 = vadd.f32 %v3919_v59, %v1269_v33  ;;  %v1822_v36 = vadd.f32 %v3919_v59, %v1821_v34  ;;  %3019 = vmatprep.mubr.msk.bf16.mxu0 %vm3605_vm0, %v3604_v0  ;;  %3295 = vmatprep.mubr.msk.bf16.mxu1 %vm3605_vm0, %v3604_v0 }
 0x11c   :  { %v2921_v37 = vpop.f32.mrf.mxu0  ;;  %v3197_v38 = vpop.f32.mrf.mxu1 }
 0x11d   :  { %2321 = vst [vmem:[%s5461_s3 + $0x70] sm:$0xff] %v1270_v35  ;;  %2459 = vst [vmem:[%s5461_s3 + $0x4c0] sm:$0xff] %v1822_v36  ;;  %v3537_v35 = vld [vmem:[%s5459_s0 + $0x120] sm:$0xff]   ;;  %v3538_v36 = vld [vmem:[%s5459_s0 + $0x348] sm:$0xff]  }
 0x11e   :  { %v1272_v39 = vpop.f32.mrf.mxu0  ;;  %v1824_v40 = vpop.f32.mrf.mxu1 }
 0x11f   :  { %v1273_v43 = vadd.f32 %v3919_v59, %v1272_v39  ;;  %v1825_v44 = vadd.f32 %v3919_v59, %v1824_v40 }
 0x120   :  { %v2922_v45 = vpop.f32.mrf.mxu0  ;;  %v3198_v46 = vpop.f32.mrf.mxu1 }
 0x121   :  { %2322 = vst [vmem:[%s5461_s3 + $0x78] sm:$0xff] %v1273_v43  ;;  %2460 = vst [vmem:[%s5461_s3 + $0x4c8] sm:$0xff] %v1825_v44 }
 0x122   :  { %v1277_v47 = vpop.f32.mrf.mxu0  ;;  %3020 = vmatmul.mubr.bf16.gmra.mxu0 %v3529_v41  ;;  %v1829_v48 = vpop.f32.mrf.mxu1  ;;  %3296 = vmatmul.mubr.bf16.gmra.mxu1 %v3530_v42 }
 0x123   :  { %v1278_v49 = vadd.f32 %v3919_v59, %v1277_v47  ;;  %v1830_v50 = vadd.f32 %v3919_v59, %v1829_v48  ;;  %3023 = vmatprep.mubr.msk.bf16.mxu0 %vm3605_vm0, %v3604_v0  ;;  %3299 = vmatprep.mubr.msk.bf16.mxu1 %vm3605_vm0, %v3604_v0 }
 0x124   :  { %v2925_v51 = vpop.f32.mrf.mxu0  ;;  %v3201_v52 = vpop.f32.mrf.mxu1 }
 0x125   :  { %2323 = vst [vmem:[%s5461_s3 + $0x80] sm:$0xff] %v1278_v49  ;;  %2461 = vst [vmem:[%s5461_s3 + $0x4d0] sm:$0xff] %v1830_v50  ;;  %v3539_v49 = vld [vmem:[%s5459_s0 + $0x128] sm:$0xff]   ;;  %v3540_v50 = vld [vmem:[%s5459_s0 + $0x350] sm:$0xff]  }
 0x126   :  { %v1280_v53 = vpop.f32.mrf.mxu0  ;;  %v1832_v54 = vpop.f32.mrf.mxu1 }
 0x127   :  { %v1281_v57 = vadd.f32 %v3919_v59, %v1280_v53  ;;  %v1833_v58 = vadd.f32 %v3919_v59, %v1832_v54 }
 0x128   :  { %v2926_v60 = vpop.f32.mrf.mxu0  ;;  %v3202_v61 = vpop.f32.mrf.mxu1 }
 0x129   :  { %2324 = vst [vmem:[%s5461_s3 + $0x88] sm:$0xff] %v1281_v57  ;;  %2462 = vst [vmem:[%s5461_s3 + $0x4d8] sm:$0xff] %v1833_v58 }
 0x12a   :  { %v1285_v62 = vpop.f32.mrf.mxu0  ;;  %3024 = vmatmul.mubr.bf16.gmra.mxu0 %v3531_v55  ;;  %v1837_v63 = vpop.f32.mrf.mxu1  ;;  %3300 = vmatmul.mubr.bf16.gmra.mxu1 %v3532_v56 }
 0x12b   :  { %v1286_v1 = vadd.f32 %v3919_v59, %v1285_v62  ;;  %v1838_v2 = vadd.f32 %v3919_v59, %v1837_v63  ;;  %3027 = vmatprep.mubr.msk.bf16.mxu0 %vm3605_vm0, %v3604_v0  ;;  %3303 = vmatprep.mubr.msk.bf16.mxu1 %vm3605_vm0, %v3604_v0 }
 0x12c   :  { %v2929_v3 = vpop.f32.mrf.mxu0  ;;  %v3205_v4 = vpop.f32.mrf.mxu1 }
 0x12d   :  { %2325 = vst [vmem:[%s5461_s3 + $0x90] sm:$0xff] %v1286_v1  ;;  %2463 = vst [vmem:[%s5461_s3 + $0x4e0] sm:$0xff] %v1838_v2  ;;  %v3541_v1 = vld [vmem:[%s5459_s0 + $0x130] sm:$0xff]   ;;  %v3542_v2 = vld [vmem:[%s5459_s0 + $0x358] sm:$0xff]  }
 0x12e   :  { %v1288_v5 = vpop.f32.mrf.mxu0  ;;  %v1840_v6 = vpop.f32.mrf.mxu1 }
 0x12f   :  { %v1289_v9 = vadd.f32 %v3919_v59, %v1288_v5  ;;  %v1841_v10 = vadd.f32 %v3919_v59, %v1840_v6 }
 0x130   :  { %v2930_v11 = vpop.f32.mrf.mxu0  ;;  %v3206_v12 = vpop.f32.mrf.mxu1 }
 0x131   :  { %2326 = vst [vmem:[%s5461_s3 + $0x98] sm:$0xff] %v1289_v9  ;;  %2464 = vst [vmem:[%s5461_s3 + $0x4e8] sm:$0xff] %v1841_v10 }
 0x132   :  { %v1293_v13 = vpop.f32.mrf.mxu0  ;;  %3028 = vmatmul.mubr.bf16.gmra.mxu0 %v3533_v7  ;;  %v1845_v14 = vpop.f32.mrf.mxu1  ;;  %3304 = vmatmul.mubr.bf16.gmra.mxu1 %v3534_v8 }
 0x133   :  { %v1294_v15 = vadd.f32 %v3919_v59, %v1293_v13  ;;  %v1846_v16 = vadd.f32 %v3919_v59, %v1845_v14  ;;  %3031 = vmatprep.mubr.msk.bf16.mxu0 %vm3605_vm0, %v3604_v0  ;;  %3307 = vmatprep.mubr.msk.bf16.mxu1 %vm3605_vm0, %v3604_v0 }
 0x134   :  { %v2933_v17 = vpop.f32.mrf.mxu0  ;;  %v3209_v18 = vpop.f32.mrf.mxu1 }
 0x135   :  { %2327 = vst [vmem:[%s5461_s3 + $0xa0] sm:$0xff] %v1294_v15  ;;  %2465 = vst [vmem:[%s5461_s3 + $0x4f0] sm:$0xff] %v1846_v16  ;;  %v3543_v15 = vld [vmem:[%s5459_s0 + $0x138] sm:$0xff]   ;;  %v3544_v16 = vld [vmem:[%s5459_s0 + $0x360] sm:$0xff]  }
 0x136   :  { %v1296_v19 = vpop.f32.mrf.mxu0  ;;  %v1848_v20 = vpop.f32.mrf.mxu1 }
 0x137   :  { %v1297_v23 = vadd.f32 %v3919_v59, %v1296_v19  ;;  %v1849_v24 = vadd.f32 %v3919_v59, %v1848_v20 }
 0x138   :  { %v2934_v25 = vpop.f32.mrf.mxu0  ;;  %v3210_v26 = vpop.f32.mrf.mxu1 }
 0x139   :  { %2328 = vst [vmem:[%s5461_s3 + $0xa8] sm:$0xff] %v1297_v23  ;;  %2466 = vst [vmem:[%s5461_s3 + $0x4f8] sm:$0xff] %v1849_v24 }
 0x13a   :  { %v1301_v27 = vpop.f32.mrf.mxu0  ;;  %3032 = vmatmul.mubr.bf16.gmra.mxu0 %v3535_v21  ;;  %v1853_v28 = vpop.f32.mrf.mxu1  ;;  %3308 = vmatmul.mubr.bf16.gmra.mxu1 %v3536_v22 }
 0x13b   :  { %v1302_v29 = vadd.f32 %v3919_v59, %v1301_v27  ;;  %v1854_v30 = vadd.f32 %v3919_v59, %v1853_v28  ;;  %3035 = vmatprep.mubr.msk.bf16.mxu0 %vm3605_vm0, %v3604_v0  ;;  %3311 = vmatprep.mubr.msk.bf16.mxu1 %vm3605_vm0, %v3604_v0 }
 0x13c   :  { %v2937_v31 = vpop.f32.mrf.mxu0  ;;  %v3213_v32 = vpop.f32.mrf.mxu1 }
 0x13d   :  { %2329 = vst [vmem:[%s5461_s3 + $0xb0] sm:$0xff] %v1302_v29  ;;  %2467 = vst [vmem:[%s5461_s3 + $0x500] sm:$0xff] %v1854_v30  ;;  %v3545_v29 = vld [vmem:[%s5459_s0 + $0x140] sm:$0xff]   ;;  %v3546_v30 = vld [vmem:[%s5459_s0 + $0x368] sm:$0xff]  }
 0x13e   :  { %v1304_v33 = vpop.f32.mrf.mxu0  ;;  %v1856_v34 = vpop.f32.mrf.mxu1 }
 0x13f   :  { %v1305_v37 = vadd.f32 %v3919_v59, %v1304_v33  ;;  %v1857_v38 = vadd.f32 %v3919_v59, %v1856_v34 }
 0x140   :  { %v2938_v39 = vpop.f32.mrf.mxu0  ;;  %v3214_v40 = vpop.f32.mrf.mxu1 }
 0x141   :  { %2330 = vst [vmem:[%s5461_s3 + $0xb8] sm:$0xff] %v1305_v37  ;;  %2468 = vst [vmem:[%s5461_s3 + $0x508] sm:$0xff] %v1857_v38 }
 0x142   :  { %v1309_v41 = vpop.f32.mrf.mxu0  ;;  %3036 = vmatmul.mubr.bf16.gmra.mxu0 %v3537_v35  ;;  %v1861_v42 = vpop.f32.mrf.mxu1  ;;  %3312 = vmatmul.mubr.bf16.gmra.mxu1 %v3538_v36 }
 0x143   :  { %v1310_v43 = vadd.f32 %v3919_v59, %v1309_v41  ;;  %v1862_v44 = vadd.f32 %v3919_v59, %v1861_v42  ;;  %3039 = vmatprep.mubr.msk.bf16.mxu0 %vm3605_vm0, %v3604_v0  ;;  %3315 = vmatprep.mubr.msk.bf16.mxu1 %vm3605_vm0, %v3604_v0 }
 0x144   :  { %v2941_v45 = vpop.f32.mrf.mxu0  ;;  %v3217_v46 = vpop.f32.mrf.mxu1 }
 0x145   :  { %2331 = vst [vmem:[%s5461_s3 + $0xc0] sm:$0xff] %v1310_v43  ;;  %2469 = vst [vmem:[%s5461_s3 + $0x510] sm:$0xff] %v1862_v44  ;;  %v3547_v43 = vld [vmem:[%s5459_s0 + $0x148] sm:$0xff]   ;;  %v3548_v44 = vld [vmem:[%s5459_s0 + $0x370] sm:$0xff]  }
 0x146   :  { %v1312_v47 = vpop.f32.mrf.mxu0  ;;  %v1864_v48 = vpop.f32.mrf.mxu1 }
 0x147   :  { %v1313_v51 = vadd.f32 %v3919_v59, %v1312_v47  ;;  %v1865_v52 = vadd.f32 %v3919_v59, %v1864_v48 }
 0x148   :  { %v2942_v53 = vpop.f32.mrf.mxu0  ;;  %v3218_v54 = vpop.f32.mrf.mxu1 }
 0x149   :  { %2332 = vst [vmem:[%s5461_s3 + $0xc8] sm:$0xff] %v1313_v51  ;;  %2470 = vst [vmem:[%s5461_s3 + $0x518] sm:$0xff] %v1865_v52 }
 0x14a   :  { %v1317_v55 = vpop.f32.mrf.mxu0  ;;  %3040 = vmatmul.mubr.bf16.gmra.mxu0 %v3539_v49  ;;  %v1869_v56 = vpop.f32.mrf.mxu1  ;;  %3316 = vmatmul.mubr.bf16.gmra.mxu1 %v3540_v50 }
 0x14b   :  { %v1318_v57 = vadd.f32 %v3919_v59, %v1317_v55  ;;  %v1870_v58 = vadd.f32 %v3919_v59, %v1869_v56  ;;  %3043 = vmatprep.mubr.msk.bf16.mxu0 %vm3605_vm0, %v3604_v0  ;;  %3319 = vmatprep.mubr.msk.bf16.mxu1 %vm3605_vm0, %v3604_v0 }
 0x14c   :  { %v2945_v60 = vpop.f32.mrf.mxu0  ;;  %v3221_v61 = vpop.f32.mrf.mxu1 }
 0x14d   :  { %2333 = vst [vmem:[%s5461_s3 + $0xd0] sm:$0xff] %v1318_v57  ;;  %2471 = vst [vmem:[%s5461_s3 + $0x520] sm:$0xff] %v1870_v58  ;;  %v3549_v57 = vld [vmem:[%s5459_s0 + $0x150] sm:$0xff]   ;;  %v3550_v58 = vld [vmem:[%s5459_s0 + $0x378] sm:$0xff]  }
 0x14e   :  { %v1320_v62 = vpop.f32.mrf.mxu0  ;;  %v1872_v63 = vpop.f32.mrf.mxu1 }
 0x14f   :  { %v1321_v3 = vadd.f32 %v3919_v59, %v1320_v62  ;;  %v1873_v4 = vadd.f32 %v3919_v59, %v1872_v63 }
 0x150   :  { %v2946_v5 = vpop.f32.mrf.mxu0  ;;  %v3222_v6 = vpop.f32.mrf.mxu1 }
 0x151   :  { %2334 = vst [vmem:[%s5461_s3 + $0xd8] sm:$0xff] %v1321_v3  ;;  %2472 = vst [vmem:[%s5461_s3 + $0x528] sm:$0xff] %v1873_v4 }
 0x152   :  { %v1325_v7 = vpop.f32.mrf.mxu0  ;;  %3044 = vmatmul.mubr.bf16.gmra.mxu0 %v3541_v1  ;;  %v1877_v8 = vpop.f32.mrf.mxu1  ;;  %3320 = vmatmul.mubr.bf16.gmra.mxu1 %v3542_v2 }
 0x153   :  { %v1326_v9 = vadd.f32 %v3919_v59, %v1325_v7  ;;  %v1878_v10 = vadd.f32 %v3919_v59, %v1877_v8  ;;  %3047 = vmatprep.mubr.msk.bf16.mxu0 %vm3605_vm0, %v3604_v0  ;;  %3323 = vmatprep.mubr.msk.bf16.mxu1 %vm3605_vm0, %v3604_v0 }
 0x154   :  { %v2949_v11 = vpop.f32.mrf.mxu0  ;;  %v3225_v12 = vpop.f32.mrf.mxu1 }
 0x155   :  { %2335 = vst [vmem:[%s5461_s3 + $0xe0] sm:$0xff] %v1326_v9  ;;  %2473 = vst [vmem:[%s5461_s3 + $0x530] sm:$0xff] %v1878_v10  ;;  %v3551_v9 = vld [vmem:[%s5459_s0 + $0x158] sm:$0xff]   ;;  %v3552_v10 = vld [vmem:[%s5459_s0 + $0x380] sm:$0xff]  }
 0x156   :  { %v1328_v13 = vpop.f32.mrf.mxu0  ;;  %v1880_v14 = vpop.f32.mrf.mxu1 }
 0x157   :  { %v1329_v17 = vadd.f32 %v3919_v59, %v1328_v13  ;;  %v1881_v18 = vadd.f32 %v3919_v59, %v1880_v14 }
 0x158   :  { %v2950_v19 = vpop.f32.mrf.mxu0  ;;  %v3226_v20 = vpop.f32.mrf.mxu1 }
 0x159   :  { %2336 = vst [vmem:[%s5461_s3 + $0xe8] sm:$0xff] %v1329_v17  ;;  %2474 = vst [vmem:[%s5461_s3 + $0x538] sm:$0xff] %v1881_v18 }
 0x15a   :  { %v1333_v21 = vpop.f32.mrf.mxu0  ;;  %3048 = vmatmul.mubr.bf16.gmra.mxu0 %v3543_v15  ;;  %v1885_v22 = vpop.f32.mrf.mxu1  ;;  %3324 = vmatmul.mubr.bf16.gmra.mxu1 %v3544_v16 }
 0x15b   :  { %v1334_v23 = vadd.f32 %v3919_v59, %v1333_v21  ;;  %v1886_v24 = vadd.f32 %v3919_v59, %v1885_v22  ;;  %3051 = vmatprep.mubr.msk.bf16.mxu0 %vm3605_vm0, %v3604_v0  ;;  %3327 = vmatprep.mubr.msk.bf16.mxu1 %vm3605_vm0, %v3604_v0 }
 0x15c   :  { %v2953_v25 = vpop.f32.mrf.mxu0  ;;  %v3229_v26 = vpop.f32.mrf.mxu1 }
 0x15d   :  { %2337 = vst [vmem:[%s5461_s3 + $0xf0] sm:$0xff] %v1334_v23  ;;  %2475 = vst [vmem:[%s5461_s3 + $0x540] sm:$0xff] %v1886_v24  ;;  %v3553_v23 = vld [vmem:[%s5459_s0 + $0x160] sm:$0xff]   ;;  %v3554_v24 = vld [vmem:[%s5459_s0 + $0x388] sm:$0xff]  }
 0x15e   :  { %v1336_v27 = vpop.f32.mrf.mxu0  ;;  %v1888_v28 = vpop.f32.mrf.mxu1 }
 0x15f   :  { %v1337_v31 = vadd.f32 %v3919_v59, %v1336_v27  ;;  %v1889_v32 = vadd.f32 %v3919_v59, %v1888_v28 }
 0x160   :  { %v2954_v33 = vpop.f32.mrf.mxu0  ;;  %v3230_v34 = vpop.f32.mrf.mxu1 }
 0x161   :  { %2338 = vst [vmem:[%s5461_s3 + $0xf8] sm:$0xff] %v1337_v31  ;;  %2476 = vst [vmem:[%s5461_s3 + $0x548] sm:$0xff] %v1889_v32 }
 0x162   :  { %v1341_v35 = vpop.f32.mrf.mxu0  ;;  %3052 = vmatmul.mubr.bf16.gmra.mxu0 %v3545_v29  ;;  %v1893_v36 = vpop.f32.mrf.mxu1  ;;  %3328 = vmatmul.mubr.bf16.gmra.mxu1 %v3546_v30 }
 0x163   :  { %v1342_v37 = vadd.f32 %v3919_v59, %v1341_v35  ;;  %v1894_v38 = vadd.f32 %v3919_v59, %v1893_v36  ;;  %3055 = vmatprep.mubr.msk.bf16.mxu0 %vm3605_vm0, %v3604_v0  ;;  %3331 = vmatprep.mubr.msk.bf16.mxu1 %vm3605_vm0, %v3604_v0 }
 0x164   :  { %v2957_v39 = vpop.f32.mrf.mxu0  ;;  %v3233_v40 = vpop.f32.mrf.mxu1 }
 0x165   :  { %2339 = vst [vmem:[%s5461_s3 + $0x100] sm:$0xff] %v1342_v37  ;;  %2477 = vst [vmem:[%s5461_s3 + $0x550] sm:$0xff] %v1894_v38  ;;  %v3555_v37 = vld [vmem:[%s5459_s0 + $0x168] sm:$0xff]   ;;  %v3556_v38 = vld [vmem:[%s5459_s0 + $0x390] sm:$0xff]  }
 0x166   :  { %v1344_v41 = vpop.f32.mrf.mxu0  ;;  %v1896_v42 = vpop.f32.mrf.mxu1 }
 0x167   :  { %v1345_v45 = vadd.f32 %v3919_v59, %v1344_v41  ;;  %v1897_v46 = vadd.f32 %v3919_v59, %v1896_v42 }
 0x168   :  { %v2958_v47 = vpop.f32.mrf.mxu0  ;;  %v3234_v48 = vpop.f32.mrf.mxu1 }
 0x169   :  { %2340 = vst [vmem:[%s5461_s3 + $0x108] sm:$0xff] %v1345_v45  ;;  %2478 = vst [vmem:[%s5461_s3 + $0x558] sm:$0xff] %v1897_v46 }
 0x16a   :  { %v1349_v49 = vpop.f32.mrf.mxu0  ;;  %3056 = vmatmul.mubr.bf16.gmra.mxu0 %v3547_v43  ;;  %v1901_v50 = vpop.f32.mrf.mxu1  ;;  %3332 = vmatmul.mubr.bf16.gmra.mxu1 %v3548_v44 }
 0x16b   :  { %v1350_v51 = vadd.f32 %v3919_v59, %v1349_v49  ;;  %v1902_v52 = vadd.f32 %v3919_v59, %v1901_v50  ;;  %3059 = vmatprep.mubr.msk.bf16.mxu0 %vm3605_vm0, %v3604_v0  ;;  %3335 = vmatprep.mubr.msk.bf16.mxu1 %vm3605_vm0, %v3604_v0 }
 0x16c   :  { %v2961_v53 = vpop.f32.mrf.mxu0  ;;  %v3237_v54 = vpop.f32.mrf.mxu1 }
 0x16d   :  { %2341 = vst [vmem:[%s5461_s3 + $0x110] sm:$0xff] %v1350_v51  ;;  %2479 = vst [vmem:[%s5461_s3 + $0x560] sm:$0xff] %v1902_v52  ;;  %v3557_v51 = vld [vmem:[%s5459_s0 + $0x170] sm:$0xff]   ;;  %v3558_v52 = vld [vmem:[%s5459_s0 + $0x398] sm:$0xff]  }
 0x16e   :  { %v1352_v55 = vpop.f32.mrf.mxu0  ;;  %v1904_v56 = vpop.f32.mrf.mxu1 }
 0x16f   :  { %v1353_v60 = vadd.f32 %v3919_v59, %v1352_v55  ;;  %v1905_v61 = vadd.f32 %v3919_v59, %v1904_v56 }
 0x170   :  { %v2962_v62 = vpop.f32.mrf.mxu0  ;;  %v3238_v63 = vpop.f32.mrf.mxu1 }
 0x171   :  { %2342 = vst [vmem:[%s5461_s3 + $0x118] sm:$0xff] %v1353_v60  ;;  %2480 = vst [vmem:[%s5461_s3 + $0x568] sm:$0xff] %v1905_v61 }
 0x172   :  { %v1357_v1 = vpop.f32.mrf.mxu0  ;;  %3060 = vmatmul.mubr.bf16.gmra.mxu0 %v3549_v57  ;;  %v1909_v2 = vpop.f32.mrf.mxu1  ;;  %3336 = vmatmul.mubr.bf16.gmra.mxu1 %v3550_v58 }
 0x173   :  { %v1358_v3 = vadd.f32 %v3919_v59, %v1357_v1  ;;  %v1910_v4 = vadd.f32 %v3919_v59, %v1909_v2  ;;  %3063 = vmatprep.mubr.msk.bf16.mxu0 %vm3605_vm0, %v3604_v0  ;;  %3339 = vmatprep.mubr.msk.bf16.mxu1 %vm3605_vm0, %v3604_v0 }
 0x174   :  { %v2965_v5 = vpop.f32.mrf.mxu0  ;;  %v3241_v6 = vpop.f32.mrf.mxu1 }
 0x175   :  { %2343 = vst [vmem:[%s5461_s3 + $0x120] sm:$0xff] %v1358_v3  ;;  %2481 = vst [vmem:[%s5461_s3 + $0x570] sm:$0xff] %v1910_v4  ;;  %v3559_v3 = vld [vmem:[%s5459_s0 + $0x178] sm:$0xff]   ;;  %v3560_v4 = vld [vmem:[%s5459_s0 + $0x3a0] sm:$0xff]  }
 0x176   :  { %v1360_v7 = vpop.f32.mrf.mxu0  ;;  %v1912_v8 = vpop.f32.mrf.mxu1 }
 0x177   :  { %v1361_v11 = vadd.f32 %v3919_v59, %v1360_v7  ;;  %v1913_v12 = vadd.f32 %v3919_v59, %v1912_v8 }
 0x178   :  { %v2966_v13 = vpop.f32.mrf.mxu0  ;;  %v3242_v14 = vpop.f32.mrf.mxu1 }
 0x179   :  { %2344 = vst [vmem:[%s5461_s3 + $0x128] sm:$0xff] %v1361_v11  ;;  %2482 = vst [vmem:[%s5461_s3 + $0x578] sm:$0xff] %v1913_v12  ;;  %v4522_v11 = vld [vmem:[%s5460_s2] ss:$0 sm:$0xff] }
 0x17a   :  { %v1365_v15 = vpop.f32.mrf.mxu0  ;;  %3064 = vmatmul.mubr.bf16.gmra.mxu0 %v3551_v9  ;;  %v1917_v16 = vpop.f32.mrf.mxu1  ;;  %3340 = vmatmul.mubr.bf16.gmra.mxu1 %v3552_v10 }
 0x17b   :  { %v1366_v17 = vadd.f32 %v3919_v59, %v1365_v15  ;;  %v1918_v18 = vadd.f32 %v3919_v59, %v1917_v16  ;;  %3067 = vmatprep.mubr.msk.bf16.mxu0 %vm3605_vm0, %v3604_v0  ;;  %3343 = vmatprep.mubr.msk.bf16.mxu1 %vm3605_vm0, %v3604_v0 }
 0x17c   :  { %v2969_v19 = vpop.f32.mrf.mxu0  ;;  %v3245_v20 = vpop.f32.mrf.mxu1 }
 0x17d   :  { %2345 = vst [vmem:[%s5461_s3 + $0x130] sm:$0xff] %v1366_v17  ;;  %2483 = vst [vmem:[%s5461_s3 + $0x580] sm:$0xff] %v1918_v18  ;;  %v3561_v17 = vld [vmem:[%s5459_s0 + $0x180] sm:$0xff]   ;;  %v3562_v18 = vld [vmem:[%s5459_s0 + $0x3a8] sm:$0xff]  }
 0x17e   :  { %v1368_v21 = vpop.f32.mrf.mxu0  ;;  %v1920_v22 = vpop.f32.mrf.mxu1 }
 0x17f   :  { %v1369_v25 = vadd.f32 %v3919_v59, %v1368_v21  ;;  %v1921_v26 = vadd.f32 %v3919_v59, %v1920_v22 }
 0x180   :  { %v2970_v27 = vpop.f32.mrf.mxu0  ;;  %v3246_v28 = vpop.f32.mrf.mxu1 }
 0x181   :  { %2346 = vst [vmem:[%s5461_s3 + $0x138] sm:$0xff] %v1369_v25  ;;  %2484 = vst [vmem:[%s5461_s3 + $0x588] sm:$0xff] %v1921_v26 }
 0x182   :  { %v1373_v29 = vpop.f32.mrf.mxu0  ;;  %3068 = vmatmul.mubr.bf16.gmra.mxu0 %v3553_v23  ;;  %v1925_v30 = vpop.f32.mrf.mxu1  ;;  %3344 = vmatmul.mubr.bf16.gmra.mxu1 %v3554_v24 }
 0x183   :  { %v1374_v31 = vadd.f32 %v3919_v59, %v1373_v29  ;;  %v1926_v32 = vadd.f32 %v3919_v59, %v1925_v30  ;;  %3071 = vmatprep.mubr.msk.bf16.mxu0 %vm3605_vm0, %v3604_v0  ;;  %3347 = vmatprep.mubr.msk.bf16.mxu1 %vm3605_vm0, %v3604_v0 }
 0x184   :  { %v2973_v33 = vpop.f32.mrf.mxu0  ;;  %v3249_v34 = vpop.f32.mrf.mxu1 }
 0x185   :  { %2347 = vst [vmem:[%s5461_s3 + $0x140] sm:$0xff] %v1374_v31  ;;  %2485 = vst [vmem:[%s5461_s3 + $0x590] sm:$0xff] %v1926_v32  ;;  %v3563_v31 = vld [vmem:[%s5459_s0 + $0x188] sm:$0xff]   ;;  %v3564_v32 = vld [vmem:[%s5459_s0 + $0x3b0] sm:$0xff]  }
 0x186   :  { %v1376_v35 = vpop.f32.mrf.mxu0  ;;  %v1928_v36 = vpop.f32.mrf.mxu1 }
 0x187   :  { %v1377_v39 = vadd.f32 %v3919_v59, %v1376_v35  ;;  %v1929_v40 = vadd.f32 %v3919_v59, %v1928_v36 }
 0x188   :  { %v2974_v41 = vpop.f32.mrf.mxu0  ;;  %v3250_v42 = vpop.f32.mrf.mxu1 }
 0x189   :  { %2348 = vst [vmem:[%s5461_s3 + $0x148] sm:$0xff] %v1377_v39  ;;  %2486 = vst [vmem:[%s5461_s3 + $0x598] sm:$0xff] %v1929_v40 }
 0x18a   :  { %v1381_v43 = vpop.f32.mrf.mxu0  ;;  %3072 = vmatmul.mubr.bf16.gmra.mxu0 %v3555_v37  ;;  %v1933_v44 = vpop.f32.mrf.mxu1  ;;  %3348 = vmatmul.mubr.bf16.gmra.mxu1 %v3556_v38 }
 0x18b   :  { %v1382_v45 = vadd.f32 %v3919_v59, %v1381_v43  ;;  %v1934_v46 = vadd.f32 %v3919_v59, %v1933_v44  ;;  %3075 = vmatprep.mubr.msk.bf16.mxu0 %vm3605_vm0, %v3604_v0  ;;  %3351 = vmatprep.mubr.msk.bf16.mxu1 %vm3605_vm0, %v3604_v0 }
 0x18c   :  { %v2977_v47 = vpop.f32.mrf.mxu0  ;;  %v3253_v48 = vpop.f32.mrf.mxu1 }
 0x18d   :  { %2349 = vst [vmem:[%s5461_s3 + $0x150] sm:$0xff] %v1382_v45  ;;  %2487 = vst [vmem:[%s5461_s3 + $0x5a0] sm:$0xff] %v1934_v46  ;;  %v3565_v45 = vld [vmem:[%s5459_s0 + $0x190] sm:$0xff]   ;;  %v3566_v46 = vld [vmem:[%s5459_s0 + $0x3b8] sm:$0xff]  }
 0x18e   :  { %v1384_v49 = vpop.f32.mrf.mxu0  ;;  %v1936_v50 = vpop.f32.mrf.mxu1 }
 0x18f   :  { %v1385_v53 = vadd.f32 %v3919_v59, %v1384_v49  ;;  %v1937_v54 = vadd.f32 %v3919_v59, %v1936_v50 }
 0x190   :  { %v2978_v55 = vpop.f32.mrf.mxu0  ;;  %v3254_v56 = vpop.f32.mrf.mxu1 }
 0x191   :  { %2350 = vst [vmem:[%s5461_s3 + $0x158] sm:$0xff] %v1385_v53  ;;  %2488 = vst [vmem:[%s5461_s3 + $0x5a8] sm:$0xff] %v1937_v54 }
 0x192   :  { %v1389_v57 = vpop.f32.mrf.mxu0  ;;  %3076 = vmatmul.mubr.bf16.gmra.mxu0 %v3557_v51  ;;  %v1941_v58 = vpop.f32.mrf.mxu1  ;;  %3352 = vmatmul.mubr.bf16.gmra.mxu1 %v3558_v52 }
 0x193   :  { %v1390_v60 = vadd.f32 %v3919_v59, %v1389_v57  ;;  %v1942_v61 = vadd.f32 %v3919_v59, %v1941_v58  ;;  %3079 = vmatprep.mubr.msk.bf16.mxu0 %vm3605_vm0, %v3604_v0  ;;  %3355 = vmatprep.mubr.msk.bf16.mxu1 %vm3605_vm0, %v3604_v0 }
 0x194   :  { %v2981_v62 = vpop.f32.mrf.mxu0  ;;  %v3257_v63 = vpop.f32.mrf.mxu1 }
 0x195   :  { %2351 = vst [vmem:[%s5461_s3 + $0x160] sm:$0xff] %v1390_v60  ;;  %2489 = vst [vmem:[%s5461_s3 + $0x5b0] sm:$0xff] %v1942_v61  ;;  %v3567_v60 = vld [vmem:[%s5459_s0 + $0x198] sm:$0xff]   ;;  %v3568_v61 = vld [vmem:[%s5459_s0 + $0x3c0] sm:$0xff]  }
 0x196   :  { %v1392_v1 = vpop.f32.mrf.mxu0  ;;  %v1944_v2 = vpop.f32.mrf.mxu1 }
 0x197   :  { %v1393_v5 = vadd.f32 %v3919_v59, %v1392_v1  ;;  %v1945_v6 = vadd.f32 %v3919_v59, %v1944_v2 }
 0x198   :  { %v2982_v7 = vpop.f32.mrf.mxu0  ;;  %v3258_v8 = vpop.f32.mrf.mxu1 }
 0x199   :  { %2352 = vst [vmem:[%s5461_s3 + $0x168] sm:$0xff] %v1393_v5  ;;  %2490 = vst [vmem:[%s5461_s3 + $0x5b8] sm:$0xff] %v1945_v6 }
 0x19a   :  { %v1397_v9 = vpop.f32.mrf.mxu0  ;;  %3080 = vmatmul.mubr.bf16.gmra.mxu0 %v3559_v3  ;;  %v1949_v10 = vpop.f32.mrf.mxu1  ;;  %3356 = vmatmul.mubr.bf16.gmra.mxu1 %v3560_v4 }
 0x19b   :  { %v1398_v59 = vadd.f32 %v4522_v11, %v1397_v9  ;;  %v1950_v12 = vadd.f32 %v4522_v11, %v1949_v10  ;;  %3083 = vmatprep.mubr.msk.bf16.mxu0 %vm3605_vm0, %v3604_v0  ;;  %3359 = vmatprep.mubr.msk.bf16.mxu1 %vm3605_vm0, %v3604_v0 }
 0x19c   :  { %v2985_v13 = vpop.f32.mrf.mxu0  ;;  %v3261_v14 = vpop.f32.mrf.mxu1 }
 0x19d   :  { %2353 = vst [vmem:[%s5461_s3 + $0x170] sm:$0xff] %v1398_v59  ;;  %2491 = vst [vmem:[%s5461_s3 + $0x5c0] sm:$0xff] %v1950_v12  ;;  %v3569_v59 = vld [vmem:[%s5459_s0 + $0x1a0] sm:$0xff]   ;;  %v3570_v12 = vld [vmem:[%s5459_s0 + $0x3c8] sm:$0xff]  }
 0x19e   :  { %v1400_v15 = vpop.f32.mrf.mxu0  ;;  %v1952_v16 = vpop.f32.mrf.mxu1 }
 0x19f   :  { %v1401_v19 = vadd.f32 %v4522_v11, %v1400_v15  ;;  %v1953_v20 = vadd.f32 %v4522_v11, %v1952_v16 }
 0x1a0   :  { %v2986_v21 = vpop.f32.mrf.mxu0  ;;  %v3262_v22 = vpop.f32.mrf.mxu1 }
 0x1a1   :  { %2354 = vst [vmem:[%s5461_s3 + $0x178] sm:$0xff] %v1401_v19  ;;  %2492 = vst [vmem:[%s5461_s3 + $0x5c8] sm:$0xff] %v1953_v20 }
 0x1a2   :  { %v1405_v23 = vpop.f32.mrf.mxu0  ;;  %3084 = vmatmul.mubr.bf16.gmra.mxu0 %v3561_v17  ;;  %v1957_v24 = vpop.f32.mrf.mxu1  ;;  %3360 = vmatmul.mubr.bf16.gmra.mxu1 %v3562_v18 }
 0x1a3   :  { %v1406_v25 = vadd.f32 %v4522_v11, %v1405_v23  ;;  %v1958_v26 = vadd.f32 %v4522_v11, %v1957_v24  ;;  %3087 = vmatprep.mubr.msk.bf16.mxu0 %vm3605_vm0, %v3604_v0  ;;  %3363 = vmatprep.mubr.msk.bf16.mxu1 %vm3605_vm0, %v3604_v0 }
 0x1a4   :  { %v2989_v27 = vpop.f32.mrf.mxu0  ;;  %v3265_v28 = vpop.f32.mrf.mxu1 }
 0x1a5   :  { %2355 = vst [vmem:[%s5461_s3 + $0x180] sm:$0xff] %v1406_v25  ;;  %2493 = vst [vmem:[%s5461_s3 + $0x5d0] sm:$0xff] %v1958_v26  ;;  %v3571_v25 = vld [vmem:[%s5459_s0 + $0x1a8] sm:$0xff]   ;;  %v3572_v26 = vld [vmem:[%s5459_s0 + $0x3d0] sm:$0xff]  }
 0x1a6   :  { %v1408_v29 = vpop.f32.mrf.mxu0  ;;  %v1960_v30 = vpop.f32.mrf.mxu1 }
 0x1a7   :  { %v1409_v33 = vadd.f32 %v4522_v11, %v1408_v29  ;;  %v1961_v34 = vadd.f32 %v4522_v11, %v1960_v30 }
 0x1a8   :  { %v2990_v35 = vpop.f32.mrf.mxu0  ;;  %v3266_v36 = vpop.f32.mrf.mxu1 }
 0x1a9   :  { %2356 = vst [vmem:[%s5461_s3 + $0x188] sm:$0xff] %v1409_v33  ;;  %2494 = vst [vmem:[%s5461_s3 + $0x5d8] sm:$0xff] %v1961_v34 }
 0x1aa   :  { %v1413_v37 = vpop.f32.mrf.mxu0  ;;  %3088 = vmatmul.mubr.bf16.gmra.mxu0 %v3563_v31  ;;  %v1965_v38 = vpop.f32.mrf.mxu1  ;;  %3364 = vmatmul.mubr.bf16.gmra.mxu1 %v3564_v32 }
 0x1ab   :  { %v1414_v39 = vadd.f32 %v4522_v11, %v1413_v37  ;;  %v1966_v40 = vadd.f32 %v4522_v11, %v1965_v38  ;;  %3091 = vmatprep.mubr.msk.bf16.mxu0 %vm3605_vm0, %v3604_v0  ;;  %3367 = vmatprep.mubr.msk.bf16.mxu1 %vm3605_vm0, %v3604_v0 }
 0x1ac   :  { %v2993_v41 = vpop.f32.mrf.mxu0  ;;  %v3269_v42 = vpop.f32.mrf.mxu1 }
 0x1ad   :  { %2357 = vst [vmem:[%s5461_s3 + $0x190] sm:$0xff] %v1414_v39  ;;  %2495 = vst [vmem:[%s5461_s3 + $0x5e0] sm:$0xff] %v1966_v40  ;;  %v3573_v39 = vld [vmem:[%s5459_s0 + $0x1b0] sm:$0xff]   ;;  %v3574_v40 = vld [vmem:[%s5459_s0 + $0x3d8] sm:$0xff]  }
 0x1ae   :  { %v1416_v43 = vpop.f32.mrf.mxu0  ;;  %v1968_v44 = vpop.f32.mrf.mxu1 }
 0x1af   :  { %v1417_v47 = vadd.f32 %v4522_v11, %v1416_v43  ;;  %v1969_v48 = vadd.f32 %v4522_v11, %v1968_v44 }
 0x1b0   :  { %v2994_v49 = vpop.f32.mrf.mxu0  ;;  %v3270_v50 = vpop.f32.mrf.mxu1 }
 0x1b1   :  { %2358 = vst [vmem:[%s5461_s3 + $0x198] sm:$0xff] %v1417_v47  ;;  %2496 = vst [vmem:[%s5461_s3 + $0x5e8] sm:$0xff] %v1969_v48 }
 0x1b2   :  { %v1421_v51 = vpop.f32.mrf.mxu0  ;;  %3092 = vmatmul.mubr.bf16.gmra.mxu0 %v3565_v45  ;;  %v1973_v52 = vpop.f32.mrf.mxu1  ;;  %3368 = vmatmul.mubr.bf16.gmra.mxu1 %v3566_v46 }
 0x1b3   :  { %v1422_v53 = vadd.f32 %v4522_v11, %v1421_v51  ;;  %v1974_v54 = vadd.f32 %v4522_v11, %v1973_v52  ;;  %3095 = vmatprep.mubr.msk.bf16.mxu0 %vm3605_vm0, %v3604_v0  ;;  %3371 = vmatprep.mubr.msk.bf16.mxu1 %vm3605_vm0, %v3604_v0 }
 0x1b4   :  { %v2997_v55 = vpop.f32.mrf.mxu0  ;;  %v3273_v56 = vpop.f32.mrf.mxu1 }
 0x1b5   :  { %2359 = vst [vmem:[%s5461_s3 + $0x1a0] sm:$0xff] %v1422_v53  ;;  %2497 = vst [vmem:[%s5461_s3 + $0x5f0] sm:$0xff] %v1974_v54  ;;  %v3575_v53 = vld [vmem:[%s5459_s0 + $0x1b8] sm:$0xff]   ;;  %v3576_v54 = vld [vmem:[%s5459_s0 + $0x3e0] sm:$0xff]  }
 0x1b6   :  { %v1424_v57 = vpop.f32.mrf.mxu0  ;;  %v1976_v58 = vpop.f32.mrf.mxu1 }
 0x1b7   :  { %v1425_v62 = vadd.f32 %v4522_v11, %v1424_v57  ;;  %v1977_v63 = vadd.f32 %v4522_v11, %v1976_v58 }
 0x1b8   :  { %v2998_v1 = vpop.f32.mrf.mxu0  ;;  %v3274_v2 = vpop.f32.mrf.mxu1 }
 0x1b9   :  { %2360 = vst [vmem:[%s5461_s3 + $0x1a8] sm:$0xff] %v1425_v62  ;;  %2498 = vst [vmem:[%s5461_s3 + $0x5f8] sm:$0xff] %v1977_v63 }
 0x1ba   :  { %v1429_v3 = vpop.f32.mrf.mxu0  ;;  %3096 = vmatmul.mubr.bf16.gmra.mxu0 %v3567_v60  ;;  %v1981_v4 = vpop.f32.mrf.mxu1  ;;  %3372 = vmatmul.mubr.bf16.gmra.mxu1 %v3568_v61 }
 0x1bb   :  { %v1430_v5 = vadd.f32 %v4522_v11, %v1429_v3  ;;  %v1982_v6 = vadd.f32 %v4522_v11, %v1981_v4  ;;  %3099 = vmatprep.mubr.msk.bf16.mxu0 %vm3605_vm0, %v3604_v0  ;;  %3375 = vmatprep.mubr.msk.bf16.mxu1 %vm3605_vm0, %v3604_v0 }
 0x1bc   :  { %v3001_v7 = vpop.f32.mrf.mxu0  ;;  %v3277_v8 = vpop.f32.mrf.mxu1 }
 0x1bd   :  { %2361 = vst [vmem:[%s5461_s3 + $0x1b0] sm:$0xff] %v1430_v5  ;;  %2499 = vst [vmem:[%s5461_s3 + $0x600] sm:$0xff] %v1982_v6  ;;  %v3577_v5 = vld [vmem:[%s5459_s0 + $0x1c0] sm:$0xff]   ;;  %v3578_v6 = vld [vmem:[%s5459_s0 + $0x3e8] sm:$0xff]  }
 0x1be   :  { %v1432_v9 = vpop.f32.mrf.mxu0  ;;  %v1984_v10 = vpop.f32.mrf.mxu1 }
 0x1bf   :  { %v1433_v13 = vadd.f32 %v4522_v11, %v1432_v9  ;;  %v1985_v14 = vadd.f32 %v4522_v11, %v1984_v10 }
 0x1c0   :  { %v3002_v15 = vpop.f32.mrf.mxu0  ;;  %v3278_v16 = vpop.f32.mrf.mxu1 }
 0x1c1   :  { %2362 = vst [vmem:[%s5461_s3 + $0x1b8] sm:$0xff] %v1433_v13  ;;  %2500 = vst [vmem:[%s5461_s3 + $0x608] sm:$0xff] %v1985_v14 }
 0x1c2   :  { %v1437_v17 = vpop.f32.mrf.mxu0  ;;  %3100 = vmatmul.mubr.bf16.gmra.mxu0 %v3569_v59  ;;  %v1989_v18 = vpop.f32.mrf.mxu1  ;;  %3376 = vmatmul.mubr.bf16.gmra.mxu1 %v3570_v12 }
 0x1c3   :  { %v1438_v19 = vadd.f32 %v4522_v11, %v1437_v17  ;;  %v1990_v20 = vadd.f32 %v4522_v11, %v1989_v18  ;;  %3103 = vmatprep.mubr.msk.bf16.mxu0 %vm3605_vm0, %v3604_v0  ;;  %3379 = vmatprep.mubr.msk.bf16.mxu1 %vm3605_vm0, %v3604_v0 }
 0x1c4   :  { %v3005_v21 = vpop.f32.mrf.mxu0  ;;  %v3281_v22 = vpop.f32.mrf.mxu1 }
 0x1c5   :  { %2363 = vst [vmem:[%s5461_s3 + $0x1c0] sm:$0xff] %v1438_v19  ;;  %2501 = vst [vmem:[%s5461_s3 + $0x610] sm:$0xff] %v1990_v20  ;;  %v3579_v19 = vld [vmem:[%s5459_s0 + $0x1c8] sm:$0xff]   ;;  %v3580_v20 = vld [vmem:[%s5459_s0 + $0x3f0] sm:$0xff]  }
 0x1c6   :  { %v1440_v23 = vpop.f32.mrf.mxu0  ;;  %v1992_v24 = vpop.f32.mrf.mxu1 }
 0x1c7   :  { %v1441_v27 = vadd.f32 %v4522_v11, %v1440_v23  ;;  %v1993_v28 = vadd.f32 %v4522_v11, %v1992_v24 }
 0x1c8   :  { %v3006_v29 = vpop.f32.mrf.mxu0  ;;  %v3282_v30 = vpop.f32.mrf.mxu1 }
 0x1c9   :  { %2364 = vst [vmem:[%s5461_s3 + $0x1c8] sm:$0xff] %v1441_v27  ;;  %2502 = vst [vmem:[%s5461_s3 + $0x618] sm:$0xff] %v1993_v28 }
 0x1ca   :  { %v1445_v31 = vpop.f32.mrf.mxu0  ;;  %3104 = vmatmul.mubr.bf16.gmra.mxu0 %v3571_v25  ;;  %v1997_v32 = vpop.f32.mrf.mxu1  ;;  %3380 = vmatmul.mubr.bf16.gmra.mxu1 %v3572_v26 }
 0x1cb   :  { %v1446_v33 = vadd.f32 %v4522_v11, %v1445_v31  ;;  %v1998_v34 = vadd.f32 %v4522_v11, %v1997_v32  ;;  %3107 = vmatprep.mubr.msk.bf16.mxu0 %vm3605_vm0, %v3604_v0  ;;  %3383 = vmatprep.mubr.msk.bf16.mxu1 %vm3605_vm0, %v3604_v0 }
 0x1cc   :  { %v3009_v35 = vpop.f32.mrf.mxu0  ;;  %v3285_v36 = vpop.f32.mrf.mxu1 }
 0x1cd   :  { %2365 = vst [vmem:[%s5461_s3 + $0x1d0] sm:$0xff] %v1446_v33  ;;  %2503 = vst [vmem:[%s5461_s3 + $0x620] sm:$0xff] %v1998_v34  ;;  %v3581_v33 = vld [vmem:[%s5459_s0 + $0x1d0] sm:$0xff]   ;;  %v3582_v34 = vld [vmem:[%s5459_s0 + $0x3f8] sm:$0xff]  }
 0x1ce   :  { %v1448_v37 = vpop.f32.mrf.mxu0  ;;  %v2000_v38 = vpop.f32.mrf.mxu1 }
 0x1cf   :  { %v1449_v41 = vadd.f32 %v4522_v11, %v1448_v37  ;;  %v2001_v42 = vadd.f32 %v4522_v11, %v2000_v38 }
 0x1d0   :  { %v3010_v43 = vpop.f32.mrf.mxu0  ;;  %v3286_v44 = vpop.f32.mrf.mxu1 }
 0x1d1   :  { %2366 = vst [vmem:[%s5461_s3 + $0x1d8] sm:$0xff] %v1449_v41  ;;  %2504 = vst [vmem:[%s5461_s3 + $0x628] sm:$0xff] %v2001_v42 }
 0x1d2   :  { %v1453_v45 = vpop.f32.mrf.mxu0  ;;  %3108 = vmatmul.mubr.bf16.gmra.mxu0 %v3573_v39  ;;  %v2005_v46 = vpop.f32.mrf.mxu1  ;;  %3384 = vmatmul.mubr.bf16.gmra.mxu1 %v3574_v40 }
 0x1d3   :  { %v1454_v47 = vadd.f32 %v4522_v11, %v1453_v45  ;;  %v2006_v48 = vadd.f32 %v4522_v11, %v2005_v46  ;;  %3111 = vmatprep.mubr.msk.bf16.mxu0 %vm3605_vm0, %v3604_v0  ;;  %3387 = vmatprep.mubr.msk.bf16.mxu1 %vm3605_vm0, %v3604_v0 }
 0x1d4   :  { %v3013_v49 = vpop.f32.mrf.mxu0  ;;  %v3289_v50 = vpop.f32.mrf.mxu1 }
 0x1d5   :  { %2367 = vst [vmem:[%s5461_s3 + $0x1e0] sm:$0xff] %v1454_v47  ;;  %2505 = vst [vmem:[%s5461_s3 + $0x630] sm:$0xff] %v2006_v48  ;;  %v3583_v47 = vld [vmem:[%s5459_s0 + $0x1d8] sm:$0xff]   ;;  %v3584_v48 = vld [vmem:[%s5459_s0 + $0x400] sm:$0xff]  }
 0x1d6   :  { %v1456_v51 = vpop.f32.mrf.mxu0  ;;  %v2008_v52 = vpop.f32.mrf.mxu1 }
 0x1d7   :  { %v1457_v55 = vadd.f32 %v4522_v11, %v1456_v51  ;;  %v2009_v56 = vadd.f32 %v4522_v11, %v2008_v52 }
 0x1d8   :  { %v3014_v57 = vpop.f32.mrf.mxu0  ;;  %v3290_v58 = vpop.f32.mrf.mxu1 }
 0x1d9   :  { %2368 = vst [vmem:[%s5461_s3 + $0x1e8] sm:$0xff] %v1457_v55  ;;  %2506 = vst [vmem:[%s5461_s3 + $0x638] sm:$0xff] %v2009_v56 }
 0x1da   :  { %v1461_v60 = vpop.f32.mrf.mxu0  ;;  %3112 = vmatmul.mubr.bf16.gmra.mxu0 %v3575_v53  ;;  %v2013_v61 = vpop.f32.mrf.mxu1  ;;  %3388 = vmatmul.mubr.bf16.gmra.mxu1 %v3576_v54 }
 0x1db   :  { %v1462_v62 = vadd.f32 %v4522_v11, %v1461_v60  ;;  %v2014_v63 = vadd.f32 %v4522_v11, %v2013_v61  ;;  %3115 = vmatprep.mubr.msk.bf16.mxu0 %vm3605_vm0, %v3604_v0  ;;  %3391 = vmatprep.mubr.msk.bf16.mxu1 %vm3605_vm0, %v3604_v0 }
 0x1dc   :  { %v3017_v1 = vpop.f32.mrf.mxu0  ;;  %v3293_v2 = vpop.f32.mrf.mxu1 }
 0x1dd   :  { %2369 = vst [vmem:[%s5461_s3 + $0x1f0] sm:$0xff] %v1462_v62  ;;  %2507 = vst [vmem:[%s5461_s3 + $0x640] sm:$0xff] %v2014_v63  ;;  %v3585_v62 = vld [vmem:[%s5459_s0 + $0x1e0] sm:$0xff]   ;;  %v3586_v63 = vld [vmem:[%s5459_s0 + $0x408] sm:$0xff]  }
 0x1de   :  { %v1464_v3 = vpop.f32.mrf.mxu0  ;;  %v2016_v4 = vpop.f32.mrf.mxu1 }
 0x1df   :  { %v1465_v7 = vadd.f32 %v4522_v11, %v1464_v3  ;;  %v2017_v8 = vadd.f32 %v4522_v11, %v2016_v4 }
 0x1e0   :  { %v3018_v9 = vpop.f32.mrf.mxu0  ;;  %v3294_v10 = vpop.f32.mrf.mxu1 }
 0x1e1   :  { %2370 = vst [vmem:[%s5461_s3 + $0x1f8] sm:$0xff] %v1465_v7  ;;  %2508 = vst [vmem:[%s5461_s3 + $0x648] sm:$0xff] %v2017_v8 }
 0x1e2   :  { %v1469_v59 = vpop.f32.mrf.mxu0  ;;  %3116 = vmatmul.mubr.bf16.gmra.mxu0 %v3577_v5  ;;  %v2021_v12 = vpop.f32.mrf.mxu1  ;;  %3392 = vmatmul.mubr.bf16.gmra.mxu1 %v3578_v6 }
 0x1e3   :  { %v1470_v13 = vadd.f32 %v4522_v11, %v1469_v59  ;;  %v2022_v14 = vadd.f32 %v4522_v11, %v2021_v12  ;;  %3119 = vmatprep.mubr.msk.bf16.mxu0 %vm3605_vm0, %v3604_v0  ;;  %3395 = vmatprep.mubr.msk.bf16.mxu1 %vm3605_vm0, %v3604_v0 }
 0x1e4   :  { %v3021_v15 = vpop.f32.mrf.mxu0  ;;  %v3297_v16 = vpop.f32.mrf.mxu1 }
 0x1e5   :  { %2371 = vst [vmem:[%s5461_s3 + $0x200] sm:$0xff] %v1470_v13  ;;  %2509 = vst [vmem:[%s5461_s3 + $0x650] sm:$0xff] %v2022_v14  ;;  %v3587_v13 = vld [vmem:[%s5459_s0 + $0x1e8] sm:$0xff]   ;;  %v3588_v14 = vld [vmem:[%s5459_s0 + $0x410] sm:$0xff]  }
 0x1e6   :  { %v1472_v17 = vpop.f32.mrf.mxu0  ;;  %v2024_v18 = vpop.f32.mrf.mxu1 }
 0x1e7   :  { %v1473_v21 = vadd.f32 %v4522_v11, %v1472_v17  ;;  %v2025_v22 = vadd.f32 %v4522_v11, %v2024_v18 }
 0x1e8   :  { %v3022_v23 = vpop.f32.mrf.mxu0  ;;  %v3298_v24 = vpop.f32.mrf.mxu1 }
 0x1e9   :  { %2372 = vst [vmem:[%s5461_s3 + $0x208] sm:$0xff] %v1473_v21  ;;  %2510 = vst [vmem:[%s5461_s3 + $0x658] sm:$0xff] %v2025_v22 }
 0x1ea   :  { %v1477_v25 = vpop.f32.mrf.mxu0  ;;  %3120 = vmatmul.mubr.bf16.gmra.mxu0 %v3579_v19  ;;  %v2029_v26 = vpop.f32.mrf.mxu1  ;;  %3396 = vmatmul.mubr.bf16.gmra.mxu1 %v3580_v20 }
 0x1eb   :  { %v1478_v27 = vadd.f32 %v4522_v11, %v1477_v25  ;;  %v2030_v28 = vadd.f32 %v4522_v11, %v2029_v26  ;;  %3123 = vmatprep.mubr.msk.bf16.mxu0 %vm3605_vm0, %v3604_v0  ;;  %3399 = vmatprep.mubr.msk.bf16.mxu1 %vm3605_vm0, %v3604_v0 }
 0x1ec   :  { %v3025_v29 = vpop.f32.mrf.mxu0  ;;  %v3301_v30 = vpop.f32.mrf.mxu1 }
 0x1ed   :  { %2373 = vst [vmem:[%s5461_s3 + $0x210] sm:$0xff] %v1478_v27  ;;  %2511 = vst [vmem:[%s5461_s3 + $0x660] sm:$0xff] %v2030_v28  ;;  %v3589_v27 = vld [vmem:[%s5459_s0 + $0x1f0] sm:$0xff]   ;;  %v3590_v28 = vld [vmem:[%s5459_s0 + $0x418] sm:$0xff]  }
 0x1ee   :  { %v1480_v31 = vpop.f32.mrf.mxu0  ;;  %v2032_v32 = vpop.f32.mrf.mxu1 }
 0x1ef   :  { %v1481_v35 = vadd.f32 %v4522_v11, %v1480_v31  ;;  %v2033_v36 = vadd.f32 %v4522_v11, %v2032_v32 }
 0x1f0   :  { %v3026_v37 = vpop.f32.mrf.mxu0  ;;  %v3302_v38 = vpop.f32.mrf.mxu1 }
 0x1f1   :  { %2374 = vst [vmem:[%s5461_s3 + $0x218] sm:$0xff] %v1481_v35  ;;  %2512 = vst [vmem:[%s5461_s3 + $0x668] sm:$0xff] %v2033_v36 }
 0x1f2   :  { %v1485_v39 = vpop.f32.mrf.mxu0  ;;  %3124 = vmatmul.mubr.bf16.gmra.mxu0 %v3581_v33  ;;  %v2037_v40 = vpop.f32.mrf.mxu1  ;;  %3400 = vmatmul.mubr.bf16.gmra.mxu1 %v3582_v34 }
 0x1f3   :  { %v1486_v41 = vadd.f32 %v4522_v11, %v1485_v39  ;;  %v2038_v42 = vadd.f32 %v4522_v11, %v2037_v40  ;;  %3127 = vmatprep.mubr.msk.bf16.mxu0 %vm3605_vm0, %v3604_v0  ;;  %3403 = vmatprep.mubr.msk.bf16.mxu1 %vm3605_vm0, %v3604_v0 }
 0x1f4   :  { %v3029_v43 = vpop.f32.mrf.mxu0  ;;  %v3305_v44 = vpop.f32.mrf.mxu1 }
 0x1f5   :  { %2375 = vst [vmem:[%s5461_s3 + $0x220] sm:$0xff] %v1486_v41  ;;  %2513 = vst [vmem:[%s5461_s3 + $0x670] sm:$0xff] %v2038_v42  ;;  %v3591_v41 = vld [vmem:[%s5459_s0 + $0x1f8] sm:$0xff]   ;;  %v3592_v42 = vld [vmem:[%s5459_s0 + $0x420] sm:$0xff]  }
 0x1f6   :  { %v1488_v45 = vpop.f32.mrf.mxu0  ;;  %v2040_v46 = vpop.f32.mrf.mxu1 }
 0x1f7   :  { %v1489_v49 = vadd.f32 %v4522_v11, %v1488_v45  ;;  %v2041_v50 = vadd.f32 %v4522_v11, %v2040_v46 }
 0x1f8   :  { %v3030_v51 = vpop.f32.mrf.mxu0  ;;  %v3306_v52 = vpop.f32.mrf.mxu1 }
 0x1f9   :  { %2376 = vst [vmem:[%s5461_s3 + $0x228] sm:$0xff] %v1489_v49  ;;  %2514 = vst [vmem:[%s5461_s3 + $0x678] sm:$0xff] %v2041_v50 }
 0x1fa   :  { %v1493_v53 = vpop.f32.mrf.mxu0  ;;  %3128 = vmatmul.mubr.bf16.gmra.mxu0 %v3583_v47  ;;  %v2045_v54 = vpop.f32.mrf.mxu1  ;;  %3404 = vmatmul.mubr.bf16.gmra.mxu1 %v3584_v48 }
 0x1fb   :  { %v1494_v55 = vadd.f32 %v4522_v11, %v1493_v53  ;;  %v2046_v56 = vadd.f32 %v4522_v11, %v2045_v54  ;;  %3131 = vmatprep.mubr.msk.bf16.mxu0 %vm3605_vm0, %v3604_v0  ;;  %3407 = vmatprep.mubr.msk.bf16.mxu1 %vm3605_vm0, %v3604_v0 }
 0x1fc   :  { %v3033_v57 = vpop.f32.mrf.mxu0  ;;  %v3309_v58 = vpop.f32.mrf.mxu1 }
 0x1fd   :  { %2377 = vst [vmem:[%s5461_s3 + $0x230] sm:$0xff] %v1494_v55  ;;  %2515 = vst [vmem:[%s5461_s3 + $0x680] sm:$0xff] %v2046_v56  ;;  %v3593_v55 = vld [vmem:[%s5459_s0 + $0x200] sm:$0xff]   ;;  %v3594_v56 = vld [vmem:[%s5459_s0 + $0x428] sm:$0xff]  }
 0x1fe   :  { %v1496_v60 = vpop.f32.mrf.mxu0  ;;  %v2048_v61 = vpop.f32.mrf.mxu1 }
 0x1ff   :  { %v1497_v1 = vadd.f32 %v4522_v11, %v1496_v60  ;;  %v2049_v2 = vadd.f32 %v4522_v11, %v2048_v61 }
 0x200   :  { %v3034_v3 = vpop.f32.mrf.mxu0  ;;  %v3310_v4 = vpop.f32.mrf.mxu1 }
 0x201   :  { %2378 = vst [vmem:[%s5461_s3 + $0x238] sm:$0xff] %v1497_v1  ;;  %2516 = vst [vmem:[%s5461_s3 + $0x688] sm:$0xff] %v2049_v2 }
 0x202   :  { %v1501_v5 = vpop.f32.mrf.mxu0  ;;  %3132 = vmatmul.mubr.bf16.gmra.mxu0 %v3585_v62  ;;  %v2053_v6 = vpop.f32.mrf.mxu1  ;;  %3408 = vmatmul.mubr.bf16.gmra.mxu1 %v3586_v63 }
 0x203   :  { %v1502_v7 = vadd.f32 %v4522_v11, %v1501_v5  ;;  %v2054_v8 = vadd.f32 %v4522_v11, %v2053_v6  ;;  %3135 = vmatprep.mubr.msk.bf16.mxu0 %vm3605_vm0, %v3604_v0  ;;  %3411 = vmatprep.mubr.msk.bf16.mxu1 %vm3605_vm0, %v3604_v0 }
 0x204   :  { %v3037_v9 = vpop.f32.mrf.mxu0  ;;  %v3313_v10 = vpop.f32.mrf.mxu1 }
 0x205   :  { %2379 = vst [vmem:[%s5461_s3 + $0x240] sm:$0xff] %v1502_v7  ;;  %2517 = vst [vmem:[%s5461_s3 + $0x690] sm:$0xff] %v2054_v8  ;;  %v3595_v7 = vld [vmem:[%s5459_s0 + $0x208] sm:$0xff]   ;;  %v3596_v8 = vld [vmem:[%s5459_s0 + $0x430] sm:$0xff]  }
 0x206   :  { %v1504_v59 = vpop.f32.mrf.mxu0  ;;  %v2056_v12 = vpop.f32.mrf.mxu1 }
 0x207   :  { %v1505_v15 = vadd.f32 %v4522_v11, %v1504_v59  ;;  %v2057_v16 = vadd.f32 %v4522_v11, %v2056_v12 }
 0x208   :  { %v3038_v17 = vpop.f32.mrf.mxu0  ;;  %v3314_v18 = vpop.f32.mrf.mxu1 }
 0x209   :  { %2380 = vst [vmem:[%s5461_s3 + $0x248] sm:$0xff] %v1505_v15  ;;  %2518 = vst [vmem:[%s5461_s3 + $0x698] sm:$0xff] %v2057_v16 }
 0x20a   :  { %v1509_v19 = vpop.f32.mrf.mxu0  ;;  %3136 = vmatmul.mubr.bf16.gmra.mxu0 %v3587_v13  ;;  %v2061_v20 = vpop.f32.mrf.mxu1  ;;  %3412 = vmatmul.mubr.bf16.gmra.mxu1 %v3588_v14 }
 0x20b   :  { %v1510_v21 = vadd.f32 %v4522_v11, %v1509_v19  ;;  %v2062_v22 = vadd.f32 %v4522_v11, %v2061_v20  ;;  %3139 = vmatprep.mubr.msk.bf16.mxu0 %vm3605_vm0, %v3604_v0  ;;  %3415 = vmatprep.mubr.msk.bf16.mxu1 %vm3605_vm0, %v3604_v0 }
 0x20c   :  { %v3041_v23 = vpop.f32.mrf.mxu0  ;;  %v3317_v24 = vpop.f32.mrf.mxu1 }
 0x20d   :  { %2381 = vst [vmem:[%s5461_s3 + $0x250] sm:$0xff] %v1510_v21  ;;  %2519 = vst [vmem:[%s5461_s3 + $0x6a0] sm:$0xff] %v2062_v22  ;;  %v3597_v21 = vld [vmem:[%s5459_s0 + $0x210] sm:$0xff]   ;;  %v3598_v22 = vld [vmem:[%s5459_s0 + $0x438] sm:$0xff]  }
 0x20e   :  { %v1512_v25 = vpop.f32.mrf.mxu0  ;;  %v2064_v26 = vpop.f32.mrf.mxu1 }
 0x20f   :  { %v1513_v29 = vadd.f32 %v4522_v11, %v1512_v25  ;;  %v2065_v30 = vadd.f32 %v4522_v11, %v2064_v26 }
 0x210   :  { %v3042_v31 = vpop.f32.mrf.mxu0  ;;  %v3318_v32 = vpop.f32.mrf.mxu1 }
 0x211   :  { %2382 = vst [vmem:[%s5461_s3 + $0x258] sm:$0xff] %v1513_v29  ;;  %2520 = vst [vmem:[%s5461_s3 + $0x6a8] sm:$0xff] %v2065_v30 }
 0x212   :  { %v1517_v33 = vpop.f32.mrf.mxu0  ;;  %3140 = vmatmul.mubr.bf16.gmra.mxu0 %v3589_v27  ;;  %v2069_v34 = vpop.f32.mrf.mxu1  ;;  %3416 = vmatmul.mubr.bf16.gmra.mxu1 %v3590_v28 }
 0x213   :  { %v1518_v35 = vadd.f32 %v4522_v11, %v1517_v33  ;;  %v2070_v36 = vadd.f32 %v4522_v11, %v2069_v34  ;;  %3143 = vmatprep.mubr.msk.bf16.mxu0 %vm3605_vm0, %v3604_v0  ;;  %3419 = vmatprep.mubr.msk.bf16.mxu1 %vm3605_vm0, %v3604_v0 }
 0x214   :  { %v3045_v37 = vpop.f32.mrf.mxu0  ;;  %v3321_v38 = vpop.f32.mrf.mxu1 }
 0x215   :  { %2383 = vst [vmem:[%s5461_s3 + $0x260] sm:$0xff] %v1518_v35  ;;  %2521 = vst [vmem:[%s5461_s3 + $0x6b0] sm:$0xff] %v2070_v36  ;;  %v3599_v35 = vld [vmem:[%s5459_s0 + $0x218] sm:$0xff]   ;;  %v3600_v36 = vld [vmem:[%s5459_s0 + $0x440] ss:$0 sps:$4 sm:$0x11]  }
 0x216   :  { %v1520_v39 = vpop.f32.mrf.mxu0  ;;  %v2072_v40 = vpop.f32.mrf.mxu1 }
 0x217   :  { %v1521_v43 = vadd.f32 %v4522_v11, %v1520_v39  ;;  %v2073_v44 = vadd.f32 %v4522_v11, %v2072_v40 }
 0x218   :  { %v3046_v45 = vpop.f32.mrf.mxu0  ;;  %v3322_v46 = vpop.f32.mrf.mxu1 }
 0x219   :  { %2384 = vst [vmem:[%s5461_s3 + $0x268] sm:$0xff] %v1521_v43  ;;  %2522 = vst [vmem:[%s5461_s3 + $0x6b8] sm:$0xff] %v2073_v44 }
 0x21a   :  { %v1525_v47 = vpop.f32.mrf.mxu0  ;;  %3144 = vmatmul.mubr.bf16.gmra.mxu0 %v3591_v41  ;;  %v2077_v48 = vpop.f32.mrf.mxu1  ;;  %3420 = vmatmul.mubr.bf16.gmra.mxu1 %v3592_v42 }
 0x21b   :  { %v1526_v49 = vadd.f32 %v4522_v11, %v1525_v47  ;;  %v2078_v50 = vadd.f32 %v4522_v11, %v2077_v48  ;;  %3147 = vmatprep.mubr.msk.bf16.mxu0 %vm3605_vm0, %v3604_v0  ;;  %3423 = vmatprep.mubr.msk.bf16.mxu1 %vm3605_vm0, %v3604_v0 }
 0x21c   :  { %v3049_v51 = vpop.f32.mrf.mxu0  ;;  %v3325_v52 = vpop.f32.mrf.mxu1 }
 0x21d   :  { %2385 = vst [vmem:[%s5461_s3 + $0x270] sm:$0xff] %v1526_v49  ;;  %2523 = vst [vmem:[%s5461_s3 + $0x6c0] sm:$0xff] %v2078_v50  ;;  %v3601_v49 = vld [vmem:[%s5459_s0 + $0x220] sm:$0xff]  }
 0x21e   :  { %v1528_v53 = vpop.f32.mrf.mxu0  ;;  %v2080_v54 = vpop.f32.mrf.mxu1 }
 0x21f   :  { %v1529_v57 = vadd.f32 %v4522_v11, %v1528_v53  ;;  %v2081_v58 = vadd.f32 %v4522_v11, %v2080_v54 }
 0x220   :  { %v3050_v60 = vpop.f32.mrf.mxu0  ;;  %v3326_v61 = vpop.f32.mrf.mxu1 }
 0x221   :  { %2386 = vst [vmem:[%s5461_s3 + $0x278] sm:$0xff] %v1529_v57  ;;  %2524 = vst [vmem:[%s5461_s3 + $0x6c8] sm:$0xff] %v2081_v58 }
 0x222   :  { %v1533_v62 = vpop.f32.mrf.mxu0  ;;  %3148 = vmatmul.mubr.bf16.gmra.mxu0 %v3593_v55  ;;  %v2085_v63 = vpop.f32.mrf.mxu1  ;;  %3424 = vmatmul.mubr.bf16.gmra.mxu1 %v3594_v56 }
 0x223   :  { %v1534_v1 = vadd.f32 %v4522_v11, %v1533_v62  ;;  %v2086_v2 = vadd.f32 %v4522_v11, %v2085_v63  ;;  %3151 = vmatprep.mubr.msk.bf16.mxu0 %vm3605_vm0, %v3604_v0  ;;  %3427 = vmatprep.mubr.msk.bf16.mxu1 %vm3605_vm0, %v3604_v0 }
 0x224   :  { %v3053_v3 = vpop.f32.mrf.mxu0  ;;  %v3329_v4 = vpop.f32.mrf.mxu1 }
 0x225   :  { %2387 = vst [vmem:[%s5461_s3 + $0x280] sm:$0xff] %v1534_v1  ;;  %2525 = vst [vmem:[%s5461_s3 + $0x6d0] sm:$0xff] %v2086_v2 }
 0x226   :  { %v1536_v5 = vpop.f32.mrf.mxu0  ;;  %v2088_v6 = vpop.f32.mrf.mxu1 }
 0x227   :  { %v1537_v9 = vadd.f32 %v4522_v11, %v1536_v5  ;;  %v2089_v10 = vadd.f32 %v4522_v11, %v2088_v6 }
 0x228   :  { %v3054_v59 = vpop.f32.mrf.mxu0  ;;  %v3330_v12 = vpop.f32.mrf.mxu1 }
 0x229   :  { %2388 = vst [vmem:[%s5461_s3 + $0x288] sm:$0xff] %v1537_v9  ;;  %2526 = vst [vmem:[%s5461_s3 + $0x6d8] sm:$0xff] %v2089_v10 }
 0x22a   :  { %v1541_v13 = vpop.f32.mrf.mxu0  ;;  %3152 = vmatmul.mubr.bf16.gmra.mxu0 %v3595_v7  ;;  %v2093_v14 = vpop.f32.mrf.mxu1  ;;  %3428 = vmatmul.mubr.bf16.gmra.mxu1 %v3596_v8 }
 0x22b   :  { %v1542_v15 = vadd.f32 %v4522_v11, %v1541_v13  ;;  %v2094_v16 = vadd.f32 %v4522_v11, %v2093_v14  ;;  %3155 = vmatprep.mubr.msk.bf16.mxu0 %vm3605_vm0, %v3604_v0  ;;  %3431 = vmatprep.mubr.msk.bf16.mxu1 %vm3605_vm0, %v3604_v0 }
 0x22c   :  { %v3057_v17 = vpop.f32.mrf.mxu0  ;;  %v3333_v18 = vpop.f32.mrf.mxu1 }
 0x22d   :  { %2389 = vst [vmem:[%s5461_s3 + $0x290] sm:$0xff] %v1542_v15  ;;  %2527 = vst [vmem:[%s5461_s3 + $0x6e0] sm:$0xff] %v2094_v16 }
 0x22e   :  { %v1544_v19 = vpop.f32.mrf.mxu0  ;;  %v2096_v20 = vpop.f32.mrf.mxu1 }
 0x22f   :  { %v1545_v23 = vadd.f32 %v4522_v11, %v1544_v19  ;;  %v2097_v24 = vadd.f32 %v4522_v11, %v2096_v20 }
 0x230   :  { %v3058_v25 = vpop.f32.mrf.mxu0  ;;  %v3334_v26 = vpop.f32.mrf.mxu1 }
 0x231   :  { %2390 = vst [vmem:[%s5461_s3 + $0x298] sm:$0xff] %v1545_v23  ;;  %2528 = vst [vmem:[%s5461_s3 + $0x6e8] sm:$0xff] %v2097_v24 }
 0x232   :  { %v1549_v27 = vpop.f32.mrf.mxu0  ;;  %3156 = vmatmul.mubr.bf16.gmra.mxu0 %v3597_v21  ;;  %v2101_v28 = vpop.f32.mrf.mxu1  ;;  %3432 = vmatmul.mubr.bf16.gmra.mxu1 %v3598_v22 }
 0x233   :  { %v1550_v29 = vadd.f32 %v4522_v11, %v1549_v27  ;;  %v2102_v30 = vadd.f32 %v4522_v11, %v2101_v28  ;;  %3159 = vmatprep.mubr.msk.bf16.mxu0 %vm3605_vm0, %v3604_v0  ;;  %3435 = vmatprep.mubr.msk.bf16.mxu1 %vm3605_vm0, %v3604_v0 }
 0x234   :  { %v3061_v31 = vpop.f32.mrf.mxu0  ;;  %v3337_v32 = vpop.f32.mrf.mxu1 }
 0x235   :  { %2391 = vst [vmem:[%s5461_s3 + $0x2a0] sm:$0xff] %v1550_v29  ;;  %2529 = vst [vmem:[%s5461_s3 + $0x6f0] sm:$0xff] %v2102_v30 }
 0x236   :  { %v1552_v33 = vpop.f32.mrf.mxu0  ;;  %v2104_v34 = vpop.f32.mrf.mxu1 }
 0x237   :  { %v1553_v37 = vadd.f32 %v4522_v11, %v1552_v33  ;;  %v2105_v38 = vadd.f32 %v4522_v11, %v2104_v34 }
 0x238   :  { %v3062_v39 = vpop.f32.mrf.mxu0  ;;  %v3338_v40 = vpop.f32.mrf.mxu1 }
 0x239   :  { %2392 = vst [vmem:[%s5461_s3 + $0x2a8] sm:$0xff] %v1553_v37  ;;  %2530 = vst [vmem:[%s5461_s3 + $0x6f8] sm:$0xff] %v2105_v38 }
 0x23a   :  { %v1557_v41 = vpop.f32.mrf.mxu0  ;;  %3160 = vmatmul.mubr.bf16.gmra.mxu0 %v3599_v35  ;;  %v2109_v42 = vpop.f32.mrf.mxu1  ;;  %3436 = vmatmul.mubr.bf16.gmra.mxu1 %v3600_v36  ;;  %v5124_v35 = vld [vmem:[%s5460_s2] ss:$0 sm:$0xff] }
 0x23b   :  { %v1558_v43 = vadd.f32 %v4522_v11, %v1557_v41  ;;  %v2110_v44 = vadd.f32 %v4522_v11, %v2109_v42  ;;  %3163 = vmatprep.mubr.msk.bf16.mxu0 %vm3605_vm0, %v3604_v0 }
 0x23c   :  { %v3065_v45 = vpop.f32.mrf.mxu0  ;;  %v3341_v46 = vpop.f32.mrf.mxu1 }
 0x23d   :  { %2393 = vst [vmem:[%s5461_s3 + $0x2b0] sm:$0xff] %v1558_v43  ;;  %2531 = vst [vmem:[%s5461_s3 + $0x700] sm:$0xff] %v2110_v44 }
 0x23e   :  { %v1560_v47 = vpop.f32.mrf.mxu0  ;;  %v2112_v48 = vpop.f32.mrf.mxu1 }
 0x23f   :  { %v1561_v50 = vadd.f32 %v4522_v11, %v1560_v47  ;;  %v2113_v0 = vadd.f32 %v4522_v11, %v2112_v48 }
 0x240   :  { %v3066_v51 = vpop.f32.mrf.mxu0  ;;  %v3342_v52 = vpop.f32.mrf.mxu1 }
 0x241   :  { %2394 = vst [vmem:[%s5461_s3 + $0x2b8] sm:$0xff] %v1561_v50  ;;  %2532 = vst [vmem:[%s5461_s3 + $0x708] sm:$0xff] %v2113_v0 }
 0x242   :  { %v1565_v53 = vpop.f32.mrf.mxu0  ;;  %3164 = vmatmul.mubr.bf16.gmra.mxu0 %v3601_v49  ;;  %v2117_v54 = vpop.f32.mrf.mxu1 }
 0x243   :  { %v1566_v55 = vadd.f32 %v4522_v11, %v1565_v53  ;;  %v2118_v56 = vadd.f32 %v4522_v11, %v2117_v54 }
 0x244   :  { %v3069_v57 = vpop.f32.mrf.mxu0  ;;  %v3345_v58 = vpop.f32.mrf.mxu1 }
 0x245   :  { %2395 = vst [vmem:[%s5461_s3 + $0x2c0] sm:$0xff] %v1566_v55  ;;  %2533 = vst [vmem:[%s5461_s3 + $0x710] sm:$0xff] %v2118_v56 }
 0x246   :  { %v1568_v60 = vpop.f32.mrf.mxu0  ;;  %v2120_v61 = vpop.f32.mrf.mxu1 }
 0x247   :  { %v1569_v62 = vadd.f32 %v4522_v11, %v1568_v60  ;;  %v2121_v63 = vadd.f32 %v4522_v11, %v2120_v61 }
 0x248   :  { %v3070_v1 = vpop.f32.mrf.mxu0  ;;  %v3346_v2 = vpop.f32.mrf.mxu1 }
 0x249   :  { %2396 = vst [vmem:[%s5461_s3 + $0x2c8] sm:$0xff] %v1569_v62  ;;  %2534 = vst [vmem:[%s5461_s3 + $0x718] sm:$0xff] %v2121_v63 }
 0x24a   :  { %v1573_v3 = vpop.f32.mrf.mxu0  ;;  %v2125_v4 = vpop.f32.mrf.mxu1 }
 0x24b   :  { %v1574_v5 = vadd.f32 %v4522_v11, %v1573_v3  ;;  %v2126_v6 = vadd.f32 %v4522_v11, %v2125_v4 }
 0x24c   :  { %v3073_v7 = vpop.f32.mrf.mxu0  ;;  %v3349_v8 = vpop.f32.mrf.mxu1 }
 0x24d   :  { %2397 = vst [vmem:[%s5461_s3 + $0x2d0] sm:$0xff] %v1574_v5  ;;  %2535 = vst [vmem:[%s5461_s3 + $0x720] sm:$0xff] %v2126_v6 }
 0x24e   :  { %v1576_v9 = vpop.f32.mrf.mxu0  ;;  %v2128_v10 = vpop.f32.mrf.mxu1 }
 0x24f   :  { %v1577_v59 = vadd.f32 %v4522_v11, %v1576_v9  ;;  %v2129_v12 = vadd.f32 %v4522_v11, %v2128_v10 }
 0x250   :  { %v3074_v13 = vpop.f32.mrf.mxu0  ;;  %v3350_v14 = vpop.f32.mrf.mxu1 }
 0x251   :  { %2398 = vst [vmem:[%s5461_s3 + $0x2d8] sm:$0xff] %v1577_v59  ;;  %2536 = vst [vmem:[%s5461_s3 + $0x728] sm:$0xff] %v2129_v12 }
 0x252   :  { %v1581_v15 = vpop.f32.mrf.mxu0  ;;  %v2133_v16 = vpop.f32.mrf.mxu1 }
 0x253   :  { %v1582_v17 = vadd.f32 %v4522_v11, %v1581_v15  ;;  %v2134_v18 = vadd.f32 %v4522_v11, %v2133_v16 }
 0x254   :  { %v3077_v19 = vpop.f32.mrf.mxu0  ;;  %v3353_v20 = vpop.f32.mrf.mxu1 }
 0x255   :  { %2399 = vst [vmem:[%s5461_s3 + $0x2e0] sm:$0xff] %v1582_v17  ;;  %2537 = vst [vmem:[%s5461_s3 + $0x730] sm:$0xff] %v2134_v18 }
 0x256   :  { %v1584_v21 = vpop.f32.mrf.mxu0  ;;  %v2136_v22 = vpop.f32.mrf.mxu1 }
 0x257   :  { %v1585_v23 = vadd.f32 %v4522_v11, %v1584_v21  ;;  %v2137_v24 = vadd.f32 %v4522_v11, %v2136_v22 }
 0x258   :  { %v3078_v25 = vpop.f32.mrf.mxu0  ;;  %v3354_v26 = vpop.f32.mrf.mxu1 }
 0x259   :  { %2400 = vst [vmem:[%s5461_s3 + $0x2e8] sm:$0xff] %v1585_v23  ;;  %2538 = vst [vmem:[%s5461_s3 + $0x738] sm:$0xff] %v2137_v24 }
 0x25a   :  { %v1589_v27 = vpop.f32.mrf.mxu0  ;;  %v2141_v28 = vpop.f32.mrf.mxu1 }
 0x25b   :  { %v1590_v29 = vadd.f32 %v4522_v11, %v1589_v27  ;;  %v2142_v30 = vadd.f32 %v4522_v11, %v2141_v28 }
 0x25c   :  { %v3081_v31 = vpop.f32.mrf.mxu0  ;;  %v3357_v32 = vpop.f32.mrf.mxu1 }
 0x25d   :  { %2401 = vst [vmem:[%s5461_s3 + $0x2f0] sm:$0xff] %v1590_v29  ;;  %2539 = vst [vmem:[%s5461_s3 + $0x740] sm:$0xff] %v2142_v30 }
 0x25e   :  { %v1592_v33 = vpop.f32.mrf.mxu0  ;;  %v2144_v34 = vpop.f32.mrf.mxu1 }
 0x25f   :  { %v1593_v36 = vadd.f32 %v5124_v35, %v1592_v33  ;;  %v2145_v11 = vadd.f32 %v5124_v35, %v2144_v34 }
 0x260   :  { %v3082_v37 = vpop.f32.mrf.mxu0  ;;  %v3358_v38 = vpop.f32.mrf.mxu1 }
 0x261   :  { %2402 = vst [vmem:[%s5461_s3 + $0x2f8] sm:$0xff] %v1593_v36  ;;  %2540 = vst [vmem:[%s5461_s3 + $0x748] sm:$0xff] %v2145_v11 }
 0x262   :  { %v1597_v39 = vpop.f32.mrf.mxu0  ;;  %v2149_v40 = vpop.f32.mrf.mxu1 }
 0x263   :  { %v1598_v41 = vadd.f32 %v5124_v35, %v1597_v39  ;;  %v2150_v42 = vadd.f32 %v5124_v35, %v2149_v40 }
 0x264   :  { %v3085_v43 = vpop.f32.mrf.mxu0  ;;  %v3361_v44 = vpop.f32.mrf.mxu1 }
 0x265   :  { %2403 = vst [vmem:[%s5461_s3 + $0x300] sm:$0xff] %v1598_v41  ;;  %2541 = vst [vmem:[%s5461_s3 + $0x750] sm:$0xff] %v2150_v42 }
 0x266   :  { %v1600_v45 = vpop.f32.mrf.mxu0  ;;  %v2152_v46 = vpop.f32.mrf.mxu1 }
 0x267   :  { %v1601_v47 = vadd.f32 %v5124_v35, %v1600_v45  ;;  %v2153_v48 = vadd.f32 %v5124_v35, %v2152_v46 }
 0x268   :  { %v3086_v49 = vpop.f32.mrf.mxu0  ;;  %v3362_v50 = vpop.f32.mrf.mxu1 }
 0x269   :  { %2404 = vst [vmem:[%s5461_s3 + $0x308] sm:$0xff] %v1601_v47  ;;  %2542 = vst [vmem:[%s5461_s3 + $0x758] sm:$0xff] %v2153_v48 }
 0x26a   :  { %v1605_v0 = vpop.f32.mrf.mxu0  ;;  %v2157_v51 = vpop.f32.mrf.mxu1 }
 0x26b   :  { %v1606_v52 = vadd.f32 %v5124_v35, %v1605_v0  ;;  %v2158_v53 = vadd.f32 %v5124_v35, %v2157_v51 }
 0x26c   :  { %v3089_v54 = vpop.f32.mrf.mxu0  ;;  %v3365_v55 = vpop.f32.mrf.mxu1 }
 0x26d   :  { %2405 = vst [vmem:[%s5461_s3 + $0x310] sm:$0xff] %v1606_v52  ;;  %2543 = vst [vmem:[%s5461_s3 + $0x760] sm:$0xff] %v2158_v53 }
 0x26e   :  { %v1608_v56 = vpop.f32.mrf.mxu0  ;;  %v2160_v57 = vpop.f32.mrf.mxu1 }
 0x26f   :  { %v1609_v58 = vadd.f32 %v5124_v35, %v1608_v56  ;;  %v2161_v60 = vadd.f32 %v5124_v35, %v2160_v57 }
 0x270   :  { %v3090_v61 = vpop.f32.mrf.mxu0  ;;  %v3366_v62 = vpop.f32.mrf.mxu1 }
 0x271   :  { %2406 = vst [vmem:[%s5461_s3 + $0x318] sm:$0xff] %v1609_v58  ;;  %2544 = vst [vmem:[%s5461_s3 + $0x768] sm:$0xff] %v2161_v60 }
 0x272   :  { %v1613_v63 = vpop.f32.mrf.mxu0  ;;  %v2165_v1 = vpop.f32.mrf.mxu1 }
 0x273   :  { %v1614_v2 = vadd.f32 %v5124_v35, %v1613_v63  ;;  %v2166_v3 = vadd.f32 %v5124_v35, %v2165_v1 }
 0x274   :  { %v3093_v4 = vpop.f32.mrf.mxu0  ;;  %v3369_v5 = vpop.f32.mrf.mxu1 }
 0x275   :  { %2407 = vst [vmem:[%s5461_s3 + $0x320] sm:$0xff] %v1614_v2  ;;  %2545 = vst [vmem:[%s5461_s3 + $0x770] sm:$0xff] %v2166_v3 }
 0x276   :  { %v1616_v6 = vpop.f32.mrf.mxu0  ;;  %v2168_v7 = vpop.f32.mrf.mxu1 }
 0x277   :  { %v1617_v8 = vadd.f32 %v5124_v35, %v1616_v6  ;;  %v2169_v9 = vadd.f32 %v5124_v35, %v2168_v7 }
 0x278   :  { %v3094_v10 = vpop.f32.mrf.mxu0  ;;  %v3370_v59 = vpop.f32.mrf.mxu1 }
 0x279   :  { %2408 = vst [vmem:[%s5461_s3 + $0x328] sm:$0xff] %v1617_v8  ;;  %2546 = vst [vmem:[%s5461_s3 + $0x778] sm:$0xff] %v2169_v9 }
 0x27a   :  { %v1621_v12 = vpop.f32.mrf.mxu0  ;;  %v2173_v13 = vpop.f32.mrf.mxu1 }
 0x27b   :  { %v1622_v14 = vadd.f32 %v5124_v35, %v1621_v12  ;;  %v2174_v15 = vadd.f32 %v5124_v35, %v2173_v13 }
 0x27c   :  { %v3097_v16 = vpop.f32.mrf.mxu0  ;;  %v3373_v17 = vpop.f32.mrf.mxu1 }
 0x27d   :  { %2409 = vst [vmem:[%s5461_s3 + $0x330] sm:$0xff] %v1622_v14  ;;  %2547 = vst [vmem:[%s5461_s3 + $0x780] sm:$0xff] %v2174_v15 }
 0x27e   :  { %v1624_v18 = vpop.f32.mrf.mxu0  ;;  %v2176_v19 = vpop.f32.mrf.mxu1 }
 0x27f   :  { %v1625_v20 = vadd.f32 %v5124_v35, %v1624_v18  ;;  %v2177_v21 = vadd.f32 %v5124_v35, %v2176_v19 }
 0x280   :  { %v3098_v22 = vpop.f32.mrf.mxu0  ;;  %v3374_v23 = vpop.f32.mrf.mxu1 }
 0x281   :  { %2410 = vst [vmem:[%s5461_s3 + $0x338] sm:$0xff] %v1625_v20  ;;  %2548 = vst [vmem:[%s5461_s3 + $0x788] sm:$0xff] %v2177_v21 }
 0x282   :  { %v1629_v24 = vpop.f32.mrf.mxu0  ;;  %v2181_v25 = vpop.f32.mrf.mxu1 }
 0x283   :  { %v1630_v26 = vadd.f32 %v5124_v35, %v1629_v24  ;;  %v2182_v27 = vadd.f32 %v5124_v35, %v2181_v25 }
 0x284   :  { %v3101_v28 = vpop.f32.mrf.mxu0  ;;  %v3377_v29 = vpop.f32.mrf.mxu1 }
 0x285   :  { %2411 = vst [vmem:[%s5461_s3 + $0x340] sm:$0xff] %v1630_v26  ;;  %2549 = vst [vmem:[%s5461_s3 + $0x790] sm:$0xff] %v2182_v27 }
 0x286   :  { %v1632_v30 = vpop.f32.mrf.mxu0  ;;  %v2184_v31 = vpop.f32.mrf.mxu1 }
 0x287   :  { %v1633_v32 = vadd.f32 %v5124_v35, %v1632_v30  ;;  %v2185_v33 = vadd.f32 %v5124_v35, %v2184_v31 }
 0x288   :  { %v3102_v34 = vpop.f32.mrf.mxu0  ;;  %v3378_v36 = vpop.f32.mrf.mxu1 }
 0x289   :  { %2412 = vst [vmem:[%s5461_s3 + $0x348] sm:$0xff] %v1633_v32  ;;  %2550 = vst [vmem:[%s5461_s3 + $0x798] sm:$0xff] %v2185_v33 }
 0x28a   :  { %v1637_v11 = vpop.f32.mrf.mxu0  ;;  %v2189_v37 = vpop.f32.mrf.mxu1 }
 0x28b   :  { %v1638_v38 = vadd.f32 %v5124_v35, %v1637_v11  ;;  %v2190_v39 = vadd.f32 %v5124_v35, %v2189_v37 }
 0x28c   :  { %v3105_v40 = vpop.f32.mrf.mxu0  ;;  %v3381_v41 = vpop.f32.mrf.mxu1 }
 0x28d   :  { %2413 = vst [vmem:[%s5461_s3 + $0x350] sm:$0xff] %v1638_v38  ;;  %2551 = vst [vmem:[%s5461_s3 + $0x7a0] sm:$0xff] %v2190_v39 }
 0x28e   :  { %v1640_v42 = vpop.f32.mrf.mxu0  ;;  %v2192_v43 = vpop.f32.mrf.mxu1 }
 0x28f   :  { %v1641_v44 = vadd.f32 %v5124_v35, %v1640_v42  ;;  %v2193_v45 = vadd.f32 %v5124_v35, %v2192_v43 }
 0x290   :  { %v3106_v46 = vpop.f32.mrf.mxu0  ;;  %v3382_v47 = vpop.f32.mrf.mxu1 }
 0x291   :  { %2414 = vst [vmem:[%s5461_s3 + $0x358] sm:$0xff] %v1641_v44  ;;  %2552 = vst [vmem:[%s5461_s3 + $0x7a8] sm:$0xff] %v2193_v45 }
 0x292   :  { %v1645_v48 = vpop.f32.mrf.mxu0  ;;  %v2197_v49 = vpop.f32.mrf.mxu1 }
 0x293   :  { %v1646_v50 = vadd.f32 %v5124_v35, %v1645_v48  ;;  %v2198_v0 = vadd.f32 %v5124_v35, %v2197_v49 }
 0x294   :  { %v3109_v51 = vpop.f32.mrf.mxu0  ;;  %v3385_v52 = vpop.f32.mrf.mxu1 }
 0x295   :  { %2415 = vst [vmem:[%s5461_s3 + $0x360] sm:$0xff] %v1646_v50  ;;  %2553 = vst [vmem:[%s5461_s3 + $0x7b0] sm:$0xff] %v2198_v0 }
 0x296   :  { %v1648_v53 = vpop.f32.mrf.mxu0  ;;  %v2200_v54 = vpop.f32.mrf.mxu1 }
 0x297   :  { %v1649_v55 = vadd.f32 %v5124_v35, %v1648_v53  ;;  %v2201_v56 = vadd.f32 %v5124_v35, %v2200_v54 }
 0x298   :  { %v3110_v57 = vpop.f32.mrf.mxu0  ;;  %v3386_v58 = vpop.f32.mrf.mxu1 }
 0x299   :  { %2416 = vst [vmem:[%s5461_s3 + $0x368] sm:$0xff] %v1649_v55  ;;  %2554 = vst [vmem:[%s5461_s3 + $0x7b8] sm:$0xff] %v2201_v56 }
 0x29a   :  { %v1653_v60 = vpop.f32.mrf.mxu0  ;;  %v2205_v61 = vpop.f32.mrf.mxu1 }
 0x29b   :  { %v1654_v62 = vadd.f32 %v5124_v35, %v1653_v60  ;;  %v2206_v63 = vadd.f32 %v5124_v35, %v2205_v61 }
 0x29c   :  { %v3113_v1 = vpop.f32.mrf.mxu0  ;;  %v3389_v2 = vpop.f32.mrf.mxu1 }
 0x29d   :  { %2417 = vst [vmem:[%s5461_s3 + $0x370] sm:$0xff] %v1654_v62  ;;  %2555 = vst [vmem:[%s5461_s3 + $0x7c0] sm:$0xff] %v2206_v63 }
 0x29e   :  { %v1656_v3 = vpop.f32.mrf.mxu0  ;;  %v2208_v4 = vpop.f32.mrf.mxu1 }
 0x29f   :  { %v1657_v5 = vadd.f32 %v5124_v35, %v1656_v3  ;;  %v2209_v6 = vadd.f32 %v5124_v35, %v2208_v4 }
 0x2a0   :  { %v3114_v7 = vpop.f32.mrf.mxu0  ;;  %v3390_v8 = vpop.f32.mrf.mxu1 }
 0x2a1   :  { %2418 = vst [vmem:[%s5461_s3 + $0x378] sm:$0xff] %v1657_v5  ;;  %2556 = vst [vmem:[%s5461_s3 + $0x7c8] sm:$0xff] %v2209_v6 }
 0x2a2   :  { %v1661_v9 = vpop.f32.mrf.mxu0  ;;  %v2213_v10 = vpop.f32.mrf.mxu1 }
 0x2a3   :  { %v1662_v59 = vadd.f32 %v5124_v35, %v1661_v9  ;;  %v2214_v12 = vadd.f32 %v5124_v35, %v2213_v10 }
 0x2a4   :  { %v3117_v13 = vpop.f32.mrf.mxu0  ;;  %v3393_v14 = vpop.f32.mrf.mxu1 }
 0x2a5   :  { %2419 = vst [vmem:[%s5461_s3 + $0x380] sm:$0xff] %v1662_v59  ;;  %2557 = vst [vmem:[%s5461_s3 + $0x7d0] sm:$0xff] %v2214_v12 }
 0x2a6   :  { %v1664_v15 = vpop.f32.mrf.mxu0  ;;  %v2216_v16 = vpop.f32.mrf.mxu1 }
 0x2a7   :  { %v1665_v17 = vadd.f32 %v5124_v35, %v1664_v15  ;;  %v2217_v18 = vadd.f32 %v5124_v35, %v2216_v16 }
 0x2a8   :  { %v3118_v19 = vpop.f32.mrf.mxu0  ;;  %v3394_v20 = vpop.f32.mrf.mxu1 }
 0x2a9   :  { %2420 = vst [vmem:[%s5461_s3 + $0x388] sm:$0xff] %v1665_v17  ;;  %2558 = vst [vmem:[%s5461_s3 + $0x7d8] sm:$0xff] %v2217_v18 }
 0x2aa   :  { %v1669_v21 = vpop.f32.mrf.mxu0  ;;  %v2221_v22 = vpop.f32.mrf.mxu1 }
 0x2ab   :  { %v1670_v23 = vadd.f32 %v5124_v35, %v1669_v21  ;;  %v2222_v24 = vadd.f32 %v5124_v35, %v2221_v22 }
 0x2ac   :  { %v3121_v25 = vpop.f32.mrf.mxu0  ;;  %v3397_v26 = vpop.f32.mrf.mxu1 }
 0x2ad   :  { %2421 = vst [vmem:[%s5461_s3 + $0x390] sm:$0xff] %v1670_v23  ;;  %2559 = vst [vmem:[%s5461_s3 + $0x7e0] sm:$0xff] %v2222_v24 }
 0x2ae   :  { %v1672_v27 = vpop.f32.mrf.mxu0  ;;  %v2224_v28 = vpop.f32.mrf.mxu1 }
 0x2af   :  { %v1673_v29 = vadd.f32 %v5124_v35, %v1672_v27  ;;  %v2225_v30 = vadd.f32 %v5124_v35, %v2224_v28 }
 0x2b0   :  { %v3122_v31 = vpop.f32.mrf.mxu0  ;;  %v3398_v32 = vpop.f32.mrf.mxu1 }
 0x2b1   :  { %2422 = vst [vmem:[%s5461_s3 + $0x398] sm:$0xff] %v1673_v29  ;;  %2560 = vst [vmem:[%s5461_s3 + $0x7e8] sm:$0xff] %v2225_v30 }
 0x2b2   :  { %v1677_v33 = vpop.f32.mrf.mxu0  ;;  %v2229_v34 = vpop.f32.mrf.mxu1 }
 0x2b3   :  { %v1678_v36 = vadd.f32 %v5124_v35, %v1677_v33  ;;  %v2230_v11 = vadd.f32 %v5124_v35, %v2229_v34 }
 0x2b4   :  { %v3125_v37 = vpop.f32.mrf.mxu0  ;;  %v3401_v38 = vpop.f32.mrf.mxu1 }
 0x2b5   :  { %2423 = vst [vmem:[%s5461_s3 + $0x3a0] sm:$0xff] %v1678_v36  ;;  %2561 = vst [vmem:[%s5461_s3 + $0x7f0] sm:$0xff] %v2230_v11 }
 0x2b6   :  { %v1680_v39 = vpop.f32.mrf.mxu0  ;;  %v2232_v40 = vpop.f32.mrf.mxu1 }
 0x2b7   :  { %v1681_v41 = vadd.f32 %v5124_v35, %v1680_v39  ;;  %v2233_v42 = vadd.f32 %v5124_v35, %v2232_v40 }
 0x2b8   :  { %v3126_v43 = vpop.f32.mrf.mxu0  ;;  %v3402_v44 = vpop.f32.mrf.mxu1 }
 0x2b9   :  { %2424 = vst [vmem:[%s5461_s3 + $0x3a8] sm:$0xff] %v1681_v41  ;;  %2562 = vst [vmem:[%s5461_s3 + $0x7f8] sm:$0xff] %v2233_v42 }
 0x2ba   :  { %v1685_v45 = vpop.f32.mrf.mxu0  ;;  %v2237_v46 = vpop.f32.mrf.mxu1 }
 0x2bb   :  { %v1686_v47 = vadd.f32 %v5124_v35, %v1685_v45  ;;  %v2238_v48 = vadd.f32 %v5124_v35, %v2237_v46 }
 0x2bc   :  { %v3129_v49 = vpop.f32.mrf.mxu0  ;;  %v3405_v50 = vpop.f32.mrf.mxu1 }
 0x2bd   :  { %2425 = vst [vmem:[%s5461_s3 + $0x3b0] sm:$0xff] %v1686_v47  ;;  %2563 = vst [vmem:[%s5461_s3 + $0x800] sm:$0xff] %v2238_v48 }
 0x2be   :  { %v1688_v0 = vpop.f32.mrf.mxu0  ;;  %v2240_v51 = vpop.f32.mrf.mxu1 }
 0x2bf   :  { %v1689_v52 = vadd.f32 %v5124_v35, %v1688_v0  ;;  %v2241_v53 = vadd.f32 %v5124_v35, %v2240_v51 }
 0x2c0   :  { %v3130_v54 = vpop.f32.mrf.mxu0  ;;  %v3406_v55 = vpop.f32.mrf.mxu1 }
 0x2c1   :  { %2426 = vst [vmem:[%s5461_s3 + $0x3b8] sm:$0xff] %v1689_v52  ;;  %2564 = vst [vmem:[%s5461_s3 + $0x808] sm:$0xff] %v2241_v53 }
 0x2c2   :  { %v1693_v56 = vpop.f32.mrf.mxu0  ;;  %v2245_v57 = vpop.f32.mrf.mxu1 }
 0x2c3   :  { %v1694_v58 = vadd.f32 %v5124_v35, %v1693_v56  ;;  %v2246_v60 = vadd.f32 %v5124_v35, %v2245_v57 }
 0x2c4   :  { %v3133_v61 = vpop.f32.mrf.mxu0  ;;  %v3409_v62 = vpop.f32.mrf.mxu1 }
 0x2c5   :  { %2427 = vst [vmem:[%s5461_s3 + $0x3c0] sm:$0xff] %v1694_v58  ;;  %2565 = vst [vmem:[%s5461_s3 + $0x810] sm:$0xff] %v2246_v60 }
 0x2c6   :  { %v1696_v63 = vpop.f32.mrf.mxu0  ;;  %v2248_v1 = vpop.f32.mrf.mxu1 }
 0x2c7   :  { %v1697_v2 = vadd.f32 %v5124_v35, %v1696_v63  ;;  %v2249_v3 = vadd.f32 %v5124_v35, %v2248_v1 }
 0x2c8   :  { %v3134_v4 = vpop.f32.mrf.mxu0  ;;  %v3410_v5 = vpop.f32.mrf.mxu1 }
 0x2c9   :  { %2428 = vst [vmem:[%s5461_s3 + $0x3c8] sm:$0xff] %v1697_v2  ;;  %2566 = vst [vmem:[%s5461_s3 + $0x818] sm:$0xff] %v2249_v3 }
 0x2ca   :  { %v1701_v6 = vpop.f32.mrf.mxu0  ;;  %v2253_v7 = vpop.f32.mrf.mxu1 }
 0x2cb   :  { %v1702_v8 = vadd.f32 %v5124_v35, %v1701_v6  ;;  %v2254_v9 = vadd.f32 %v5124_v35, %v2253_v7 }
 0x2cc   :  { %v3137_v10 = vpop.f32.mrf.mxu0  ;;  %v3413_v59 = vpop.f32.mrf.mxu1 }
 0x2cd   :  { %2429 = vst [vmem:[%s5461_s3 + $0x3d0] sm:$0xff] %v1702_v8  ;;  %2567 = vst [vmem:[%s5461_s3 + $0x820] sm:$0xff] %v2254_v9 }
 0x2ce   :  { %v1704_v12 = vpop.f32.mrf.mxu0  ;;  %v2256_v13 = vpop.f32.mrf.mxu1 }
 0x2cf   :  { %v1705_v14 = vadd.f32 %v5124_v35, %v1704_v12  ;;  %v2257_v15 = vadd.f32 %v5124_v35, %v2256_v13 }
 0x2d0   :  { %v3138_v16 = vpop.f32.mrf.mxu0  ;;  %v3414_v17 = vpop.f32.mrf.mxu1 }
 0x2d1   :  { %2430 = vst [vmem:[%s5461_s3 + $0x3d8] sm:$0xff] %v1705_v14  ;;  %2568 = vst [vmem:[%s5461_s3 + $0x828] sm:$0xff] %v2257_v15 }
 0x2d2   :  { %v1709_v18 = vpop.f32.mrf.mxu0  ;;  %v2261_v19 = vpop.f32.mrf.mxu1 }
 0x2d3   :  { %v1710_v20 = vadd.f32 %v5124_v35, %v1709_v18  ;;  %v2262_v21 = vadd.f32 %v5124_v35, %v2261_v19 }
 0x2d4   :  { %v3141_v22 = vpop.f32.mrf.mxu0  ;;  %v3417_v23 = vpop.f32.mrf.mxu1 }
 0x2d5   :  { %2431 = vst [vmem:[%s5461_s3 + $0x3e0] sm:$0xff] %v1710_v20  ;;  %2569 = vst [vmem:[%s5461_s3 + $0x830] sm:$0xff] %v2262_v21 }
 0x2d6   :  { %v1712_v24 = vpop.f32.mrf.mxu0  ;;  %v2264_v25 = vpop.f32.mrf.mxu1 }
 0x2d7   :  { %v1713_v26 = vadd.f32 %v5124_v35, %v1712_v24  ;;  %v2265_v27 = vadd.f32 %v5124_v35, %v2264_v25 }
 0x2d8   :  { %v3142_v28 = vpop.f32.mrf.mxu0  ;;  %v3418_v29 = vpop.f32.mrf.mxu1 }
 0x2d9   :  { %2432 = vst [vmem:[%s5461_s3 + $0x3e8] sm:$0xff] %v1713_v26  ;;  %2570 = vst [vmem:[%s5461_s3 + $0x838] sm:$0xff] %v2265_v27 }
 0x2da   :  { %v1717_v30 = vpop.f32.mrf.mxu0  ;;  %v2269_v31 = vpop.f32.mrf.mxu1 }
 0x2db   :  { %v1718_v32 = vadd.f32 %v5124_v35, %v1717_v30  ;;  %v2270_v33 = vadd.f32 %v5124_v35, %v2269_v31 }
 0x2dc   :  { %v3145_v34 = vpop.f32.mrf.mxu0  ;;  %v3421_v36 = vpop.f32.mrf.mxu1 }
 0x2dd   :  { %2433 = vst [vmem:[%s5461_s3 + $0x3f0] sm:$0xff] %v1718_v32  ;;  %2571 = vst [vmem:[%s5461_s3 + $0x840] sm:$0xff] %v2270_v33 }
 0x2de   :  { %v1720_v11 = vpop.f32.mrf.mxu0  ;;  %v2272_v37 = vpop.f32.mrf.mxu1 }
 0x2df   :  { %v1721_v38 = vadd.f32 %v5124_v35, %v1720_v11  ;;  %v2273_v39 = vadd.f32 %v5124_v35, %v2272_v37 }
 0x2e0   :  { %v3146_v40 = vpop.f32.mrf.mxu0  ;;  %v3422_v41 = vpop.f32.mrf.mxu1 }
 0x2e1   :  { %2434 = vst [vmem:[%s5461_s3 + $0x3f8] sm:$0xff] %v1721_v38  ;;  %2572 = vst [vmem:[%s5461_s3 + $0x848] sm:$0xff] %v2273_v39 }
 0x2e2   :  { %v1725_v42 = vpop.f32.mrf.mxu0  ;;  %v2277_v43 = vpop.f32.mrf.mxu1 }
 0x2e3   :  { %v1726_v44 = vadd.f32 %v5124_v35, %v1725_v42  ;;  %v2278_v45 = vadd.f32 %v5124_v35, %v2277_v43 }
 0x2e4   :  { %v3149_v46 = vpop.f32.mrf.mxu0  ;;  %v3425_v47 = vpop.f32.mrf.mxu1 }
 0x2e5   :  { %2435 = vst [vmem:[%s5461_s3 + $0x400] sm:$0xff] %v1726_v44  ;;  %2573 = vst [vmem:[%s5461_s3 + $0x850] sm:$0xff] %v2278_v45 }
 0x2e6   :  { %v1728_v48 = vpop.f32.mrf.mxu0  ;;  %v2280_v49 = vpop.f32.mrf.mxu1 }
 0x2e7   :  { %v1729_v50 = vadd.f32 %v5124_v35, %v1728_v48  ;;  %v2281_v0 = vadd.f32 %v5124_v35, %v2280_v49 }
 0x2e8   :  { %v3150_v51 = vpop.f32.mrf.mxu0  ;;  %v3426_v52 = vpop.f32.mrf.mxu1 }
 0x2e9   :  { %2436 = vst [vmem:[%s5461_s3 + $0x408] sm:$0xff] %v1729_v50  ;;  %2574 = vst [vmem:[%s5461_s3 + $0x858] sm:$0xff] %v2281_v0 }
 0x2ea   :  { %v1733_v53 = vpop.f32.mrf.mxu0  ;;  %v2285_v54 = vpop.f32.mrf.mxu1 }
 0x2eb   :  { %v1734_v55 = vadd.f32 %v5124_v35, %v1733_v53  ;;  %v2286_v56 = vadd.f32 %v5124_v35, %v2285_v54 }
 0x2ec   :  { %v3153_v57 = vpop.f32.mrf.mxu0  ;;  %v3429_v58 = vpop.f32.mrf.mxu1 }
 0x2ed   :  { %2437 = vst [vmem:[%s5461_s3 + $0x410] sm:$0xff] %v1734_v55  ;;  %2575 = vst [vmem:[%s5461_s3 + $0x860] sm:$0xff] %v2286_v56 }
 0x2ee   :  { %v1736_v60 = vpop.f32.mrf.mxu0  ;;  %v2288_v61 = vpop.f32.mrf.mxu1 }
 0x2ef   :  { %v1737_v62 = vadd.f32 %v5124_v35, %v1736_v60  ;;  %v2289_v63 = vadd.f32 %v5124_v35, %v2288_v61 }
 0x2f0   :  { %v3154_v1 = vpop.f32.mrf.mxu0  ;;  %v3430_v2 = vpop.f32.mrf.mxu1 }
 0x2f1   :  { %2438 = vst [vmem:[%s5461_s3 + $0x418] sm:$0xff] %v1737_v62  ;;  %2576 = vst [vmem:[%s5461_s3 + $0x868] sm:$0xff] %v2289_v63 }
 0x2f2   :  { %v1741_v3 = vpop.f32.mrf.mxu0  ;;  %v2293_v4 = vpop.f32.mrf.mxu1 }
 0x2f3   :  { %v1742_v5 = vadd.f32 %v5124_v35, %v1741_v3  ;;  %v2294_v6 = vadd.f32 %v5124_v35, %v2293_v4 }
 0x2f4   :  { %v3157_v7 = vpop.f32.mrf.mxu0  ;;  %v3433_v8 = vpop.f32.mrf.mxu1 }
 0x2f5   :  { %2439 = vst [vmem:[%s5461_s3 + $0x420] sm:$0xff] %v1742_v5  ;;  %2577 = vst [vmem:[%s5461_s3 + $0x870] sm:$0xff] %v2294_v6 }
 0x2f6   :  { %v1744_v9 = vpop.f32.mrf.mxu0  ;;  %v2296_v10 = vpop.f32.mrf.mxu1 }
 0x2f7   :  { %v1745_v59 = vadd.f32 %v5124_v35, %v1744_v9  ;;  %v2297_v12 = vadd.f32 %v5124_v35, %v2296_v10 }
 0x2f8   :  { %v3158_v13 = vpop.f32.mrf.mxu0  ;;  %v3434_v14 = vpop.f32.mrf.mxu1 }
 0x2f9   :  { %2440 = vst [vmem:[%s5461_s3 + $0x428] sm:$0xff] %v1745_v59  ;;  %2578 = vst [vmem:[%s5461_s3 + $0x878] sm:$0xff] %v2297_v12 }
 0x2fa   :  { %v1749_v15 = vpop.f32.mrf.mxu0  ;;  %v2301_v16 = vpop.f32.mrf.mxu1 }
 0x2fb   :  { %v1750_v17 = vadd.f32 %v5124_v35, %v1749_v15  ;;  %v2302_v18 = vadd.f32 %v5124_v35, %v2301_v16 }
 0x2fc   :  { %v3161_v19 = vpop.f32.mrf.mxu0  ;;  %v3437_v20 = vpop.f32.mrf.mxu1 }
 0x2fd   :  { %2441 = vst [vmem:[%s5461_s3 + $0x430] sm:$0xff] %v1750_v17  ;;  %2579 = vst [vmem:[%s5461_s3 + $0x880] sm:$0x3] %v2302_v18 }
 0x2fe   :  { %v1752_v21 = vpop.f32.mrf.mxu0  ;;  %v2304_v22 = vpop.f32.mrf.mxu1 }
 0x2ff   :  { %v1753_v23 = vadd.f32 %v5124_v35, %v1752_v21 }
 0x300   :  { %v3162_v24 = vpop.f32.mrf.mxu0  ;;  %v3438_v25 = vpop.f32.mrf.mxu1 }
 0x301   :  { %2442 = vst [vmem:[%s5461_s3 + $0x438] sm:$0xff] %v1753_v23 }
 0x302   :  { %v1757_v26 = vpop.f32.mrf.mxu0 }
 0x303   :  { %v1758_v27 = vadd.f32 %v5124_v35, %v1757_v26 }
 0x304   :  { %v3165_v28 = vpop.f32.mrf.mxu0 }
 0x305   :  { %2443 = vst [vmem:[%s5461_s3 + $0x440] sm:$0xff] %v1758_v27 }
 0x306   :  { %v1760_v29 = vpop.f32.mrf.mxu0 }
 0x307   :  { %v1761_v30 = vadd.f32 %v5124_v35, %v1760_v29 }
 0x308   :  { %v3166_v31 = vpop.f32.mrf.mxu0 }
 0x309   :  { %2444 = vst [vmem:[%s5461_s3 + $0x448] sm:$0xff] %v1761_v30 }

</bundles_post_ra>
